<compile_context>
chip_gen: v6e
topology: v6e:2x2x1
jax: 0.10.0
libtpu: 0.0.40
codegen_flags: <defaults>
</compile_context>

<pallas_src>
import functools

import jax
import jax.numpy as jnp
from jax.experimental import pallas as pl
from jax.experimental.pallas import tpu as pltpu


_VMEM_LIMIT = 48 * 1024 * 1024
_COMPILER_PARAMS = pltpu.CompilerParams(
    dimension_semantics=("parallel",),
    vmem_limit_bytes=_VMEM_LIMIT,
)
_BN_EPS = 1e-5


def _round_up(x, m):
    return ((x + m - 1) // m) * m


# ---------------------------------------------------------------------------
# Pallas kernels
# ---------------------------------------------------------------------------
def _matmul_stats_kernel(p_ref, w_ref, y_ref, s_ref):
    """y = patches(bf16) @ W(bf16) -> f32; also emit per-tile sum / sumsq per channel."""
    y = jnp.dot(p_ref[...], w_ref[...], preferred_element_type=jnp.float32)
    y_ref[...] = y
    s = jnp.sum(y, axis=0, keepdims=True)            # (1, Cpad)
    ss = jnp.sum(y * y, axis=0, keepdims=True)       # (1, Cpad)
    pad = jnp.zeros((6, y.shape[1]), dtype=jnp.float32)
    s_ref[...] = jnp.concatenate([s, ss, pad], axis=0)   # (8, Cpad), lane-dense


def _bn_apply_kernel(y_ref, sc_ref, sh_ref, *rest, relu, has_res):
    """out = y*scale + shift (+ residual) (+ ReLU), all f32, tiled over M."""
    if has_res:
        r_ref, o_ref = rest
    else:
        (o_ref,) = rest
    y = y_ref[...] * sc_ref[...] + sh_ref[...]
    if has_res:
        y = y + r_ref[...]
    if relu:
        y = jnp.maximum(y, 0.0)
    o_ref[...] = y


def _matmul_bias_tanh_kernel(p_ref, w_ref, b_ref, o_ref):
    """Final conv: y = patches(bf16) @ W(bf16) + b; tanh; f32 out."""
    y = jnp.dot(p_ref[...], w_ref[...], preferred_element_type=jnp.float32)
    o_ref[...] = jnp.tanh(y + b_ref[...])


# ---------------------------------------------------------------------------
# pallas_call wrappers
# ---------------------------------------------------------------------------
def _matmul_stats_call(patches, w, tm):
    mpad, kpad = patches.shape
    _, cpad = w.shape
    nt = mpad // tm
    return pl.pallas_call(
        _matmul_stats_kernel,
        out_shape=(jax.ShapeDtypeStruct((mpad, cpad), jnp.float32),
                   jax.ShapeDtypeStruct((nt * 8, cpad), jnp.float32)),
        grid=(nt,),
        in_specs=[pl.BlockSpec((tm, kpad), lambda i: (i, 0)),
                  pl.BlockSpec((kpad, cpad), lambda i: (0, 0))],
        out_specs=(pl.BlockSpec((tm, cpad), lambda i: (i, 0)),
                   pl.BlockSpec((8, cpad), lambda i: (i, 0))),
        compiler_params=_COMPILER_PARAMS,
    )(patches, w)


def _bn_apply_call(y, scale, shift, residual, tm, *, relu):
    mpad, cpad = y.shape
    nt = mpad // tm
    has_res = residual is not None
    kernel = functools.partial(_bn_apply_kernel, relu=relu, has_res=has_res)
    in_specs = [pl.BlockSpec((tm, cpad), lambda i: (i, 0)),
                pl.BlockSpec((1, cpad), lambda i: (0, 0)),
                pl.BlockSpec((1, cpad), lambda i: (0, 0))]
    args = [y, scale, shift]
    if has_res:
        in_specs.append(pl.BlockSpec((tm, cpad), lambda i: (i, 0)))
        args.append(residual)
    return pl.pallas_call(
        kernel,
        out_shape=jax.ShapeDtypeStruct((mpad, cpad), jnp.float32),
        grid=(nt,),
        in_specs=in_specs,
        out_specs=pl.BlockSpec((tm, cpad), lambda i: (i, 0)),
        compiler_params=_COMPILER_PARAMS,
    )(*args)


def _matmul_bias_tanh_call(patches, w, b, tm):
    mpad, kpad = patches.shape
    _, cpad = w.shape
    nt = mpad // tm
    return pl.pallas_call(
        _matmul_bias_tanh_kernel,
        out_shape=jax.ShapeDtypeStruct((mpad, cpad), jnp.float32),
        grid=(nt,),
        in_specs=[pl.BlockSpec((tm, kpad), lambda i: (i, 0)),
                  pl.BlockSpec((kpad, cpad), lambda i: (0, 0)),
                  pl.BlockSpec((1, cpad), lambda i: (0, 0))],
        out_specs=pl.BlockSpec((tm, cpad), lambda i: (i, 0)),
        compiler_params=_COMPILER_PARAMS,
    )(patches, w, b)


# ---------------------------------------------------------------------------
# Plain-JAX glue: padding, dilation, im2col, weight packing
# ---------------------------------------------------------------------------
def _dilate(x, stride):
    if stride == 1:
        return x
    n, h, w, c = x.shape
    y = jnp.zeros((n, (h - 1) * stride + 1, (w - 1) * stride + 1, c), x.dtype)
    return y.at[:, ::stride, ::stride, :].set(x)


def _pad_spatial(x, layer):
    if layer.get('deconv', False):
        s, k, p, op = layer['stride'], layer['k'], layer['pad'], layer['outpad']
        x = _dilate(x, s)
        lo = k - 1 - p
        hi = k - 1 - p + op
        return jnp.pad(x, ((0, 0), (lo, hi), (lo, hi), (0, 0)))
    p = layer['pad']
    if p == 0:
        return x
    mode = 'reflect' if layer['pad_mode'] == 'reflect' else 'constant'
    return jnp.pad(x, ((0, 0), (p, p), (p, p), (0, 0)), mode=mode)


def _im2col(x_padded, kh, kw, stride):
    n, hp, wp, c = x_padded.shape
    oh = (hp - kh) // stride + 1
    ow = (wp - kw) // stride + 1
    cols = []
    for i in range(kh):
        for j in range(kw):
            cols.append(x_padded[:, i:i + stride * oh:stride, j:j + stride * ow:stride, :])
    col = jnp.stack(cols, axis=3).reshape(n, oh, ow, kh * kw * c)
    return col.reshape(n * oh * ow, kh * kw * c), (n, oh, ow)


def _pack_conv_weight(w_oihw):
    """PyTorch (Cout, Cin, KH, KW) -> (Kpad, Cpad) bf16 in im2col (tap-major) order."""
    cout, cin, kh, kw = w_oihw.shape
    k = kh * kw * cin
    kpad, cpad = _round_up(k, 128), _round_up(cout, 128)
    wp = jnp.transpose(w_oihw, (2, 3, 1, 0)).reshape(k, cout)
    wp = jnp.pad(wp, ((0, kpad - k), (0, cpad - cout)))
    return wp.astype(jnp.bfloat16)


def _pack_deconv_weight(w_iohw):
    """ConvTranspose2d (Cin, Cout, KH, KW) -> equivalent regular-conv packed weight."""
    w = jnp.flip(w_iohw, axis=(2, 3))
    w = jnp.transpose(w, (1, 0, 2, 3))      # (Cout, Cin, KH, KW)
    return _pack_conv_weight(w)


def _tile_m(m):
    tm = min(512, _round_up(m, 8))
    mpad = _round_up(m, tm)
    return tm, mpad


# ---------------------------------------------------------------------------
# Layer implementations
# ---------------------------------------------------------------------------
def conv_bn_relu(x, layer, *, residual=None, relu=True):
    """Conv (or ConvTranspose) -> BatchNorm (batch stats) -> [+residual] -> [ReLU]."""
    xp = _pad_spatial(x, layer)
    stride = 1 if layer.get('deconv', False) else layer['stride']
    patches, (n, oh, ow) = _im2col(xp, layer['k'], layer['k'], stride)
    m, k = patches.shape
    kpad, cpad = layer['w'].shape
    tm, mpad = _tile_m(m)
    patches = jnp.pad(patches, ((0, mpad - m), (0, kpad - k))).astype(jnp.bfloat16)

    y, stats = _matmul_stats_call(patches, layer['w'], tm)

    nt = mpad // tm
    st = stats.reshape(nt, 8, cpad)
    mean = st[:, 0, :].sum(axis=0) / m                 # zero-padded rows add nothing
    var = jnp.maximum(st[:, 1, :].sum(axis=0) / m - mean * mean, 0.0)
    scale = layer['gamma'] * jax.lax.rsqrt(var + _BN_EPS)
    shift = layer['beta'] - mean * scale

    res = None
    if residual is not None:
        r = residual.reshape(m, -1).astype(jnp.float32)
        res = jnp.pad(r, ((0, mpad - m), (0, cpad - r.shape[1])))

    out = _bn_apply_call(y, scale[None, :], shift[None, :], res, tm, relu=relu)
    return out[:m, :layer['cout']].reshape(n, oh, ow, layer['cout'])


def conv_bias_tanh(x, layer):
    """Final Conv2d (bias=True) -> Tanh."""
    xp = _pad_spatial(x, layer)
    patches, (n, oh, ow) = _im2col(xp, layer['k'], layer['k'], layer['stride'])
    m, k = patches.shape
    kpad, cpad = layer['w'].shape
    tm, mpad = _tile_m(m)
    patches = jnp.pad(patches, ((0, mpad - m), (0, kpad - k))).astype(jnp.bfloat16)
    out = _matmul_bias_tanh_call(patches, layer['w'], layer['b'], tm)
    return out[:m, :layer['cout']].reshape(n, oh, ow, layer['cout'])


# ---------------------------------------------------------------------------
# Parameter construction (synthetic, mirroring the PyTorch module's shapes)
# ---------------------------------------------------------------------------
def init_generator_params(key, input_nc, output_nc, ngf, n_blocks):
    def conv_layer(key, cin, cout, k, stride, pad, pad_mode, deconv=False, outpad=0):
        key, kw_ = jax.random.split(key)
        if deconv:
            w = 0.02 * jax.random.normal(kw_, (cin, cout, k, k), jnp.float32)
            wp = _pack_deconv_weight(w)
        else:
            w = 0.02 * jax.random.normal(kw_, (cout, cin, k, k), jnp.float32)
            wp = _pack_conv_weight(w)
        cpad = wp.shape[1]
        gamma = jnp.zeros((cpad,), jnp.float32).at[:cout].set(1.0)   # fresh BN: weight=1
        beta = jnp.zeros((cpad,), jnp.float32)                       # fresh BN: bias=0
        return key, dict(kind='conv', w=wp, cout=cout, k=k, stride=stride, pad=pad,
                         pad_mode=pad_mode, gamma=gamma, beta=beta,
                         deconv=deconv, outpad=outpad)

    params = []
    # c7s1-ngf (ReflectionPad2d(3) + Conv2d k7, bias=False) + BN + ReLU
    key, l = conv_layer(key, input_nc, ngf, 7, 1, 3, 'reflect')
    params.append(l)
    # two downsampling convs (k3, s2, p1, zero pad, bias=False) + BN + ReLU
    n_down = 2
    for i in range(n_down):
        mult = 2 ** i
        key, l = conv_layer(key, ngf * mult, ngf * mult * 2, 3, 2, 1, 'zero')
        params.append(l)
    # n_blocks ResnetBlocks (reflect pad, k3 conv, BN, ReLU, reflect pad, k3 conv, BN, +x)
    dim = ngf * (2 ** n_down)
    for _ in range(n_blocks):
        key, c1 = conv_layer(key, dim, dim, 3, 1, 1, 'reflect')
        key, c2 = conv_layer(key, dim, dim, 3, 1, 1, 'reflect')
        params.append(dict(kind='resblock', conv1=c1, conv2=c2))
    # two upsampling ConvTranspose2d (k3, s2, p1, op1, bias=False) + BN + ReLU
    for i in range(n_down):
        mult = 2 ** (n_down - i)
        key, l = conv_layer(key, ngf * mult, (ngf * mult) // 2, 3, 2, 1, 'zero',
                            deconv=True, outpad=1)
        params.append(l)
    # ReflectionPad2d(3) + Conv2d(ngf, output_nc, k7, bias=True) + Tanh
    key, kw_, kb_ = jax.random.split(key, 3)
    w = 0.02 * jax.random.normal(kw_, (output_nc, ngf, 7, 7), jnp.float32)
    wp = _pack_conv_weight(w)
    cpad = wp.shape[1]
    b = jnp.zeros((1, cpad), jnp.float32).at[0, :output_nc].set(
        0.02 * jax.random.normal(kb_, (output_nc,), jnp.float32))
    params.append(dict(kind='final', w=wp, b=b, cout=output_nc, k=7, stride=1,
                       pad=3, pad_mode='reflect'))
    return params


# ---------------------------------------------------------------------------
# ResnetGenerator forward
# ---------------------------------------------------------------------------
def resnet_generator_forward(x_nchw, params):
    """x_nchw: (N, C, H, W) f32 -> (N, output_nc, H, W) f32 (tanh range)."""
    x = jnp.transpose(x_nchw, (0, 2, 3, 1)).astype(jnp.float32)   # NCHW -> NHWC
    for layer in params:
        if layer['kind'] == 'conv':
            x = conv_bn_relu(x, layer)
        elif layer['kind'] == 'resblock':
            h = conv_bn_relu(x, layer['conv1'], relu=True)
            x = conv_bn_relu(h, layer['conv2'], residual=x, relu=False)
        elif layer['kind'] == 'final':
            x = conv_bias_tanh(x, layer)
        else:
            raise ValueError(layer['kind'])
    return jnp.transpose(x, (0, 3, 1, 2))                          # NHWC -> NCHW


# ---------------------------------------------------------------------------
if __name__ == "__main__":
    # Small but valid config: input_nc=3, output_nc=3, ngf=16, n_blocks=2, 32x32 input.
    # Spatial trace: 32 -> 32 -> 16 -> 8 -> (res blocks @ 8) -> 16 -> 32 -> 32.
    batch, input_nc, output_nc, H, W = 2, 3, 3, 32, 32
    ngf, n_blocks = 16, 2

    key = jax.random.PRNGKey(0)
    key, kx = jax.random.split(key)
    x = jax.random.normal(kx, (batch, input_nc, H, W), dtype=jnp.float32)

    params = init_generator_params(key, input_nc, output_nc, ngf, n_blocks)

    fwd = jax.jit(lambda inp: resnet_generator_forward(inp, params))
    out = jax.block_until_ready(fwd(x))

    assert out.shape == (batch, output_nc, H, W), out.shape
    assert bool(jnp.all(jnp.isfinite(out)))
    assert float(jnp.max(jnp.abs(out))) <= 1.0 + 1e-5   # tanh output range
    print("KERNEL_OK")
</pallas_src>

<mosaic_0001>
module attributes {stable_mosaic.version = 11 : i64} {
  func.func @_matmul_stats_kernel(%arg0: i32, %arg1: memref<512x256xbf16, #tpu.memory_space<vmem>>, %arg2: memref<256x128xbf16, #tpu.memory_space<vmem>>, %arg3: memref<512x128xf32, #tpu.memory_space<vmem>>, %arg4: memref<8x128xf32, #tpu.memory_space<vmem>>) attributes {dimension_semantics = [#tpu.dimension_semantics<parallel>], iteration_bounds = array<i64: 4>, scalar_prefetch = 0 : i64, scratch_operands = 0 : i64, tpu.core_type = #tpu.core_type<tc>, window_params = [{transform_indices = @transform_0, window_bounds = array<i64: 512, 256>}, {pipeline_mode = #tpu.pipeline_mode<synchronous>, transform_indices = @transform_1, window_bounds = array<i64: 256, 128>}, {transform_indices = @transform_2, window_bounds = array<i64: 512, 128>}, {transform_indices = @transform_3, window_bounds = array<i64: 8, 128>}]} {
    %c0 = arith.constant 0 : index
    %c0_0 = arith.constant 0 : index
    %0 = vector.load %arg1[%c0, %c0_0] : memref<512x256xbf16, #tpu.memory_space<vmem>>, vector<512x256xbf16>
    %c0_1 = arith.constant 0 : index
    %c0_2 = arith.constant 0 : index
    %1 = vector.load %arg2[%c0_1, %c0_2] : memref<256x128xbf16, #tpu.memory_space<vmem>>, vector<256x128xbf16>
    %cst = arith.constant dense<0.000000e+00> : vector<512x128xf32>
    %2 = tpu.matmul %0, %1, %cst {dimension_numbers = #tpu.dot_dimension_numbers<[1], [0], [0], [1], [0, 0, 1, 1], [], []>} : vector<512x256xbf16>, vector<256x128xbf16>, vector<512x128xf32> -> vector<512x128xf32>
    %c0_3 = arith.constant 0 : index
    %c0_4 = arith.constant 0 : index
    %3 = vector.load %arg3[%c0_3, %c0_4] : memref<512x128xf32, #tpu.memory_space<vmem>>, vector<512x128xf32>
    tpu.vector_store %arg3[%c0_3, %c0_4], %2 {strides = array<i32>} : memref<512x128xf32, #tpu.memory_space<vmem>>, vector<512x128xf32>,
    %cst_5 = arith.constant dense<0.000000e+00> : vector<128xf32>
    %4 = vector.multi_reduction <add>, %2, %cst_5 [0] : vector<512x128xf32> to vector<128xf32>
    %5 = vector.shape_cast %4 : vector<128xf32> to vector<1x128xf32>
    %6 = arith.mulf %2, %2 : vector<512x128xf32>
    %cst_6 = arith.constant dense<0.000000e+00> : vector<128xf32>
    %7 = vector.multi_reduction <add>, %6, %cst_6 [0] : vector<512x128xf32> to vector<128xf32>
    %8 = vector.shape_cast %7 : vector<128xf32> to vector<1x128xf32>
    %cst_7 = arith.constant 0.000000e+00 : f32
    %9 = vector.broadcast %cst_7 : f32 to vector<6x128xf32>
    %10 = tpu.concatenate %5, %8, %9 in 0 : vector<1x128xf32>, vector<1x128xf32>, vector<6x128xf32> -> vector<8x128xf32>
    %c0_8 = arith.constant 0 : index
    %c0_9 = arith.constant 0 : index
    %11 = vector.load %arg4[%c0_8, %c0_9] : memref<8x128xf32, #tpu.memory_space<vmem>>, vector<8x128xf32>
    tpu.vector_store %arg4[%c0_8, %c0_9], %10 {strides = array<i32>} : memref<8x128xf32, #tpu.memory_space<vmem>>, vector<8x128xf32>,
    return
  }
  func.func @transform_0(%arg0: i32) -> (i32, i32) {
    %c0_i32 = arith.constant 0 : i32
    %c0_i32_0 = arith.constant 0 : i32
    return %arg0, %c0_i32 : i32, i32
  }
  func.func @transform_1(%arg0: i32) -> (i32, i32) {
    %c0_i32 = arith.constant 0 : i32
    %c0_i32_0 = arith.constant 0 : i32
    %c0_i32_1 = arith.constant 0 : i32
    return %c0_i32, %c0_i32_0 : i32, i32
  }
  func.func @transform_2(%arg0: i32) -> (i32, i32) {
    %c0_i32 = arith.constant 0 : i32
    %c0_i32_0 = arith.constant 0 : i32
    return %arg0, %c0_i32 : i32, i32
  }
  func.func @transform_3(%arg0: i32) -> (i32, i32) {
    %c0_i32 = arith.constant 0 : i32
    %c0_i32_0 = arith.constant 0 : i32
    return %arg0, %c0_i32 : i32, i32
  }
}

module attributes {stable_mosaic.version = 11 : i64} {
  func.func @_bn_apply_kernel(%arg0: i32, %arg1: memref<512x128xf32, #tpu.memory_space<vmem>>, %arg2: memref<1x128xf32, #tpu.memory_space<vmem>>, %arg3: memref<1x128xf32, #tpu.memory_space<vmem>>, %arg4: memref<512x128xf32, #tpu.memory_space<vmem>>) attributes {dimension_semantics = [#tpu.dimension_semantics<parallel>], iteration_bounds = array<i64: 4>, scalar_prefetch = 0 : i64, scratch_operands = 0 : i64, tpu.core_type = #tpu.core_type<tc>, window_params = [{transform_indices = @transform_0, window_bounds = array<i64: 512, 128>}, {pipeline_mode = #tpu.pipeline_mode<synchronous>, transform_indices = @transform_1, window_bounds = array<i64: 1, 128>}, {pipeline_mode = #tpu.pipeline_mode<synchronous>, transform_indices = @transform_2, window_bounds = array<i64: 1, 128>}, {transform_indices = @transform_3, window_bounds = array<i64: 512, 128>}]} {
    %c0 = arith.constant 0 : index
    %c0_0 = arith.constant 0 : index
    %0 = vector.load %arg1[%c0, %c0_0] : memref<512x128xf32, #tpu.memory_space<vmem>>, vector<512x128xf32>
    %c0_1 = arith.constant 0 : index
    %c0_2 = arith.constant 0 : index
    %1 = vector.load %arg2[%c0_1, %c0_2] : memref<1x128xf32, #tpu.memory_space<vmem>>, vector<1x128xf32>
    %2 = vector.broadcast %1 : vector<1x128xf32> to vector<512x128xf32>
    %3 = arith.mulf %0, %2 : vector<512x128xf32>
    %c0_3 = arith.constant 0 : index
    %c0_4 = arith.constant 0 : index
    %4 = vector.load %arg3[%c0_3, %c0_4] : memref<1x128xf32, #tpu.memory_space<vmem>>, vector<1x128xf32>
    %5 = vector.broadcast %4 : vector<1x128xf32> to vector<512x128xf32>
    %6 = arith.addf %3, %5 : vector<512x128xf32>
    %cst = arith.constant 0.000000e+00 : f32
    %7 = vector.broadcast %cst : f32 to vector<512x128xf32>
    %8 = arith.maximumf %6, %7 : vector<512x128xf32>
    %c0_5 = arith.constant 0 : index
    %c0_6 = arith.constant 0 : index
    %9 = vector.load %arg4[%c0_5, %c0_6] : memref<512x128xf32, #tpu.memory_space<vmem>>, vector<512x128xf32>
    tpu.vector_store %arg4[%c0_5, %c0_6], %8 {strides = array<i32>} : memref<512x128xf32, #tpu.memory_space<vmem>>, vector<512x128xf32>,
    return
  }
  func.func @transform_0(%arg0: i32) -> (i32, i32) {
    %c0_i32 = arith.constant 0 : i32
    %c0_i32_0 = arith.constant 0 : i32
    return %arg0, %c0_i32 : i32, i32
  }
  func.func @transform_1(%arg0: i32) -> (i32, i32) {
    %c0_i32 = arith.constant 0 : i32
    %c0_i32_0 = arith.constant 0 : i32
    %c0_i32_1 = arith.constant 0 : i32
    return %c0_i32, %c0_i32_0 : i32, i32
  }
  func.func @transform_2(%arg0: i32) -> (i32, i32) {
    %c0_i32 = arith.constant 0 : i32
    %c0_i32_0 = arith.constant 0 : i32
    %c0_i32_1 = arith.constant 0 : i32
    return %c0_i32, %c0_i32_0 : i32, i32
  }
  func.func @transform_3(%arg0: i32) -> (i32, i32) {
    %c0_i32 = arith.constant 0 : i32
    %c0_i32_0 = arith.constant 0 : i32
    return %arg0, %c0_i32 : i32, i32
  }
}

module attributes {stable_mosaic.version = 11 : i64} {
  func.func @_matmul_stats_kernel(%arg0: i32, %arg1: memref<512x256xbf16, #tpu.memory_space<vmem>>, %arg2: memref<256x128xbf16, #tpu.memory_space<vmem>>, %arg3: memref<512x128xf32, #tpu.memory_space<vmem>>, %arg4: memref<8x128xf32, #tpu.memory_space<vmem>>) attributes {dimension_semantics = [#tpu.dimension_semantics<parallel>], iteration_bounds = array<i64: 1>, scalar_prefetch = 0 : i64, scratch_operands = 0 : i64, tpu.core_type = #tpu.core_type<tc>, window_params = [{transform_indices = @transform_0, window_bounds = array<i64: 512, 256>}, {pipeline_mode = #tpu.pipeline_mode<synchronous>, transform_indices = @transform_1, window_bounds = array<i64: 256, 128>}, {transform_indices = @transform_2, window_bounds = array<i64: 512, 128>}, {transform_indices = @transform_3, window_bounds = array<i64: 8, 128>}]} {
    %c0 = arith.constant 0 : index
    %c0_0 = arith.constant 0 : index
    %0 = vector.load %arg1[%c0, %c0_0] : memref<512x256xbf16, #tpu.memory_space<vmem>>, vector<512x256xbf16>
    %c0_1 = arith.constant 0 : index
    %c0_2 = arith.constant 0 : index
    %1 = vector.load %arg2[%c0_1, %c0_2] : memref<256x128xbf16, #tpu.memory_space<vmem>>, vector<256x128xbf16>
    %cst = arith.constant dense<0.000000e+00> : vector<512x128xf32>
    %2 = tpu.matmul %0, %1, %cst {dimension_numbers = #tpu.dot_dimension_numbers<[1], [0], [0], [1], [0, 0, 1, 1], [], []>} : vector<512x256xbf16>, vector<256x128xbf16>, vector<512x128xf32> -> vector<512x128xf32>
    %c0_3 = arith.constant 0 : index
    %c0_4 = arith.constant 0 : index
    %3 = vector.load %arg3[%c0_3, %c0_4] : memref<512x128xf32, #tpu.memory_space<vmem>>, vector<512x128xf32>
    tpu.vector_store %arg3[%c0_3, %c0_4], %2 {strides = array<i32>} : memref<512x128xf32, #tpu.memory_space<vmem>>, vector<512x128xf32>,
    %cst_5 = arith.constant dense<0.000000e+00> : vector<128xf32>
    %4 = vector.multi_reduction <add>, %2, %cst_5 [0] : vector<512x128xf32> to vector<128xf32>
    %5 = vector.shape_cast %4 : vector<128xf32> to vector<1x128xf32>
    %6 = arith.mulf %2, %2 : vector<512x128xf32>
    %cst_6 = arith.constant dense<0.000000e+00> : vector<128xf32>
    %7 = vector.multi_reduction <add>, %6, %cst_6 [0] : vector<512x128xf32> to vector<128xf32>
    %8 = vector.shape_cast %7 : vector<128xf32> to vector<1x128xf32>
    %cst_7 = arith.constant 0.000000e+00 : f32
    %9 = vector.broadcast %cst_7 : f32 to vector<6x128xf32>
    %10 = tpu.concatenate %5, %8, %9 in 0 : vector<1x128xf32>, vector<1x128xf32>, vector<6x128xf32> -> vector<8x128xf32>
    %c0_8 = arith.constant 0 : index
    %c0_9 = arith.constant 0 : index
    %11 = vector.load %arg4[%c0_8, %c0_9] : memref<8x128xf32, #tpu.memory_space<vmem>>, vector<8x128xf32>
    tpu.vector_store %arg4[%c0_8, %c0_9], %10 {strides = array<i32>} : memref<8x128xf32, #tpu.memory_space<vmem>>, vector<8x128xf32>,
    return
  }
  func.func @transform_0(%arg0: i32) -> (i32, i32) {
    %c0_i32 = arith.constant 0 : i32
    %c0_i32_0 = arith.constant 0 : i32
    return %arg0, %c0_i32 : i32, i32
  }
  func.func @transform_1(%arg0: i32) -> (i32, i32) {
    %c0_i32 = arith.constant 0 : i32
    %c0_i32_0 = arith.constant 0 : i32
    %c0_i32_1 = arith.constant 0 : i32
    return %c0_i32, %c0_i32_0 : i32, i32
  }
  func.func @transform_2(%arg0: i32) -> (i32, i32) {
    %c0_i32 = arith.constant 0 : i32
    %c0_i32_0 = arith.constant 0 : i32
    return %arg0, %c0_i32 : i32, i32
  }
  func.func @transform_3(%arg0: i32) -> (i32, i32) {
    %c0_i32 = arith.constant 0 : i32
    %c0_i32_0 = arith.constant 0 : i32
    return %arg0, %c0_i32 : i32, i32
  }
}

module attributes {stable_mosaic.version = 11 : i64} {
  func.func @_bn_apply_kernel(%arg0: i32, %arg1: memref<512x128xf32, #tpu.memory_space<vmem>>, %arg2: memref<1x128xf32, #tpu.memory_space<vmem>>, %arg3: memref<1x128xf32, #tpu.memory_space<vmem>>, %arg4: memref<512x128xf32, #tpu.memory_space<vmem>>) attributes {dimension_semantics = [#tpu.dimension_semantics<parallel>], iteration_bounds = array<i64: 1>, scalar_prefetch = 0 : i64, scratch_operands = 0 : i64, tpu.core_type = #tpu.core_type<tc>, window_params = [{transform_indices = @transform_0, window_bounds = array<i64: 512, 128>}, {pipeline_mode = #tpu.pipeline_mode<synchronous>, transform_indices = @transform_1, window_bounds = array<i64: 1, 128>}, {pipeline_mode = #tpu.pipeline_mode<synchronous>, transform_indices = @transform_2, window_bounds = array<i64: 1, 128>}, {transform_indices = @transform_3, window_bounds = array<i64: 512, 128>}]} {
    %c0 = arith.constant 0 : index
    %c0_0 = arith.constant 0 : index
    %0 = vector.load %arg1[%c0, %c0_0] : memref<512x128xf32, #tpu.memory_space<vmem>>, vector<512x128xf32>
    %c0_1 = arith.constant 0 : index
    %c0_2 = arith.constant 0 : index
    %1 = vector.load %arg2[%c0_1, %c0_2] : memref<1x128xf32, #tpu.memory_space<vmem>>, vector<1x128xf32>
    %2 = vector.broadcast %1 : vector<1x128xf32> to vector<512x128xf32>
    %3 = arith.mulf %0, %2 : vector<512x128xf32>
    %c0_3 = arith.constant 0 : index
    %c0_4 = arith.constant 0 : index
    %4 = vector.load %arg3[%c0_3, %c0_4] : memref<1x128xf32, #tpu.memory_space<vmem>>, vector<1x128xf32>
    %5 = vector.broadcast %4 : vector<1x128xf32> to vector<512x128xf32>
    %6 = arith.addf %3, %5 : vector<512x128xf32>
    %cst = arith.constant 0.000000e+00 : f32
    %7 = vector.broadcast %cst : f32 to vector<512x128xf32>
    %8 = arith.maximumf %6, %7 : vector<512x128xf32>
    %c0_5 = arith.constant 0 : index
    %c0_6 = arith.constant 0 : index
    %9 = vector.load %arg4[%c0_5, %c0_6] : memref<512x128xf32, #tpu.memory_space<vmem>>, vector<512x128xf32>
    tpu.vector_store %arg4[%c0_5, %c0_6], %8 {strides = array<i32>} : memref<512x128xf32, #tpu.memory_space<vmem>>, vector<512x128xf32>,
    return
  }
  func.func @transform_0(%arg0: i32) -> (i32, i32) {
    %c0_i32 = arith.constant 0 : i32
    %c0_i32_0 = arith.constant 0 : i32
    return %arg0, %c0_i32 : i32, i32
  }
  func.func @transform_1(%arg0: i32) -> (i32, i32) {
    %c0_i32 = arith.constant 0 : i32
    %c0_i32_0 = arith.constant 0 : i32
    %c0_i32_1 = arith.constant 0 : i32
    return %c0_i32, %c0_i32_0 : i32, i32
  }
  func.func @transform_2(%arg0: i32) -> (i32, i32) {
    %c0_i32 = arith.constant 0 : i32
    %c0_i32_0 = arith.constant 0 : i32
    %c0_i32_1 = arith.constant 0 : i32
    return %c0_i32, %c0_i32_0 : i32, i32
  }
  func.func @transform_3(%arg0: i32) -> (i32, i32) {
    %c0_i32 = arith.constant 0 : i32
    %c0_i32_0 = arith.constant 0 : i32
    return %arg0, %c0_i32 : i32, i32
  }
}

module attributes {stable_mosaic.version = 11 : i64} {
  func.func @_matmul_stats_kernel(%arg0: i32, %arg1: memref<128x384xbf16, #tpu.memory_space<vmem>>, %arg2: memref<384x128xbf16, #tpu.memory_space<vmem>>, %arg3: memref<128x128xf32, #tpu.memory_space<vmem>>, %arg4: memref<8x128xf32, #tpu.memory_space<vmem>>) attributes {dimension_semantics = [#tpu.dimension_semantics<parallel>], iteration_bounds = array<i64: 1>, scalar_prefetch = 0 : i64, scratch_operands = 0 : i64, tpu.core_type = #tpu.core_type<tc>, window_params = [{transform_indices = @transform_0, window_bounds = array<i64: 128, 384>}, {pipeline_mode = #tpu.pipeline_mode<synchronous>, transform_indices = @transform_1, window_bounds = array<i64: 384, 128>}, {transform_indices = @transform_2, window_bounds = array<i64: 128, 128>}, {transform_indices = @transform_3, window_bounds = array<i64: 8, 128>}]} {
    %c0 = arith.constant 0 : index
    %c0_0 = arith.constant 0 : index
    %0 = vector.load %arg1[%c0, %c0_0] : memref<128x384xbf16, #tpu.memory_space<vmem>>, vector<128x384xbf16>
    %c0_1 = arith.constant 0 : index
    %c0_2 = arith.constant 0 : index
    %1 = vector.load %arg2[%c0_1, %c0_2] : memref<384x128xbf16, #tpu.memory_space<vmem>>, vector<384x128xbf16>
    %cst = arith.constant dense<0.000000e+00> : vector<128x128xf32>
    %2 = tpu.matmul %0, %1, %cst {dimension_numbers = #tpu.dot_dimension_numbers<[1], [0], [0], [1], [0, 0, 1, 1], [], []>} : vector<128x384xbf16>, vector<384x128xbf16>, vector<128x128xf32> -> vector<128x128xf32>
    %c0_3 = arith.constant 0 : index
    %c0_4 = arith.constant 0 : index
    %3 = vector.load %arg3[%c0_3, %c0_4] : memref<128x128xf32, #tpu.memory_space<vmem>>, vector<128x128xf32>
    tpu.vector_store %arg3[%c0_3, %c0_4], %2 {strides = array<i32>} : memref<128x128xf32, #tpu.memory_space<vmem>>, vector<128x128xf32>,
    %cst_5 = arith.constant dense<0.000000e+00> : vector<128xf32>
    %4 = vector.multi_reduction <add>, %2, %cst_5 [0] : vector<128x128xf32> to vector<128xf32>
    %5 = vector.shape_cast %4 : vector<128xf32> to vector<1x128xf32>
    %6 = arith.mulf %2, %2 : vector<128x128xf32>
    %cst_6 = arith.constant dense<0.000000e+00> : vector<128xf32>
    %7 = vector.multi_reduction <add>, %6, %cst_6 [0] : vector<128x128xf32> to vector<128xf32>
    %8 = vector.shape_cast %7 : vector<128xf32> to vector<1x128xf32>
    %cst_7 = arith.constant 0.000000e+00 : f32
    %9 = vector.broadcast %cst_7 : f32 to vector<6x128xf32>
    %10 = tpu.concatenate %5, %8, %9 in 0 : vector<1x128xf32>, vector<1x128xf32>, vector<6x128xf32> -> vector<8x128xf32>
    %c0_8 = arith.constant 0 : index
    %c0_9 = arith.constant 0 : index
    %11 = vector.load %arg4[%c0_8, %c0_9] : memref<8x128xf32, #tpu.memory_space<vmem>>, vector<8x128xf32>
    tpu.vector_store %arg4[%c0_8, %c0_9], %10 {strides = array<i32>} : memref<8x128xf32, #tpu.memory_space<vmem>>, vector<8x128xf32>,
    return
  }
  func.func @transform_0(%arg0: i32) -> (i32, i32) {
    %c0_i32 = arith.constant 0 : i32
    %c0_i32_0 = arith.constant 0 : i32
    return %arg0, %c0_i32 : i32, i32
  }
  func.func @transform_1(%arg0: i32) -> (i32, i32) {
    %c0_i32 = arith.constant 0 : i32
    %c0_i32_0 = arith.constant 0 : i32
    %c0_i32_1 = arith.constant 0 : i32
    return %c0_i32, %c0_i32_0 : i32, i32
  }
  func.func @transform_2(%arg0: i32) -> (i32, i32) {
    %c0_i32 = arith.constant 0 : i32
    %c0_i32_0 = arith.constant 0 : i32
    return %arg0, %c0_i32 : i32, i32
  }
  func.func @transform_3(%arg0: i32) -> (i32, i32) {
    %c0_i32 = arith.constant 0 : i32
    %c0_i32_0 = arith.constant 0 : i32
    return %arg0, %c0_i32 : i32, i32
  }
}

module attributes {stable_mosaic.version = 11 : i64} {
  func.func @_bn_apply_kernel(%arg0: i32, %arg1: memref<128x128xf32, #tpu.memory_space<vmem>>, %arg2: memref<1x128xf32, #tpu.memory_space<vmem>>, %arg3: memref<1x128xf32, #tpu.memory_space<vmem>>, %arg4: memref<128x128xf32, #tpu.memory_space<vmem>>) attributes {dimension_semantics = [#tpu.dimension_semantics<parallel>], iteration_bounds = array<i64: 1>, scalar_prefetch = 0 : i64, scratch_operands = 0 : i64, tpu.core_type = #tpu.core_type<tc>, window_params = [{transform_indices = @transform_0, window_bounds = array<i64: 128, 128>}, {pipeline_mode = #tpu.pipeline_mode<synchronous>, transform_indices = @transform_1, window_bounds = array<i64: 1, 128>}, {pipeline_mode = #tpu.pipeline_mode<synchronous>, transform_indices = @transform_2, window_bounds = array<i64: 1, 128>}, {transform_indices = @transform_3, window_bounds = array<i64: 128, 128>}]} {
    %c0 = arith.constant 0 : index
    %c0_0 = arith.constant 0 : index
    %0 = vector.load %arg1[%c0, %c0_0] : memref<128x128xf32, #tpu.memory_space<vmem>>, vector<128x128xf32>
    %c0_1 = arith.constant 0 : index
    %c0_2 = arith.constant 0 : index
    %1 = vector.load %arg2[%c0_1, %c0_2] : memref<1x128xf32, #tpu.memory_space<vmem>>, vector<1x128xf32>
    %2 = vector.broadcast %1 : vector<1x128xf32> to vector<128x128xf32>
    %3 = arith.mulf %0, %2 : vector<128x128xf32>
    %c0_3 = arith.constant 0 : index
    %c0_4 = arith.constant 0 : index
    %4 = vector.load %arg3[%c0_3, %c0_4] : memref<1x128xf32, #tpu.memory_space<vmem>>, vector<1x128xf32>
    %5 = vector.broadcast %4 : vector<1x128xf32> to vector<128x128xf32>
    %6 = arith.addf %3, %5 : vector<128x128xf32>
    %cst = arith.constant 0.000000e+00 : f32
    %7 = vector.broadcast %cst : f32 to vector<128x128xf32>
    %8 = arith.maximumf %6, %7 : vector<128x128xf32>
    %c0_5 = arith.constant 0 : index
    %c0_6 = arith.constant 0 : index
    %9 = vector.load %arg4[%c0_5, %c0_6] : memref<128x128xf32, #tpu.memory_space<vmem>>, vector<128x128xf32>
    tpu.vector_store %arg4[%c0_5, %c0_6], %8 {strides = array<i32>} : memref<128x128xf32, #tpu.memory_space<vmem>>, vector<128x128xf32>,
    return
  }
  func.func @transform_0(%arg0: i32) -> (i32, i32) {
    %c0_i32 = arith.constant 0 : i32
    %c0_i32_0 = arith.constant 0 : i32
    return %arg0, %c0_i32 : i32, i32
  }
  func.func @transform_1(%arg0: i32) -> (i32, i32) {
    %c0_i32 = arith.constant 0 : i32
    %c0_i32_0 = arith.constant 0 : i32
    %c0_i32_1 = arith.constant 0 : i32
    return %c0_i32, %c0_i32_0 : i32, i32
  }
  func.func @transform_2(%arg0: i32) -> (i32, i32) {
    %c0_i32 = arith.constant 0 : i32
    %c0_i32_0 = arith.constant 0 : i32
    %c0_i32_1 = arith.constant 0 : i32
    return %c0_i32, %c0_i32_0 : i32, i32
  }
  func.func @transform_3(%arg0: i32) -> (i32, i32) {
    %c0_i32 = arith.constant 0 : i32
    %c0_i32_0 = arith.constant 0 : i32
    return %arg0, %c0_i32 : i32, i32
  }
}

module attributes {stable_mosaic.version = 11 : i64} {
  func.func @_matmul_stats_kernel(%arg0: i32, %arg1: memref<128x640xbf16, #tpu.memory_space<vmem>>, %arg2: memref<640x128xbf16, #tpu.memory_space<vmem>>, %arg3: memref<128x128xf32, #tpu.memory_space<vmem>>, %arg4: memref<8x128xf32, #tpu.memory_space<vmem>>) attributes {dimension_semantics = [#tpu.dimension_semantics<parallel>], iteration_bounds = array<i64: 1>, scalar_prefetch = 0 : i64, scratch_operands = 0 : i64, tpu.core_type = #tpu.core_type<tc>, window_params = [{transform_indices = @transform_0, window_bounds = array<i64: 128, 640>}, {pipeline_mode = #tpu.pipeline_mode<synchronous>, transform_indices = @transform_1, window_bounds = array<i64: 640, 128>}, {transform_indices = @transform_2, window_bounds = array<i64: 128, 128>}, {transform_indices = @transform_3, window_bounds = array<i64: 8, 128>}]} {
    %c0 = arith.constant 0 : index
    %c0_0 = arith.constant 0 : index
    %0 = vector.load %arg1[%c0, %c0_0] : memref<128x640xbf16, #tpu.memory_space<vmem>>, vector<128x640xbf16>
    %c0_1 = arith.constant 0 : index
    %c0_2 = arith.constant 0 : index
    %1 = vector.load %arg2[%c0_1, %c0_2] : memref<640x128xbf16, #tpu.memory_space<vmem>>, vector<640x128xbf16>
    %cst = arith.constant dense<0.000000e+00> : vector<128x128xf32>
    %2 = tpu.matmul %0, %1, %cst {dimension_numbers = #tpu.dot_dimension_numbers<[1], [0], [0], [1], [0, 0, 1, 1], [], []>} : vector<128x640xbf16>, vector<640x128xbf16>, vector<128x128xf32> -> vector<128x128xf32>
    %c0_3 = arith.constant 0 : index
    %c0_4 = arith.constant 0 : index
    %3 = vector.load %arg3[%c0_3, %c0_4] : memref<128x128xf32, #tpu.memory_space<vmem>>, vector<128x128xf32>
    tpu.vector_store %arg3[%c0_3, %c0_4], %2 {strides = array<i32>} : memref<128x128xf32, #tpu.memory_space<vmem>>, vector<128x128xf32>,
    %cst_5 = arith.constant dense<0.000000e+00> : vector<128xf32>
    %4 = vector.multi_reduction <add>, %2, %cst_5 [0] : vector<128x128xf32> to vector<128xf32>
    %5 = vector.shape_cast %4 : vector<128xf32> to vector<1x128xf32>
    %6 = arith.mulf %2, %2 : vector<128x128xf32>
    %cst_6 = arith.constant dense<0.000000e+00> : vector<128xf32>
    %7 = vector.multi_reduction <add>, %6, %cst_6 [0] : vector<128x128xf32> to vector<128xf32>
    %8 = vector.shape_cast %7 : vector<128xf32> to vector<1x128xf32>
    %cst_7 = arith.constant 0.000000e+00 : f32
    %9 = vector.broadcast %cst_7 : f32 to vector<6x128xf32>
    %10 = tpu.concatenate %5, %8, %9 in 0 : vector<1x128xf32>, vector<1x128xf32>, vector<6x128xf32> -> vector<8x128xf32>
    %c0_8 = arith.constant 0 : index
    %c0_9 = arith.constant 0 : index
    %11 = vector.load %arg4[%c0_8, %c0_9] : memref<8x128xf32, #tpu.memory_space<vmem>>, vector<8x128xf32>
    tpu.vector_store %arg4[%c0_8, %c0_9], %10 {strides = array<i32>} : memref<8x128xf32, #tpu.memory_space<vmem>>, vector<8x128xf32>,
    return
  }
  func.func @transform_0(%arg0: i32) -> (i32, i32) {
    %c0_i32 = arith.constant 0 : i32
    %c0_i32_0 = arith.constant 0 : i32
    return %arg0, %c0_i32 : i32, i32
  }
  func.func @transform_1(%arg0: i32) -> (i32, i32) {
    %c0_i32 = arith.constant 0 : i32
    %c0_i32_0 = arith.constant 0 : i32
    %c0_i32_1 = arith.constant 0 : i32
    return %c0_i32, %c0_i32_0 : i32, i32
  }
  func.func @transform_2(%arg0: i32) -> (i32, i32) {
    %c0_i32 = arith.constant 0 : i32
    %c0_i32_0 = arith.constant 0 : i32
    return %arg0, %c0_i32 : i32, i32
  }
  func.func @transform_3(%arg0: i32) -> (i32, i32) {
    %c0_i32 = arith.constant 0 : i32
    %c0_i32_0 = arith.constant 0 : i32
    return %arg0, %c0_i32 : i32, i32
  }
}

module attributes {stable_mosaic.version = 11 : i64} {
  func.func @_bn_apply_kernel(%arg0: i32, %arg1: memref<128x128xf32, #tpu.memory_space<vmem>>, %arg2: memref<1x128xf32, #tpu.memory_space<vmem>>, %arg3: memref<1x128xf32, #tpu.memory_space<vmem>>, %arg4: memref<128x128xf32, #tpu.memory_space<vmem>>, %arg5: memref<128x128xf32, #tpu.memory_space<vmem>>) attributes {dimension_semantics = [#tpu.dimension_semantics<parallel>], iteration_bounds = array<i64: 1>, scalar_prefetch = 0 : i64, scratch_operands = 0 : i64, tpu.core_type = #tpu.core_type<tc>, window_params = [{transform_indices = @transform_0, window_bounds = array<i64: 128, 128>}, {pipeline_mode = #tpu.pipeline_mode<synchronous>, transform_indices = @transform_1, window_bounds = array<i64: 1, 128>}, {pipeline_mode = #tpu.pipeline_mode<synchronous>, transform_indices = @transform_2, window_bounds = array<i64: 1, 128>}, {transform_indices = @transform_3, window_bounds = array<i64: 128, 128>}, {transform_indices = @transform_4, window_bounds = array<i64: 128, 128>}]} {
    %c0 = arith.constant 0 : index
    %c0_0 = arith.constant 0 : index
    %0 = vector.load %arg1[%c0, %c0_0] : memref<128x128xf32, #tpu.memory_space<vmem>>, vector<128x128xf32>
    %c0_1 = arith.constant 0 : index
    %c0_2 = arith.constant 0 : index
    %1 = vector.load %arg2[%c0_1, %c0_2] : memref<1x128xf32, #tpu.memory_space<vmem>>, vector<1x128xf32>
    %2 = vector.broadcast %1 : vector<1x128xf32> to vector<128x128xf32>
    %3 = arith.mulf %0, %2 : vector<128x128xf32>
    %c0_3 = arith.constant 0 : index
    %c0_4 = arith.constant 0 : index
    %4 = vector.load %arg3[%c0_3, %c0_4] : memref<1x128xf32, #tpu.memory_space<vmem>>, vector<1x128xf32>
    %5 = vector.broadcast %4 : vector<1x128xf32> to vector<128x128xf32>
    %6 = arith.addf %3, %5 : vector<128x128xf32>
    %c0_5 = arith.constant 0 : index
    %c0_6 = arith.constant 0 : index
    %7 = vector.load %arg4[%c0_5, %c0_6] : memref<128x128xf32, #tpu.memory_space<vmem>>, vector<128x128xf32>
    %8 = arith.addf %6, %7 : vector<128x128xf32>
    %c0_7 = arith.constant 0 : index
    %c0_8 = arith.constant 0 : index
    %9 = vector.load %arg5[%c0_7, %c0_8] : memref<128x128xf32, #tpu.memory_space<vmem>>, vector<128x128xf32>
    tpu.vector_store %arg5[%c0_7, %c0_8], %8 {strides = array<i32>} : memref<128x128xf32, #tpu.memory_space<vmem>>, vector<128x128xf32>,
    return
  }
  func.func @transform_0(%arg0: i32) -> (i32, i32) {
    %c0_i32 = arith.constant 0 : i32
    %c0_i32_0 = arith.constant 0 : i32
    return %arg0, %c0_i32 : i32, i32
  }
  func.func @transform_1(%arg0: i32) -> (i32, i32) {
    %c0_i32 = arith.constant 0 : i32
    %c0_i32_0 = arith.constant 0 : i32
    %c0_i32_1 = arith.constant 0 : i32
    return %c0_i32, %c0_i32_0 : i32, i32
  }
  func.func @transform_2(%arg0: i32) -> (i32, i32) {
    %c0_i32 = arith.constant 0 : i32
    %c0_i32_0 = arith.constant 0 : i32
    %c0_i32_1 = arith.constant 0 : i32
    return %c0_i32, %c0_i32_0 : i32, i32
  }
  func.func @transform_3(%arg0: i32) -> (i32, i32) {
    %c0_i32 = arith.constant 0 : i32
    %c0_i32_0 = arith.constant 0 : i32
    return %arg0, %c0_i32 : i32, i32
  }
  func.func @transform_4(%arg0: i32) -> (i32, i32) {
    %c0_i32 = arith.constant 0 : i32
    %c0_i32_0 = arith.constant 0 : i32
    return %arg0, %c0_i32 : i32, i32
  }
}

module attributes {stable_mosaic.version = 11 : i64} {
  func.func @_matmul_stats_kernel(%arg0: i32, %arg1: memref<512x640xbf16, #tpu.memory_space<vmem>>, %arg2: memref<640x128xbf16, #tpu.memory_space<vmem>>, %arg3: memref<512x128xf32, #tpu.memory_space<vmem>>, %arg4: memref<8x128xf32, #tpu.memory_space<vmem>>) attributes {dimension_semantics = [#tpu.dimension_semantics<parallel>], iteration_bounds = array<i64: 1>, scalar_prefetch = 0 : i64, scratch_operands = 0 : i64, tpu.core_type = #tpu.core_type<tc>, window_params = [{transform_indices = @transform_0, window_bounds = array<i64: 512, 640>}, {pipeline_mode = #tpu.pipeline_mode<synchronous>, transform_indices = @transform_1, window_bounds = array<i64: 640, 128>}, {transform_indices = @transform_2, window_bounds = array<i64: 512, 128>}, {transform_indices = @transform_3, window_bounds = array<i64: 8, 128>}]} {
    %c0 = arith.constant 0 : index
    %c0_0 = arith.constant 0 : index
    %0 = vector.load %arg1[%c0, %c0_0] : memref<512x640xbf16, #tpu.memory_space<vmem>>, vector<512x640xbf16>
    %c0_1 = arith.constant 0 : index
    %c0_2 = arith.constant 0 : index
    %1 = vector.load %arg2[%c0_1, %c0_2] : memref<640x128xbf16, #tpu.memory_space<vmem>>, vector<640x128xbf16>
    %cst = arith.constant dense<0.000000e+00> : vector<512x128xf32>
    %2 = tpu.matmul %0, %1, %cst {dimension_numbers = #tpu.dot_dimension_numbers<[1], [0], [0], [1], [0, 0, 1, 1], [], []>} : vector<512x640xbf16>, vector<640x128xbf16>, vector<512x128xf32> -> vector<512x128xf32>
    %c0_3 = arith.constant 0 : index
    %c0_4 = arith.constant 0 : index
    %3 = vector.load %arg3[%c0_3, %c0_4] : memref<512x128xf32, #tpu.memory_space<vmem>>, vector<512x128xf32>
    tpu.vector_store %arg3[%c0_3, %c0_4], %2 {strides = array<i32>} : memref<512x128xf32, #tpu.memory_space<vmem>>, vector<512x128xf32>,
    %cst_5 = arith.constant dense<0.000000e+00> : vector<128xf32>
    %4 = vector.multi_reduction <add>, %2, %cst_5 [0] : vector<512x128xf32> to vector<128xf32>
    %5 = vector.shape_cast %4 : vector<128xf32> to vector<1x128xf32>
    %6 = arith.mulf %2, %2 : vector<512x128xf32>
    %cst_6 = arith.constant dense<0.000000e+00> : vector<128xf32>
    %7 = vector.multi_reduction <add>, %6, %cst_6 [0] : vector<512x128xf32> to vector<128xf32>
    %8 = vector.shape_cast %7 : vector<128xf32> to vector<1x128xf32>
    %cst_7 = arith.constant 0.000000e+00 : f32
    %9 = vector.broadcast %cst_7 : f32 to vector<6x128xf32>
    %10 = tpu.concatenate %5, %8, %9 in 0 : vector<1x128xf32>, vector<1x128xf32>, vector<6x128xf32> -> vector<8x128xf32>
    %c0_8 = arith.constant 0 : index
    %c0_9 = arith.constant 0 : index
    %11 = vector.load %arg4[%c0_8, %c0_9] : memref<8x128xf32, #tpu.memory_space<vmem>>, vector<8x128xf32>
    tpu.vector_store %arg4[%c0_8, %c0_9], %10 {strides = array<i32>} : memref<8x128xf32, #tpu.memory_space<vmem>>, vector<8x128xf32>,
    return
  }
  func.func @transform_0(%arg0: i32) -> (i32, i32) {
    %c0_i32 = arith.constant 0 : i32
    %c0_i32_0 = arith.constant 0 : i32
    return %arg0, %c0_i32 : i32, i32
  }
  func.func @transform_1(%arg0: i32) -> (i32, i32) {
    %c0_i32 = arith.constant 0 : i32
    %c0_i32_0 = arith.constant 0 : i32
    %c0_i32_1 = arith.constant 0 : i32
    return %c0_i32, %c0_i32_0 : i32, i32
  }
  func.func @transform_2(%arg0: i32) -> (i32, i32) {
    %c0_i32 = arith.constant 0 : i32
    %c0_i32_0 = arith.constant 0 : i32
    return %arg0, %c0_i32 : i32, i32
  }
  func.func @transform_3(%arg0: i32) -> (i32, i32) {
    %c0_i32 = arith.constant 0 : i32
    %c0_i32_0 = arith.constant 0 : i32
    return %arg0, %c0_i32 : i32, i32
  }
}

module attributes {stable_mosaic.version = 11 : i64} {
  func.func @_matmul_stats_kernel(%arg0: i32, %arg1: memref<512x384xbf16, #tpu.memory_space<vmem>>, %arg2: memref<384x128xbf16, #tpu.memory_space<vmem>>, %arg3: memref<512x128xf32, #tpu.memory_space<vmem>>, %arg4: memref<8x128xf32, #tpu.memory_space<vmem>>) attributes {dimension_semantics = [#tpu.dimension_semantics<parallel>], iteration_bounds = array<i64: 4>, scalar_prefetch = 0 : i64, scratch_operands = 0 : i64, tpu.core_type = #tpu.core_type<tc>, window_params = [{transform_indices = @transform_0, window_bounds = array<i64: 512, 384>}, {pipeline_mode = #tpu.pipeline_mode<synchronous>, transform_indices = @transform_1, window_bounds = array<i64: 384, 128>}, {transform_indices = @transform_2, window_bounds = array<i64: 512, 128>}, {transform_indices = @transform_3, window_bounds = array<i64: 8, 128>}]} {
    %c0 = arith.constant 0 : index
    %c0_0 = arith.constant 0 : index
    %0 = vector.load %arg1[%c0, %c0_0] : memref<512x384xbf16, #tpu.memory_space<vmem>>, vector<512x384xbf16>
    %c0_1 = arith.constant 0 : index
    %c0_2 = arith.constant 0 : index
    %1 = vector.load %arg2[%c0_1, %c0_2] : memref<384x128xbf16, #tpu.memory_space<vmem>>, vector<384x128xbf16>
    %cst = arith.constant dense<0.000000e+00> : vector<512x128xf32>
    %2 = tpu.matmul %0, %1, %cst {dimension_numbers = #tpu.dot_dimension_numbers<[1], [0], [0], [1], [0, 0, 1, 1], [], []>} : vector<512x384xbf16>, vector<384x128xbf16>, vector<512x128xf32> -> vector<512x128xf32>
    %c0_3 = arith.constant 0 : index
    %c0_4 = arith.constant 0 : index
    %3 = vector.load %arg3[%c0_3, %c0_4] : memref<512x128xf32, #tpu.memory_space<vmem>>, vector<512x128xf32>
    tpu.vector_store %arg3[%c0_3, %c0_4], %2 {strides = array<i32>} : memref<512x128xf32, #tpu.memory_space<vmem>>, vector<512x128xf32>,
    %cst_5 = arith.constant dense<0.000000e+00> : vector<128xf32>
    %4 = vector.multi_reduction <add>, %2, %cst_5 [0] : vector<512x128xf32> to vector<128xf32>
    %5 = vector.shape_cast %4 : vector<128xf32> to vector<1x128xf32>
    %6 = arith.mulf %2, %2 : vector<512x128xf32>
    %cst_6 = arith.constant dense<0.000000e+00> : vector<128xf32>
    %7 = vector.multi_reduction <add>, %6, %cst_6 [0] : vector<512x128xf32> to vector<128xf32>
    %8 = vector.shape_cast %7 : vector<128xf32> to vector<1x128xf32>
    %cst_7 = arith.constant 0.000000e+00 : f32
    %9 = vector.broadcast %cst_7 : f32 to vector<6x128xf32>
    %10 = tpu.concatenate %5, %8, %9 in 0 : vector<1x128xf32>, vector<1x128xf32>, vector<6x128xf32> -> vector<8x128xf32>
    %c0_8 = arith.constant 0 : index
    %c0_9 = arith.constant 0 : index
    %11 = vector.load %arg4[%c0_8, %c0_9] : memref<8x128xf32, #tpu.memory_space<vmem>>, vector<8x128xf32>
    tpu.vector_store %arg4[%c0_8, %c0_9], %10 {strides = array<i32>} : memref<8x128xf32, #tpu.memory_space<vmem>>, vector<8x128xf32>,
    return
  }
  func.func @transform_0(%arg0: i32) -> (i32, i32) {
    %c0_i32 = arith.constant 0 : i32
    %c0_i32_0 = arith.constant 0 : i32
    return %arg0, %c0_i32 : i32, i32
  }
  func.func @transform_1(%arg0: i32) -> (i32, i32) {
    %c0_i32 = arith.constant 0 : i32
    %c0_i32_0 = arith.constant 0 : i32
    %c0_i32_1 = arith.constant 0 : i32
    return %c0_i32, %c0_i32_0 : i32, i32
  }
  func.func @transform_2(%arg0: i32) -> (i32, i32) {
    %c0_i32 = arith.constant 0 : i32
    %c0_i32_0 = arith.constant 0 : i32
    return %arg0, %c0_i32 : i32, i32
  }
  func.func @transform_3(%arg0: i32) -> (i32, i32) {
    %c0_i32 = arith.constant 0 : i32
    %c0_i32_0 = arith.constant 0 : i32
    return %arg0, %c0_i32 : i32, i32
  }
}

module attributes {stable_mosaic.version = 11 : i64} {
  func.func @_matmul_bias_tanh_kernel(%arg0: i32, %arg1: memref<512x896xbf16, #tpu.memory_space<vmem>>, %arg2: memref<896x128xbf16, #tpu.memory_space<vmem>>, %arg3: memref<1x128xf32, #tpu.memory_space<vmem>>, %arg4: memref<512x128xf32, #tpu.memory_space<vmem>>) attributes {dimension_semantics = [#tpu.dimension_semantics<parallel>], iteration_bounds = array<i64: 4>, scalar_prefetch = 0 : i64, scratch_operands = 0 : i64, tpu.core_type = #tpu.core_type<tc>, window_params = [{transform_indices = @transform_0, window_bounds = array<i64: 512, 896>}, {pipeline_mode = #tpu.pipeline_mode<synchronous>, transform_indices = @transform_1, window_bounds = array<i64: 896, 128>}, {pipeline_mode = #tpu.pipeline_mode<synchronous>, transform_indices = @transform_2, window_bounds = array<i64: 1, 128>}, {transform_indices = @transform_3, window_bounds = array<i64: 512, 128>}]} {
    %c0 = arith.constant 0 : index
    %c0_0 = arith.constant 0 : index
    %0 = vector.load %arg1[%c0, %c0_0] : memref<512x896xbf16, #tpu.memory_space<vmem>>, vector<512x896xbf16>
    %c0_1 = arith.constant 0 : index
    %c0_2 = arith.constant 0 : index
    %1 = vector.load %arg2[%c0_1, %c0_2] : memref<896x128xbf16, #tpu.memory_space<vmem>>, vector<896x128xbf16>
    %cst = arith.constant dense<0.000000e+00> : vector<512x128xf32>
    %2 = tpu.matmul %0, %1, %cst {dimension_numbers = #tpu.dot_dimension_numbers<[1], [0], [0], [1], [0, 0, 1, 1], [], []>} : vector<512x896xbf16>, vector<896x128xbf16>, vector<512x128xf32> -> vector<512x128xf32>
    %c0_3 = arith.constant 0 : index
    %c0_4 = arith.constant 0 : index
    %3 = vector.load %arg3[%c0_3, %c0_4] : memref<1x128xf32, #tpu.memory_space<vmem>>, vector<1x128xf32>
    %4 = vector.broadcast %3 : vector<1x128xf32> to vector<512x128xf32>
    %5 = arith.addf %2, %4 : vector<512x128xf32>
    %6 = math.tanh %5 : vector<512x128xf32>
    %c0_5 = arith.constant 0 : index
    %c0_6 = arith.constant 0 : index
    %7 = vector.load %arg4[%c0_5, %c0_6] : memref<512x128xf32, #tpu.memory_space<vmem>>, vector<512x128xf32>
    tpu.vector_store %arg4[%c0_5, %c0_6], %6 {strides = array<i32>} : memref<512x128xf32, #tpu.memory_space<vmem>>, vector<512x128xf32>,
    return
  }
  func.func @transform_0(%arg0: i32) -> (i32, i32) {
    %c0_i32 = arith.constant 0 : i32
    %c0_i32_0 = arith.constant 0 : i32
    return %arg0, %c0_i32 : i32, i32
  }
  func.func @transform_1(%arg0: i32) -> (i32, i32) {
    %c0_i32 = arith.constant 0 : i32
    %c0_i32_0 = arith.constant 0 : i32
    %c0_i32_1 = arith.constant 0 : i32
    return %c0_i32, %c0_i32_0 : i32, i32
  }
  func.func @transform_2(%arg0: i32) -> (i32, i32) {
    %c0_i32 = arith.constant 0 : i32
    %c0_i32_0 = arith.constant 0 : i32
    %c0_i32_1 = arith.constant 0 : i32
    return %c0_i32, %c0_i32_0 : i32, i32
  }
  func.func @transform_3(%arg0: i32) -> (i32, i32) {
    %c0_i32 = arith.constant 0 : i32
    %c0_i32_0 = arith.constant 0 : i32
    return %arg0, %c0_i32 : i32, i32
  }
}

</mosaic_0001>

<bundles_post_ra>
// kernel: _lambda_.19
= control target key start
LH: loop header
LB: loop body
LE: loop exit
PB: predicated region body
PF: predicated region fallthrough
CT: control target
= control target key end

     0   :  { %s1624_s12 = smov 0   ;;  %s2192_s0 = inlined_call_operand.vmem [shape: bf16[2048,256], index: 0, kind: input, shape index: {}]   ;;  %s2193_s1 = inlined_call_operand.vmem [shape: bf16[256,128], index: 1, kind: input, shape index: {}]   ;;  %s2194_s2 = inlined_call_operand.vmem [shape: f32[2048,128], index: 2, kind: output, shape index: {0}]   ;;  %s2195_s3 = inlined_call_operand.vmem [shape: f32[32,128], index: 3, kind: output, shape index: {1}]  }
   0x1 LB: > { %s1630_s13 = sadd.s32 4294967295, %s1601_s12   ;;  %p1352_p0 = scmp.ge.s32.totalorder %s1601_s12, 1  ;;  %s1601_s12 = sphi %s1624_s12, %s14_s12  }
   0x2   : > { %p142_p1 = scmp.lt.s32.totalorder %s1601_s12, 5 }
   0x4   : > { %p143_p2 = pnand %p1352_p0, %p142_p1 }
   0x5   : > { %s1353_s16 = sshll.u32 (!%p143_p2), %s1630_s13, 6  ;;  %p184_p4 = scmp.lt.s32.totalorder (!%p143_p2), %s1630_s13, 3 }
   0x6   : > { %146 = sbr.rel (%p143_p2) target bundleno = 476 (0x1dc), region = 28  ;;  %p172_p3 = scmp.lt.s32.totalorder (!%p143_p2), %s1353_s16, 255 }
   0xb   : > { %v1483_v0 = vld [vmem:[%s2193_s1 + $0x38] sm:$0xff]   ;;  %v1603_v1 = vmov 0   ;;  %v1484_v2 = vld [vmem:[%s2193_s1 + $0x30] sm:$0xff]   ;;  %v1485_v3 = vld [vmem:[%s2193_s1 + $0x28] sm:$0xff]   ;;  %s2197_s16 = smov (!%p172_p3, %s1353_s16), 255  ;;  %s2199_s13 = smov (!%p184_p4, %s1630_s13), 3 }
   0xc   : > { %701 = vmatprep.subr.bf16.mxu0 %v1603_v1  ;;  %1442 = vmatprep.subr.bf16.mxu1 %v1603_v1  ;;  %v1486_v4 = vld [vmem:[%s2193_s1 + $0x20] sm:$0xff]   ;;  %s1441_s23 = sshll.u32 %s2197_s16, 3  ;;  %v1487_v5 = vld [vmem:[%s2193_s1 + $0x18] sm:$0xff]   ;;  %v1488_v7 = vld [vmem:[%s2193_s1 + $0x10] sm:$0xff]   ;;  %s1358_s16 = sshll.u32 %s2199_s13, 3  ;;  %vm1256_vm0 = vcmask 1040384  }
   0xd   : > { %702 = vmatpush1.bf16.msra.mxu0 %v1483_v0  ;;  %1458 = vmatpush1.bf16.msra.mxu1 %v1483_v0  ;;  %s1666_s28 = scalar_lea.vmem %s2192_s0, %s1441_s23  ;;  %v1489_v8 = vld [vmem:[%s2193_s1 + $0x8] sm:$0xff]   ;;  %v1490_v9 = vld [vmem:[%s2193_s1] sm:$0xff]   ;;  %v1491_v11 = vld [vmem:[%s2193_s1 + $0x78] sm:$0xff]   ;;  %s1794_s4 = scalar_lea.vmem %s2194_s2, %s1441_s23  ;;  %vm1258_vm1 = vcmask 1041408  }
   0xe   : > { %703 = vmatprep.subr.bf16.mxu0 %v1603_v1  ;;  %1443 = vmatprep.subr.bf16.mxu1 %v1603_v1  ;;  %v1501_v6 = vld [vmem:[%s1666_s28 + $0x4] ss:$8 sps:$4 sm:$0xff]   ;;  %v1492_v12 = vld [vmem:[%s2193_s1 + $0x70] sm:$0xff]   ;;  %v1495_v15 = vld [vmem:[%s2193_s1 + $0x58] sm:$0xff]   ;;  %s187_s5 = scalar_lea.vmem %s2195_s3, %s1358_s16 }
   0xf   : > { %733 = vmatprep.mubr.bf16.mxu0 %v1501_v6  ;;  %v1525_v10 = vld [vmem:[%s1666_s28 + $0x104] ss:$8 sps:$4 sm:$0xff]   ;;  %v1496_v16 = vld [vmem:[%s2193_s1 + $0x50] sm:$0xff]   ;;  %v1499_v19 = vld [vmem:[%s1666_s28] ss:$8 sps:$4 sm:$0xff]  }
  0x10   : > { %861 = vmatprep.mubr.bf16.mxu1 %v1525_v10  ;;  %v1493_v13 = vld [vmem:[%s2193_s1 + $0x68] sm:$0xff]   ;;  %v1494_v14 = vld [vmem:[%s2193_s1 + $0x60] sm:$0xff]   ;;  %v1502_v21 = vld [vmem:[%s1666_s28 + $0x14] ss:$8 sps:$4 sm:$0xff]  }
  0x11   : > { %704 = vmatpush1.bf16.msra.mxu0 %v1484_v2  ;;  %1459 = vmatpush1.bf16.msra.mxu1 %v1484_v2  ;;  %v1497_v17 = vld [vmem:[%s2193_s1 + $0x48] sm:$0xff]   ;;  %v1498_v18 = vld [vmem:[%s2193_s1 + $0x40] sm:$0xff]   ;;  %v1529_v22 = vld [vmem:[%s1666_s28 + $0x114] ss:$8 sps:$4 sm:$0xff]  }
  0x12   : > { %705 = vmatprep.subr.bf16.mxu0 %v1603_v1  ;;  %1444 = vmatprep.subr.bf16.mxu1 %v1603_v1  ;;  %v1523_v20 = vld [vmem:[%s1666_s28 + $0x100] ss:$8 sps:$4 sm:$0xff]   ;;  %v1504_v23 = vld [vmem:[%s1666_s28 + $0x10] ss:$8 sps:$4 sm:$0xff]   ;;  %v1505_v25 = vld [vmem:[%s1666_s28 + $0x24] ss:$8 sps:$4 sm:$0xff]  }
  0x13   : > { %v1531_v24 = vld [vmem:[%s1666_s28 + $0x110] ss:$8 sps:$4 sm:$0xff]   ;;  %v1535_v26 = vld [vmem:[%s1666_s28 + $0x124] ss:$8 sps:$4 sm:$0xff]   ;;  %v1507_v27 = vld [vmem:[%s1666_s28 + $0x20] ss:$8 sps:$4 sm:$0xff]  }
  0x14   : > { %v1537_v28 = vld [vmem:[%s1666_s28 + $0x120] ss:$8 sps:$4 sm:$0xff]   ;;  %v1508_v29 = vld [vmem:[%s1666_s28 + $0x34] ss:$8 sps:$4 sm:$0xff]   ;;  %v1510_v31 = vld [vmem:[%s1666_s28 + $0x30] ss:$8 sps:$4 sm:$0xff]  }
  0x15   : > { %706 = vmatpush1.bf16.msra.mxu0 %v1485_v3  ;;  %1460 = vmatpush1.bf16.msra.mxu1 %v1485_v3  ;;  %v1541_v30 = vld [vmem:[%s1666_s28 + $0x134] ss:$8 sps:$4 sm:$0xff]   ;;  %v1543_v32 = vld [vmem:[%s1666_s28 + $0x130] ss:$8 sps:$4 sm:$0xff]   ;;  %v1511_v33 = vld [vmem:[%s1666_s28 + $0x44] ss:$8 sps:$4 sm:$0xff]  }
  0x16   : > { %707 = vmatprep.subr.bf16.mxu0 %v1603_v1  ;;  %1445 = vmatprep.subr.bf16.mxu1 %v1603_v1  ;;  %v1547_v34 = vld [vmem:[%s1666_s28 + $0x144] ss:$8 sps:$4 sm:$0xff]   ;;  %v1513_v35 = vld [vmem:[%s1666_s28 + $0x40] ss:$8 sps:$4 sm:$0xff]   ;;  %v1514_v37 = vld [vmem:[%s1666_s28 + $0x54] ss:$8 sps:$4 sm:$0xff]  }
  0x17   : > { %v1549_v36 = vld [vmem:[%s1666_s28 + $0x140] ss:$8 sps:$4 sm:$0xff]   ;;  %v1553_v38 = vld [vmem:[%s1666_s28 + $0x154] ss:$8 sps:$4 sm:$0xff]   ;;  %v1516_v39 = vld [vmem:[%s1666_s28 + $0x50] ss:$8 sps:$4 sm:$0xff]  }
  0x18   : > { %v1555_v40 = vld [vmem:[%s1666_s28 + $0x150] ss:$8 sps:$4 sm:$0xff]   ;;  %v1517_v41 = vld [vmem:[%s1666_s28 + $0x64] ss:$8 sps:$4 sm:$0xff]   ;;  %v1519_v43 = vld [vmem:[%s1666_s28 + $0x60] ss:$8 sps:$4 sm:$0xff]  }
  0x19   : > { %708 = vmatpush1.bf16.msra.mxu0 %v1486_v4  ;;  %1461 = vmatpush1.bf16.msra.mxu1 %v1486_v4  ;;  %v1559_v42 = vld [vmem:[%s1666_s28 + $0x164] ss:$8 sps:$4 sm:$0xff]   ;;  %v1561_v44 = vld [vmem:[%s1666_s28 + $0x160] ss:$8 sps:$4 sm:$0xff]   ;;  %v1520_v45 = vld [vmem:[%s1666_s28 + $0x74] ss:$8 sps:$4 sm:$0xff]  }
  0x1a   : > { %709 = vmatprep.subr.bf16.mxu0 %v1603_v1  ;;  %1446 = vmatprep.subr.bf16.mxu1 %v1603_v1  ;;  %v1565_v46 = vld [vmem:[%s1666_s28 + $0x174] ss:$8 sps:$4 sm:$0xff]   ;;  %v1522_v47 = vld [vmem:[%s1666_s28 + $0x70] ss:$8 sps:$4 sm:$0xff]   ;;  %v1526_v49 = vld [vmem:[%s1666_s28 + $0x84] ss:$8 sps:$4 sm:$0xff]  }
  0x1b   : > { %v1567_v48 = vld [vmem:[%s1666_s28 + $0x170] ss:$8 sps:$4 sm:$0xff]   ;;  %v1571_v50 = vld [vmem:[%s1666_s28 + $0x184] ss:$8 sps:$4 sm:$0xff]   ;;  %v1528_v51 = vld [vmem:[%s1666_s28 + $0x80] ss:$8 sps:$4 sm:$0xff]  }
  0x1c   : > { %v1573_v52 = vld [vmem:[%s1666_s28 + $0x180] ss:$8 sps:$4 sm:$0xff]   ;;  %v1532_v53 = vld [vmem:[%s1666_s28 + $0x94] ss:$8 sps:$4 sm:$0xff]   ;;  %v1534_v55 = vld [vmem:[%s1666_s28 + $0x90] ss:$8 sps:$4 sm:$0xff]  }
  0x1d   : > { %710 = vmatpush1.bf16.msra.mxu0 %v1487_v5  ;;  %1462 = vmatpush1.bf16.msra.mxu1 %v1487_v5  ;;  %v1574_v54 = vld [vmem:[%s1666_s28 + $0x194] ss:$8 sps:$4 sm:$0xff]   ;;  %v1576_v56 = vld [vmem:[%s1666_s28 + $0x190] ss:$8 sps:$4 sm:$0xff]   ;;  %v1538_v57 = vld [vmem:[%s1666_s28 + $0xa4] ss:$8 sps:$4 sm:$0xff]  }
  0x1e   : > { %711 = vmatprep.subr.bf16.mxu0 %v1603_v1  ;;  %1447 = vmatprep.subr.bf16.mxu1 %v1603_v1  ;;  %v1577_v58 = vld [vmem:[%s1666_s28 + $0x1a4] ss:$8 sps:$4 sm:$0xff]   ;;  %v1540_v59 = vld [vmem:[%s1666_s28 + $0xa0] ss:$8 sps:$4 sm:$0xff]   ;;  %v1544_v61 = vld [vmem:[%s1666_s28 + $0xb4] ss:$8 sps:$4 sm:$0xff]  }
  0x1f   : > { %v1579_v60 = vld [vmem:[%s1666_s28 + $0x1a0] ss:$8 sps:$4 sm:$0xff]   ;;  %v1580_v62 = vld [vmem:[%s1666_s28 + $0x1b4] ss:$8 sps:$4 sm:$0xff]   ;;  %v1546_v63 = vld [vmem:[%s1666_s28 + $0xb0] ss:$8 sps:$4 sm:$0xff]  }
  0x20   : > { %v1582_v0 = vld [vmem:[%s1666_s28 + $0x1b0] ss:$8 sps:$4 sm:$0xff]   ;;  %v1583_v2 = vld [vmem:[%s1666_s28 + $0x1c4] ss:$8 sps:$4 sm:$0xff]   ;;  %v1552_v3 = vld [vmem:[%s1666_s28 + $0xc0] ss:$8 sps:$4 sm:$0xff]  }
  0x21   : > { %712 = vmatpush1.bf16.msra.mxu0 %v1488_v7  ;;  %1463 = vmatpush1.bf16.msra.mxu1 %v1488_v7  ;;  %v1585_v4 = vld [vmem:[%s1666_s28 + $0x1c0] ss:$8 sps:$4 sm:$0xff]   ;;  %v1556_v5 = vld [vmem:[%s1666_s28 + $0xd4] ss:$8 sps:$4 sm:$0xff]   ;;  %v1558_v7 = vld [vmem:[%s1666_s28 + $0xd0] ss:$8 sps:$4 sm:$0xff]  }
  0x22   : > { %713 = vmatprep.subr.bf16.mxu0 %v1603_v1  ;;  %1448 = vmatprep.subr.bf16.mxu1 %v1603_v1  ;;  %v1586_v6 = vld [vmem:[%s1666_s28 + $0x1d4] ss:$8 sps:$4 sm:$0xff]   ;;  %v1589_v10 = vld [vmem:[%s1666_s28 + $0x1e4] ss:$8 sps:$4 sm:$0xff]  }
  0x25   : > { %714 = vmatpush1.bf16.msra.mxu0 %v1489_v8  ;;  %1464 = vmatpush1.bf16.msra.mxu1 %v1489_v8  ;;  %v1588_v8 = vld [vmem:[%s1666_s28 + $0x1d0] ss:$8 sps:$4 sm:$0xff]  }
  0x26   : > { %715 = vmatprep.subr.bf16.mxu0 %v1603_v1  ;;  %1449 = vmatprep.subr.bf16.mxu1 %v1603_v1 }
  0x29   : > { %716 = vmatpush1.bf16.msra.mxu0 %v1490_v9  ;;  %1465 = vmatpush1.bf16.msra.mxu1 %v1490_v9  ;;  %v1562_v9 = vld [vmem:[%s1666_s28 + $0xe4] ss:$8 sps:$4 sm:$0xff]  }
  0x2a   : > { %717 = vmatprep.subr.bf16.mxu0 %v1603_v1  ;;  %1450 = vmatprep.subr.bf16.mxu1 %v1603_v1 }
  0x2d   : > { %718 = vmatpush2.bf16.msra.mxu0 %v1491_v11  ;;  %1466 = vmatpush2.bf16.msra.mxu1 %v1491_v11  ;;  %v1564_v11 = vld [vmem:[%s1666_s28 + $0xe0] ss:$8 sps:$4 sm:$0xff]  }
  0x2e   : > { %719 = vmatprep.subr.bf16.mxu0 %v1603_v1  ;;  %1451 = vmatprep.subr.bf16.mxu1 %v1603_v1 }
  0x31   : > { %720 = vmatpush2.bf16.msra.mxu0 %v1492_v12  ;;  %1467 = vmatpush2.bf16.msra.mxu1 %v1492_v12  ;;  %v1591_v12 = vld [vmem:[%s1666_s28 + $0x1e0] ss:$8 sps:$4 sm:$0xff]  }
  0x32   : > { %721 = vmatprep.subr.bf16.mxu0 %v1603_v1  ;;  %1452 = vmatprep.subr.bf16.mxu1 %v1603_v1 }
  0x35   : > { %722 = vmatpush2.bf16.msra.mxu0 %v1493_v13  ;;  %1468 = vmatpush2.bf16.msra.mxu1 %v1493_v13  ;;  %v1568_v13 = vld [vmem:[%s1666_s28 + $0xf4] ss:$8 sps:$4 sm:$0xff]  }
  0x36   : > { %723 = vmatprep.subr.bf16.mxu0 %v1603_v1  ;;  %1453 = vmatprep.subr.bf16.mxu1 %v1603_v1 }
  0x39   : > { %724 = vmatpush2.bf16.msra.mxu0 %v1494_v14  ;;  %1469 = vmatpush2.bf16.msra.mxu1 %v1494_v14  ;;  %v1592_v14 = vld [vmem:[%s1666_s28 + $0x1f4] ss:$8 sps:$4 sm:$0xff]  }
  0x3a   : > { %725 = vmatprep.subr.bf16.mxu0 %v1603_v1  ;;  %1454 = vmatprep.subr.bf16.mxu1 %v1603_v1 }
  0x3d   : > { %726 = vmatpush2.bf16.msra.mxu0 %v1495_v15  ;;  %1470 = vmatpush2.bf16.msra.mxu1 %v1495_v15  ;;  %v1570_v15 = vld [vmem:[%s1666_s28 + $0xf0] ss:$8 sps:$4 sm:$0xff]  }
  0x3e   : > { %727 = vmatprep.subr.bf16.mxu0 %v1603_v1  ;;  %1455 = vmatprep.subr.bf16.mxu1 %v1603_v1 }
  0x41   : > { %728 = vmatpush2.bf16.msra.mxu0 %v1496_v16  ;;  %1471 = vmatpush2.bf16.msra.mxu1 %v1496_v16  ;;  %v1594_v16 = vld [vmem:[%s1666_s28 + $0x1f0] ss:$8 sps:$4 sm:$0xff]  }
  0x42   : > { %729 = vmatprep.subr.bf16.mxu0 %v1603_v1  ;;  %1456 = vmatprep.subr.bf16.mxu1 %v1603_v1 }
  0x45   : > { %730 = vmatpush2.bf16.msra.mxu0 %v1497_v17  ;;  %1472 = vmatpush2.bf16.msra.mxu1 %v1497_v17 }
  0x46   : > { %731 = vmatprep.subr.bf16.mxu0 %v1603_v1  ;;  %1457 = vmatprep.subr.bf16.mxu1 %v1603_v1  ;;  %v1550_v1 = vld [vmem:[%s1666_s28 + $0xc4] ss:$8 sps:$4 sm:$0xff]  }
  0x49   : > { %732 = vmatpush2.bf16.msra.mxu0 %v1498_v18  ;;  %1473 = vmatpush2.bf16.msra.mxu1 %v1498_v18 }
  0x4c   : > { %734 = vmatmul.mubr.bf16.vlgmr.msra.gmra.mxu0 %v1499_v19  ;;  %862 = vmatmul.mubr.bf16.vlgmr.msra.gmra.mxu1 %v1523_v20 }
  0x4d   : > { %741 = vmatprep.mubr.bf16.mxu0 %v1502_v21  ;;  %869 = vmatprep.mubr.bf16.mxu1 %v1529_v22 }
  0x54   : > { %742 = vmatmul.mubr.bf16.gmra.mxu0 %v1504_v23  ;;  %870 = vmatmul.mubr.bf16.gmra.mxu1 %v1531_v24 }
  0x55   : > { %749 = vmatprep.mubr.bf16.mxu0 %v1505_v25  ;;  %877 = vmatprep.mubr.bf16.mxu1 %v1535_v26 }
  0x5c   : > { %750 = vmatmul.mubr.bf16.gmra.mxu0 %v1507_v27  ;;  %878 = vmatmul.mubr.bf16.gmra.mxu1 %v1537_v28 }
  0x5d   : > { %757 = vmatprep.mubr.bf16.mxu0 %v1508_v29  ;;  %885 = vmatprep.mubr.bf16.mxu1 %v1541_v30 }
  0x64   : > { %758 = vmatmul.mubr.bf16.gmra.mxu0 %v1510_v31  ;;  %886 = vmatmul.mubr.bf16.gmra.mxu1 %v1543_v32 }
  0x65   : > { %765 = vmatprep.mubr.bf16.mxu0 %v1511_v33  ;;  %893 = vmatprep.mubr.bf16.mxu1 %v1547_v34 }
  0x6c   : > { %766 = vmatmul.mubr.bf16.gmra.mxu0 %v1513_v35  ;;  %894 = vmatmul.mubr.bf16.gmra.mxu1 %v1549_v36 }
  0x6d   : > { %773 = vmatprep.mubr.bf16.mxu0 %v1514_v37  ;;  %901 = vmatprep.mubr.bf16.mxu1 %v1553_v38 }
  0x74   : > { %774 = vmatmul.mubr.bf16.gmra.mxu0 %v1516_v39  ;;  %902 = vmatmul.mubr.bf16.gmra.mxu1 %v1555_v40 }
  0x75   : > { %781 = vmatprep.mubr.bf16.mxu0 %v1517_v41  ;;  %909 = vmatprep.mubr.bf16.mxu1 %v1559_v42 }
  0x7c   : > { %782 = vmatmul.mubr.bf16.gmra.mxu0 %v1519_v43  ;;  %910 = vmatmul.mubr.bf16.gmra.mxu1 %v1561_v44 }
  0x7d   : > { %789 = vmatprep.mubr.bf16.mxu0 %v1520_v45  ;;  %917 = vmatprep.mubr.bf16.mxu1 %v1565_v46 }
  0x84   : > { %790 = vmatmul.mubr.bf16.gmra.mxu0 %v1522_v47  ;;  %918 = vmatmul.mubr.bf16.gmra.mxu1 %v1567_v48 }
  0x85   : > { %797 = vmatprep.mubr.bf16.mxu0 %v1526_v49  ;;  %925 = vmatprep.mubr.bf16.mxu1 %v1571_v50 }
  0x8c   : > { %798 = vmatmul.mubr.bf16.gmra.mxu0 %v1528_v51  ;;  %926 = vmatmul.mubr.bf16.gmra.mxu1 %v1573_v52 }
  0x8d   : > { %805 = vmatprep.mubr.bf16.mxu0 %v1532_v53  ;;  %933 = vmatprep.mubr.bf16.mxu1 %v1574_v54 }
  0x94   : > { %806 = vmatmul.mubr.bf16.gmra.mxu0 %v1534_v55  ;;  %934 = vmatmul.mubr.bf16.gmra.mxu1 %v1576_v56 }
  0x95   : > { %813 = vmatprep.mubr.bf16.mxu0 %v1538_v57  ;;  %941 = vmatprep.mubr.bf16.mxu1 %v1577_v58 }
  0x9c   : > { %814 = vmatmul.mubr.bf16.gmra.mxu0 %v1540_v59  ;;  %942 = vmatmul.mubr.bf16.gmra.mxu1 %v1579_v60 }
  0x9d   : > { %821 = vmatprep.mubr.bf16.mxu0 %v1544_v61  ;;  %949 = vmatprep.mubr.bf16.mxu1 %v1580_v62 }
  0xa4   : > { %822 = vmatmul.mubr.bf16.gmra.mxu0 %v1546_v63  ;;  %950 = vmatmul.mubr.bf16.gmra.mxu1 %v1582_v0 }
  0xa5   : > { %829 = vmatprep.mubr.bf16.mxu0 %v1550_v1  ;;  %957 = vmatprep.mubr.bf16.mxu1 %v1583_v2 }
  0xac   : > { %830 = vmatmul.mubr.bf16.gmra.mxu0 %v1552_v3  ;;  %958 = vmatmul.mubr.bf16.gmra.mxu1 %v1585_v4 }
  0xad   : > { %837 = vmatprep.mubr.bf16.mxu0 %v1556_v5  ;;  %965 = vmatprep.mubr.bf16.mxu1 %v1586_v6 }
  0xb4   : > { %838 = vmatmul.mubr.bf16.gmra.mxu0 %v1558_v7  ;;  %966 = vmatmul.mubr.bf16.gmra.mxu1 %v1588_v8 }
  0xb5   : > { %845 = vmatprep.mubr.bf16.mxu0 %v1562_v9  ;;  %973 = vmatprep.mubr.bf16.mxu1 %v1589_v10 }
  0xbc   : > { %846 = vmatmul.mubr.bf16.gmra.mxu0 %v1564_v11  ;;  %974 = vmatmul.mubr.bf16.gmra.mxu1 %v1591_v12 }
  0xbd   : > { %853 = vmatprep.mubr.bf16.mxu0 %v1568_v13  ;;  %981 = vmatprep.mubr.bf16.mxu1 %v1592_v14 }
  0xc4   : > { %854 = vmatmul.mubr.bf16.gmra.mxu0 %v1570_v15  ;;  %982 = vmatmul.mubr.bf16.gmra.mxu1 %v1594_v16 }
 0x10c   : > { %v1796_v17 = vpop.f32.mrf.mxu0  ;;  %v1798_v18 = vpop.f32.mrf.mxu1 }
 0x10d   : > { %990 = vst [vmem:[%s1794_s4] sm:$0xff] %v1796_v17  ;;  %1022 = vst [vmem:[%s1794_s4 + $0x100] sm:$0xff] %v1798_v18 }
 0x10e   : > { %v737_v19 = vpop.f32.mrf.mxu0  ;;  %v865_v20 = vpop.f32.mrf.mxu1 }
 0x110   : > { %v1804_v21 = vpop.f32.mrf.mxu0  ;;  %v1806_v22 = vpop.f32.mrf.mxu1 }
 0x111   : > { %991 = vst [vmem:[%s1794_s4 + $0x8] sm:$0xff] %v1804_v21  ;;  %1023 = vst [vmem:[%s1794_s4 + $0x108] sm:$0xff] %v1806_v22  ;;  %v1124_v19 = vmul.f32 %v1804_v21, %v1804_v21 }
 0x112   : > { %v740_v23 = vpop.f32.mrf.mxu0  ;;  %v868_v24 = vpop.f32.mrf.mxu1 }
 0x113   : > { %v1123_v24 = vmul.f32 %v1796_v17, %v1796_v17 }
 0x114   : > { %v1812_v25 = vpop.f32.mrf.mxu0  ;;  %v1814_v26 = vpop.f32.mrf.mxu1 }
 0x115   : > { %992 = vst [vmem:[%s1794_s4 + $0x10] sm:$0xff] %v1812_v25  ;;  %1024 = vst [vmem:[%s1794_s4 + $0x110] sm:$0xff] %v1814_v26 }
 0x116   : > { %v745_v27 = vpop.f32.mrf.mxu0  ;;  %v873_v28 = vpop.f32.mrf.mxu1 }
 0x117   : > { %v1054_v27 = vadd.f32 %v1804_v21, %v1796_v17  ;;  %v1125_v28 = vmul.f32 %v1812_v25, %v1812_v25 }
 0x118   : > { %v1820_v29 = vpop.f32.mrf.mxu0  ;;  %v1822_v30 = vpop.f32.mrf.mxu1 }
 0x119   : > { %993 = vst [vmem:[%s1794_s4 + $0x18] sm:$0xff] %v1820_v29  ;;  %1025 = vst [vmem:[%s1794_s4 + $0x118] sm:$0xff] %v1822_v30 }
 0x11a   : > { %v748_v31 = vpop.f32.mrf.mxu0  ;;  %v876_v32 = vpop.f32.mrf.mxu1 }
 0x11c   : > { %v1828_v33 = vpop.f32.mrf.mxu0  ;;  %v1830_v34 = vpop.f32.mrf.mxu1 }
 0x11d   : > { %994 = vst [vmem:[%s1794_s4 + $0x20] sm:$0xff] %v1828_v33  ;;  %1026 = vst [vmem:[%s1794_s4 + $0x120] sm:$0xff] %v1830_v34 }
 0x11e   : > { %v753_v35 = vpop.f32.mrf.mxu0  ;;  %v881_v36 = vpop.f32.mrf.mxu1 }
 0x11f   : > { %v1187_v35 = vadd.f32 %v1124_v19, %v1123_v24  ;;  %v1055_v36 = vadd.f32 %v1054_v27, %v1812_v25 }
 0x120   : > { %v1836_v37 = vpop.f32.mrf.mxu0  ;;  %v1838_v38 = vpop.f32.mrf.mxu1 }
 0x121   : > { %995 = vst [vmem:[%s1794_s4 + $0x28] sm:$0xff] %v1836_v37  ;;  %1027 = vst [vmem:[%s1794_s4 + $0x128] sm:$0xff] %v1838_v38  ;;  %v1188_v17 = vadd.f32 %v1187_v35, %v1125_v28  ;;  %v1056_v21 = vadd.f32 %v1055_v36, %v1820_v29 }
 0x122   : > { %v756_v39 = vpop.f32.mrf.mxu0  ;;  %v884_v40 = vpop.f32.mrf.mxu1 }
 0x123   : > { %v1126_v39 = vmul.f32 %v1820_v29, %v1820_v29 }
 0x124   : > { %v1844_v41 = vpop.f32.mrf.mxu0  ;;  %v1846_v42 = vpop.f32.mrf.mxu1 }
 0x125   : > { %996 = vst [vmem:[%s1794_s4 + $0x30] sm:$0xff] %v1844_v41  ;;  %1028 = vst [vmem:[%s1794_s4 + $0x130] sm:$0xff] %v1846_v42 }
 0x126   : > { %v761_v43 = vpop.f32.mrf.mxu0  ;;  %v889_v44 = vpop.f32.mrf.mxu1 }
 0x127   : > { %v1127_v44 = vmul.f32 %v1828_v33, %v1828_v33 }
 0x128   : > { %v1852_v45 = vpop.f32.mrf.mxu0  ;;  %v1854_v46 = vpop.f32.mrf.mxu1 }
 0x129   : > { %997 = vst [vmem:[%s1794_s4 + $0x38] sm:$0xff] %v1852_v45  ;;  %1029 = vst [vmem:[%s1794_s4 + $0x138] sm:$0xff] %v1854_v46 }
 0x12a   : > { %v764_v47 = vpop.f32.mrf.mxu0  ;;  %v892_v48 = vpop.f32.mrf.mxu1 }
 0x12b   : > { %v1189_v48 = vadd.f32 %v1188_v17, %v1126_v39 }
 0x12c   : > { %v1860_v49 = vpop.f32.mrf.mxu0  ;;  %v1862_v50 = vpop.f32.mrf.mxu1 }
 0x12d   : > { %998 = vst [vmem:[%s1794_s4 + $0x40] sm:$0xff] %v1860_v49  ;;  %1030 = vst [vmem:[%s1794_s4 + $0x140] sm:$0xff] %v1862_v50  ;;  %v1190_v29 = vadd.f32 %v1189_v48, %v1127_v44 }
 0x12e   : > { %v769_v51 = vpop.f32.mrf.mxu0  ;;  %v897_v52 = vpop.f32.mrf.mxu1 }
 0x12f   : > { %v1057_v51 = vadd.f32 %v1056_v21, %v1828_v33  ;;  %v1128_v52 = vmul.f32 %v1836_v37, %v1836_v37 }
 0x130   : > { %v1868_v53 = vpop.f32.mrf.mxu0  ;;  %v1870_v54 = vpop.f32.mrf.mxu1 }
 0x131   : > { %999 = vst [vmem:[%s1794_s4 + $0x48] sm:$0xff] %v1868_v53  ;;  %1031 = vst [vmem:[%s1794_s4 + $0x148] sm:$0xff] %v1870_v54  ;;  %v1132_v24 = vmul.f32 %v1868_v53, %v1868_v53 }
 0x132   : > { %v772_v55 = vpop.f32.mrf.mxu0  ;;  %v900_v56 = vpop.f32.mrf.mxu1 }
 0x134   : > { %v1876_v57 = vpop.f32.mrf.mxu0  ;;  %v1878_v58 = vpop.f32.mrf.mxu1 }
 0x135   : > { %1000 = vst [vmem:[%s1794_s4 + $0x50] sm:$0xff] %v1876_v57  ;;  %1032 = vst [vmem:[%s1794_s4 + $0x150] sm:$0xff] %v1878_v58 }
 0x136   : > { %v777_v59 = vpop.f32.mrf.mxu0  ;;  %v905_v60 = vpop.f32.mrf.mxu1 }
 0x137   : > { %v1058_v59 = vadd.f32 %v1057_v51, %v1836_v37  ;;  %v1129_v60 = vmul.f32 %v1844_v41, %v1844_v41 }
 0x138   : > { %v1884_v61 = vpop.f32.mrf.mxu0  ;;  %v1886_v62 = vpop.f32.mrf.mxu1 }
 0x139   : > { %1001 = vst [vmem:[%s1794_s4 + $0x58] sm:$0xff] %v1884_v61  ;;  %1033 = vst [vmem:[%s1794_s4 + $0x158] sm:$0xff] %v1886_v62  ;;  %v1134_v17 = vmul.f32 %v1884_v61, %v1884_v61 }
 0x13a   : > { %v780_v63 = vpop.f32.mrf.mxu0  ;;  %v908_v0 = vpop.f32.mrf.mxu1 }
 0x13b   : > { %v1191_v0 = vadd.f32 %v1190_v29, %v1128_v52 }
 0x13c   : > { %v1892_v1 = vpop.f32.mrf.mxu0  ;;  %v1894_v2 = vpop.f32.mrf.mxu1 }
 0x13d   : > { %1002 = vst [vmem:[%s1794_s4 + $0x60] sm:$0xff] %v1892_v1  ;;  %1034 = vst [vmem:[%s1794_s4 + $0x160] sm:$0xff] %v1894_v2  ;;  %v1192_v37 = vadd.f32 %v1191_v0, %v1129_v60 }
 0x13e   : > { %v785_v3 = vpop.f32.mrf.mxu0  ;;  %v913_v4 = vpop.f32.mrf.mxu1 }
 0x13f   : > { %v1059_v3 = vadd.f32 %v1058_v59, %v1844_v41  ;;  %v1130_v4 = vmul.f32 %v1852_v45, %v1852_v45 }
 0x140   : > { %v1900_v5 = vpop.f32.mrf.mxu0  ;;  %v1902_v6 = vpop.f32.mrf.mxu1 }
 0x141   : > { %1003 = vst [vmem:[%s1794_s4 + $0x68] sm:$0xff] %v1900_v5  ;;  %1035 = vst [vmem:[%s1794_s4 + $0x168] sm:$0xff] %v1902_v6  ;;  %v1136_v29 = vmul.f32 %v1900_v5, %v1900_v5 }
 0x142   : > { %v788_v7 = vpop.f32.mrf.mxu0  ;;  %v916_v8 = vpop.f32.mrf.mxu1 }
 0x144   : > { %v1908_v9 = vpop.f32.mrf.mxu0  ;;  %v1910_v10 = vpop.f32.mrf.mxu1 }
 0x145   : > { %1004 = vst [vmem:[%s1794_s4 + $0x70] sm:$0xff] %v1908_v9  ;;  %1036 = vst [vmem:[%s1794_s4 + $0x170] sm:$0xff] %v1910_v10 }
 0x146   : > { %v793_v11 = vpop.f32.mrf.mxu0  ;;  %v921_v12 = vpop.f32.mrf.mxu1 }
 0x147   : > { %v1060_v11 = vadd.f32 %v1059_v3, %v1852_v45  ;;  %v1131_v12 = vmul.f32 %v1860_v49, %v1860_v49 }
 0x148   : > { %v1916_v13 = vpop.f32.mrf.mxu0  ;;  %v1918_v14 = vpop.f32.mrf.mxu1 }
 0x149   : > { %1005 = vst [vmem:[%s1794_s4 + $0x78] sm:$0xff] %v1916_v13  ;;  %1037 = vst [vmem:[%s1794_s4 + $0x178] sm:$0xff] %v1918_v14  ;;  %v1061_v19 = vadd.f32 %v1060_v11, %v1860_v49 }
 0x14a   : > { %v796_v15 = vpop.f32.mrf.mxu0  ;;  %v924_v16 = vpop.f32.mrf.mxu1 }
 0x14b   : > { %v1193_v16 = vadd.f32 %v1192_v37, %v1130_v4  ;;  %v1138_v37 = vmul.f32 %v1916_v13, %v1916_v13 }
 0x14c   : > { %v1926_v20 = vpop.f32.mrf.mxu0  ;;  %v1928_v23 = vpop.f32.mrf.mxu1 }
 0x14d   : > { %1006 = vst [vmem:[%s1794_s4 + $0x80] sm:$0xff] %v1926_v20  ;;  %1038 = vst [vmem:[%s1794_s4 + $0x180] sm:$0xff] %v1928_v23  ;;  %v1194_v45 = vadd.f32 %v1193_v16, %v1131_v12 }
 0x14e   : > { %v801_v31 = vpop.f32.mrf.mxu0  ;;  %v929_v32 = vpop.f32.mrf.mxu1 }
 0x14f   : > { %v1062_v31 = vadd.f32 %v1061_v19, %v1868_v53  ;;  %v1133_v32 = vmul.f32 %v1876_v57, %v1876_v57  ;;  %v1195_v36 = vadd.f32 %v1194_v45, %v1132_v24 }
 0x150   : > { %v1943_v40 = vpop.f32.mrf.mxu0  ;;  %v1945_v43 = vpop.f32.mrf.mxu1 }
 0x151   : > { %1007 = vst [vmem:[%s1794_s4 + $0x88] sm:$0xff] %v1943_v40  ;;  %1039 = vst [vmem:[%s1794_s4 + $0x188] sm:$0xff] %v1945_v43  ;;  %v1063_v39 = vadd.f32 %v1062_v31, %v1876_v57  ;;  %v1196_v53 = vadd.f32 %v1195_v36, %v1133_v32  ;;  %v1140_v45 = vmul.f32 %v1943_v40, %v1943_v40 }
 0x152   : > { %v804_v25 = vpop.f32.mrf.mxu0  ;;  %v932_v47 = vpop.f32.mrf.mxu1 }
 0x153   : > { %v1064_v25 = vadd.f32 %v1063_v39, %v1884_v61  ;;  %v1135_v47 = vmul.f32 %v1892_v1, %v1892_v1  ;;  %v1197_v51 = vadd.f32 %v1196_v53, %v1134_v17 }
 0x154   : > { %v1957_v55 = vpop.f32.mrf.mxu0  ;;  %v1959_v56 = vpop.f32.mrf.mxu1 }
 0x155   : > { %1008 = vst [vmem:[%s1794_s4 + $0x90] sm:$0xff] %v1957_v55  ;;  %1040 = vst [vmem:[%s1794_s4 + $0x190] sm:$0xff] %v1959_v56  ;;  %v1065_v52 = vadd.f32 %v1064_v25, %v1892_v1  ;;  %v1198_v61 = vadd.f32 %v1197_v51, %v1135_v47 }
 0x156   : > { %v809_v33 = vpop.f32.mrf.mxu0  ;;  %v937_v63 = vpop.f32.mrf.mxu1 }
 0x157   : > { %v1066_v33 = vadd.f32 %v1065_v52, %v1900_v5  ;;  %v1137_v63 = vmul.f32 %v1908_v9, %v1908_v9  ;;  %v1199_v1 = vadd.f32 %v1198_v61, %v1136_v29 }
 0x158   : > { %v1971_v7 = vpop.f32.mrf.mxu0  ;;  %v1973_v8 = vpop.f32.mrf.mxu1 }
 0x159   : > { %1009 = vst [vmem:[%s1794_s4 + $0x98] sm:$0xff] %v1971_v7  ;;  %1041 = vst [vmem:[%s1794_s4 + $0x198] sm:$0xff] %v1973_v8  ;;  %v1067_v4 = vadd.f32 %v1066_v33, %v1908_v9  ;;  %v1142_v53 = vmul.f32 %v1971_v7, %v1971_v7 }
 0x15a   : > { %v812_v41 = vpop.f32.mrf.mxu0  ;;  %v940_v15 = vpop.f32.mrf.mxu1 }
 0x15b   : > { %v1200_v41 = vadd.f32 %v1199_v1, %v1137_v63  ;;  %v1068_v5 = vadd.f32 %v1067_v4, %v1916_v13  ;;  %v1139_v15 = vmul.f32 %v1926_v20, %v1926_v20 }
 0x15c   : > { %v1985_v27 = vpop.f32.mrf.mxu0  ;;  %v1987_v28 = vpop.f32.mrf.mxu1 }
 0x15d   : > { %1010 = vst [vmem:[%s1794_s4 + $0xa0] sm:$0xff] %v1985_v27  ;;  %1042 = vst [vmem:[%s1794_s4 + $0x1a0] sm:$0xff] %v1987_v28  ;;  %v1201_v9 = vadd.f32 %v1200_v41, %v1138_v37  ;;  %v1069_v24 = vadd.f32 %v1068_v5, %v1926_v20 }
 0x15e   : > { %v817_v49 = vpop.f32.mrf.mxu0  ;;  %v945_v35 = vpop.f32.mrf.mxu1 }
 0x15f   : > { %v1202_v49 = vadd.f32 %v1201_v9, %v1139_v15  ;;  %v1070_v13 = vadd.f32 %v1069_v24, %v1943_v40  ;;  %v1141_v35 = vmul.f32 %v1957_v55, %v1957_v55 }
 0x160   : > { %v1999_v21 = vpop.f32.mrf.mxu0  ;;  %v2001_v44 = vpop.f32.mrf.mxu1 }
 0x161   : > { %1011 = vst [vmem:[%s1794_s4 + $0xa8] sm:$0xff] %v1999_v21  ;;  %1043 = vst [vmem:[%s1794_s4 + $0x1a8] sm:$0xff] %v2001_v44  ;;  %v1203_v20 = vadd.f32 %v1202_v49, %v1140_v45  ;;  %v1071_v17 = vadd.f32 %v1070_v13, %v1957_v55  ;;  %v1144_v61 = vmul.f32 %v1999_v21, %v1999_v21 }
 0x162   : > { %v820_v57 = vpop.f32.mrf.mxu0  ;;  %v948_v48 = vpop.f32.mrf.mxu1 }
 0x163   : > { %v1204_v57 = vadd.f32 %v1203_v20, %v1141_v35  ;;  %v1072_v40 = vadd.f32 %v1071_v17, %v1971_v7  ;;  %v1143_v48 = vmul.f32 %v1985_v27, %v1985_v27 }
 0x164   : > { %v823_v59 = vpop.f32.mrf.mxu0  ;;  %v2013_v60 = vpop.f32.mrf.mxu1 }
 0x165   : > { %1012 = vst [vmem:[%s1794_s4 + $0xb0] sm:$0xff] %v823_v59  ;;  %1044 = vst [vmem:[%s1794_s4 + $0x1b0] sm:$0xff] %v2013_v60  ;;  %v1205_v55 = vadd.f32 %v1204_v57, %v1142_v53  ;;  %v1073_v29 = vadd.f32 %v1072_v40, %v1985_v27 }
 0x166   : > { %v825_v0 = vpop.f32.mrf.mxu0  ;;  %v953_v3 = vpop.f32.mrf.mxu1 }
 0x167   : > { %v1206_v0 = vadd.f32 %v1205_v55, %v1143_v48  ;;  %v1074_v7 = vadd.f32 %v1073_v29, %v1999_v21  ;;  %v1145_v3 = vmul.f32 %v823_v59, %v823_v59 }
 0x168   : > { %v826_v11 = vpop.f32.mrf.mxu0  ;;  %v2024_v12 = vpop.f32.mrf.mxu1 }
 0x169   : > { %1013 = vst [vmem:[%s1794_s4 + $0xb8] sm:$0xff] %v826_v11  ;;  %1045 = vst [vmem:[%s1794_s4 + $0x1b8] sm:$0xff] %v2024_v12  ;;  %v1207_v37 = vadd.f32 %v1206_v0, %v1144_v61  ;;  %v1075_v41 = vadd.f32 %v1074_v7, %v823_v59  ;;  %v1146_v27 = vmul.f32 %v826_v11, %v826_v11 }
 0x16a   : > { %v828_v16 = vpop.f32.mrf.mxu0  ;;  %v956_v19 = vpop.f32.mrf.mxu1 }
 0x16b   : > { %v1208_v16 = vadd.f32 %v1207_v37, %v1145_v3  ;;  %v1076_v19 = vadd.f32 %v1075_v41, %v826_v11 }
 0x16c   : > { %v831_v31 = vpop.f32.mrf.mxu0  ;;  %v2035_v32 = vpop.f32.mrf.mxu1 }
 0x16d   : > { %1014 = vst [vmem:[%s1794_s4 + $0xc0] sm:$0xff] %v831_v31  ;;  %1046 = vst [vmem:[%s1794_s4 + $0x1c0] sm:$0xff] %v2035_v32  ;;  %v1147_v9 = vmul.f32 %v831_v31, %v831_v31  ;;  %v1209_v45 = vadd.f32 %v1208_v16, %v1146_v27  ;;  %v1077_v49 = vadd.f32 %v1076_v19, %v831_v31 }
 0x16e   : > { %v833_v36 = vpop.f32.mrf.mxu0  ;;  %v961_v39 = vpop.f32.mrf.mxu1 }
 0x16f   : > { %v1210_v59 = vadd.f32 %v1209_v45, %v1147_v9 }
 0x170   : > { %v834_v25 = vpop.f32.mrf.mxu0  ;;  %v2046_v47 = vpop.f32.mrf.mxu1 }
 0x171   : > { %1015 = vst [vmem:[%s1794_s4 + $0xc8] sm:$0xff] %v834_v25  ;;  %1047 = vst [vmem:[%s1794_s4 + $0x1c8] sm:$0xff] %v2046_v47  ;;  %v1148_v13 = vmul.f32 %v834_v25, %v834_v25  ;;  %v1078_v39 = vadd.f32 %v1077_v49, %v834_v25 }
 0x172   : > { %v836_v51 = vpop.f32.mrf.mxu0  ;;  %v964_v52 = vpop.f32.mrf.mxu1 }
 0x173   : > { %v1211_v53 = vadd.f32 %v1210_v59, %v1148_v13 }
 0x174   : > { %v839_v33 = vpop.f32.mrf.mxu0  ;;  %v2057_v63 = vpop.f32.mrf.mxu1 }
 0x175   : > { %1016 = vst [vmem:[%s1794_s4 + $0xd0] sm:$0xff] %v839_v33  ;;  %1048 = vst [vmem:[%s1794_s4 + $0x1d0] sm:$0xff] %v2057_v63  ;;  %v1149_v20 = vmul.f32 %v839_v33, %v839_v33  ;;  %v1079_v57 = vadd.f32 %v1078_v39, %v839_v33 }
 0x176   : > { %v841_v1 = vpop.f32.mrf.mxu0  ;;  %v969_v4 = vpop.f32.mrf.mxu1 }
 0x177   : > { %v1212_v51 = vadd.f32 %v1211_v53, %v1149_v20  ;;  %v1156_v20 = vmul.f32 %v1806_v22, %v1806_v22  ;;  %v1157_v53 = vmul.f32 %v1814_v26, %v1814_v26 }
 0x178   : > { %v842_v5 = vpop.f32.mrf.mxu0  ;;  %v2063_v15 = vpop.f32.mrf.mxu1 }
 0x179   : > { %1017 = vst [vmem:[%s1794_s4 + $0xd8] sm:$0xff] %v842_v5  ;;  %1049 = vst [vmem:[%s1794_s4 + $0x1d8] sm:$0xff] %v2063_v15  ;;  %v1150_v40 = vmul.f32 %v842_v5, %v842_v5  ;;  %v1080_v52 = vadd.f32 %v1079_v57, %v842_v5 }
 0x17a   : > { %v844_v21 = vpop.f32.mrf.mxu0  ;;  %v972_v24 = vpop.f32.mrf.mxu1 }
 0x17b   : > { %v1213_v61 = vadd.f32 %v1212_v51, %v1150_v40 }
 0x17c   : > { %v847_v35 = vpop.f32.mrf.mxu0  ;;  %v2068_v36 = vpop.f32.mrf.mxu1 }
 0x17d   : > { %1018 = vst [vmem:[%s1794_s4 + $0xe0] sm:$0xff] %v847_v35  ;;  %1050 = vst [vmem:[%s1794_s4 + $0x1e0] sm:$0xff] %v2068_v36  ;;  %v1151_v55 = vmul.f32 %v847_v35, %v847_v35  ;;  %v1081_v0 = vadd.f32 %v1080_v52, %v847_v35  ;;  %v1155_v35 = vmul.f32 %v1798_v18, %v1798_v18 }
 0x17e   : > { %v849_v11 = vpop.f32.mrf.mxu0  ;;  %v977_v17 = vpop.f32.mrf.mxu1 }
 0x17f   : > { %v1214_v1 = vadd.f32 %v1213_v61, %v1151_v55 }
 0x180   : > { %v850_v48 = vpop.f32.mrf.mxu0  ;;  %v2073_v31 = vpop.f32.mrf.mxu1 }
 0x181   : > { %1019 = vst [vmem:[%s1794_s4 + $0xe8] sm:$0xff] %v850_v48  ;;  %1051 = vst [vmem:[%s1794_s4 + $0x1e8] sm:$0xff] %v2073_v31  ;;  %v1152_v7 = vmul.f32 %v850_v48, %v850_v48  ;;  %v1082_v4 = vadd.f32 %v1081_v0, %v850_v48  ;;  %v1158_v48 = vmul.f32 %v1822_v30, %v1822_v30 }
 0x182   : > { %v852_v25 = vpop.f32.mrf.mxu0  ;;  %v980_v29 = vpop.f32.mrf.mxu1 }
 0x183   : > { %v1215_v5 = vadd.f32 %v1214_v1, %v1152_v7 }
 0x184   : > { %v855_v3 = vpop.f32.mrf.mxu0  ;;  %v2078_v33 = vpop.f32.mrf.mxu1 }
 0x185   : > { %1020 = vst [vmem:[%s1794_s4 + $0xf0] sm:$0xff] %v855_v3  ;;  %v1153_v37 = vmul.f32 %v855_v3, %v855_v3  ;;  %1052 = vst [vmem:[%s1794_s4 + $0x1f0] sm:$0xff] %v2078_v33  ;;  %v1083_v16 = vadd.f32 %v1082_v4, %v855_v3 }
 0x186   : > { %v857_v41 = vpop.f32.mrf.mxu0  ;;  %v985_v27 = vpop.f32.mrf.mxu1 }
 0x187   : > { %v1216_v21 = vadd.f32 %v1215_v5, %v1153_v37 }
 0x188   : > { %v858_v19 = vpop.f32.mrf.mxu0  ;;  %v2083_v9 = vpop.f32.mrf.mxu1 }
 0x189   : > { %1021 = vst [vmem:[%s1794_s4 + $0xf8] sm:$0xff] %v858_v19  ;;  %v1084_v24 = vadd.f32 %v1083_v16, %v858_v19  ;;  %v1154_v45 = vmul.f32 %v858_v19, %v858_v19  ;;  %1053 = vst [vmem:[%s1794_s4 + $0x1f8] sm:$0xff] %v2083_v9 }
 0x18a   : > { %v860_v49 = vpop.f32.mrf.mxu0  ;;  %v988_v13 = vpop.f32.mrf.mxu1 }
 0x18b   : > { %v1085_v59 = vadd.f32 %v1084_v24, %v1798_v18  ;;  %v1217_v39 = vadd.f32 %v1216_v21, %v1154_v45  ;;  %v1159_v18 = vmul.f32 %v1830_v34, %v1830_v34 }
 0x18d   : > { %v1086_v11 = vadd.f32 %v1085_v59, %v1806_v22  ;;  %v1218_v17 = vadd.f32 %v1217_v39, %v1155_v35  ;;  %v1160_v22 = vmul.f32 %v1838_v38, %v1838_v38 }
 0x18f   : > { %v1087_v57 = vadd.f32 %v1086_v11, %v1814_v26  ;;  %v1219_v40 = vadd.f32 %v1218_v17, %v1156_v20  ;;  %v1161_v26 = vmul.f32 %v1846_v42, %v1846_v42 }
 0x191   : > { %v1088_v51 = vadd.f32 %v1087_v57, %v1822_v30  ;;  %v1220_v52 = vadd.f32 %v1219_v40, %v1157_v53  ;;  %v1162_v30 = vmul.f32 %v1854_v46, %v1854_v46  ;;  %v1172_v53 = vmul.f32 %v1945_v43, %v1945_v43 }
 0x193   : > { %v1089_v55 = vadd.f32 %v1088_v51, %v1830_v34  ;;  %v1221_v25 = vadd.f32 %v1220_v52, %v1158_v48  ;;  %v1163_v34 = vmul.f32 %v1862_v50, %v1862_v50  ;;  %v1173_v48 = vmul.f32 %v1959_v56, %v1959_v56 }
 0x194   : > { %v1174_v52 = vmul.f32 %v1973_v8, %v1973_v8 }
 0x195   : > { %v1090_v29 = vadd.f32 %v1089_v55, %v1838_v38  ;;  %v1222_v61 = vadd.f32 %v1221_v25, %v1159_v18  ;;  %v1164_v38 = vmul.f32 %v1870_v54, %v1870_v54  ;;  %v1175_v55 = vmul.f32 %v1987_v28, %v1987_v28 }
 0x197   : > { %v1091_v0 = vadd.f32 %v1090_v29, %v1846_v42  ;;  %v1223_v7 = vadd.f32 %v1222_v61, %v1160_v22  ;;  %v1165_v42 = vmul.f32 %v1878_v58, %v1878_v58  ;;  %v1176_v22 = vmul.f32 %v2001_v44, %v2001_v44 }
 0x198   : > { %v1177_v61 = vmul.f32 %v2013_v60, %v2013_v60 }
 0x199   : > { %v1092_v3 = vadd.f32 %v1091_v0, %v1854_v46  ;;  %v1224_v1 = vadd.f32 %v1223_v7, %v1161_v26  ;;  %v1166_v46 = vmul.f32 %v1886_v62, %v1886_v62  ;;  %v1178_v0 = vmul.f32 %v2024_v12, %v2024_v12 }
 0x19b   : > { %v1225_v4 = vadd.f32 %v1224_v1, %v1162_v30  ;;  %v1093_v37 = vadd.f32 %v1092_v3, %v1862_v50  ;;  %v1167_v50 = vmul.f32 %v1894_v2, %v1894_v2  ;;  %v1179_v30 = vmul.f32 %v2035_v32, %v2035_v32 }
 0x19c   : > { %v1180_v1 = vmul.f32 %v2046_v47, %v2046_v47 }
 0x19d   : > { %v1094_v41 = vadd.f32 %v1093_v37, %v1870_v54  ;;  %v1226_v27 = vadd.f32 %v1225_v4, %v1163_v34  ;;  %v1168_v54 = vmul.f32 %v1902_v6, %v1902_v6  ;;  %v1181_v4 = vmul.f32 %v2057_v63, %v2057_v63 }
 0x19f   : > { %v1095_v5 = vadd.f32 %v1094_v41, %v1878_v58  ;;  %v1227_v16 = vadd.f32 %v1226_v27, %v1164_v38  ;;  %v1169_v58 = vmul.f32 %v1910_v10, %v1910_v10  ;;  %v1182_v38 = vmul.f32 %v2063_v15, %v2063_v15 }
 0x1a0   : > { %v1183_v27 = vmul.f32 %v2068_v36, %v2068_v36 }
 0x1a1   : > { %v1096_v19 = vadd.f32 %v1095_v5, %v1886_v62  ;;  %v1228_v21 = vadd.f32 %v1227_v16, %v1165_v42  ;;  %v1170_v62 = vmul.f32 %v1918_v14, %v1918_v14 }
 0x1a3   : > { %v1097_v24 = vadd.f32 %v1096_v19, %v1894_v2  ;;  %v1229_v45 = vadd.f32 %v1228_v21, %v1166_v46  ;;  %v1171_v2 = vmul.f32 %v1928_v23, %v1928_v23  ;;  %v1185_v46 = vmul.f32 %v2078_v33, %v2078_v33 }
 0x1a4   : > { %v1186_v21 = vmul.f32 %v2083_v9, %v2083_v9 }
 0x1a5   : > { %v1098_v49 = vadd.f32 %v1097_v24, %v1902_v6  ;;  %v1230_v13 = vadd.f32 %v1229_v45, %v1167_v50 }
 0x1a7   : > { %v1099_v35 = vadd.f32 %v1098_v49, %v1910_v10  ;;  %v1231_v59 = vadd.f32 %v1230_v13, %v1168_v54 }
 0x1a9   : > { %v1100_v39 = vadd.f32 %v1099_v35, %v1918_v14  ;;  %v1232_v20 = vadd.f32 %v1231_v59, %v1169_v58 }
 0x1ab   : > { %v1101_v11 = vadd.f32 %v1100_v39, %v1928_v23  ;;  %v1233_v17 = vadd.f32 %v1232_v20, %v1170_v62 }
 0x1ad   : > { %v1102_v6 = vadd.f32 %v1101_v11, %v1945_v43  ;;  %v1234_v57 = vadd.f32 %v1233_v17, %v1171_v2 }
 0x1af   : > { %v1235_v10 = vadd.f32 %v1234_v57, %v1172_v53  ;;  %v1103_v40 = vadd.f32 %v1102_v6, %v1959_v56 }
 0x1b1   : > { %v1236_v14 = vadd.f32 %v1235_v10, %v1173_v48  ;;  %v1104_v51 = vadd.f32 %v1103_v40, %v1973_v8 }
 0x1b3   : > { %v1237_v23 = vadd.f32 %v1236_v14, %v1174_v52  ;;  %v1105_v18 = vadd.f32 %v1104_v51, %v1987_v28 }
 0x1b5   : > { %v1238_v43 = vadd.f32 %v1237_v23, %v1175_v55  ;;  %v1106_v25 = vadd.f32 %v1105_v18, %v2001_v44 }
 0x1b7   : > { %v1239_v29 = vadd.f32 %v1238_v43, %v1176_v22  ;;  %v1107_v56 = vadd.f32 %v1106_v25, %v2013_v60 }
 0x1b9   : > { %v1240_v26 = vadd.f32 %v1239_v29, %v1177_v61  ;;  %v1108_v8 = vadd.f32 %v1107_v56, %v2024_v12 }
 0x1bb   : > { %v1241_v7 = vadd.f32 %v1240_v26, %v1178_v0  ;;  %v1109_v28 = vadd.f32 %v1108_v8, %v2035_v32 }
 0x1bd   : > { %v1242_v3 = vadd.f32 %v1241_v7, %v1179_v30  ;;  %v1110_v44 = vadd.f32 %v1109_v28, %v2046_v47 }
 0x1bf   : > { %v1243_v34 = vadd.f32 %v1242_v3, %v1180_v1  ;;  %v1111_v60 = vadd.f32 %v1110_v44, %v2057_v63  ;;  %v1184_v63 = vmul.f32 %v2073_v31, %v2073_v31 }
 0x1c1   : > { %v1244_v37 = vadd.f32 %v1243_v34, %v1181_v4  ;;  %v1112_v12 = vadd.f32 %v1111_v60, %v2063_v15 }
 0x1c3   : > { %v1245_v32 = vadd.f32 %v1244_v37, %v1182_v38  ;;  %v1113_v41 = vadd.f32 %v1112_v12, %v2068_v36 }
 0x1c5   : > { %v1246_v47 = vadd.f32 %v1245_v32, %v1183_v27  ;;  %v1114_v42 = vadd.f32 %v1113_v41, %v2073_v31 }
 0x1c7   : > { %v1247_v5 = vadd.f32 %v1246_v47, %v1184_v63  ;;  %v1115_v16 = vadd.f32 %v1114_v42, %v2078_v33 }
 0x1c9   : > { %v1248_v15 = vadd.f32 %v1247_v5, %v1185_v46  ;;  %v1116_v19 = vadd.f32 %v1115_v16, %v2083_v9 }
 0x1cb   : > { %v1117_v36 = vrot.slane %v1116_v19, 4  ;;  %v1249_v50 = vadd.f32 %v1248_v15, %v1186_v21 }
 0x1cd   : > { %v1118_v24 = vadd.f32 %v1117_v36, %v1116_v19  ;;  %v1250_v45 = vrot.slane %v1249_v50, 4 }
 0x1cf   : > { %v1119_v54 = vrot.slane %v1118_v24, 2  ;;  %v1251_v49 = vadd.f32 %v1250_v45, %v1249_v50 }
 0x1d1   : > { %v1120_v31 = vadd.f32 %v1119_v54, %v1118_v24  ;;  %v1252_v13 = vrot.slane %v1251_v49, 2 }
 0x1d3   : > { %v1121_v58 = vrot.slane %v1120_v31, 1  ;;  %v1253_v35 = vadd.f32 %v1252_v13, %v1251_v49 }
 0x1d5   : > { %v1254_v33 = vrot.slane %v1253_v35, 1  ;;  %v1122_v59 = vadd.f32 %v1121_v58, %v1120_v31 }
 0x1d7   : > { %v1255_v62 = vadd.f32 %v1254_v33, %v1253_v35 }
 0x1d9   : > { %v1257_v9 = vsel %vm1256_vm0, %v1122_v59, %v1255_v62 }
 0x1da   : > { %v1259_v39 = vsel %vm1258_vm1, %v1257_v9, 0.0 }
 0x1db   : > { %1260 = vst [vmem:[%s187_s5] sm:$0xff] %v1259_v39 }
 0x1dc PF: > { %s14_s12 = sadd.s32 1, %s1601_s12  }
 0x1dd   : > { %p11_p5 = scmp.ge.s32.totalorder %s14_s12, 6  }
 0x1df   :  { %13 = sbr.rel (!%p11_p5) target bundleno = 1 (0x1), region = 70 }

// kernel: _lambda_.20
= control target key start
LH: loop header
LB: loop body
LE: loop exit
PB: predicated region body
PF: predicated region fallthrough
CT: control target
= control target key end

     0   :  { %s613_s12 = smov 0   ;;  %s900_s0 = inlined_call_operand.vmem [shape: f32[2048,128], index: 0, kind: input, shape index: {}]   ;;  %s901_s1 = inlined_call_operand.vmem [shape: f32[1,128], index: 1, kind: input, shape index: {}]   ;;  %s902_s2 = inlined_call_operand.vmem [shape: f32[1,128], index: 2, kind: input, shape index: {}]   ;;  %s903_s3 = inlined_call_operand.vmem [shape: f32[2048,128], index: 3, kind: output, shape index: {}]  }
   0x1 LB: > { %s564_s13 = sadd.s32 4294967295, %s591_s12   ;;  %p568_p0 = scmp.ge.s32.totalorder %s591_s12, 1  ;;  %s591_s12 = sphi %s613_s12, %s13_s12  }
   0x2   : > { %p138_p1 = scmp.lt.s32.totalorder %s591_s12, 5 }
   0x4   : > { %p139_p2 = pnand %p568_p0, %p138_p1 }
   0x5   : > { %s569_s14 = sshll.u32 (!%p139_p2), %s564_s13, 6 }
   0x6   : > { %142 = sbr.rel (%p139_p2) target bundleno = 68 (0x44), region = 32  ;;  %p163_p3 = scmp.lt.s32.totalorder (!%p139_p2), %s569_s14, 255 }
   0xb   : > { %s905_s14 = smov (!%p163_p3, %s569_s14), 255  ;;  %v624_v0 = vld [vmem:[%s901_s1] ss:$0 sm:$0xff] }
   0xc   : > { %s570_s15 = sshll.u32 %s905_s14, 3  ;;  %v634_v1 = vld [vmem:[%s902_s2] ss:$0 sm:$0xff] }
   0xd   : > { %s629_s20 = scalar_lea.vmem %s900_s0, %s570_s15  ;;  %s657_s25 = scalar_lea.vmem %s903_s3, %s570_s15 }
   0xe   : > { %v174_v2 = vld [vmem:[%s629_s20] sm:$0xff]  ;;  %v175_v3 = vld [vmem:[%s629_s20 + $0x8] sm:$0xff]  ;;  %v176_v4 = vld [vmem:[%s629_s20 + $0x10] sm:$0xff] }
   0xf   : > { %v245_v5 = vmul.f32 %v624_v0, %v174_v2  ;;  %v246_v6 = vmul.f32 %v624_v0, %v175_v3  ;;  %v247_v7 = vmul.f32 %v624_v0, %v176_v4  ;;  %v177_v8 = vld [vmem:[%s629_s20 + $0x18] sm:$0xff]  ;;  %v178_v9 = vld [vmem:[%s629_s20 + $0x20] sm:$0xff]  ;;  %v179_v10 = vld [vmem:[%s629_s20 + $0x28] sm:$0xff] }
  0x10   : > { %v248_v11 = vmul.f32 %v624_v0, %v177_v8  ;;  %v249_v12 = vmul.f32 %v624_v0, %v178_v9  ;;  %v250_v13 = vmul.f32 %v624_v0, %v179_v10  ;;  %v180_v14 = vld [vmem:[%s629_s20 + $0x30] sm:$0xff]  ;;  %v181_v15 = vld [vmem:[%s629_s20 + $0x38] sm:$0xff]  ;;  %v182_v24 = vld [vmem:[%s629_s20 + $0x40] sm:$0xff] }
  0x11   : > { %v316_v16 = vadd.f32 %v634_v1, %v245_v5  ;;  %v317_v17 = vadd.f32 %v634_v1, %v246_v6  ;;  %v318_v18 = vadd.f32 %v634_v1, %v247_v7  ;;  %v251_v19 = vmul.f32 %v624_v0, %v180_v14  ;;  %v183_v25 = vld [vmem:[%s629_s20 + $0x48] sm:$0xff]  ;;  %v184_v26 = vld [vmem:[%s629_s20 + $0x50] sm:$0xff]  ;;  %v185_v31 = vld [vmem:[%s629_s20 + $0x58] sm:$0xff] }
  0x12   : > { %v319_v20 = vadd.f32 %v634_v1, %v248_v11  ;;  %v320_v21 = vadd.f32 %v634_v1, %v249_v12  ;;  %v321_v22 = vadd.f32 %v634_v1, %v250_v13  ;;  %v252_v23 = vmul.f32 %v624_v0, %v181_v15  ;;  %v186_v32 = vld [vmem:[%s629_s20 + $0x60] sm:$0xff]  ;;  %v187_v33 = vld [vmem:[%s629_s20 + $0x68] sm:$0xff]  ;;  %v188_v38 = vld [vmem:[%s629_s20 + $0x70] sm:$0xff] }
  0x13   : > { %v380_v27 = vmax.f32 %v316_v16, 0.0  ;;  %v381_v28 = vmax.f32 %v317_v17, 0.0  ;;  %v382_v29 = vmax.f32 %v318_v18, 0.0  ;;  %v322_v30 = vadd.f32 %v634_v1, %v251_v19  ;;  %v189_v43 = vld [vmem:[%s629_s20 + $0x78] sm:$0xff]  ;;  %v190_v56 = vld [vmem:[%s629_s20 + $0x80] sm:$0xff]  ;;  %v191_v57 = vld [vmem:[%s629_s20 + $0x88] sm:$0xff] }
  0x14   : > { %v383_v34 = vmax.f32 %v319_v20, 0.0  ;;  %v384_v35 = vmax.f32 %v320_v21, 0.0  ;;  %v385_v36 = vmax.f32 %v321_v22, 0.0  ;;  %v323_v37 = vadd.f32 %v634_v1, %v252_v23  ;;  %v192_v58 = vld [vmem:[%s629_s20 + $0x90] sm:$0xff]  ;;  %v193_v63 = vld [vmem:[%s629_s20 + $0x98] sm:$0xff]  ;;  %v194_v2 = vld [vmem:[%s629_s20 + $0xa0] sm:$0xff] }
  0x15   : > { %444 = vst [vmem:[%s657_s25] sm:$0xff] %v380_v27  ;;  %445 = vst [vmem:[%s657_s25 + $0x8] sm:$0xff] %v381_v28  ;;  %v386_v39 = vmax.f32 %v322_v30, 0.0  ;;  %v253_v40 = vmul.f32 %v624_v0, %v182_v24  ;;  %v254_v41 = vmul.f32 %v624_v0, %v183_v25  ;;  %v255_v42 = vmul.f32 %v624_v0, %v184_v26  ;;  %v195_v3 = vld [vmem:[%s629_s20 + $0xa8] sm:$0xff]  ;;  %v196_v8 = vld [vmem:[%s629_s20 + $0xb0] sm:$0xff] }
  0x16   : > { %446 = vst [vmem:[%s657_s25 + $0x10] sm:$0xff] %v382_v29  ;;  %447 = vst [vmem:[%s657_s25 + $0x18] sm:$0xff] %v383_v34  ;;  %v387_v44 = vmax.f32 %v323_v37, 0.0  ;;  %v256_v45 = vmul.f32 %v624_v0, %v185_v31  ;;  %v257_v46 = vmul.f32 %v624_v0, %v186_v32  ;;  %v258_v47 = vmul.f32 %v624_v0, %v187_v33  ;;  %v197_v13 = vld [vmem:[%s629_s20 + $0xb8] sm:$0xff]  ;;  %v198_v26 = vld [vmem:[%s629_s20 + $0xc0] sm:$0xff] }
  0x17   : > { %448 = vst [vmem:[%s657_s25 + $0x20] sm:$0xff] %v384_v35  ;;  %449 = vst [vmem:[%s657_s25 + $0x28] sm:$0xff] %v385_v36  ;;  %v324_v48 = vadd.f32 %v634_v1, %v253_v40  ;;  %v325_v49 = vadd.f32 %v634_v1, %v254_v41  ;;  %v326_v50 = vadd.f32 %v634_v1, %v255_v42  ;;  %v199_v27 = vld [vmem:[%s629_s20 + $0xc8] sm:$0xff]  ;;  %v200_v28 = vld [vmem:[%s629_s20 + $0xd0] sm:$0xff] }
  0x18   : > { %450 = vst [vmem:[%s657_s25 + $0x30] sm:$0xff] %v386_v39  ;;  %v259_v51 = vmul.f32 %v624_v0, %v188_v38  ;;  %451 = vst [vmem:[%s657_s25 + $0x38] sm:$0xff] %v387_v44  ;;  %v327_v52 = vadd.f32 %v634_v1, %v256_v45  ;;  %v328_v53 = vadd.f32 %v634_v1, %v257_v46  ;;  %v201_v33 = vld [vmem:[%s629_s20 + $0xd8] sm:$0xff]  ;;  %v202_v34 = vld [vmem:[%s629_s20 + $0xe0] sm:$0xff] }
  0x19   : > { %v329_v54 = vadd.f32 %v634_v1, %v258_v47  ;;  %v260_v55 = vmul.f32 %v624_v0, %v189_v43  ;;  %v388_v59 = vmax.f32 %v324_v48, 0.0  ;;  %v389_v60 = vmax.f32 %v325_v49, 0.0  ;;  %v203_v35 = vld [vmem:[%s629_s20 + $0xe8] sm:$0xff]  ;;  %v204_v40 = vld [vmem:[%s629_s20 + $0xf0] sm:$0xff]  ;;  %v205_v45 = vld [vmem:[%s629_s20 + $0xf8] sm:$0xff] }
  0x1a   : > { %v390_v61 = vmax.f32 %v326_v50, 0.0  ;;  %v330_v62 = vadd.f32 %v634_v1, %v259_v51  ;;  %v391_v4 = vmax.f32 %v327_v52, 0.0  ;;  %v392_v5 = vmax.f32 %v328_v53, 0.0 }
  0x1b   : > { %v393_v6 = vmax.f32 %v329_v54, 0.0  ;;  %v331_v7 = vadd.f32 %v634_v1, %v260_v55  ;;  %452 = vst [vmem:[%s657_s25 + $0x40] sm:$0xff] %v388_v59  ;;  %453 = vst [vmem:[%s657_s25 + $0x48] sm:$0xff] %v389_v60  ;;  %v261_v10 = vmul.f32 %v624_v0, %v190_v56  ;;  %v262_v11 = vmul.f32 %v624_v0, %v191_v57  ;;  %v207_v59 = vld [vmem:[%s629_s20 + $0x108] sm:$0xff]  ;;  %v208_v60 = vld [vmem:[%s629_s20 + $0x110] sm:$0xff] }
  0x1c   : > { %454 = vst [vmem:[%s657_s25 + $0x50] sm:$0xff] %v390_v61  ;;  %v394_v9 = vmax.f32 %v330_v62, 0.0  ;;  %v263_v12 = vmul.f32 %v624_v0, %v192_v58  ;;  %455 = vst [vmem:[%s657_s25 + $0x58] sm:$0xff] %v391_v4  ;;  %v264_v15 = vmul.f32 %v624_v0, %v193_v63  ;;  %v265_v16 = vmul.f32 %v624_v0, %v194_v2  ;;  %v206_v58 = vld [vmem:[%s629_s20 + $0x100] sm:$0xff] }
  0x1d   : > { %456 = vst [vmem:[%s657_s25 + $0x60] sm:$0xff] %v392_v5  ;;  %457 = vst [vmem:[%s657_s25 + $0x68] sm:$0xff] %v393_v6  ;;  %v395_v14 = vmax.f32 %v331_v7, 0.0  ;;  %v266_v17 = vmul.f32 %v624_v0, %v195_v3  ;;  %v332_v18 = vadd.f32 %v634_v1, %v261_v10  ;;  %v333_v19 = vadd.f32 %v634_v1, %v262_v11  ;;  %v209_v3 = vld [vmem:[%s629_s20 + $0x118] sm:$0xff]  ;;  %v210_v4 = vld [vmem:[%s629_s20 + $0x120] sm:$0xff] }
  0x1e   : > { %458 = vst [vmem:[%s657_s25 + $0x70] sm:$0xff] %v394_v9  ;;  %v334_v20 = vadd.f32 %v634_v1, %v263_v12  ;;  %v267_v21 = vmul.f32 %v624_v0, %v196_v8  ;;  %v335_v22 = vadd.f32 %v634_v1, %v264_v15  ;;  %v336_v23 = vadd.f32 %v634_v1, %v265_v16  ;;  %v211_v5 = vld [vmem:[%s629_s20 + $0x128] sm:$0xff]  ;;  %v212_v10 = vld [vmem:[%s629_s20 + $0x130] sm:$0xff]  ;;  %v213_v15 = vld [vmem:[%s629_s20 + $0x138] sm:$0xff] }
  0x1f   : > { %459 = vst [vmem:[%s657_s25 + $0x78] sm:$0xff] %v395_v14  ;;  %v337_v24 = vadd.f32 %v634_v1, %v266_v17  ;;  %v268_v25 = vmul.f32 %v624_v0, %v197_v13  ;;  %v396_v29 = vmax.f32 %v332_v18, 0.0  ;;  %v397_v30 = vmax.f32 %v333_v19, 0.0 }
  0x20   : > { %v398_v31 = vmax.f32 %v334_v20, 0.0  ;;  %v338_v32 = vadd.f32 %v634_v1, %v267_v21  ;;  %v399_v36 = vmax.f32 %v335_v22, 0.0  ;;  %v400_v37 = vmax.f32 %v336_v23, 0.0 }
  0x21   : > { %v401_v38 = vmax.f32 %v337_v24, 0.0  ;;  %v339_v39 = vadd.f32 %v634_v1, %v268_v25  ;;  %460 = vst [vmem:[%s657_s25 + $0x80] sm:$0xff] %v396_v29  ;;  %461 = vst [vmem:[%s657_s25 + $0x88] sm:$0xff] %v397_v30  ;;  %v269_v42 = vmul.f32 %v624_v0, %v198_v26  ;;  %v270_v43 = vmul.f32 %v624_v0, %v199_v27  ;;  %v215_v29 = vld [vmem:[%s629_s20 + $0x148] sm:$0xff]  ;;  %v216_v30 = vld [vmem:[%s629_s20 + $0x150] sm:$0xff] }
  0x22   : > { %462 = vst [vmem:[%s657_s25 + $0x90] sm:$0xff] %v398_v31  ;;  %v402_v41 = vmax.f32 %v338_v32, 0.0  ;;  %v271_v44 = vmul.f32 %v624_v0, %v200_v28  ;;  %463 = vst [vmem:[%s657_s25 + $0x98] sm:$0xff] %v399_v36  ;;  %v272_v47 = vmul.f32 %v624_v0, %v201_v33  ;;  %v273_v48 = vmul.f32 %v624_v0, %v202_v34  ;;  %v214_v28 = vld [vmem:[%s629_s20 + $0x140] sm:$0xff] }
  0x23   : > { %464 = vst [vmem:[%s657_s25 + $0xa0] sm:$0xff] %v400_v37  ;;  %465 = vst [vmem:[%s657_s25 + $0xa8] sm:$0xff] %v401_v38  ;;  %v403_v46 = vmax.f32 %v339_v39, 0.0  ;;  %v274_v49 = vmul.f32 %v624_v0, %v203_v35  ;;  %v340_v50 = vadd.f32 %v634_v1, %v269_v42  ;;  %v341_v51 = vadd.f32 %v634_v1, %v270_v43  ;;  %v217_v35 = vld [vmem:[%s629_s20 + $0x158] sm:$0xff]  ;;  %v218_v36 = vld [vmem:[%s629_s20 + $0x160] sm:$0xff] }
  0x24   : > { %466 = vst [vmem:[%s657_s25 + $0xb0] sm:$0xff] %v402_v41  ;;  %v342_v52 = vadd.f32 %v634_v1, %v271_v44  ;;  %v275_v53 = vmul.f32 %v624_v0, %v204_v40  ;;  %v343_v54 = vadd.f32 %v634_v1, %v272_v47  ;;  %v344_v55 = vadd.f32 %v634_v1, %v273_v48  ;;  %v219_v37 = vld [vmem:[%s629_s20 + $0x168] sm:$0xff]  ;;  %v220_v42 = vld [vmem:[%s629_s20 + $0x170] sm:$0xff]  ;;  %v221_v47 = vld [vmem:[%s629_s20 + $0x178] sm:$0xff] }
  0x25   : > { %467 = vst [vmem:[%s657_s25 + $0xb8] sm:$0xff] %v403_v46  ;;  %v345_v56 = vadd.f32 %v634_v1, %v274_v49  ;;  %v276_v57 = vmul.f32 %v624_v0, %v205_v45  ;;  %v404_v61 = vmax.f32 %v340_v50, 0.0  ;;  %v405_v62 = vmax.f32 %v341_v51, 0.0 }
  0x26   : > { %v406_v63 = vmax.f32 %v342_v52, 0.0  ;;  %v346_v2 = vadd.f32 %v634_v1, %v275_v53  ;;  %v407_v6 = vmax.f32 %v343_v54, 0.0  ;;  %v408_v7 = vmax.f32 %v344_v55, 0.0 }
  0x27   : > { %v409_v8 = vmax.f32 %v345_v56, 0.0  ;;  %v347_v9 = vadd.f32 %v634_v1, %v276_v57  ;;  %468 = vst [vmem:[%s657_s25 + $0xc0] sm:$0xff] %v404_v61  ;;  %469 = vst [vmem:[%s657_s25 + $0xc8] sm:$0xff] %v405_v62  ;;  %v277_v12 = vmul.f32 %v624_v0, %v206_v58  ;;  %v278_v13 = vmul.f32 %v624_v0, %v207_v59  ;;  %v223_v61 = vld [vmem:[%s629_s20 + $0x188] sm:$0xff]  ;;  %v224_v62 = vld [vmem:[%s629_s20 + $0x190] sm:$0xff] }
  0x28   : > { %470 = vst [vmem:[%s657_s25 + $0xd0] sm:$0xff] %v406_v63  ;;  %v410_v11 = vmax.f32 %v346_v2, 0.0  ;;  %v279_v14 = vmul.f32 %v624_v0, %v208_v60  ;;  %471 = vst [vmem:[%s657_s25 + $0xd8] sm:$0xff] %v407_v6  ;;  %v280_v17 = vmul.f32 %v624_v0, %v209_v3  ;;  %v281_v18 = vmul.f32 %v624_v0, %v210_v4  ;;  %v222_v60 = vld [vmem:[%s629_s20 + $0x180] sm:$0xff] }
  0x29   : > { %472 = vst [vmem:[%s657_s25 + $0xe0] sm:$0xff] %v408_v7  ;;  %473 = vst [vmem:[%s657_s25 + $0xe8] sm:$0xff] %v409_v8  ;;  %v411_v16 = vmax.f32 %v347_v9, 0.0  ;;  %v282_v19 = vmul.f32 %v624_v0, %v211_v5  ;;  %v348_v20 = vadd.f32 %v634_v1, %v277_v12  ;;  %v349_v21 = vadd.f32 %v634_v1, %v278_v13  ;;  %v225_v5 = vld [vmem:[%s629_s20 + $0x198] sm:$0xff]  ;;  %v226_v6 = vld [vmem:[%s629_s20 + $0x1a0] sm:$0xff] }
  0x2a   : > { %474 = vst [vmem:[%s657_s25 + $0xf0] sm:$0xff] %v410_v11  ;;  %v350_v22 = vadd.f32 %v634_v1, %v279_v14  ;;  %v283_v23 = vmul.f32 %v624_v0, %v212_v10  ;;  %v351_v24 = vadd.f32 %v634_v1, %v280_v17  ;;  %v352_v25 = vadd.f32 %v634_v1, %v281_v18  ;;  %v227_v7 = vld [vmem:[%s629_s20 + $0x1a8] sm:$0xff]  ;;  %v228_v12 = vld [vmem:[%s629_s20 + $0x1b0] sm:$0xff]  ;;  %v229_v17 = vld [vmem:[%s629_s20 + $0x1b8] sm:$0xff] }
  0x2b   : > { %475 = vst [vmem:[%s657_s25 + $0xf8] sm:$0xff] %v411_v16  ;;  %v353_v26 = vadd.f32 %v634_v1, %v282_v19  ;;  %v284_v27 = vmul.f32 %v624_v0, %v213_v15  ;;  %v412_v31 = vmax.f32 %v348_v20, 0.0  ;;  %v413_v32 = vmax.f32 %v349_v21, 0.0 }
  0x2c   : > { %v414_v33 = vmax.f32 %v350_v22, 0.0  ;;  %v354_v34 = vadd.f32 %v634_v1, %v283_v23  ;;  %v415_v38 = vmax.f32 %v351_v24, 0.0  ;;  %v416_v39 = vmax.f32 %v352_v25, 0.0 }
  0x2d   : > { %v417_v40 = vmax.f32 %v353_v26, 0.0  ;;  %v355_v41 = vadd.f32 %v634_v1, %v284_v27  ;;  %476 = vst [vmem:[%s657_s25 + $0x100] sm:$0xff] %v412_v31  ;;  %477 = vst [vmem:[%s657_s25 + $0x108] sm:$0xff] %v413_v32  ;;  %v285_v44 = vmul.f32 %v624_v0, %v214_v28  ;;  %v286_v45 = vmul.f32 %v624_v0, %v215_v29  ;;  %v231_v31 = vld [vmem:[%s629_s20 + $0x1c8] sm:$0xff]  ;;  %v232_v32 = vld [vmem:[%s629_s20 + $0x1d0] sm:$0xff] }
  0x2e   : > { %478 = vst [vmem:[%s657_s25 + $0x110] sm:$0xff] %v414_v33  ;;  %v418_v43 = vmax.f32 %v354_v34, 0.0  ;;  %v287_v46 = vmul.f32 %v624_v0, %v216_v30  ;;  %479 = vst [vmem:[%s657_s25 + $0x118] sm:$0xff] %v415_v38  ;;  %v288_v49 = vmul.f32 %v624_v0, %v217_v35  ;;  %v289_v50 = vmul.f32 %v624_v0, %v218_v36  ;;  %v230_v30 = vld [vmem:[%s629_s20 + $0x1c0] sm:$0xff] }
  0x2f   : > { %480 = vst [vmem:[%s657_s25 + $0x120] sm:$0xff] %v416_v39  ;;  %481 = vst [vmem:[%s657_s25 + $0x128] sm:$0xff] %v417_v40  ;;  %v419_v48 = vmax.f32 %v355_v41, 0.0  ;;  %v290_v51 = vmul.f32 %v624_v0, %v219_v37  ;;  %v356_v52 = vadd.f32 %v634_v1, %v285_v44  ;;  %v357_v53 = vadd.f32 %v634_v1, %v286_v45  ;;  %v233_v37 = vld [vmem:[%s629_s20 + $0x1d8] sm:$0xff]  ;;  %v234_v38 = vld [vmem:[%s629_s20 + $0x1e0] sm:$0xff] }
  0x30   : > { %482 = vst [vmem:[%s657_s25 + $0x130] sm:$0xff] %v418_v43  ;;  %v358_v54 = vadd.f32 %v634_v1, %v287_v46  ;;  %v291_v55 = vmul.f32 %v624_v0, %v220_v42  ;;  %v359_v56 = vadd.f32 %v634_v1, %v288_v49  ;;  %v360_v57 = vadd.f32 %v634_v1, %v289_v50  ;;  %v235_v39 = vld [vmem:[%s629_s20 + $0x1e8] sm:$0xff]  ;;  %v236_v44 = vld [vmem:[%s629_s20 + $0x1f0] sm:$0xff]  ;;  %v237_v49 = vld [vmem:[%s629_s20 + $0x1f8] sm:$0xff] }
  0x31   : > { %483 = vst [vmem:[%s657_s25 + $0x138] sm:$0xff] %v419_v48  ;;  %v361_v58 = vadd.f32 %v634_v1, %v290_v51  ;;  %v292_v59 = vmul.f32 %v624_v0, %v221_v47  ;;  %v420_v63 = vmax.f32 %v356_v52, 0.0  ;;  %v421_v2 = vmax.f32 %v357_v53, 0.0 }
  0x32   : > { %v422_v3 = vmax.f32 %v358_v54, 0.0  ;;  %v362_v4 = vadd.f32 %v634_v1, %v291_v55  ;;  %v423_v8 = vmax.f32 %v359_v56, 0.0  ;;  %v424_v9 = vmax.f32 %v360_v57, 0.0 }
  0x33   : > { %v425_v10 = vmax.f32 %v361_v58, 0.0  ;;  %v363_v11 = vadd.f32 %v634_v1, %v292_v59  ;;  %484 = vst [vmem:[%s657_s25 + $0x140] sm:$0xff] %v420_v63  ;;  %485 = vst [vmem:[%s657_s25 + $0x148] sm:$0xff] %v421_v2  ;;  %v293_v14 = vmul.f32 %v624_v0, %v222_v60  ;;  %v294_v15 = vmul.f32 %v624_v0, %v223_v61 }
  0x34   : > { %486 = vst [vmem:[%s657_s25 + $0x150] sm:$0xff] %v422_v3  ;;  %v426_v13 = vmax.f32 %v362_v4, 0.0  ;;  %v295_v16 = vmul.f32 %v624_v0, %v224_v62  ;;  %487 = vst [vmem:[%s657_s25 + $0x158] sm:$0xff] %v423_v8  ;;  %v296_v19 = vmul.f32 %v624_v0, %v225_v5  ;;  %v297_v20 = vmul.f32 %v624_v0, %v226_v6 }
  0x35   : > { %488 = vst [vmem:[%s657_s25 + $0x160] sm:$0xff] %v424_v9  ;;  %489 = vst [vmem:[%s657_s25 + $0x168] sm:$0xff] %v425_v10  ;;  %v427_v18 = vmax.f32 %v363_v11, 0.0  ;;  %v298_v21 = vmul.f32 %v624_v0, %v227_v7  ;;  %v364_v22 = vadd.f32 %v634_v1, %v293_v14  ;;  %v365_v23 = vadd.f32 %v634_v1, %v294_v15 }
  0x36   : > { %490 = vst [vmem:[%s657_s25 + $0x170] sm:$0xff] %v426_v13  ;;  %v366_v24 = vadd.f32 %v634_v1, %v295_v16  ;;  %v299_v25 = vmul.f32 %v624_v0, %v228_v12  ;;  %v367_v26 = vadd.f32 %v634_v1, %v296_v19  ;;  %v368_v27 = vadd.f32 %v634_v1, %v297_v20 }
  0x37   : > { %491 = vst [vmem:[%s657_s25 + $0x178] sm:$0xff] %v427_v18  ;;  %v369_v28 = vadd.f32 %v634_v1, %v298_v21  ;;  %v300_v29 = vmul.f32 %v624_v0, %v229_v17  ;;  %v428_v33 = vmax.f32 %v364_v22, 0.0  ;;  %v429_v34 = vmax.f32 %v365_v23, 0.0 }
  0x38   : > { %v430_v35 = vmax.f32 %v366_v24, 0.0  ;;  %v370_v36 = vadd.f32 %v634_v1, %v299_v25  ;;  %v431_v40 = vmax.f32 %v367_v26, 0.0  ;;  %v432_v41 = vmax.f32 %v368_v27, 0.0 }
  0x39   : > { %v433_v42 = vmax.f32 %v369_v28, 0.0  ;;  %v371_v43 = vadd.f32 %v634_v1, %v300_v29  ;;  %492 = vst [vmem:[%s657_s25 + $0x180] sm:$0xff] %v428_v33  ;;  %493 = vst [vmem:[%s657_s25 + $0x188] sm:$0xff] %v429_v34  ;;  %v301_v46 = vmul.f32 %v624_v0, %v230_v30  ;;  %v302_v47 = vmul.f32 %v624_v0, %v231_v31 }
  0x3a   : > { %494 = vst [vmem:[%s657_s25 + $0x190] sm:$0xff] %v430_v35  ;;  %v434_v45 = vmax.f32 %v370_v36, 0.0  ;;  %v303_v48 = vmul.f32 %v624_v0, %v232_v32  ;;  %495 = vst [vmem:[%s657_s25 + $0x198] sm:$0xff] %v431_v40  ;;  %v304_v51 = vmul.f32 %v624_v0, %v233_v37  ;;  %v305_v52 = vmul.f32 %v624_v0, %v234_v38 }
  0x3b   : > { %496 = vst [vmem:[%s657_s25 + $0x1a0] sm:$0xff] %v432_v41  ;;  %497 = vst [vmem:[%s657_s25 + $0x1a8] sm:$0xff] %v433_v42  ;;  %v435_v50 = vmax.f32 %v371_v43, 0.0  ;;  %v306_v53 = vmul.f32 %v624_v0, %v235_v39  ;;  %v372_v54 = vadd.f32 %v634_v1, %v301_v46  ;;  %v373_v55 = vadd.f32 %v634_v1, %v302_v47 }
  0x3c   : > { %498 = vst [vmem:[%s657_s25 + $0x1b0] sm:$0xff] %v434_v45  ;;  %v374_v56 = vadd.f32 %v634_v1, %v303_v48  ;;  %v307_v57 = vmul.f32 %v624_v0, %v236_v44  ;;  %v375_v58 = vadd.f32 %v634_v1, %v304_v51  ;;  %v376_v59 = vadd.f32 %v634_v1, %v305_v52 }
  0x3d   : > { %499 = vst [vmem:[%s657_s25 + $0x1b8] sm:$0xff] %v435_v50  ;;  %v377_v60 = vadd.f32 %v634_v1, %v306_v53  ;;  %v308_v61 = vmul.f32 %v624_v0, %v237_v49  ;;  %v436_v62 = vmax.f32 %v372_v54, 0.0  ;;  %v437_v63 = vmax.f32 %v373_v55, 0.0 }
  0x3e   : > { %v438_v2 = vmax.f32 %v374_v56, 0.0  ;;  %v378_v3 = vadd.f32 %v634_v1, %v307_v57  ;;  %v439_v4 = vmax.f32 %v375_v58, 0.0  ;;  %v440_v5 = vmax.f32 %v376_v59, 0.0 }
  0x3f   : > { %v441_v6 = vmax.f32 %v377_v60, 0.0  ;;  %v379_v7 = vadd.f32 %v634_v1, %v308_v61  ;;  %500 = vst [vmem:[%s657_s25 + $0x1c0] sm:$0xff] %v436_v62  ;;  %501 = vst [vmem:[%s657_s25 + $0x1c8] sm:$0xff] %v437_v63 }
  0x40   : > { %502 = vst [vmem:[%s657_s25 + $0x1d0] sm:$0xff] %v438_v2  ;;  %v442_v8 = vmax.f32 %v378_v3, 0.0  ;;  %503 = vst [vmem:[%s657_s25 + $0x1d8] sm:$0xff] %v439_v4 }
  0x41   : > { %504 = vst [vmem:[%s657_s25 + $0x1e0] sm:$0xff] %v440_v5  ;;  %505 = vst [vmem:[%s657_s25 + $0x1e8] sm:$0xff] %v441_v6  ;;  %v443_v0 = vmax.f32 %v379_v7, 0.0 }
  0x42   : > { %506 = vst [vmem:[%s657_s25 + $0x1f0] sm:$0xff] %v442_v8 }
  0x43   : > { %507 = vst [vmem:[%s657_s25 + $0x1f8] sm:$0xff] %v443_v0 }
  0x44 PF: > { %s13_s12 = sadd.s32 1, %s591_s12  }
  0x45   : > { %p10_p4 = scmp.ge.s32.totalorder %s13_s12, 6  }
  0x47   :  { %12 = sbr.rel (!%p10_p4) target bundleno = 1 (0x1), region = 62 }

// kernel: _lambda_.21
= control target key start
LH: loop header
LB: loop body
LE: loop exit
PB: predicated region body
PF: predicated region fallthrough
CT: control target
= control target key end

     0   :  { %v1319_v0 = vmov 0   ;;  %vm1081_vm0 = vcmask 1040384   ;;  %vm1083_vm1 = vcmask 1041408   ;;  %s2131_s1 = inlined_call_operand.vmem [shape: bf16[256,128], index: 1, kind: input, shape index: {}]   ;;  %s2132_s0 = inlined_call_operand.vmem [shape: bf16[512,256], index: 0, kind: input, shape index: {}]   ;;  %s2133_s2 = inlined_call_operand.vmem [shape: f32[512,128], index: 2, kind: output, shape index: {0}]   ;;  %s2134_s3 = inlined_call_operand.vmem [shape: f32[8,128], index: 3, kind: output, shape index: {1}]  }
   0x1   :  { %526 = vmatprep.subr.bf16.mxu0 %v1319_v0  ;;  %v1207_v1 = vld [vmem:[%s2131_s1 + $0x38] sm:$0xff]   ;;  %1174 = vmatprep.subr.bf16.mxu1 %v1319_v0  ;;  %v1208_v2 = vld [vmem:[%s2131_s1 + $0x30] sm:$0xff]   ;;  %v1209_v3 = vld [vmem:[%s2131_s1 + $0x28] sm:$0xff]  }
   0x2   :  { %527 = vmatpush1.bf16.msra.mxu0 %v1207_v1  ;;  %1190 = vmatpush1.bf16.msra.mxu1 %v1207_v1  ;;  %v1210_v4 = vld [vmem:[%s2131_s1 + $0x20] sm:$0xff]   ;;  %v1211_v5 = vld [vmem:[%s2131_s1 + $0x18] sm:$0xff]   ;;  %v1212_v7 = vld [vmem:[%s2131_s1 + $0x10] sm:$0xff]  }
   0x3   :  { %528 = vmatprep.subr.bf16.mxu0 %v1319_v0  ;;  %1175 = vmatprep.subr.bf16.mxu1 %v1319_v0  ;;  %v1225_v6 = vld [vmem:[%s2132_s0 + $0x4] ss:$8 sps:$4 sm:$0xff]   ;;  %v1215_v11 = vld [vmem:[%s2131_s1 + $0x78] sm:$0xff]   ;;  %v1216_v12 = vld [vmem:[%s2131_s1 + $0x70] sm:$0xff]  }
   0x4   :  { %558 = vmatprep.mubr.bf16.mxu0 %v1225_v6  ;;  %v1213_v8 = vld [vmem:[%s2131_s1 + $0x8] sm:$0xff]   ;;  %v1214_v9 = vld [vmem:[%s2131_s1] sm:$0xff]   ;;  %v1219_v15 = vld [vmem:[%s2131_s1 + $0x58] sm:$0xff]  }
   0x5   :  { %v1249_v10 = vld [vmem:[%s2132_s0 + $0x104] ss:$8 sps:$4 sm:$0xff]   ;;  %v1220_v16 = vld [vmem:[%s2131_s1 + $0x50] sm:$0xff]   ;;  %v1223_v19 = vld [vmem:[%s2132_s0] ss:$8 sps:$4 sm:$0xff]  }
   0x6   :  { %529 = vmatpush1.bf16.msra.mxu0 %v1208_v2  ;;  %1191 = vmatpush1.bf16.msra.mxu1 %v1208_v2  ;;  %v1217_v13 = vld [vmem:[%s2131_s1 + $0x68] sm:$0xff]   ;;  %v1218_v14 = vld [vmem:[%s2131_s1 + $0x60] sm:$0xff]   ;;  %v1226_v21 = vld [vmem:[%s2132_s0 + $0x14] ss:$8 sps:$4 sm:$0xff]  }
   0x7   :  { %530 = vmatprep.subr.bf16.mxu0 %v1319_v0  ;;  %1176 = vmatprep.subr.bf16.mxu1 %v1319_v0  ;;  %v1221_v17 = vld [vmem:[%s2131_s1 + $0x48] sm:$0xff]   ;;  %v1222_v18 = vld [vmem:[%s2131_s1 + $0x40] sm:$0xff]   ;;  %v1253_v22 = vld [vmem:[%s2132_s0 + $0x114] ss:$8 sps:$4 sm:$0xff]  }
   0x8   :  { %686 = vmatprep.mubr.bf16.mxu1 %v1249_v10  ;;  %v1247_v20 = vld [vmem:[%s2132_s0 + $0x100] ss:$8 sps:$4 sm:$0xff]   ;;  %v1228_v23 = vld [vmem:[%s2132_s0 + $0x10] ss:$8 sps:$4 sm:$0xff]   ;;  %v1229_v25 = vld [vmem:[%s2132_s0 + $0x24] ss:$8 sps:$4 sm:$0xff]  }
   0x9   :  { %v1255_v24 = vld [vmem:[%s2132_s0 + $0x110] ss:$8 sps:$4 sm:$0xff]   ;;  %v1259_v26 = vld [vmem:[%s2132_s0 + $0x124] ss:$8 sps:$4 sm:$0xff]   ;;  %v1231_v27 = vld [vmem:[%s2132_s0 + $0x20] ss:$8 sps:$4 sm:$0xff]  }
   0xa   :  { %531 = vmatpush1.bf16.msra.mxu0 %v1209_v3  ;;  %1192 = vmatpush1.bf16.msra.mxu1 %v1209_v3  ;;  %v1261_v28 = vld [vmem:[%s2132_s0 + $0x120] ss:$8 sps:$4 sm:$0xff]   ;;  %v1232_v29 = vld [vmem:[%s2132_s0 + $0x34] ss:$8 sps:$4 sm:$0xff]   ;;  %v1234_v31 = vld [vmem:[%s2132_s0 + $0x30] ss:$8 sps:$4 sm:$0xff]  }
   0xb   :  { %532 = vmatprep.subr.bf16.mxu0 %v1319_v0  ;;  %1177 = vmatprep.subr.bf16.mxu1 %v1319_v0  ;;  %v1265_v30 = vld [vmem:[%s2132_s0 + $0x134] ss:$8 sps:$4 sm:$0xff]   ;;  %v1267_v32 = vld [vmem:[%s2132_s0 + $0x130] ss:$8 sps:$4 sm:$0xff]   ;;  %v1235_v33 = vld [vmem:[%s2132_s0 + $0x44] ss:$8 sps:$4 sm:$0xff]  }
   0xc   :  { %v1271_v34 = vld [vmem:[%s2132_s0 + $0x144] ss:$8 sps:$4 sm:$0xff]   ;;  %v1237_v35 = vld [vmem:[%s2132_s0 + $0x40] ss:$8 sps:$4 sm:$0xff]   ;;  %v1238_v37 = vld [vmem:[%s2132_s0 + $0x54] ss:$8 sps:$4 sm:$0xff]  }
   0xd   :  { %v1273_v36 = vld [vmem:[%s2132_s0 + $0x140] ss:$8 sps:$4 sm:$0xff]   ;;  %v1277_v38 = vld [vmem:[%s2132_s0 + $0x154] ss:$8 sps:$4 sm:$0xff]   ;;  %v1240_v39 = vld [vmem:[%s2132_s0 + $0x50] ss:$8 sps:$4 sm:$0xff]  }
   0xe   :  { %533 = vmatpush1.bf16.msra.mxu0 %v1210_v4  ;;  %1193 = vmatpush1.bf16.msra.mxu1 %v1210_v4  ;;  %v1279_v40 = vld [vmem:[%s2132_s0 + $0x150] ss:$8 sps:$4 sm:$0xff]   ;;  %v1241_v41 = vld [vmem:[%s2132_s0 + $0x64] ss:$8 sps:$4 sm:$0xff]   ;;  %v1243_v43 = vld [vmem:[%s2132_s0 + $0x60] ss:$8 sps:$4 sm:$0xff]  }
   0xf   :  { %534 = vmatprep.subr.bf16.mxu0 %v1319_v0  ;;  %1178 = vmatprep.subr.bf16.mxu1 %v1319_v0  ;;  %v1283_v42 = vld [vmem:[%s2132_s0 + $0x164] ss:$8 sps:$4 sm:$0xff]   ;;  %v1285_v44 = vld [vmem:[%s2132_s0 + $0x160] ss:$8 sps:$4 sm:$0xff]   ;;  %v1244_v45 = vld [vmem:[%s2132_s0 + $0x74] ss:$8 sps:$4 sm:$0xff]  }
  0x10   :  { %v1289_v46 = vld [vmem:[%s2132_s0 + $0x174] ss:$8 sps:$4 sm:$0xff]   ;;  %v1246_v47 = vld [vmem:[%s2132_s0 + $0x70] ss:$8 sps:$4 sm:$0xff]   ;;  %v1250_v49 = vld [vmem:[%s2132_s0 + $0x84] ss:$8 sps:$4 sm:$0xff]  }
  0x11   :  { %v1291_v48 = vld [vmem:[%s2132_s0 + $0x170] ss:$8 sps:$4 sm:$0xff]   ;;  %v1295_v50 = vld [vmem:[%s2132_s0 + $0x184] ss:$8 sps:$4 sm:$0xff]   ;;  %v1252_v51 = vld [vmem:[%s2132_s0 + $0x80] ss:$8 sps:$4 sm:$0xff]  }
  0x12   :  { %535 = vmatpush1.bf16.msra.mxu0 %v1211_v5  ;;  %1194 = vmatpush1.bf16.msra.mxu1 %v1211_v5  ;;  %v1297_v52 = vld [vmem:[%s2132_s0 + $0x180] ss:$8 sps:$4 sm:$0xff]   ;;  %v1256_v53 = vld [vmem:[%s2132_s0 + $0x94] ss:$8 sps:$4 sm:$0xff]   ;;  %v1258_v55 = vld [vmem:[%s2132_s0 + $0x90] ss:$8 sps:$4 sm:$0xff]  }
  0x13   :  { %536 = vmatprep.subr.bf16.mxu0 %v1319_v0  ;;  %1179 = vmatprep.subr.bf16.mxu1 %v1319_v0  ;;  %v1298_v54 = vld [vmem:[%s2132_s0 + $0x194] ss:$8 sps:$4 sm:$0xff]   ;;  %v1300_v56 = vld [vmem:[%s2132_s0 + $0x190] ss:$8 sps:$4 sm:$0xff]   ;;  %v1262_v57 = vld [vmem:[%s2132_s0 + $0xa4] ss:$8 sps:$4 sm:$0xff]  }
  0x14   :  { %v1301_v58 = vld [vmem:[%s2132_s0 + $0x1a4] ss:$8 sps:$4 sm:$0xff]   ;;  %v1264_v59 = vld [vmem:[%s2132_s0 + $0xa0] ss:$8 sps:$4 sm:$0xff]   ;;  %v1268_v61 = vld [vmem:[%s2132_s0 + $0xb4] ss:$8 sps:$4 sm:$0xff]  }
  0x15   :  { %v1303_v60 = vld [vmem:[%s2132_s0 + $0x1a0] ss:$8 sps:$4 sm:$0xff]   ;;  %v1304_v62 = vld [vmem:[%s2132_s0 + $0x1b4] ss:$8 sps:$4 sm:$0xff]   ;;  %v1270_v63 = vld [vmem:[%s2132_s0 + $0xb0] ss:$8 sps:$4 sm:$0xff]  }
  0x16   :  { %537 = vmatpush1.bf16.msra.mxu0 %v1212_v7  ;;  %1195 = vmatpush1.bf16.msra.mxu1 %v1212_v7  ;;  %v1274_v1 = vld [vmem:[%s2132_s0 + $0xc4] ss:$8 sps:$4 sm:$0xff]   ;;  %v1276_v3 = vld [vmem:[%s2132_s0 + $0xc0] ss:$8 sps:$4 sm:$0xff]   ;;  %v1280_v5 = vld [vmem:[%s2132_s0 + $0xd4] ss:$8 sps:$4 sm:$0xff]  }
  0x17   :  { %538 = vmatprep.subr.bf16.mxu0 %v1319_v0  ;;  %1180 = vmatprep.subr.bf16.mxu1 %v1319_v0  ;;  %v1307_v2 = vld [vmem:[%s2132_s0 + $0x1c4] ss:$8 sps:$4 sm:$0xff]   ;;  %v1309_v4 = vld [vmem:[%s2132_s0 + $0x1c0] ss:$8 sps:$4 sm:$0xff]   ;;  %v1310_v6 = vld [vmem:[%s2132_s0 + $0x1d4] ss:$8 sps:$4 sm:$0xff]  }
  0x18   :  { %v1282_v7 = vld [vmem:[%s2132_s0 + $0xd0] ss:$8 sps:$4 sm:$0xff]   ;;  %v1313_v10 = vld [vmem:[%s2132_s0 + $0x1e4] ss:$8 sps:$4 sm:$0xff]  }
  0x1a   :  { %539 = vmatpush1.bf16.msra.mxu0 %v1213_v8  ;;  %1196 = vmatpush1.bf16.msra.mxu1 %v1213_v8  ;;  %v1312_v8 = vld [vmem:[%s2132_s0 + $0x1d0] ss:$8 sps:$4 sm:$0xff]  }
  0x1b   :  { %540 = vmatprep.subr.bf16.mxu0 %v1319_v0  ;;  %1181 = vmatprep.subr.bf16.mxu1 %v1319_v0 }
  0x1e   :  { %541 = vmatpush1.bf16.msra.mxu0 %v1214_v9  ;;  %1197 = vmatpush1.bf16.msra.mxu1 %v1214_v9  ;;  %v1286_v9 = vld [vmem:[%s2132_s0 + $0xe4] ss:$8 sps:$4 sm:$0xff]  }
  0x1f   :  { %542 = vmatprep.subr.bf16.mxu0 %v1319_v0  ;;  %1182 = vmatprep.subr.bf16.mxu1 %v1319_v0 }
  0x22   :  { %543 = vmatpush2.bf16.msra.mxu0 %v1215_v11  ;;  %1198 = vmatpush2.bf16.msra.mxu1 %v1215_v11  ;;  %v1288_v11 = vld [vmem:[%s2132_s0 + $0xe0] ss:$8 sps:$4 sm:$0xff]  }
  0x23   :  { %544 = vmatprep.subr.bf16.mxu0 %v1319_v0  ;;  %1183 = vmatprep.subr.bf16.mxu1 %v1319_v0 }
  0x26   :  { %545 = vmatpush2.bf16.msra.mxu0 %v1216_v12  ;;  %1199 = vmatpush2.bf16.msra.mxu1 %v1216_v12  ;;  %v1315_v12 = vld [vmem:[%s2132_s0 + $0x1e0] ss:$8 sps:$4 sm:$0xff]  }
  0x27   :  { %546 = vmatprep.subr.bf16.mxu0 %v1319_v0  ;;  %1184 = vmatprep.subr.bf16.mxu1 %v1319_v0 }
  0x2a   :  { %547 = vmatpush2.bf16.msra.mxu0 %v1217_v13  ;;  %1200 = vmatpush2.bf16.msra.mxu1 %v1217_v13  ;;  %v1292_v13 = vld [vmem:[%s2132_s0 + $0xf4] ss:$8 sps:$4 sm:$0xff]  }
  0x2b   :  { %548 = vmatprep.subr.bf16.mxu0 %v1319_v0  ;;  %1185 = vmatprep.subr.bf16.mxu1 %v1319_v0 }
  0x2e   :  { %549 = vmatpush2.bf16.msra.mxu0 %v1218_v14  ;;  %1201 = vmatpush2.bf16.msra.mxu1 %v1218_v14  ;;  %v1316_v14 = vld [vmem:[%s2132_s0 + $0x1f4] ss:$8 sps:$4 sm:$0xff]  }
  0x2f   :  { %550 = vmatprep.subr.bf16.mxu0 %v1319_v0  ;;  %1186 = vmatprep.subr.bf16.mxu1 %v1319_v0 }
  0x32   :  { %551 = vmatpush2.bf16.msra.mxu0 %v1219_v15  ;;  %1202 = vmatpush2.bf16.msra.mxu1 %v1219_v15  ;;  %v1294_v15 = vld [vmem:[%s2132_s0 + $0xf0] ss:$8 sps:$4 sm:$0xff]  }
  0x33   :  { %552 = vmatprep.subr.bf16.mxu0 %v1319_v0  ;;  %1187 = vmatprep.subr.bf16.mxu1 %v1319_v0 }
  0x36   :  { %553 = vmatpush2.bf16.msra.mxu0 %v1220_v16  ;;  %1203 = vmatpush2.bf16.msra.mxu1 %v1220_v16  ;;  %v1318_v16 = vld [vmem:[%s2132_s0 + $0x1f0] ss:$8 sps:$4 sm:$0xff]  }
  0x37   :  { %554 = vmatprep.subr.bf16.mxu0 %v1319_v0  ;;  %1188 = vmatprep.subr.bf16.mxu1 %v1319_v0 }
  0x3a   :  { %555 = vmatpush2.bf16.msra.mxu0 %v1221_v17  ;;  %1204 = vmatpush2.bf16.msra.mxu1 %v1221_v17 }
  0x3b   :  { %556 = vmatprep.subr.bf16.mxu0 %v1319_v0  ;;  %1189 = vmatprep.subr.bf16.mxu1 %v1319_v0  ;;  %v1306_v0 = vld [vmem:[%s2132_s0 + $0x1b0] ss:$8 sps:$4 sm:$0xff]  }
  0x3e   :  { %557 = vmatpush2.bf16.msra.mxu0 %v1222_v18  ;;  %1205 = vmatpush2.bf16.msra.mxu1 %v1222_v18 }
  0x41   :  { %559 = vmatmul.mubr.bf16.vlgmr.msra.gmra.mxu0 %v1223_v19  ;;  %687 = vmatmul.mubr.bf16.vlgmr.msra.gmra.mxu1 %v1247_v20 }
  0x42   :  { %566 = vmatprep.mubr.bf16.mxu0 %v1226_v21  ;;  %694 = vmatprep.mubr.bf16.mxu1 %v1253_v22 }
  0x49   :  { %567 = vmatmul.mubr.bf16.gmra.mxu0 %v1228_v23  ;;  %695 = vmatmul.mubr.bf16.gmra.mxu1 %v1255_v24 }
  0x4a   :  { %574 = vmatprep.mubr.bf16.mxu0 %v1229_v25  ;;  %702 = vmatprep.mubr.bf16.mxu1 %v1259_v26 }
  0x51   :  { %575 = vmatmul.mubr.bf16.gmra.mxu0 %v1231_v27  ;;  %703 = vmatmul.mubr.bf16.gmra.mxu1 %v1261_v28 }
  0x52   :  { %582 = vmatprep.mubr.bf16.mxu0 %v1232_v29  ;;  %710 = vmatprep.mubr.bf16.mxu1 %v1265_v30 }
  0x59   :  { %583 = vmatmul.mubr.bf16.gmra.mxu0 %v1234_v31  ;;  %711 = vmatmul.mubr.bf16.gmra.mxu1 %v1267_v32 }
  0x5a   :  { %590 = vmatprep.mubr.bf16.mxu0 %v1235_v33  ;;  %718 = vmatprep.mubr.bf16.mxu1 %v1271_v34 }
  0x61   :  { %591 = vmatmul.mubr.bf16.gmra.mxu0 %v1237_v35  ;;  %719 = vmatmul.mubr.bf16.gmra.mxu1 %v1273_v36 }
  0x62   :  { %598 = vmatprep.mubr.bf16.mxu0 %v1238_v37  ;;  %726 = vmatprep.mubr.bf16.mxu1 %v1277_v38 }
  0x69   :  { %599 = vmatmul.mubr.bf16.gmra.mxu0 %v1240_v39  ;;  %727 = vmatmul.mubr.bf16.gmra.mxu1 %v1279_v40 }
  0x6a   :  { %606 = vmatprep.mubr.bf16.mxu0 %v1241_v41  ;;  %734 = vmatprep.mubr.bf16.mxu1 %v1283_v42 }
  0x71   :  { %607 = vmatmul.mubr.bf16.gmra.mxu0 %v1243_v43  ;;  %735 = vmatmul.mubr.bf16.gmra.mxu1 %v1285_v44 }
  0x72   :  { %614 = vmatprep.mubr.bf16.mxu0 %v1244_v45  ;;  %742 = vmatprep.mubr.bf16.mxu1 %v1289_v46 }
  0x79   :  { %615 = vmatmul.mubr.bf16.gmra.mxu0 %v1246_v47  ;;  %743 = vmatmul.mubr.bf16.gmra.mxu1 %v1291_v48 }
  0x7a   :  { %622 = vmatprep.mubr.bf16.mxu0 %v1250_v49  ;;  %750 = vmatprep.mubr.bf16.mxu1 %v1295_v50 }
  0x81   :  { %623 = vmatmul.mubr.bf16.gmra.mxu0 %v1252_v51  ;;  %751 = vmatmul.mubr.bf16.gmra.mxu1 %v1297_v52 }
  0x82   :  { %630 = vmatprep.mubr.bf16.mxu0 %v1256_v53  ;;  %758 = vmatprep.mubr.bf16.mxu1 %v1298_v54 }
  0x89   :  { %631 = vmatmul.mubr.bf16.gmra.mxu0 %v1258_v55  ;;  %759 = vmatmul.mubr.bf16.gmra.mxu1 %v1300_v56 }
  0x8a   :  { %638 = vmatprep.mubr.bf16.mxu0 %v1262_v57  ;;  %766 = vmatprep.mubr.bf16.mxu1 %v1301_v58 }
  0x91   :  { %639 = vmatmul.mubr.bf16.gmra.mxu0 %v1264_v59  ;;  %767 = vmatmul.mubr.bf16.gmra.mxu1 %v1303_v60 }
  0x92   :  { %646 = vmatprep.mubr.bf16.mxu0 %v1268_v61  ;;  %774 = vmatprep.mubr.bf16.mxu1 %v1304_v62 }
  0x99   :  { %647 = vmatmul.mubr.bf16.gmra.mxu0 %v1270_v63  ;;  %775 = vmatmul.mubr.bf16.gmra.mxu1 %v1306_v0 }
  0x9a   :  { %654 = vmatprep.mubr.bf16.mxu0 %v1274_v1  ;;  %782 = vmatprep.mubr.bf16.mxu1 %v1307_v2 }
  0xa1   :  { %655 = vmatmul.mubr.bf16.gmra.mxu0 %v1276_v3  ;;  %783 = vmatmul.mubr.bf16.gmra.mxu1 %v1309_v4 }
  0xa2   :  { %662 = vmatprep.mubr.bf16.mxu0 %v1280_v5  ;;  %790 = vmatprep.mubr.bf16.mxu1 %v1310_v6 }
  0xa9   :  { %663 = vmatmul.mubr.bf16.gmra.mxu0 %v1282_v7  ;;  %791 = vmatmul.mubr.bf16.gmra.mxu1 %v1312_v8 }
  0xaa   :  { %670 = vmatprep.mubr.bf16.mxu0 %v1286_v9  ;;  %798 = vmatprep.mubr.bf16.mxu1 %v1313_v10 }
  0xb1   :  { %671 = vmatmul.mubr.bf16.gmra.mxu0 %v1288_v11  ;;  %799 = vmatmul.mubr.bf16.gmra.mxu1 %v1315_v12 }
  0xb2   :  { %678 = vmatprep.mubr.bf16.mxu0 %v1292_v13  ;;  %806 = vmatprep.mubr.bf16.mxu1 %v1316_v14 }
  0xb9   :  { %679 = vmatmul.mubr.bf16.gmra.mxu0 %v1294_v15  ;;  %807 = vmatmul.mubr.bf16.gmra.mxu1 %v1318_v16 }
 0x101   :  { %v1612_v17 = vpop.f32.mrf.mxu0  ;;  %v1614_v18 = vpop.f32.mrf.mxu1 }
 0x102   :  { %815 = vst [vmem:[%s2133_s2] sm:$0xff] %v1612_v17  ;;  %847 = vst [vmem:[%s2133_s2 + $0x100] sm:$0xff] %v1614_v18 }
 0x103   :  { %v562_v19 = vpop.f32.mrf.mxu0  ;;  %v690_v20 = vpop.f32.mrf.mxu1 }
 0x105   :  { %v1624_v21 = vpop.f32.mrf.mxu0  ;;  %v1626_v22 = vpop.f32.mrf.mxu1 }
 0x106   :  { %816 = vst [vmem:[%s2133_s2 + $0x8] sm:$0xff] %v1624_v21  ;;  %848 = vst [vmem:[%s2133_s2 + $0x108] sm:$0xff] %v1626_v22  ;;  %v949_v19 = vmul.f32 %v1624_v21, %v1624_v21 }
 0x107   :  { %v565_v23 = vpop.f32.mrf.mxu0  ;;  %v693_v24 = vpop.f32.mrf.mxu1 }
 0x108   :  { %v948_v24 = vmul.f32 %v1612_v17, %v1612_v17 }
 0x109   :  { %v1636_v25 = vpop.f32.mrf.mxu0  ;;  %v1638_v26 = vpop.f32.mrf.mxu1 }
 0x10a   :  { %817 = vst [vmem:[%s2133_s2 + $0x10] sm:$0xff] %v1636_v25  ;;  %849 = vst [vmem:[%s2133_s2 + $0x110] sm:$0xff] %v1638_v26 }
 0x10b   :  { %v570_v27 = vpop.f32.mrf.mxu0  ;;  %v698_v28 = vpop.f32.mrf.mxu1 }
 0x10c   :  { %v879_v27 = vadd.f32 %v1624_v21, %v1612_v17  ;;  %v950_v28 = vmul.f32 %v1636_v25, %v1636_v25 }
 0x10d   :  { %v1648_v29 = vpop.f32.mrf.mxu0  ;;  %v1650_v30 = vpop.f32.mrf.mxu1 }
 0x10e   :  { %818 = vst [vmem:[%s2133_s2 + $0x18] sm:$0xff] %v1648_v29  ;;  %850 = vst [vmem:[%s2133_s2 + $0x118] sm:$0xff] %v1650_v30  ;;  %v951_v17 = vmul.f32 %v1648_v29, %v1648_v29 }
 0x10f   :  { %v573_v31 = vpop.f32.mrf.mxu0  ;;  %v701_v32 = vpop.f32.mrf.mxu1 }
 0x111   :  { %v1660_v33 = vpop.f32.mrf.mxu0  ;;  %v1662_v34 = vpop.f32.mrf.mxu1 }
 0x112   :  { %819 = vst [vmem:[%s2133_s2 + $0x20] sm:$0xff] %v1660_v33  ;;  %851 = vst [vmem:[%s2133_s2 + $0x120] sm:$0xff] %v1662_v34 }
 0x113   :  { %v578_v35 = vpop.f32.mrf.mxu0  ;;  %v706_v36 = vpop.f32.mrf.mxu1 }
 0x114   :  { %v1012_v35 = vadd.f32 %v949_v19, %v948_v24  ;;  %v880_v36 = vadd.f32 %v879_v27, %v1636_v25 }
 0x115   :  { %v1672_v37 = vpop.f32.mrf.mxu0  ;;  %v1674_v38 = vpop.f32.mrf.mxu1 }
 0x116   :  { %820 = vst [vmem:[%s2133_s2 + $0x28] sm:$0xff] %v1672_v37  ;;  %852 = vst [vmem:[%s2133_s2 + $0x128] sm:$0xff] %v1674_v38 }
 0x117   :  { %v581_v39 = vpop.f32.mrf.mxu0  ;;  %v709_v40 = vpop.f32.mrf.mxu1 }
 0x118   :  { %v1013_v40 = vadd.f32 %v1012_v35, %v950_v28 }
 0x119   :  { %v1684_v41 = vpop.f32.mrf.mxu0  ;;  %v1686_v42 = vpop.f32.mrf.mxu1 }
 0x11a   :  { %821 = vst [vmem:[%s2133_s2 + $0x30] sm:$0xff] %v1684_v41  ;;  %853 = vst [vmem:[%s2133_s2 + $0x130] sm:$0xff] %v1686_v42 }
 0x11b   :  { %v586_v43 = vpop.f32.mrf.mxu0  ;;  %v714_v44 = vpop.f32.mrf.mxu1 }
 0x11c   :  { %v881_v43 = vadd.f32 %v880_v36, %v1648_v29  ;;  %v952_v44 = vmul.f32 %v1660_v33, %v1660_v33  ;;  %v953_v29 = vmul.f32 %v1672_v37, %v1672_v37 }
 0x11d   :  { %v1696_v45 = vpop.f32.mrf.mxu0  ;;  %v1698_v46 = vpop.f32.mrf.mxu1 }
 0x11e   :  { %822 = vst [vmem:[%s2133_s2 + $0x38] sm:$0xff] %v1696_v45  ;;  %854 = vst [vmem:[%s2133_s2 + $0x138] sm:$0xff] %v1698_v46 }
 0x11f   :  { %v589_v47 = vpop.f32.mrf.mxu0  ;;  %v717_v48 = vpop.f32.mrf.mxu1 }
 0x120   :  { %v1014_v48 = vadd.f32 %v1013_v40, %v951_v17 }
 0x121   :  { %v1708_v49 = vpop.f32.mrf.mxu0  ;;  %v1710_v50 = vpop.f32.mrf.mxu1 }
 0x122   :  { %823 = vst [vmem:[%s2133_s2 + $0x40] sm:$0xff] %v1708_v49  ;;  %855 = vst [vmem:[%s2133_s2 + $0x140] sm:$0xff] %v1710_v50 }
 0x123   :  { %v594_v51 = vpop.f32.mrf.mxu0  ;;  %v722_v52 = vpop.f32.mrf.mxu1 }
 0x124   :  { %v882_v51 = vadd.f32 %v881_v43, %v1660_v33 }
 0x125   :  { %v1720_v53 = vpop.f32.mrf.mxu0  ;;  %v1722_v54 = vpop.f32.mrf.mxu1 }
 0x126   :  { %824 = vst [vmem:[%s2133_s2 + $0x48] sm:$0xff] %v1720_v53  ;;  %856 = vst [vmem:[%s2133_s2 + $0x148] sm:$0xff] %v1722_v54 }
 0x127   :  { %v597_v55 = vpop.f32.mrf.mxu0  ;;  %v725_v56 = vpop.f32.mrf.mxu1 }
 0x128   :  { %v1015_v56 = vadd.f32 %v1014_v48, %v952_v44 }
 0x129   :  { %v1732_v57 = vpop.f32.mrf.mxu0  ;;  %v1734_v58 = vpop.f32.mrf.mxu1 }
 0x12a   :  { %825 = vst [vmem:[%s2133_s2 + $0x50] sm:$0xff] %v1732_v57  ;;  %857 = vst [vmem:[%s2133_s2 + $0x150] sm:$0xff] %v1734_v58 }
 0x12b   :  { %v602_v59 = vpop.f32.mrf.mxu0  ;;  %v730_v60 = vpop.f32.mrf.mxu1 }
 0x12c   :  { %v883_v59 = vadd.f32 %v882_v51, %v1672_v37  ;;  %v954_v60 = vmul.f32 %v1684_v41, %v1684_v41  ;;  %v955_v37 = vmul.f32 %v1696_v45, %v1696_v45 }
 0x12d   :  { %v1744_v61 = vpop.f32.mrf.mxu0  ;;  %v1746_v62 = vpop.f32.mrf.mxu1 }
 0x12e   :  { %826 = vst [vmem:[%s2133_s2 + $0x58] sm:$0xff] %v1744_v61  ;;  %858 = vst [vmem:[%s2133_s2 + $0x158] sm:$0xff] %v1746_v62 }
 0x12f   :  { %v605_v63 = vpop.f32.mrf.mxu0  ;;  %v733_v0 = vpop.f32.mrf.mxu1 }
 0x130   :  { %v1016_v0 = vadd.f32 %v1015_v56, %v953_v29 }
 0x131   :  { %v1756_v1 = vpop.f32.mrf.mxu0  ;;  %v1758_v2 = vpop.f32.mrf.mxu1 }
 0x132   :  { %827 = vst [vmem:[%s2133_s2 + $0x60] sm:$0xff] %v1756_v1  ;;  %859 = vst [vmem:[%s2133_s2 + $0x160] sm:$0xff] %v1758_v2 }
 0x133   :  { %v610_v3 = vpop.f32.mrf.mxu0  ;;  %v738_v4 = vpop.f32.mrf.mxu1 }
 0x134   :  { %v884_v3 = vadd.f32 %v883_v59, %v1684_v41 }
 0x135   :  { %v1768_v5 = vpop.f32.mrf.mxu0  ;;  %v1770_v6 = vpop.f32.mrf.mxu1 }
 0x136   :  { %828 = vst [vmem:[%s2133_s2 + $0x68] sm:$0xff] %v1768_v5  ;;  %860 = vst [vmem:[%s2133_s2 + $0x168] sm:$0xff] %v1770_v6 }
 0x137   :  { %v613_v7 = vpop.f32.mrf.mxu0  ;;  %v741_v8 = vpop.f32.mrf.mxu1 }
 0x138   :  { %v1017_v8 = vadd.f32 %v1016_v0, %v954_v60 }
 0x139   :  { %v1780_v9 = vpop.f32.mrf.mxu0  ;;  %v1782_v10 = vpop.f32.mrf.mxu1 }
 0x13a   :  { %829 = vst [vmem:[%s2133_s2 + $0x70] sm:$0xff] %v1780_v9  ;;  %861 = vst [vmem:[%s2133_s2 + $0x170] sm:$0xff] %v1782_v10 }
 0x13b   :  { %v618_v11 = vpop.f32.mrf.mxu0  ;;  %v746_v12 = vpop.f32.mrf.mxu1 }
 0x13c   :  { %v885_v11 = vadd.f32 %v884_v3, %v1696_v45  ;;  %v956_v12 = vmul.f32 %v1708_v49, %v1708_v49  ;;  %v957_v45 = vmul.f32 %v1720_v53, %v1720_v53 }
 0x13d   :  { %v1792_v13 = vpop.f32.mrf.mxu0  ;;  %v1794_v14 = vpop.f32.mrf.mxu1 }
 0x13e   :  { %830 = vst [vmem:[%s2133_s2 + $0x78] sm:$0xff] %v1792_v13  ;;  %862 = vst [vmem:[%s2133_s2 + $0x178] sm:$0xff] %v1794_v14  ;;  %v886_v19 = vadd.f32 %v885_v11, %v1708_v49 }
 0x13f   :  { %v621_v15 = vpop.f32.mrf.mxu0  ;;  %v749_v16 = vpop.f32.mrf.mxu1 }
 0x140   :  { %v1018_v16 = vadd.f32 %v1017_v8, %v955_v37 }
 0x141   :  { %v1806_v20 = vpop.f32.mrf.mxu0  ;;  %v1808_v23 = vpop.f32.mrf.mxu1 }
 0x142   :  { %831 = vst [vmem:[%s2133_s2 + $0x80] sm:$0xff] %v1806_v20  ;;  %863 = vst [vmem:[%s2133_s2 + $0x180] sm:$0xff] %v1808_v23  ;;  %v1019_v28 = vadd.f32 %v1018_v16, %v956_v12 }
 0x143   :  { %v626_v31 = vpop.f32.mrf.mxu0  ;;  %v754_v32 = vpop.f32.mrf.mxu1 }
 0x144   :  { %v887_v31 = vadd.f32 %v886_v19, %v1720_v53  ;;  %v958_v32 = vmul.f32 %v1732_v57, %v1732_v57  ;;  %v1020_v36 = vadd.f32 %v1019_v28, %v957_v45  ;;  %v959_v53 = vmul.f32 %v1744_v61, %v1744_v61 }
 0x145   :  { %v1827_v21 = vpop.f32.mrf.mxu0  ;;  %v1829_v39 = vpop.f32.mrf.mxu1 }
 0x146   :  { %832 = vst [vmem:[%s2133_s2 + $0x88] sm:$0xff] %v1827_v21  ;;  %864 = vst [vmem:[%s2133_s2 + $0x188] sm:$0xff] %v1829_v39  ;;  %v888_v17 = vadd.f32 %v887_v31, %v1732_v57  ;;  %v1021_v44 = vadd.f32 %v1020_v36, %v958_v32 }
 0x147   :  { %v629_v25 = vpop.f32.mrf.mxu0  ;;  %v757_v47 = vpop.f32.mrf.mxu1 }
 0x148   :  { %v889_v25 = vadd.f32 %v888_v17, %v1744_v61  ;;  %v960_v47 = vmul.f32 %v1756_v1, %v1756_v1  ;;  %v1022_v51 = vadd.f32 %v1021_v44, %v959_v53  ;;  %v961_v61 = vmul.f32 %v1768_v5, %v1768_v5 }
 0x149   :  { %v1845_v52 = vpop.f32.mrf.mxu0  ;;  %v1847_v55 = vpop.f32.mrf.mxu1 }
 0x14a   :  { %833 = vst [vmem:[%s2133_s2 + $0x90] sm:$0xff] %v1845_v52  ;;  %865 = vst [vmem:[%s2133_s2 + $0x190] sm:$0xff] %v1847_v55  ;;  %v890_v29 = vadd.f32 %v889_v25, %v1756_v1  ;;  %v1023_v60 = vadd.f32 %v1022_v51, %v960_v47 }
 0x14b   :  { %v634_v33 = vpop.f32.mrf.mxu0  ;;  %v762_v63 = vpop.f32.mrf.mxu1 }
 0x14c   :  { %v891_v33 = vadd.f32 %v890_v29, %v1768_v5  ;;  %v962_v63 = vmul.f32 %v1780_v9, %v1780_v9  ;;  %v1024_v3 = vadd.f32 %v1023_v60, %v961_v61  ;;  %v963_v5 = vmul.f32 %v1792_v13, %v1792_v13 }
 0x14d   :  { %v1863_v4 = vpop.f32.mrf.mxu0  ;;  %v1865_v7 = vpop.f32.mrf.mxu1 }
 0x14e   :  { %834 = vst [vmem:[%s2133_s2 + $0x98] sm:$0xff] %v1863_v4  ;;  %866 = vst [vmem:[%s2133_s2 + $0x198] sm:$0xff] %v1865_v7  ;;  %v892_v37 = vadd.f32 %v891_v33, %v1780_v9  ;;  %v1025_v12 = vadd.f32 %v1024_v3, %v962_v63 }
 0x14f   :  { %v637_v41 = vpop.f32.mrf.mxu0  ;;  %v765_v15 = vpop.f32.mrf.mxu1 }
 0x150   :  { %v893_v41 = vadd.f32 %v892_v37, %v1792_v13  ;;  %v964_v15 = vmul.f32 %v1806_v20, %v1806_v20  ;;  %v1026_v19 = vadd.f32 %v1025_v12, %v963_v5  ;;  %v965_v13 = vmul.f32 %v1827_v21, %v1827_v21 }
 0x151   :  { %v1881_v24 = vpop.f32.mrf.mxu0  ;;  %v1883_v27 = vpop.f32.mrf.mxu1 }
 0x152   :  { %835 = vst [vmem:[%s2133_s2 + $0xa0] sm:$0xff] %v1881_v24  ;;  %867 = vst [vmem:[%s2133_s2 + $0x1a0] sm:$0xff] %v1883_v27  ;;  %v894_v45 = vadd.f32 %v893_v41, %v1806_v20  ;;  %v1027_v32 = vadd.f32 %v1026_v19, %v964_v15 }
 0x153   :  { %v642_v49 = vpop.f32.mrf.mxu0  ;;  %v770_v35 = vpop.f32.mrf.mxu1 }
 0x154   :  { %v895_v49 = vadd.f32 %v894_v45, %v1827_v21  ;;  %v966_v35 = vmul.f32 %v1845_v52, %v1845_v52  ;;  %v1028_v17 = vadd.f32 %v1027_v32, %v965_v13  ;;  %v967_v21 = vmul.f32 %v1863_v4, %v1863_v4 }
 0x155   :  { %v1899_v40 = vpop.f32.mrf.mxu0  ;;  %v1901_v43 = vpop.f32.mrf.mxu1 }
 0x156   :  { %836 = vst [vmem:[%s2133_s2 + $0xa8] sm:$0xff] %v1899_v40  ;;  %868 = vst [vmem:[%s2133_s2 + $0x1a8] sm:$0xff] %v1901_v43  ;;  %v896_v53 = vadd.f32 %v895_v49, %v1845_v52  ;;  %v1029_v47 = vadd.f32 %v1028_v17, %v966_v35 }
 0x157   :  { %v645_v57 = vpop.f32.mrf.mxu0  ;;  %v773_v48 = vpop.f32.mrf.mxu1 }
 0x158   :  { %v897_v57 = vadd.f32 %v896_v53, %v1863_v4  ;;  %v968_v48 = vmul.f32 %v1881_v24, %v1881_v24  ;;  %v1030_v29 = vadd.f32 %v1029_v47, %v967_v21  ;;  %v969_v4 = vmul.f32 %v1899_v40, %v1899_v40 }
 0x159   :  { %v648_v56 = vpop.f32.mrf.mxu0  ;;  %v1917_v59 = vpop.f32.mrf.mxu1 }
 0x15a   :  { %837 = vst [vmem:[%s2133_s2 + $0xb0] sm:$0xff] %v648_v56  ;;  %869 = vst [vmem:[%s2133_s2 + $0x1b0] sm:$0xff] %v1917_v59  ;;  %v898_v61 = vadd.f32 %v897_v57, %v1881_v24  ;;  %v1031_v63 = vadd.f32 %v1030_v29, %v968_v48 }
 0x15b   :  { %v650_v1 = vpop.f32.mrf.mxu0  ;;  %v778_v0 = vpop.f32.mrf.mxu1 }
 0x15c   :  { %v899_v1 = vadd.f32 %v898_v61, %v1899_v40  ;;  %v970_v0 = vmul.f32 %v648_v56, %v648_v56  ;;  %v1032_v37 = vadd.f32 %v1031_v63, %v969_v4 }
 0x15d   :  { %v651_v8 = vpop.f32.mrf.mxu0  ;;  %v1932_v11 = vpop.f32.mrf.mxu1 }
 0x15e   :  { %838 = vst [vmem:[%s2133_s2 + $0xb8] sm:$0xff] %v651_v8  ;;  %870 = vst [vmem:[%s2133_s2 + $0x1b8] sm:$0xff] %v1932_v11  ;;  %v900_v5 = vadd.f32 %v899_v1, %v648_v56  ;;  %v971_v12 = vmul.f32 %v651_v8, %v651_v8 }
 0x15f   :  { %v653_v9 = vpop.f32.mrf.mxu0  ;;  %v781_v16 = vpop.f32.mrf.mxu1 }
 0x160   :  { %v1033_v9 = vadd.f32 %v1032_v37, %v970_v0  ;;  %v901_v40 = vadd.f32 %v900_v5, %v651_v8 }
 0x161   :  { %v656_v28 = vpop.f32.mrf.mxu0  ;;  %v1947_v31 = vpop.f32.mrf.mxu1 }
 0x162   :  { %839 = vst [vmem:[%s2133_s2 + $0xc0] sm:$0xff] %v656_v28  ;;  %871 = vst [vmem:[%s2133_s2 + $0x1c0] sm:$0xff] %v1947_v31  ;;  %v972_v16 = vmul.f32 %v656_v28, %v656_v28  ;;  %v1034_v13 = vadd.f32 %v1033_v9, %v971_v12  ;;  %v902_v56 = vadd.f32 %v901_v40, %v656_v28 }
 0x163   :  { %v658_v20 = vpop.f32.mrf.mxu0  ;;  %v786_v36 = vpop.f32.mrf.mxu1 }
 0x164   :  { %v1035_v20 = vadd.f32 %v1034_v13, %v972_v16 }
 0x165   :  { %v659_v44 = vpop.f32.mrf.mxu0  ;;  %v1962_v25 = vpop.f32.mrf.mxu1 }
 0x166   :  { %840 = vst [vmem:[%s2133_s2 + $0xc8] sm:$0xff] %v659_v44  ;;  %872 = vst [vmem:[%s2133_s2 + $0x1c8] sm:$0xff] %v1962_v25  ;;  %v973_v32 = vmul.f32 %v659_v44, %v659_v44  ;;  %v903_v8 = vadd.f32 %v902_v56, %v659_v44 }
 0x167   :  { %v661_v52 = vpop.f32.mrf.mxu0  ;;  %v789_v51 = vpop.f32.mrf.mxu1 }
 0x168   :  { %v1036_v21 = vadd.f32 %v1035_v20, %v973_v32 }
 0x169   :  { %v664_v60 = vpop.f32.mrf.mxu0  ;;  %v1977_v33 = vpop.f32.mrf.mxu1 }
 0x16a   :  { %841 = vst [vmem:[%s2133_s2 + $0xd0] sm:$0xff] %v664_v60  ;;  %873 = vst [vmem:[%s2133_s2 + $0x1d0] sm:$0xff] %v1977_v33  ;;  %v974_v36 = vmul.f32 %v664_v60, %v664_v60  ;;  %v904_v28 = vadd.f32 %v903_v8, %v664_v60 }
 0x16b   :  { %v666_v24 = vpop.f32.mrf.mxu0  ;;  %v794_v3 = vpop.f32.mrf.mxu1 }
 0x16c   :  { %v1037_v52 = vadd.f32 %v1036_v21, %v974_v36  ;;  %v981_v36 = vmul.f32 %v1626_v22, %v1626_v22  ;;  %v982_v21 = vmul.f32 %v1638_v26, %v1638_v26 }
 0x16d   :  { %v667_v41 = vpop.f32.mrf.mxu0  ;;  %v1987_v15 = vpop.f32.mrf.mxu1 }
 0x16e   :  { %842 = vst [vmem:[%s2133_s2 + $0xd8] sm:$0xff] %v667_v41  ;;  %874 = vst [vmem:[%s2133_s2 + $0x1d8] sm:$0xff] %v1987_v15  ;;  %v975_v47 = vmul.f32 %v667_v41, %v667_v41  ;;  %v905_v44 = vadd.f32 %v904_v28, %v667_v41 }
 0x16f   :  { %v669_v19 = vpop.f32.mrf.mxu0  ;;  %v797_v45 = vpop.f32.mrf.mxu1 }
 0x170   :  { %v1038_v4 = vadd.f32 %v1037_v52, %v975_v47 }
 0x171   :  { %v672_v49 = vpop.f32.mrf.mxu0  ;;  %v1996_v35 = vpop.f32.mrf.mxu1 }
 0x172   :  { %843 = vst [vmem:[%s2133_s2 + $0xe0] sm:$0xff] %v672_v49  ;;  %875 = vst [vmem:[%s2133_s2 + $0x1e0] sm:$0xff] %v1996_v35  ;;  %v976_v51 = vmul.f32 %v672_v49, %v672_v49  ;;  %v906_v60 = vadd.f32 %v905_v44, %v672_v49  ;;  %v980_v49 = vmul.f32 %v1614_v18, %v1614_v18 }
 0x173   :  { %v674_v17 = vpop.f32.mrf.mxu0  ;;  %v802_v53 = vpop.f32.mrf.mxu1 }
 0x174   :  { %v1039_v24 = vadd.f32 %v1038_v4, %v976_v51 }
 0x175   :  { %v675_v57 = vpop.f32.mrf.mxu0  ;;  %v2005_v48 = vpop.f32.mrf.mxu1 }
 0x176   :  { %844 = vst [vmem:[%s2133_s2 + $0xe8] sm:$0xff] %v675_v57  ;;  %876 = vst [vmem:[%s2133_s2 + $0x1e8] sm:$0xff] %v2005_v48  ;;  %v977_v63 = vmul.f32 %v675_v57, %v675_v57  ;;  %v907_v3 = vadd.f32 %v906_v60, %v675_v57  ;;  %v983_v57 = vmul.f32 %v1650_v30, %v1650_v30 }
 0x177   :  { %v677_v29 = vpop.f32.mrf.mxu0  ;;  %v805_v61 = vpop.f32.mrf.mxu1 }
 0x178   :  { %v1040_v41 = vadd.f32 %v1039_v24, %v977_v63 }
 0x179   :  { %v680_v1 = vpop.f32.mrf.mxu0  ;;  %v2014_v0 = vpop.f32.mrf.mxu1 }
 0x17a   :  { %845 = vst [vmem:[%s2133_s2 + $0xf0] sm:$0xff] %v680_v1  ;;  %v978_v37 = vmul.f32 %v680_v1, %v680_v1  ;;  %877 = vst [vmem:[%s2133_s2 + $0x1f0] sm:$0xff] %v2014_v0  ;;  %v908_v9 = vadd.f32 %v907_v3, %v680_v1 }
 0x17b   :  { %v682_v5 = vpop.f32.mrf.mxu0  ;;  %v810_v12 = vpop.f32.mrf.mxu1 }
 0x17c   :  { %v1041_v19 = vadd.f32 %v1040_v41, %v978_v37 }
 0x17d   :  { %v683_v40 = vpop.f32.mrf.mxu0  ;;  %v2023_v16 = vpop.f32.mrf.mxu1 }
 0x17e   :  { %846 = vst [vmem:[%s2133_s2 + $0xf8] sm:$0xff] %v683_v40  ;;  %v909_v45 = vadd.f32 %v908_v9, %v683_v40  ;;  %v979_v13 = vmul.f32 %v683_v40, %v683_v40  ;;  %878 = vst [vmem:[%s2133_s2 + $0x1f8] sm:$0xff] %v2023_v16 }
 0x17f   :  { %v685_v56 = vpop.f32.mrf.mxu0  ;;  %v813_v32 = vpop.f32.mrf.mxu1 }
 0x180   :  { %v910_v20 = vadd.f32 %v909_v45, %v1614_v18  ;;  %v1042_v8 = vadd.f32 %v1041_v19, %v979_v13  ;;  %v984_v18 = vmul.f32 %v1662_v34, %v1662_v34 }
 0x182   :  { %v911_v17 = vadd.f32 %v910_v20, %v1626_v22  ;;  %v1043_v53 = vadd.f32 %v1042_v8, %v980_v49  ;;  %v985_v22 = vmul.f32 %v1674_v38, %v1674_v38 }
 0x184   :  { %v912_v28 = vadd.f32 %v911_v17, %v1638_v26  ;;  %v1044_v47 = vadd.f32 %v1043_v53, %v981_v36  ;;  %v986_v26 = vmul.f32 %v1686_v42, %v1686_v42 }
 0x186   :  { %v913_v52 = vadd.f32 %v912_v28, %v1650_v30  ;;  %v1045_v44 = vadd.f32 %v1044_v47, %v982_v21  ;;  %v987_v30 = vmul.f32 %v1698_v46, %v1698_v46  ;;  %v997_v21 = vmul.f32 %v1829_v39, %v1829_v39 }
 0x188   :  { %v914_v51 = vadd.f32 %v913_v52, %v1662_v34  ;;  %v1046_v29 = vadd.f32 %v1045_v44, %v983_v57  ;;  %v988_v34 = vmul.f32 %v1710_v50, %v1710_v50  ;;  %v998_v57 = vmul.f32 %v1847_v55, %v1847_v55 }
 0x189   :  { %v999_v44 = vmul.f32 %v1865_v7, %v1865_v7 }
 0x18a   :  { %v915_v61 = vadd.f32 %v914_v51, %v1674_v38  ;;  %v1047_v4 = vadd.f32 %v1046_v29, %v984_v18  ;;  %v989_v38 = vmul.f32 %v1722_v54, %v1722_v54  ;;  %v1000_v51 = vmul.f32 %v1883_v27, %v1883_v27 }
 0x18c   :  { %v916_v60 = vadd.f32 %v915_v61, %v1686_v42  ;;  %v1048_v63 = vadd.f32 %v1047_v4, %v985_v22  ;;  %v990_v42 = vmul.f32 %v1734_v58, %v1734_v58  ;;  %v1001_v22 = vmul.f32 %v1901_v43, %v1901_v43 }
 0x18d   :  { %v1002_v4 = vmul.f32 %v1917_v59, %v1917_v59 }
 0x18e   :  { %v917_v1 = vadd.f32 %v916_v60, %v1698_v46  ;;  %v1049_v24 = vadd.f32 %v1048_v63, %v986_v26  ;;  %v991_v46 = vmul.f32 %v1746_v62, %v1746_v62  ;;  %v1003_v60 = vmul.f32 %v1932_v11, %v1932_v11 }
 0x190   :  { %v1050_v3 = vadd.f32 %v1049_v24, %v987_v30  ;;  %v918_v37 = vadd.f32 %v917_v1, %v1710_v50  ;;  %v992_v50 = vmul.f32 %v1758_v2, %v1758_v2  ;;  %v1004_v30 = vmul.f32 %v1947_v31, %v1947_v31 }
 0x191   :  { %v1005_v24 = vmul.f32 %v1962_v25, %v1962_v25 }
 0x192   :  { %v919_v5 = vadd.f32 %v918_v37, %v1722_v54  ;;  %v1051_v12 = vadd.f32 %v1050_v3, %v988_v34  ;;  %v993_v54 = vmul.f32 %v1770_v6, %v1770_v6  ;;  %v1006_v3 = vmul.f32 %v1977_v33, %v1977_v33 }
 0x194   :  { %v920_v41 = vadd.f32 %v919_v5, %v1734_v58  ;;  %v1052_v9 = vadd.f32 %v1051_v12, %v989_v38  ;;  %v994_v58 = vmul.f32 %v1782_v10, %v1782_v10  ;;  %v1007_v38 = vmul.f32 %v1987_v15, %v1987_v15 }
 0x195   :  { %v1008_v12 = vmul.f32 %v1996_v35, %v1996_v35 }
 0x196   :  { %v921_v40 = vadd.f32 %v920_v41, %v1746_v62  ;;  %v1053_v19 = vadd.f32 %v1052_v9, %v990_v42  ;;  %v995_v62 = vmul.f32 %v1794_v14, %v1794_v14  ;;  %v1009_v41 = vmul.f32 %v2005_v48, %v2005_v48 }
 0x198   :  { %v922_v45 = vadd.f32 %v921_v40, %v1758_v2  ;;  %v1054_v13 = vadd.f32 %v1053_v19, %v991_v46  ;;  %v996_v2 = vmul.f32 %v1808_v23, %v1808_v23  ;;  %v1010_v46 = vmul.f32 %v2014_v0, %v2014_v0 }
 0x199   :  { %v1011_v19 = vmul.f32 %v2023_v16, %v2023_v16 }
 0x19a   :  { %v923_v56 = vadd.f32 %v922_v45, %v1770_v6  ;;  %v1055_v32 = vadd.f32 %v1054_v13, %v992_v50 }
 0x19c   :  { %v924_v49 = vadd.f32 %v923_v56, %v1782_v10  ;;  %v1056_v20 = vadd.f32 %v1055_v32, %v993_v54 }
 0x19e   :  { %v925_v8 = vadd.f32 %v924_v49, %v1794_v14  ;;  %v1057_v36 = vadd.f32 %v1056_v20, %v994_v58 }
 0x1a0   :  { %v926_v17 = vadd.f32 %v925_v8, %v1808_v23  ;;  %v1058_v53 = vadd.f32 %v1057_v36, %v995_v62 }
 0x1a2   :  { %v927_v6 = vadd.f32 %v926_v17, %v1829_v39  ;;  %v1059_v28 = vadd.f32 %v1058_v53, %v996_v2 }
 0x1a4   :  { %v1060_v10 = vadd.f32 %v1059_v28, %v997_v21  ;;  %v928_v47 = vadd.f32 %v927_v6, %v1847_v55 }
 0x1a6   :  { %v1061_v14 = vadd.f32 %v1060_v10, %v998_v57  ;;  %v929_v52 = vadd.f32 %v928_v47, %v1865_v7 }
 0x1a8   :  { %v1062_v23 = vadd.f32 %v1061_v14, %v999_v44  ;;  %v930_v18 = vadd.f32 %v929_v52, %v1883_v27 }
 0x1aa   :  { %v1063_v39 = vadd.f32 %v1062_v23, %v1000_v51  ;;  %v931_v29 = vadd.f32 %v930_v18, %v1901_v43 }
 0x1ac   :  { %v1064_v61 = vadd.f32 %v1063_v39, %v1001_v22  ;;  %v932_v55 = vadd.f32 %v931_v29, %v1917_v59 }
 0x1ae   :  { %v1065_v26 = vadd.f32 %v1064_v61, %v1002_v4  ;;  %v933_v7 = vadd.f32 %v932_v55, %v1932_v11 }
 0x1b0   :  { %v1066_v63 = vadd.f32 %v1065_v26, %v1003_v60  ;;  %v934_v27 = vadd.f32 %v933_v7, %v1947_v31 }
 0x1b2   :  { %v1067_v1 = vadd.f32 %v1066_v63, %v1004_v30  ;;  %v935_v43 = vadd.f32 %v934_v27, %v1962_v25 }
 0x1b4   :  { %v1068_v34 = vadd.f32 %v1067_v1, %v1005_v24  ;;  %v936_v59 = vadd.f32 %v935_v43, %v1977_v33 }
 0x1b6   :  { %v1069_v37 = vadd.f32 %v1068_v34, %v1006_v3  ;;  %v937_v11 = vadd.f32 %v936_v59, %v1987_v15 }
 0x1b8   :  { %v1070_v5 = vadd.f32 %v1069_v37, %v1007_v38  ;;  %v938_v31 = vadd.f32 %v937_v11, %v1996_v35 }
 0x1ba   :  { %v1071_v42 = vadd.f32 %v1070_v5, %v1008_v12  ;;  %v939_v25 = vadd.f32 %v938_v31, %v2005_v48 }
 0x1bc   :  { %v1072_v9 = vadd.f32 %v1071_v42, %v1009_v41  ;;  %v940_v33 = vadd.f32 %v939_v25, %v2014_v0 }
 0x1be   :  { %v1073_v40 = vadd.f32 %v1072_v9, %v1010_v46  ;;  %v941_v15 = vadd.f32 %v940_v33, %v2023_v16 }
 0x1c0   :  { %v942_v50 = vrot.slane %v941_v15, 4  ;;  %v1074_v35 = vadd.f32 %v1073_v40, %v1011_v19 }
 0x1c2   :  { %v943_v45 = vadd.f32 %v942_v50, %v941_v15  ;;  %v1075_v13 = vrot.slane %v1074_v35, 4 }
 0x1c4   :  { %v944_v54 = vrot.slane %v943_v45, 2  ;;  %v1076_v56 = vadd.f32 %v1075_v13, %v1074_v35 }
 0x1c6   :  { %v945_v32 = vadd.f32 %v944_v54, %v943_v45  ;;  %v1077_v48 = vrot.slane %v1076_v56, 2 }
 0x1c8   :  { %v946_v58 = vrot.slane %v945_v32, 1  ;;  %v1078_v49 = vadd.f32 %v1077_v48, %v1076_v56 }
 0x1ca   :  { %v1079_v20 = vrot.slane %v1078_v49, 1  ;;  %v947_v62 = vadd.f32 %v946_v58, %v945_v32 }
 0x1cc   :  { %v1080_v0 = vadd.f32 %v1079_v20, %v1078_v49 }
 0x1ce   :  { %v1082_v8 = vsel %vm1081_vm0, %v947_v62, %v1080_v0 }
 0x1cf   :  { %v1084_v36 = vsel %vm1083_vm1, %v1082_v8, 0.0 }
 0x1d0   :  { %1085 = vst [vmem:[%s2134_s3] sm:$0xff] %v1084_v36 }

// kernel: _lambda_.22
= control target key start
LH: loop header
LB: loop body
LE: loop exit
PB: predicated region body
PF: predicated region fallthrough
CT: control target
= control target key end

     0   :  { %s896_s0 = inlined_call_operand.vmem [shape: f32[512,128], index: 0, kind: input, shape index: {}]   ;;  %s897_s1 = inlined_call_operand.vmem [shape: f32[1,128], index: 1, kind: input, shape index: {}]   ;;  %s898_s2 = inlined_call_operand.vmem [shape: f32[1,128], index: 2, kind: input, shape index: {}]   ;;  %s899_s3 = inlined_call_operand.vmem [shape: f32[512,128], index: 3, kind: output, shape index: {}]  }
   0x1   :  { %v14_v0 = vld [vmem:[%s896_s0] sm:$0xff]  ;;  %v15_v4 = vld [vmem:[%s896_s0 + $0x8] sm:$0xff]  ;;  %v16_v5 = vld [vmem:[%s896_s0 + $0x10] sm:$0xff] }
   0x2   :  { %v380_v1 = vld [vmem:[%s897_s1] ss:$0 sm:$0xff]  ;;  %v17_v6 = vld [vmem:[%s896_s0 + $0x18] sm:$0xff]  ;;  %v19_v11 = vld [vmem:[%s896_s0 + $0x28] sm:$0xff] }
   0x3   :  { %v385_v2 = vld [vmem:[%s898_s2] ss:$0 sm:$0xff]  ;;  %v85_v3 = vmul.f32 %v380_v1, %v14_v0  ;;  %v86_v7 = vmul.f32 %v380_v1, %v15_v4  ;;  %v87_v8 = vmul.f32 %v380_v1, %v16_v5  ;;  %v88_v9 = vmul.f32 %v380_v1, %v17_v6  ;;  %v20_v12 = vld [vmem:[%s896_s0 + $0x30] sm:$0xff]  ;;  %v21_v17 = vld [vmem:[%s896_s0 + $0x38] sm:$0xff] }
   0x4   :  { %v18_v10 = vld [vmem:[%s896_s0 + $0x20] sm:$0xff]  ;;  %v90_v15 = vmul.f32 %v380_v1, %v19_v11  ;;  %v91_v16 = vmul.f32 %v380_v1, %v20_v12  ;;  %v92_v21 = vmul.f32 %v380_v1, %v21_v17  ;;  %v23_v27 = vld [vmem:[%s896_s0 + $0x48] sm:$0xff]  ;;  %v24_v28 = vld [vmem:[%s896_s0 + $0x50] sm:$0xff] }
   0x5   :  { %v156_v13 = vadd.f32 %v385_v2, %v85_v3  ;;  %v89_v14 = vmul.f32 %v380_v1, %v18_v10  ;;  %v157_v18 = vadd.f32 %v385_v2, %v86_v7  ;;  %v158_v19 = vadd.f32 %v385_v2, %v87_v8  ;;  %v22_v22 = vld [vmem:[%s896_s0 + $0x40] sm:$0xff]  ;;  %v25_v29 = vld [vmem:[%s896_s0 + $0x58] sm:$0xff]  ;;  %v27_v35 = vld [vmem:[%s896_s0 + $0x68] sm:$0xff] }
   0x6   :  { %v159_v20 = vadd.f32 %v385_v2, %v88_v9  ;;  %v161_v25 = vadd.f32 %v385_v2, %v90_v15  ;;  %v162_v26 = vadd.f32 %v385_v2, %v91_v16  ;;  %v163_v33 = vadd.f32 %v385_v2, %v92_v21  ;;  %v26_v34 = vld [vmem:[%s896_s0 + $0x60] sm:$0xff]  ;;  %v28_v36 = vld [vmem:[%s896_s0 + $0x70] sm:$0xff]  ;;  %v29_v41 = vld [vmem:[%s896_s0 + $0x78] sm:$0xff] }
   0x7   :  { %v220_v23 = vmax.f32 %v156_v13, 0.0  ;;  %v160_v24 = vadd.f32 %v385_v2, %v89_v14  ;;  %v221_v30 = vmax.f32 %v157_v18, 0.0  ;;  %v222_v31 = vmax.f32 %v158_v19, 0.0  ;;  %v30_v54 = vld [vmem:[%s896_s0 + $0x80] sm:$0xff]  ;;  %v31_v59 = vld [vmem:[%s896_s0 + $0x88] sm:$0xff]  ;;  %v32_v60 = vld [vmem:[%s896_s0 + $0x90] sm:$0xff] }
   0x8   :  { %v223_v32 = vmax.f32 %v159_v20, 0.0  ;;  %v225_v38 = vmax.f32 %v161_v25, 0.0  ;;  %v226_v39 = vmax.f32 %v162_v26, 0.0  ;;  %v93_v40 = vmul.f32 %v380_v1, %v22_v22  ;;  %v33_v61 = vld [vmem:[%s896_s0 + $0x98] sm:$0xff]  ;;  %v34_v4 = vld [vmem:[%s896_s0 + $0xa0] sm:$0xff]  ;;  %v35_v5 = vld [vmem:[%s896_s0 + $0xa8] sm:$0xff] }
   0x9   :  { %284 = vst [vmem:[%s899_s3] sm:$0xff] %v220_v23  ;;  %v224_v37 = vmax.f32 %v160_v24, 0.0  ;;  %285 = vst [vmem:[%s899_s3 + $0x8] sm:$0xff] %v221_v30  ;;  %v227_v42 = vmax.f32 %v163_v33, 0.0  ;;  %v94_v43 = vmul.f32 %v380_v1, %v23_v27  ;;  %v95_v44 = vmul.f32 %v380_v1, %v24_v28  ;;  %v36_v6 = vld [vmem:[%s896_s0 + $0xb0] sm:$0xff]  ;;  %v37_v11 = vld [vmem:[%s896_s0 + $0xb8] sm:$0xff] }
   0xa   :  { %286 = vst [vmem:[%s899_s3 + $0x10] sm:$0xff] %v222_v31  ;;  %287 = vst [vmem:[%s899_s3 + $0x18] sm:$0xff] %v223_v32  ;;  %v96_v45 = vmul.f32 %v380_v1, %v25_v29  ;;  %v164_v46 = vadd.f32 %v385_v2, %v93_v40  ;;  %v97_v47 = vmul.f32 %v380_v1, %v26_v34  ;;  %v38_v24 = vld [vmem:[%s896_s0 + $0xc0] sm:$0xff]  ;;  %v39_v29 = vld [vmem:[%s896_s0 + $0xc8] sm:$0xff] }
   0xb   :  { %288 = vst [vmem:[%s899_s3 + $0x20] sm:$0xff] %v224_v37  ;;  %289 = vst [vmem:[%s899_s3 + $0x28] sm:$0xff] %v225_v38  ;;  %v98_v48 = vmul.f32 %v380_v1, %v27_v35  ;;  %v99_v49 = vmul.f32 %v380_v1, %v28_v36  ;;  %v165_v50 = vadd.f32 %v385_v2, %v94_v43  ;;  %v40_v30 = vld [vmem:[%s896_s0 + $0xd0] sm:$0xff]  ;;  %v41_v31 = vld [vmem:[%s896_s0 + $0xd8] sm:$0xff] }
   0xc   :  { %290 = vst [vmem:[%s899_s3 + $0x30] sm:$0xff] %v226_v39  ;;  %291 = vst [vmem:[%s899_s3 + $0x38] sm:$0xff] %v227_v42  ;;  %v166_v51 = vadd.f32 %v385_v2, %v95_v44  ;;  %v167_v52 = vadd.f32 %v385_v2, %v96_v45  ;;  %v100_v53 = vmul.f32 %v380_v1, %v29_v41  ;;  %v228_v55 = vmax.f32 %v164_v46, 0.0  ;;  %v42_v36 = vld [vmem:[%s896_s0 + $0xe0] sm:$0xff]  ;;  %v43_v37 = vld [vmem:[%s896_s0 + $0xe8] sm:$0xff] }
   0xd   :  { %v168_v56 = vadd.f32 %v385_v2, %v97_v47  ;;  %v169_v57 = vadd.f32 %v385_v2, %v98_v48  ;;  %v170_v58 = vadd.f32 %v385_v2, %v99_v49  ;;  %v229_v62 = vmax.f32 %v165_v50, 0.0  ;;  %v44_v38 = vld [vmem:[%s896_s0 + $0xf0] sm:$0xff]  ;;  %v45_v43 = vld [vmem:[%s896_s0 + $0xf8] sm:$0xff] }
   0xe   :  { %v230_v63 = vmax.f32 %v166_v51, 0.0  ;;  %v231_v0 = vmax.f32 %v167_v52, 0.0  ;;  %v171_v3 = vadd.f32 %v385_v2, %v100_v53  ;;  %292 = vst [vmem:[%s899_s3 + $0x40] sm:$0xff] %v228_v55  ;;  %v101_v10 = vmul.f32 %v380_v1, %v30_v54 }
   0xf   :  { %v232_v7 = vmax.f32 %v168_v56, 0.0  ;;  %v233_v8 = vmax.f32 %v169_v57, 0.0  ;;  %v234_v9 = vmax.f32 %v170_v58, 0.0  ;;  %293 = vst [vmem:[%s899_s3 + $0x48] sm:$0xff] %v229_v62  ;;  %v102_v13 = vmul.f32 %v380_v1, %v31_v59  ;;  %v46_v56 = vld [vmem:[%s896_s0 + $0x100] sm:$0xff]  ;;  %v48_v62 = vld [vmem:[%s896_s0 + $0x110] sm:$0xff] }
  0x10   :  { %294 = vst [vmem:[%s899_s3 + $0x50] sm:$0xff] %v230_v63  ;;  %295 = vst [vmem:[%s899_s3 + $0x58] sm:$0xff] %v231_v0  ;;  %v235_v12 = vmax.f32 %v171_v3, 0.0  ;;  %v103_v14 = vmul.f32 %v380_v1, %v32_v60  ;;  %v104_v15 = vmul.f32 %v380_v1, %v33_v61  ;;  %v172_v16 = vadd.f32 %v385_v2, %v101_v10  ;;  %v47_v61 = vld [vmem:[%s896_s0 + $0x108] sm:$0xff]  ;;  %v49_v63 = vld [vmem:[%s896_s0 + $0x118] sm:$0xff] }
  0x11   :  { %296 = vst [vmem:[%s899_s3 + $0x60] sm:$0xff] %v232_v7  ;;  %297 = vst [vmem:[%s899_s3 + $0x68] sm:$0xff] %v233_v8  ;;  %v105_v17 = vmul.f32 %v380_v1, %v34_v4  ;;  %v106_v18 = vmul.f32 %v380_v1, %v35_v5  ;;  %v107_v19 = vmul.f32 %v380_v1, %v36_v6  ;;  %v50_v6 = vld [vmem:[%s896_s0 + $0x120] sm:$0xff]  ;;  %v51_v7 = vld [vmem:[%s896_s0 + $0x128] sm:$0xff] }
  0x12   :  { %298 = vst [vmem:[%s899_s3 + $0x70] sm:$0xff] %v234_v9  ;;  %299 = vst [vmem:[%s899_s3 + $0x78] sm:$0xff] %v235_v12  ;;  %v173_v20 = vadd.f32 %v385_v2, %v102_v13  ;;  %v174_v21 = vadd.f32 %v385_v2, %v103_v14  ;;  %v175_v22 = vadd.f32 %v385_v2, %v104_v15  ;;  %v236_v25 = vmax.f32 %v172_v16, 0.0  ;;  %v52_v8 = vld [vmem:[%s896_s0 + $0x130] sm:$0xff]  ;;  %v53_v13 = vld [vmem:[%s896_s0 + $0x138] sm:$0xff] }
  0x13   :  { %v108_v23 = vmul.f32 %v380_v1, %v37_v11  ;;  %v176_v26 = vadd.f32 %v385_v2, %v105_v17  ;;  %v177_v27 = vadd.f32 %v385_v2, %v106_v18  ;;  %v178_v28 = vadd.f32 %v385_v2, %v107_v19 }
  0x14   :  { %v237_v32 = vmax.f32 %v173_v20, 0.0  ;;  %v238_v33 = vmax.f32 %v174_v21, 0.0  ;;  %v239_v34 = vmax.f32 %v175_v22, 0.0  ;;  %300 = vst [vmem:[%s899_s3 + $0x80] sm:$0xff] %v236_v25  ;;  %v109_v42 = vmul.f32 %v380_v1, %v38_v24 }
  0x15   :  { %v179_v35 = vadd.f32 %v385_v2, %v108_v23  ;;  %v240_v39 = vmax.f32 %v176_v26, 0.0  ;;  %v241_v40 = vmax.f32 %v177_v27, 0.0  ;;  %v242_v41 = vmax.f32 %v178_v28, 0.0  ;;  %v54_v26 = vld [vmem:[%s896_s0 + $0x140] sm:$0xff] }
  0x16   :  { %301 = vst [vmem:[%s899_s3 + $0x88] sm:$0xff] %v237_v32  ;;  %302 = vst [vmem:[%s899_s3 + $0x90] sm:$0xff] %v238_v33  ;;  %v110_v45 = vmul.f32 %v380_v1, %v39_v29  ;;  %v111_v46 = vmul.f32 %v380_v1, %v40_v30  ;;  %v112_v47 = vmul.f32 %v380_v1, %v41_v31  ;;  %v55_v31 = vld [vmem:[%s896_s0 + $0x148] sm:$0xff]  ;;  %v56_v32 = vld [vmem:[%s896_s0 + $0x150] sm:$0xff] }
  0x17   :  { %303 = vst [vmem:[%s899_s3 + $0x98] sm:$0xff] %v239_v34  ;;  %v243_v44 = vmax.f32 %v179_v35, 0.0  ;;  %304 = vst [vmem:[%s899_s3 + $0xa0] sm:$0xff] %v240_v39  ;;  %v180_v48 = vadd.f32 %v385_v2, %v109_v42  ;;  %v113_v49 = vmul.f32 %v380_v1, %v42_v36  ;;  %v114_v50 = vmul.f32 %v380_v1, %v43_v37  ;;  %v57_v33 = vld [vmem:[%s896_s0 + $0x158] sm:$0xff]  ;;  %v59_v39 = vld [vmem:[%s896_s0 + $0x168] sm:$0xff] }
  0x18   :  { %305 = vst [vmem:[%s899_s3 + $0xa8] sm:$0xff] %v241_v40  ;;  %306 = vst [vmem:[%s899_s3 + $0xb0] sm:$0xff] %v242_v41  ;;  %v115_v51 = vmul.f32 %v380_v1, %v44_v38  ;;  %v181_v52 = vadd.f32 %v385_v2, %v110_v45  ;;  %v182_v53 = vadd.f32 %v385_v2, %v111_v46  ;;  %v58_v38 = vld [vmem:[%s896_s0 + $0x160] sm:$0xff]  ;;  %v60_v40 = vld [vmem:[%s896_s0 + $0x170] sm:$0xff] }
  0x19   :  { %307 = vst [vmem:[%s899_s3 + $0xb8] sm:$0xff] %v243_v44  ;;  %v183_v54 = vadd.f32 %v385_v2, %v112_v47  ;;  %v116_v55 = vmul.f32 %v380_v1, %v45_v43  ;;  %v244_v57 = vmax.f32 %v180_v48, 0.0  ;;  %v184_v58 = vadd.f32 %v385_v2, %v113_v49  ;;  %v61_v45 = vld [vmem:[%s896_s0 + $0x178] sm:$0xff] }
  0x1a   :  { %v185_v59 = vadd.f32 %v385_v2, %v114_v50  ;;  %v186_v60 = vadd.f32 %v385_v2, %v115_v51  ;;  %v245_v0 = vmax.f32 %v181_v52, 0.0  ;;  %v246_v3 = vmax.f32 %v182_v53, 0.0 }
  0x1b   :  { %v247_v4 = vmax.f32 %v183_v54, 0.0  ;;  %v187_v5 = vadd.f32 %v385_v2, %v116_v55  ;;  %308 = vst [vmem:[%s899_s3 + $0xc0] sm:$0xff] %v244_v57  ;;  %v248_v9 = vmax.f32 %v184_v58, 0.0  ;;  %v117_v12 = vmul.f32 %v380_v1, %v46_v56  ;;  %v62_v58 = vld [vmem:[%s896_s0 + $0x180] sm:$0xff] }
  0x1c   :  { %v249_v10 = vmax.f32 %v185_v59, 0.0  ;;  %v250_v11 = vmax.f32 %v186_v60, 0.0  ;;  %309 = vst [vmem:[%s899_s3 + $0xc8] sm:$0xff] %v245_v0  ;;  %310 = vst [vmem:[%s899_s3 + $0xd0] sm:$0xff] %v246_v3  ;;  %v118_v15 = vmul.f32 %v380_v1, %v47_v61  ;;  %v119_v16 = vmul.f32 %v380_v1, %v48_v62  ;;  %v64_v0 = vld [vmem:[%s896_s0 + $0x190] sm:$0xff]  ;;  %v65_v3 = vld [vmem:[%s896_s0 + $0x198] sm:$0xff] }
  0x1d   :  { %311 = vst [vmem:[%s899_s3 + $0xd8] sm:$0xff] %v247_v4  ;;  %v251_v14 = vmax.f32 %v187_v5, 0.0  ;;  %v120_v17 = vmul.f32 %v380_v1, %v49_v63  ;;  %312 = vst [vmem:[%s899_s3 + $0xe0] sm:$0xff] %v248_v9  ;;  %v188_v18 = vadd.f32 %v385_v2, %v117_v12  ;;  %v121_v19 = vmul.f32 %v380_v1, %v50_v6  ;;  %v63_v63 = vld [vmem:[%s896_s0 + $0x188] sm:$0xff] }
  0x1e   :  { %313 = vst [vmem:[%s899_s3 + $0xe8] sm:$0xff] %v249_v10  ;;  %314 = vst [vmem:[%s899_s3 + $0xf0] sm:$0xff] %v250_v11  ;;  %v122_v20 = vmul.f32 %v380_v1, %v51_v7  ;;  %v123_v21 = vmul.f32 %v380_v1, %v52_v8  ;;  %v189_v22 = vadd.f32 %v385_v2, %v118_v15  ;;  %v66_v8 = vld [vmem:[%s896_s0 + $0x1a0] sm:$0xff]  ;;  %v67_v9 = vld [vmem:[%s896_s0 + $0x1a8] sm:$0xff] }
  0x1f   :  { %315 = vst [vmem:[%s899_s3 + $0xf8] sm:$0xff] %v251_v14  ;;  %v190_v23 = vadd.f32 %v385_v2, %v119_v16  ;;  %v191_v24 = vadd.f32 %v385_v2, %v120_v17  ;;  %v124_v25 = vmul.f32 %v380_v1, %v53_v13  ;;  %v252_v27 = vmax.f32 %v188_v18, 0.0  ;;  %v68_v10 = vld [vmem:[%s896_s0 + $0x1b0] sm:$0xff]  ;;  %v69_v15 = vld [vmem:[%s896_s0 + $0x1b8] sm:$0xff] }
  0x20   :  { %v192_v28 = vadd.f32 %v385_v2, %v121_v19  ;;  %v193_v29 = vadd.f32 %v385_v2, %v122_v20  ;;  %v194_v30 = vadd.f32 %v385_v2, %v123_v21  ;;  %v253_v34 = vmax.f32 %v189_v22, 0.0 }
  0x21   :  { %v254_v35 = vmax.f32 %v190_v23, 0.0  ;;  %v255_v36 = vmax.f32 %v191_v24, 0.0  ;;  %v195_v37 = vadd.f32 %v385_v2, %v124_v25  ;;  %316 = vst [vmem:[%s899_s3 + $0x100] sm:$0xff] %v252_v27  ;;  %v125_v44 = vmul.f32 %v380_v1, %v54_v26 }
  0x22   :  { %v256_v41 = vmax.f32 %v192_v28, 0.0  ;;  %v257_v42 = vmax.f32 %v193_v29, 0.0  ;;  %v258_v43 = vmax.f32 %v194_v30, 0.0  ;;  %317 = vst [vmem:[%s899_s3 + $0x108] sm:$0xff] %v253_v34  ;;  %v126_v47 = vmul.f32 %v380_v1, %v55_v31  ;;  %v70_v28 = vld [vmem:[%s896_s0 + $0x1c0] sm:$0xff]  ;;  %v72_v34 = vld [vmem:[%s896_s0 + $0x1d0] sm:$0xff] }
  0x23   :  { %318 = vst [vmem:[%s899_s3 + $0x110] sm:$0xff] %v254_v35  ;;  %319 = vst [vmem:[%s899_s3 + $0x118] sm:$0xff] %v255_v36  ;;  %v259_v46 = vmax.f32 %v195_v37, 0.0  ;;  %v127_v48 = vmul.f32 %v380_v1, %v56_v32  ;;  %v128_v49 = vmul.f32 %v380_v1, %v57_v33  ;;  %v196_v50 = vadd.f32 %v385_v2, %v125_v44  ;;  %v71_v33 = vld [vmem:[%s896_s0 + $0x1c8] sm:$0xff]  ;;  %v73_v35 = vld [vmem:[%s896_s0 + $0x1d8] sm:$0xff] }
  0x24   :  { %320 = vst [vmem:[%s899_s3 + $0x120] sm:$0xff] %v256_v41  ;;  %321 = vst [vmem:[%s899_s3 + $0x128] sm:$0xff] %v257_v42  ;;  %v129_v51 = vmul.f32 %v380_v1, %v58_v38  ;;  %v130_v52 = vmul.f32 %v380_v1, %v59_v39  ;;  %v131_v53 = vmul.f32 %v380_v1, %v60_v40  ;;  %v74_v40 = vld [vmem:[%s896_s0 + $0x1e0] sm:$0xff]  ;;  %v75_v41 = vld [vmem:[%s896_s0 + $0x1e8] sm:$0xff] }
  0x25   :  { %322 = vst [vmem:[%s899_s3 + $0x130] sm:$0xff] %v258_v43  ;;  %323 = vst [vmem:[%s899_s3 + $0x138] sm:$0xff] %v259_v46  ;;  %v197_v54 = vadd.f32 %v385_v2, %v126_v47  ;;  %v198_v55 = vadd.f32 %v385_v2, %v127_v48  ;;  %v199_v56 = vadd.f32 %v385_v2, %v128_v49  ;;  %v260_v59 = vmax.f32 %v196_v50, 0.0  ;;  %v76_v42 = vld [vmem:[%s896_s0 + $0x1f0] sm:$0xff]  ;;  %v77_v47 = vld [vmem:[%s896_s0 + $0x1f8] sm:$0xff] }
  0x26   :  { %v132_v57 = vmul.f32 %v380_v1, %v61_v45  ;;  %v200_v60 = vadd.f32 %v385_v2, %v129_v51  ;;  %v201_v61 = vadd.f32 %v385_v2, %v130_v52  ;;  %v202_v62 = vadd.f32 %v385_v2, %v131_v53 }
  0x27   :  { %v261_v4 = vmax.f32 %v197_v54, 0.0  ;;  %v262_v5 = vmax.f32 %v198_v55, 0.0  ;;  %v263_v6 = vmax.f32 %v199_v56, 0.0  ;;  %324 = vst [vmem:[%s899_s3 + $0x140] sm:$0xff] %v260_v59  ;;  %v133_v14 = vmul.f32 %v380_v1, %v62_v58 }
  0x28   :  { %v203_v7 = vadd.f32 %v385_v2, %v132_v57  ;;  %v264_v11 = vmax.f32 %v200_v60, 0.0  ;;  %v265_v12 = vmax.f32 %v201_v61, 0.0  ;;  %v266_v13 = vmax.f32 %v202_v62, 0.0 }
  0x29   :  { %325 = vst [vmem:[%s899_s3 + $0x148] sm:$0xff] %v261_v4  ;;  %326 = vst [vmem:[%s899_s3 + $0x150] sm:$0xff] %v262_v5  ;;  %v134_v17 = vmul.f32 %v380_v1, %v63_v63  ;;  %v135_v18 = vmul.f32 %v380_v1, %v64_v0  ;;  %v136_v19 = vmul.f32 %v380_v1, %v65_v3 }
  0x2a   :  { %327 = vst [vmem:[%s899_s3 + $0x158] sm:$0xff] %v263_v6  ;;  %v267_v16 = vmax.f32 %v203_v7, 0.0  ;;  %328 = vst [vmem:[%s899_s3 + $0x160] sm:$0xff] %v264_v11  ;;  %v204_v20 = vadd.f32 %v385_v2, %v133_v14  ;;  %v137_v21 = vmul.f32 %v380_v1, %v66_v8  ;;  %v138_v22 = vmul.f32 %v380_v1, %v67_v9 }
  0x2b   :  { %329 = vst [vmem:[%s899_s3 + $0x168] sm:$0xff] %v265_v12  ;;  %330 = vst [vmem:[%s899_s3 + $0x170] sm:$0xff] %v266_v13  ;;  %v139_v23 = vmul.f32 %v380_v1, %v68_v10  ;;  %v205_v24 = vadd.f32 %v385_v2, %v134_v17  ;;  %v206_v25 = vadd.f32 %v385_v2, %v135_v18 }
  0x2c   :  { %331 = vst [vmem:[%s899_s3 + $0x178] sm:$0xff] %v267_v16  ;;  %v207_v26 = vadd.f32 %v385_v2, %v136_v19  ;;  %v140_v27 = vmul.f32 %v380_v1, %v69_v15  ;;  %v268_v29 = vmax.f32 %v204_v20, 0.0  ;;  %v208_v30 = vadd.f32 %v385_v2, %v137_v21 }
  0x2d   :  { %v209_v31 = vadd.f32 %v385_v2, %v138_v22  ;;  %v210_v32 = vadd.f32 %v385_v2, %v139_v23  ;;  %v269_v36 = vmax.f32 %v205_v24, 0.0  ;;  %v270_v37 = vmax.f32 %v206_v25, 0.0 }
  0x2e   :  { %v271_v38 = vmax.f32 %v207_v26, 0.0  ;;  %v211_v39 = vadd.f32 %v385_v2, %v140_v27  ;;  %332 = vst [vmem:[%s899_s3 + $0x180] sm:$0xff] %v268_v29  ;;  %v272_v43 = vmax.f32 %v208_v30, 0.0  ;;  %v141_v46 = vmul.f32 %v380_v1, %v70_v28 }
  0x2f   :  { %v273_v44 = vmax.f32 %v209_v31, 0.0  ;;  %v274_v45 = vmax.f32 %v210_v32, 0.0  ;;  %333 = vst [vmem:[%s899_s3 + $0x188] sm:$0xff] %v269_v36  ;;  %334 = vst [vmem:[%s899_s3 + $0x190] sm:$0xff] %v270_v37  ;;  %v142_v49 = vmul.f32 %v380_v1, %v71_v33  ;;  %v143_v50 = vmul.f32 %v380_v1, %v72_v34 }
  0x30   :  { %335 = vst [vmem:[%s899_s3 + $0x198] sm:$0xff] %v271_v38  ;;  %v275_v48 = vmax.f32 %v211_v39, 0.0  ;;  %v144_v51 = vmul.f32 %v380_v1, %v73_v35  ;;  %336 = vst [vmem:[%s899_s3 + $0x1a0] sm:$0xff] %v272_v43  ;;  %v212_v52 = vadd.f32 %v385_v2, %v141_v46  ;;  %v145_v53 = vmul.f32 %v380_v1, %v74_v40 }
  0x31   :  { %337 = vst [vmem:[%s899_s3 + $0x1a8] sm:$0xff] %v273_v44  ;;  %338 = vst [vmem:[%s899_s3 + $0x1b0] sm:$0xff] %v274_v45  ;;  %v146_v54 = vmul.f32 %v380_v1, %v75_v41  ;;  %v147_v55 = vmul.f32 %v380_v1, %v76_v42  ;;  %v213_v56 = vadd.f32 %v385_v2, %v142_v49 }
  0x32   :  { %339 = vst [vmem:[%s899_s3 + $0x1b8] sm:$0xff] %v275_v48  ;;  %v214_v57 = vadd.f32 %v385_v2, %v143_v50  ;;  %v215_v58 = vadd.f32 %v385_v2, %v144_v51  ;;  %v148_v59 = vmul.f32 %v380_v1, %v77_v47  ;;  %v276_v60 = vmax.f32 %v212_v52, 0.0 }
  0x33   :  { %v216_v61 = vadd.f32 %v385_v2, %v145_v53  ;;  %v217_v62 = vadd.f32 %v385_v2, %v146_v54  ;;  %v218_v63 = vadd.f32 %v385_v2, %v147_v55  ;;  %v277_v0 = vmax.f32 %v213_v56, 0.0 }
  0x34   :  { %v278_v3 = vmax.f32 %v214_v57, 0.0  ;;  %v279_v4 = vmax.f32 %v215_v58, 0.0  ;;  %v219_v5 = vadd.f32 %v385_v2, %v148_v59  ;;  %340 = vst [vmem:[%s899_s3 + $0x1c0] sm:$0xff] %v276_v60 }
  0x35   :  { %v280_v6 = vmax.f32 %v216_v61, 0.0  ;;  %v281_v7 = vmax.f32 %v217_v62, 0.0  ;;  %v282_v8 = vmax.f32 %v218_v63, 0.0  ;;  %341 = vst [vmem:[%s899_s3 + $0x1c8] sm:$0xff] %v277_v0 }
  0x36   :  { %342 = vst [vmem:[%s899_s3 + $0x1d0] sm:$0xff] %v278_v3  ;;  %343 = vst [vmem:[%s899_s3 + $0x1d8] sm:$0xff] %v279_v4  ;;  %v283_v1 = vmax.f32 %v219_v5, 0.0 }
  0x37   :  { %344 = vst [vmem:[%s899_s3 + $0x1e0] sm:$0xff] %v280_v6  ;;  %345 = vst [vmem:[%s899_s3 + $0x1e8] sm:$0xff] %v281_v7 }
  0x38   :  { %346 = vst [vmem:[%s899_s3 + $0x1f0] sm:$0xff] %v282_v8  ;;  %347 = vst [vmem:[%s899_s3 + $0x1f8] sm:$0xff] %v283_v1 }

// kernel: _lambda_.24
= control target key start
LH: loop header
LB: loop body
LE: loop exit
PB: predicated region body
PF: predicated region fallthrough
CT: control target
= control target key end

     0   :  { %s254_s0 = inlined_call_operand.vmem [shape: f32[128,128], index: 0, kind: input, shape index: {}]   ;;  %s255_s1 = inlined_call_operand.vmem [shape: f32[1,128], index: 1, kind: input, shape index: {}]   ;;  %s256_s2 = inlined_call_operand.vmem [shape: f32[1,128], index: 2, kind: input, shape index: {}]   ;;  %s257_s3 = inlined_call_operand.vmem [shape: f32[128,128], index: 3, kind: output, shape index: {}]  }
   0x1   :  { %v14_v0 = vld [vmem:[%s254_s0] sm:$0xff]  ;;  %v15_v4 = vld [vmem:[%s254_s0 + $0x8] sm:$0xff]  ;;  %v16_v5 = vld [vmem:[%s254_s0 + $0x10] sm:$0xff] }
   0x2   :  { %v112_v1 = vld [vmem:[%s255_s1] ss:$0 sm:$0xff]  ;;  %v17_v6 = vld [vmem:[%s254_s0 + $0x18] sm:$0xff]  ;;  %v19_v11 = vld [vmem:[%s254_s0 + $0x28] sm:$0xff] }
   0x3   :  { %v143_v2 = vld [vmem:[%s256_s2] ss:$0 sm:$0xff]  ;;  %v37_v3 = vmul.f32 %v112_v1, %v14_v0  ;;  %v38_v7 = vmul.f32 %v112_v1, %v15_v4  ;;  %v39_v8 = vmul.f32 %v112_v1, %v16_v5  ;;  %v40_v9 = vmul.f32 %v112_v1, %v17_v6  ;;  %v20_v12 = vld [vmem:[%s254_s0 + $0x30] sm:$0xff]  ;;  %v21_v17 = vld [vmem:[%s254_s0 + $0x38] sm:$0xff] }
   0x4   :  { %v18_v10 = vld [vmem:[%s254_s0 + $0x20] sm:$0xff]  ;;  %v42_v15 = vmul.f32 %v112_v1, %v19_v11  ;;  %v43_v16 = vmul.f32 %v112_v1, %v20_v12  ;;  %v44_v21 = vmul.f32 %v112_v1, %v21_v17  ;;  %v23_v27 = vld [vmem:[%s254_s0 + $0x48] sm:$0xff]  ;;  %v24_v28 = vld [vmem:[%s254_s0 + $0x50] sm:$0xff] }
   0x5   :  { %v60_v13 = vadd.f32 %v143_v2, %v37_v3  ;;  %v41_v14 = vmul.f32 %v112_v1, %v18_v10  ;;  %v61_v18 = vadd.f32 %v143_v2, %v38_v7  ;;  %v62_v19 = vadd.f32 %v143_v2, %v39_v8  ;;  %v22_v22 = vld [vmem:[%s254_s0 + $0x40] sm:$0xff]  ;;  %v25_v29 = vld [vmem:[%s254_s0 + $0x58] sm:$0xff]  ;;  %v27_v35 = vld [vmem:[%s254_s0 + $0x68] sm:$0xff] }
   0x6   :  { %v63_v20 = vadd.f32 %v143_v2, %v40_v9  ;;  %v65_v25 = vadd.f32 %v143_v2, %v42_v15  ;;  %v66_v26 = vadd.f32 %v143_v2, %v43_v16  ;;  %v67_v33 = vadd.f32 %v143_v2, %v44_v21  ;;  %v26_v34 = vld [vmem:[%s254_s0 + $0x60] sm:$0xff]  ;;  %v28_v36 = vld [vmem:[%s254_s0 + $0x70] sm:$0xff]  ;;  %v29_v41 = vld [vmem:[%s254_s0 + $0x78] sm:$0xff] }
   0x7   :  { %v76_v23 = vmax.f32 %v60_v13, 0.0  ;;  %v64_v24 = vadd.f32 %v143_v2, %v41_v14  ;;  %v77_v30 = vmax.f32 %v61_v18, 0.0  ;;  %v78_v31 = vmax.f32 %v62_v19, 0.0 }
   0x8   :  { %v79_v32 = vmax.f32 %v63_v20, 0.0  ;;  %v81_v38 = vmax.f32 %v65_v25, 0.0  ;;  %v82_v39 = vmax.f32 %v66_v26, 0.0  ;;  %v45_v40 = vmul.f32 %v112_v1, %v22_v22 }
   0x9   :  { %92 = vst [vmem:[%s257_s3] sm:$0xff] %v76_v23  ;;  %v80_v37 = vmax.f32 %v64_v24, 0.0  ;;  %93 = vst [vmem:[%s257_s3 + $0x8] sm:$0xff] %v77_v30  ;;  %v83_v42 = vmax.f32 %v67_v33, 0.0  ;;  %v46_v43 = vmul.f32 %v112_v1, %v23_v27  ;;  %v47_v44 = vmul.f32 %v112_v1, %v24_v28 }
   0xa   :  { %94 = vst [vmem:[%s257_s3 + $0x10] sm:$0xff] %v78_v31  ;;  %95 = vst [vmem:[%s257_s3 + $0x18] sm:$0xff] %v79_v32  ;;  %v48_v45 = vmul.f32 %v112_v1, %v25_v29  ;;  %v68_v46 = vadd.f32 %v143_v2, %v45_v40  ;;  %v49_v47 = vmul.f32 %v112_v1, %v26_v34 }
   0xb   :  { %96 = vst [vmem:[%s257_s3 + $0x20] sm:$0xff] %v80_v37  ;;  %97 = vst [vmem:[%s257_s3 + $0x28] sm:$0xff] %v81_v38  ;;  %v50_v48 = vmul.f32 %v112_v1, %v27_v35  ;;  %v51_v49 = vmul.f32 %v112_v1, %v28_v36  ;;  %v69_v50 = vadd.f32 %v143_v2, %v46_v43 }
   0xc   :  { %98 = vst [vmem:[%s257_s3 + $0x30] sm:$0xff] %v82_v39  ;;  %99 = vst [vmem:[%s257_s3 + $0x38] sm:$0xff] %v83_v42  ;;  %v70_v51 = vadd.f32 %v143_v2, %v47_v44  ;;  %v71_v52 = vadd.f32 %v143_v2, %v48_v45  ;;  %v52_v53 = vmul.f32 %v112_v1, %v29_v41  ;;  %v84_v54 = vmax.f32 %v68_v46, 0.0 }
   0xd   :  { %v72_v55 = vadd.f32 %v143_v2, %v49_v47  ;;  %v73_v56 = vadd.f32 %v143_v2, %v50_v48  ;;  %v74_v57 = vadd.f32 %v143_v2, %v51_v49  ;;  %v85_v58 = vmax.f32 %v69_v50, 0.0 }
   0xe   :  { %v86_v59 = vmax.f32 %v70_v51, 0.0  ;;  %v87_v60 = vmax.f32 %v71_v52, 0.0  ;;  %v75_v61 = vadd.f32 %v143_v2, %v52_v53  ;;  %100 = vst [vmem:[%s257_s3 + $0x40] sm:$0xff] %v84_v54 }
   0xf   :  { %v88_v62 = vmax.f32 %v72_v55, 0.0  ;;  %v89_v63 = vmax.f32 %v73_v56, 0.0  ;;  %v90_v0 = vmax.f32 %v74_v57, 0.0  ;;  %101 = vst [vmem:[%s257_s3 + $0x48] sm:$0xff] %v85_v58 }
  0x10   :  { %102 = vst [vmem:[%s257_s3 + $0x50] sm:$0xff] %v86_v59  ;;  %103 = vst [vmem:[%s257_s3 + $0x58] sm:$0xff] %v87_v60  ;;  %v91_v1 = vmax.f32 %v75_v61, 0.0 }
  0x11   :  { %104 = vst [vmem:[%s257_s3 + $0x60] sm:$0xff] %v88_v62  ;;  %105 = vst [vmem:[%s257_s3 + $0x68] sm:$0xff] %v89_v63 }
  0x12   :  { %106 = vst [vmem:[%s257_s3 + $0x70] sm:$0xff] %v90_v0  ;;  %107 = vst [vmem:[%s257_s3 + $0x78] sm:$0xff] %v91_v1 }

// kernel: _lambda_.23
= control target key start
LH: loop header
LB: loop body
LE: loop exit
PB: predicated region body
PF: predicated region fallthrough
CT: control target
= control target key end

     0   :  { %vm634_vm0 = vcmask 1040384   ;;  %vm636_vm1 = vcmask 1041408   ;;  %s1078_s1 = inlined_call_operand.vmem [shape: bf16[384,128], index: 1, kind: input, shape index: {}]   ;;  %s1079_s0 = inlined_call_operand.vmem [shape: bf16[128,384], index: 0, kind: input, shape index: {}]   ;;  %s1080_s2 = inlined_call_operand.vmem [shape: f32[128,128], index: 2, kind: output, shape index: {0}]   ;;  %s1081_s3 = inlined_call_operand.vmem [shape: f32[8,128], index: 3, kind: output, shape index: {1}]  }
   0x1   :  { %v807_v0 = vld [vmem:[%s1078_s1 + $0x78] sm:$0xff]   ;;  %v810_v3 = vld [vmem:[%s1078_s1 + $0x70] sm:$0xff]   ;;  %v813_v6 = vld [vmem:[%s1078_s1 + $0x68] sm:$0xff]  }
   0x2   :  { %v808_v1 = vld [vmem:[%s1078_s1 + $0x38] sm:$0xff]   ;;  %695 = vmatprep.subr.bf16.mxu0 %v807_v0  ;;  %v811_v4 = vld [vmem:[%s1078_s1 + $0x30] sm:$0xff]   ;;  %v814_v7 = vld [vmem:[%s1078_s1 + $0x28] sm:$0xff]  }
   0x3   :  { %v809_v2 = vld [vmem:[%s1078_s1 + $0xb8] sm:$0xff]   ;;  %696 = vmatpush3.bf16.msra.mxu0 %v808_v1  ;;  %v812_v5 = vld [vmem:[%s1078_s1 + $0xb0] sm:$0xff]   ;;  %v815_v8 = vld [vmem:[%s1078_s1 + $0xa8] sm:$0xff]  }
   0x4   :  { %775 = vmatprep.subr.bf16.mxu1 %v809_v2  ;;  %697 = vmatprep.subr.bf16.mxu0 %v810_v3  ;;  %v816_v9 = vld [vmem:[%s1078_s1 + $0x60] sm:$0xff]   ;;  %v819_v12 = vld [vmem:[%s1078_s1 + $0x58] sm:$0xff]   ;;  %v822_v15 = vld [vmem:[%s1078_s1 + $0x50] sm:$0xff]  }
   0x5   :  { %776 = vmatpush3.bf16.msra.mxu1 %v809_v2  ;;  %v817_v10 = vld [vmem:[%s1078_s1 + $0x20] sm:$0xff]   ;;  %v821_v13 = vld [vmem:[%s1078_s1 + $0x98] sm:$0xff]   ;;  %v824_v16 = vld [vmem:[%s1078_s1 + $0x90] sm:$0xff]  }
   0x6   :  { %777 = vmatprep.subr.bf16.mxu1 %v812_v5  ;;  %v818_v11 = vld [vmem:[%s1078_s1 + $0xa0] sm:$0xff]   ;;  %v820_v14 = vld [vmem:[%s1078_s1 + $0x18] sm:$0xff]   ;;  %v823_v17 = vld [vmem:[%s1078_s1 + $0x10] sm:$0xff]  }
   0x7   :  { %698 = vmatpush3.bf16.msra.mxu0 %v811_v4  ;;  %v825_v18 = vld [vmem:[%s1078_s1 + $0x48] sm:$0xff]   ;;  %v828_v21 = vld [vmem:[%s1078_s1 + $0x40] sm:$0xff]   ;;  %v843_v32 = vld [vmem:[%s1079_s0 + $0x50] ss:$12 sps:$4 sm:$0xff]  }
   0x8   :  { %699 = vmatprep.subr.bf16.mxu0 %v813_v6  ;;  %v826_v19 = vld [vmem:[%s1078_s1 + $0x8] sm:$0xff]   ;;  %v830_v22 = vld [vmem:[%s1078_s1 + $0x80] sm:$0xff]   ;;  %v841_v34 = vld [vmem:[%s1079_s0 + $0x30] ss:$12 sps:$4 sm:$0xff]  }
   0x9   :  { %778 = vmatpush3.bf16.msra.mxu1 %v812_v5  ;;  %v827_v20 = vld [vmem:[%s1078_s1 + $0x88] sm:$0xff]   ;;  %v833_v23 = vld [vmem:[%s1079_s0 + $0x4] ss:$12 sps:$4 sm:$0xff]   ;;  %v839_v31 = vld [vmem:[%s1079_s0 + $0x34] ss:$12 sps:$4 sm:$0xff]  }
   0xa   :  { %779 = vmatprep.subr.bf16.mxu1 %v815_v8  ;;  %v834_v24 = vld [vmem:[%s1079_s0 + $0x8] ss:$12 sps:$4 sm:$0xff]   ;;  %v829_v25 = vld [vmem:[%s1078_s1] sm:$0xff]   ;;  %398 = vmatprep.mubr.bf16.mxu0 %v833_v23  ;;  %v844_v35 = vld [vmem:[%s1079_s0 + $0x4c] ss:$12 sps:$4 sm:$0xff]  }
   0xb   :  { %700 = vmatpush3.bf16.msra.mxu0 %v814_v7  ;;  %791 = vmatprep.mubr.bf16.mxu1 %v834_v24  ;;  %v831_v26 = vld [vmem:[%s1079_s0] ss:$12 sps:$4 sm:$0xff]   ;;  %v836_v27 = vld [vmem:[%s1079_s0 + $0x1c] ss:$12 sps:$4 sm:$0xff]   ;;  %v842_v29 = vld [vmem:[%s1079_s0 + $0x38] ss:$12 sps:$4 sm:$0xff]  }
   0xc   :  { %701 = vmatprep.subr.bf16.mxu0 %v816_v9  ;;  %v835_v28 = vld [vmem:[%s1079_s0 + $0x20] ss:$12 sps:$4 sm:$0xff]   ;;  %v838_v30 = vld [vmem:[%s1079_s0 + $0x18] ss:$12 sps:$4 sm:$0xff]   ;;  %v850_v33 = vld [vmem:[%s1079_s0 + $0x68] ss:$12 sps:$4 sm:$0xff]  }
   0xd   :  { %780 = vmatpush3.bf16.msra.mxu1 %v815_v8  ;;  %v851_v36 = vld [vmem:[%s1079_s0 + $0x80] ss:$12 sps:$4 sm:$0xff]   ;;  %v857_v37 = vld [vmem:[%s1079_s0 + $0x98] ss:$12 sps:$4 sm:$0xff]   ;;  %v846_v38 = vld [vmem:[%s1079_s0 + $0x48] ss:$12 sps:$4 sm:$0xff]  }
   0xe   :  { %781 = vmatprep.subr.bf16.mxu1 %v818_v11  ;;  %v847_v39 = vld [vmem:[%s1079_s0 + $0x64] ss:$12 sps:$4 sm:$0xff]   ;;  %v849_v41 = vld [vmem:[%s1079_s0 + $0x60] ss:$12 sps:$4 sm:$0xff]   ;;  %v852_v42 = vld [vmem:[%s1079_s0 + $0x7c] ss:$12 sps:$4 sm:$0xff]  }
   0xf   :  { %702 = vmatpush3.bf16.msra.mxu0 %v817_v10  ;;  %v859_v40 = vld [vmem:[%s1079_s0 + $0xb0] ss:$12 sps:$4 sm:$0xff]   ;;  %v854_v43 = vld [vmem:[%s1079_s0 + $0x78] ss:$12 sps:$4 sm:$0xff]   ;;  %v855_v44 = vld [vmem:[%s1079_s0 + $0x94] ss:$12 sps:$4 sm:$0xff]  }
  0x10   :  { %703 = vmatprep.subr.bf16.mxu0 %v819_v12  ;;  %v858_v45 = vld [vmem:[%s1079_s0 + $0x90] ss:$12 sps:$4 sm:$0xff]   ;;  %v860_v46 = vld [vmem:[%s1079_s0 + $0xac] ss:$12 sps:$4 sm:$0xff]   ;;  %v862_v47 = vld [vmem:[%s1079_s0 + $0xa8] ss:$12 sps:$4 sm:$0xff]  }
  0x11   :  { %782 = vmatpush3.bf16.msra.mxu1 %v818_v11 }
  0x12   :  { %783 = vmatprep.subr.bf16.mxu1 %v821_v13 }
  0x13   :  { %704 = vmatpush3.bf16.msra.mxu0 %v820_v14 }
  0x14   :  { %705 = vmatprep.subr.bf16.mxu0 %v822_v15 }
  0x15   :  { %784 = vmatpush3.bf16.msra.mxu1 %v821_v13 }
  0x16   :  { %785 = vmatprep.subr.bf16.mxu1 %v824_v16 }
  0x17   :  { %706 = vmatpush3.bf16.msra.mxu0 %v823_v17 }
  0x18   :  { %707 = vmatprep.subr.bf16.mxu0 %v825_v18 }
  0x19   :  { %786 = vmatpush3.bf16.msra.mxu1 %v824_v16 }
  0x1a   :  { %787 = vmatprep.subr.bf16.mxu1 %v827_v20 }
  0x1b   :  { %708 = vmatpush3.bf16.msra.mxu0 %v826_v19 }
  0x1c   :  { %709 = vmatprep.subr.bf16.mxu0 %v828_v21 }
  0x1d   :  { %788 = vmatpush3.bf16.msra.mxu1 %v827_v20 }
  0x1e   :  { %789 = vmatprep.subr.bf16.mxu1 %v830_v22 }
  0x1f   :  { %710 = vmatpush3.bf16.msra.mxu0 %v829_v25 }
  0x21   :  { %790 = vmatpush3.bf16.msra.mxu1 %v830_v22 }
  0x22   :  { %399 = vmatmul.mubr.bf16.vlgmr.msra.gmra.mxu0 %v831_v26 }
  0x23   :  { %406 = vmatprep.mubr.bf16.mxu0 %v836_v27 }
  0x24   :  { %792 = vmatmul.mubr.bf16.vlgmr.msra.gmra.mxu1 %v835_v28 }
  0x25   :  { %795 = vmatprep.mubr.bf16.mxu1 %v842_v29 }
  0x2a   :  { %407 = vmatmul.mubr.bf16.gmra.mxu0 %v838_v30 }
  0x2b   :  { %414 = vmatprep.mubr.bf16.mxu0 %v839_v31 }
  0x2c   :  { %796 = vmatmul.mubr.bf16.gmra.mxu1 %v843_v32 }
  0x2d   :  { %799 = vmatprep.mubr.bf16.mxu1 %v850_v33 }
  0x32   :  { %415 = vmatmul.mubr.bf16.gmra.mxu0 %v841_v34 }
  0x33   :  { %422 = vmatprep.mubr.bf16.mxu0 %v844_v35 }
  0x34   :  { %800 = vmatmul.mubr.bf16.gmra.mxu1 %v851_v36 }
  0x35   :  { %803 = vmatprep.mubr.bf16.mxu1 %v857_v37 }
  0x3a   :  { %423 = vmatmul.mubr.bf16.gmra.mxu0 %v846_v38 }
  0x3b   :  { %430 = vmatprep.mubr.bf16.mxu0 %v847_v39 }
  0x3c   :  { %804 = vmatmul.mubr.bf16.gmra.mxu1 %v859_v40 }
  0x42   :  { %431 = vmatmul.mubr.bf16.gmra.mxu0 %v849_v41 }
  0x43   :  { %438 = vmatprep.mubr.bf16.mxu0 %v852_v42 }
  0x4a   :  { %439 = vmatmul.mubr.bf16.gmra.mxu0 %v854_v43 }
  0x4b   :  { %446 = vmatprep.mubr.bf16.mxu0 %v855_v44 }
  0x52   :  { %447 = vmatmul.mubr.bf16.gmra.mxu0 %v858_v45 }
  0x53   :  { %454 = vmatprep.mubr.bf16.mxu0 %v860_v46 }
  0x5a   :  { %455 = vmatmul.mubr.bf16.gmra.mxu0 %v862_v47 }
  0xe2   :  { %v711_v48 = vpop.f32.mrf.mxu0 }
  0xe4   :  { %v712_v49 = vpop.f32.mrf.mxu0  ;;  %v793_v50 = vpop.f32.mrf.mxu1 }
  0xe5   :  { %v713_v51 = vadd.f32 %v712_v49, %v711_v48 }
  0xe6   :  { %v714_v52 = vpop.f32.mrf.mxu0  ;;  %v497_v53 = vpop.f32.mrf.mxu1 }
  0xe7   :  { %v498_v54 = vadd.f32 %v713_v51, %v497_v53 }
  0xe8   :  { %v715_v55 = vpop.f32.mrf.mxu0  ;;  %v794_v56 = vpop.f32.mrf.mxu1 }
  0xe9   :  { %560 = vst [vmem:[%s1080_s2] sm:$0xff] %v498_v54  ;;  %v716_v57 = vadd.f32 %v715_v55, %v714_v52  ;;  %v597_v35 = vmul.f32 %v498_v54, %v498_v54 }
  0xea   :  { %v717_v58 = vpop.f32.mrf.mxu0  ;;  %v500_v59 = vpop.f32.mrf.mxu1 }
  0xeb   :  { %v501_v60 = vadd.f32 %v716_v57, %v500_v59 }
  0xec   :  { %v718_v61 = vpop.f32.mrf.mxu0  ;;  %v797_v62 = vpop.f32.mrf.mxu1 }
  0xed   :  { %561 = vst [vmem:[%s1080_s2 + $0x8] sm:$0xff] %v501_v60  ;;  %v719_v63 = vadd.f32 %v718_v61, %v717_v58  ;;  %v598_v31 = vmul.f32 %v501_v60, %v501_v60  ;;  %v576_v36 = vadd.f32 %v501_v60, %v498_v54 }
  0xee   :  { %v720_v0 = vpop.f32.mrf.mxu0  ;;  %v513_v3 = vpop.f32.mrf.mxu1 }
  0xef   :  { %v506_v1 = vadd.f32 %v793_v50, %v719_v63  ;;  %v613_v40 = vadd.f32 %v598_v31, %v597_v35 }
  0xf0   :  { %v721_v2 = vpop.f32.mrf.mxu0  ;;  %v798_v8 = vpop.f32.mrf.mxu1 }
  0xf1   :  { %562 = vst [vmem:[%s1080_s2 + $0x10] sm:$0xff] %v506_v1  ;;  %v722_v4 = vadd.f32 %v721_v2, %v720_v0  ;;  %v599_v37 = vmul.f32 %v506_v1, %v506_v1  ;;  %v577_v41 = vadd.f32 %v576_v36, %v506_v1 }
  0xf2   :  { %v723_v5 = vpop.f32.mrf.mxu0  ;;  %v516_v13 = vpop.f32.mrf.mxu1 }
  0xf3   :  { %v509_v6 = vadd.f32 %v794_v56, %v722_v4  ;;  %v614_v45 = vadd.f32 %v613_v40, %v599_v37 }
  0xf4   :  { %v724_v7 = vpop.f32.mrf.mxu0  ;;  %v801_v18 = vpop.f32.mrf.mxu1 }
  0xf5   :  { %563 = vst [vmem:[%s1080_s2 + $0x18] sm:$0xff] %v509_v6  ;;  %v725_v9 = vadd.f32 %v724_v7, %v723_v5  ;;  %v600_v42 = vmul.f32 %v509_v6, %v509_v6  ;;  %v578_v46 = vadd.f32 %v577_v41, %v509_v6 }
  0xf6   :  { %v726_v10 = vpop.f32.mrf.mxu0  ;;  %v529_v23 = vpop.f32.mrf.mxu1 }
  0xf7   :  { %v514_v11 = vadd.f32 %v725_v9, %v513_v3  ;;  %v615_v52 = vadd.f32 %v614_v45, %v600_v42 }
  0xf8   :  { %v727_v12 = vpop.f32.mrf.mxu0  ;;  %v802_v28 = vpop.f32.mrf.mxu1 }
  0xf9   :  { %564 = vst [vmem:[%s1080_s2 + $0x20] sm:$0xff] %v514_v11  ;;  %v728_v14 = vadd.f32 %v727_v12, %v726_v10  ;;  %v601_v47 = vmul.f32 %v514_v11, %v514_v11  ;;  %v579_v51 = vadd.f32 %v578_v46, %v514_v11 }
  0xfa   :  { %v729_v15 = vpop.f32.mrf.mxu0  ;;  %v532_v34 = vpop.f32.mrf.mxu1 }
  0xfb   :  { %v517_v16 = vadd.f32 %v728_v14, %v516_v13  ;;  %v616_v56 = vadd.f32 %v615_v52, %v601_v47 }
  0xfc   :  { %v730_v17 = vpop.f32.mrf.mxu0  ;;  %v805_v50 = vpop.f32.mrf.mxu1 }
  0xfd   :  { %565 = vst [vmem:[%s1080_s2 + $0x28] sm:$0xff] %v517_v16  ;;  %v731_v19 = vadd.f32 %v730_v17, %v729_v15  ;;  %v602_v53 = vmul.f32 %v517_v16, %v517_v16  ;;  %v580_v57 = vadd.f32 %v579_v51, %v517_v16 }
  0xfe   :  { %v732_v20 = vpop.f32.mrf.mxu0  ;;  %v545_v61 = vpop.f32.mrf.mxu1 }
  0xff   :  { %v522_v21 = vadd.f32 %v797_v62, %v731_v19  ;;  %v617_v62 = vadd.f32 %v616_v56, %v602_v53 }
 0x100   :  { %v733_v22 = vpop.f32.mrf.mxu0 }
 0x101   :  { %566 = vst [vmem:[%s1080_s2 + $0x30] sm:$0xff] %v522_v21  ;;  %v734_v24 = vadd.f32 %v733_v22, %v732_v20  ;;  %v603_v58 = vmul.f32 %v522_v21, %v522_v21  ;;  %v581_v63 = vadd.f32 %v580_v57, %v522_v21 }
 0x102   :  { %v735_v25 = vpop.f32.mrf.mxu0 }
 0x103   :  { %v525_v26 = vadd.f32 %v798_v8, %v734_v24  ;;  %v618_v3 = vadd.f32 %v617_v62, %v603_v58  ;;  %v806_v8 = vpop.f32.mrf.mxu1 }
 0x104   :  { %v736_v27 = vpop.f32.mrf.mxu0 }
 0x105   :  { %567 = vst [vmem:[%s1080_s2 + $0x38] sm:$0xff] %v525_v26  ;;  %v737_v29 = vadd.f32 %v736_v27, %v735_v25  ;;  %v604_v0 = vmul.f32 %v525_v26, %v525_v26  ;;  %v582_v4 = vadd.f32 %v581_v63, %v525_v26 }
 0x106   :  { %v738_v30 = vpop.f32.mrf.mxu0 }
 0x107   :  { %v530_v32 = vadd.f32 %v737_v29, %v529_v23  ;;  %v619_v10 = vadd.f32 %v618_v3, %v604_v0 }
 0x108   :  { %v739_v33 = vpop.f32.mrf.mxu0 }
 0x109   :  { %568 = vst [vmem:[%s1080_s2 + $0x40] sm:$0xff] %v530_v32  ;;  %v740_v38 = vadd.f32 %v739_v33, %v738_v30  ;;  %v605_v5 = vmul.f32 %v530_v32, %v530_v32  ;;  %v583_v9 = vadd.f32 %v582_v4, %v530_v32 }
 0x10a   :  { %v741_v39 = vpop.f32.mrf.mxu0 }
 0x10b   :  { %v533_v43 = vadd.f32 %v740_v38, %v532_v34  ;;  %v620_v14 = vadd.f32 %v619_v10, %v605_v5 }
 0x10c   :  { %v742_v44 = vpop.f32.mrf.mxu0 }
 0x10d   :  { %569 = vst [vmem:[%s1080_s2 + $0x48] sm:$0xff] %v533_v43  ;;  %v743_v48 = vadd.f32 %v742_v44, %v741_v39  ;;  %v606_v11 = vmul.f32 %v533_v43, %v533_v43  ;;  %v584_v15 = vadd.f32 %v583_v9, %v533_v43 }
 0x10e   :  { %v744_v49 = vpop.f32.mrf.mxu0 }
 0x10f   :  { %v538_v54 = vadd.f32 %v801_v18, %v743_v48  ;;  %v548_v18 = vpop.f32.mrf.mxu1  ;;  %v621_v20 = vadd.f32 %v620_v14, %v606_v11 }
 0x110   :  { %v745_v55 = vpop.f32.mrf.mxu0 }
 0x111   :  { %570 = vst [vmem:[%s1080_s2 + $0x50] sm:$0xff] %v538_v54  ;;  %v746_v59 = vadd.f32 %v745_v55, %v744_v49  ;;  %v607_v16 = vmul.f32 %v538_v54, %v538_v54  ;;  %v585_v21 = vadd.f32 %v584_v15, %v538_v54 }
 0x112   :  { %v747_v60 = vpop.f32.mrf.mxu0 }
 0x113   :  { %v541_v1 = vadd.f32 %v802_v28, %v746_v59  ;;  %v622_v25 = vadd.f32 %v621_v20, %v607_v16 }
 0x114   :  { %v748_v2 = vpop.f32.mrf.mxu0 }
 0x115   :  { %571 = vst [vmem:[%s1080_s2 + $0x58] sm:$0xff] %v541_v1  ;;  %v749_v6 = vadd.f32 %v748_v2, %v747_v60  ;;  %v608_v22 = vmul.f32 %v541_v1, %v541_v1  ;;  %v586_v26 = vadd.f32 %v585_v21, %v541_v1 }
 0x116   :  { %v750_v7 = vpop.f32.mrf.mxu0 }
 0x117   :  { %v546_v12 = vadd.f32 %v749_v6, %v545_v61  ;;  %v623_v31 = vadd.f32 %v622_v25, %v608_v22 }
 0x118   :  { %v751_v13 = vpop.f32.mrf.mxu0 }
 0x119   :  { %572 = vst [vmem:[%s1080_s2 + $0x60] sm:$0xff] %v546_v12  ;;  %v752_v17 = vadd.f32 %v751_v13, %v750_v7  ;;  %v609_v27 = vmul.f32 %v546_v12, %v546_v12  ;;  %v587_v30 = vadd.f32 %v586_v26, %v546_v12 }
 0x11a   :  { %v753_v19 = vpop.f32.mrf.mxu0 }
 0x11b   :  { %v549_v23 = vadd.f32 %v752_v17, %v548_v18  ;;  %v624_v35 = vadd.f32 %v623_v31, %v609_v27 }
 0x11c   :  { %v754_v24 = vpop.f32.mrf.mxu0 }
 0x11d   :  { %573 = vst [vmem:[%s1080_s2 + $0x68] sm:$0xff] %v549_v23  ;;  %v755_v28 = vadd.f32 %v754_v24, %v753_v19  ;;  %v610_v32 = vmul.f32 %v549_v23, %v549_v23  ;;  %v588_v36 = vadd.f32 %v587_v30, %v549_v23 }
 0x11e   :  { %v756_v29 = vpop.f32.mrf.mxu0 }
 0x11f   :  { %v554_v33 = vadd.f32 %v805_v50, %v755_v28  ;;  %v625_v39 = vadd.f32 %v624_v35, %v610_v32 }
 0x120   :  { %v757_v34 = vpop.f32.mrf.mxu0 }
 0x121   :  { %574 = vst [vmem:[%s1080_s2 + $0x70] sm:$0xff] %v554_v33  ;;  %v611_v37 = vmul.f32 %v554_v33, %v554_v33  ;;  %v758_v38 = vadd.f32 %v757_v34, %v756_v29  ;;  %v589_v40 = vadd.f32 %v588_v36, %v554_v33 }
 0x123   :  { %v557_v41 = vadd.f32 %v806_v8, %v758_v38  ;;  %v626_v42 = vadd.f32 %v625_v39, %v611_v37 }
 0x125   :  { %575 = vst [vmem:[%s1080_s2 + $0x78] sm:$0xff] %v557_v41  ;;  %v590_v43 = vadd.f32 %v589_v40, %v557_v41  ;;  %v612_v44 = vmul.f32 %v557_v41, %v557_v41 }
 0x127   :  { %v591_v45 = vrot.slane %v590_v43, 4  ;;  %v627_v46 = vadd.f32 %v626_v42, %v612_v44 }
 0x129   :  { %v592_v47 = vadd.f32 %v591_v45, %v590_v43  ;;  %v628_v48 = vrot.slane %v627_v46, 4 }
 0x12b   :  { %v593_v49 = vrot.slane %v592_v47, 2  ;;  %v629_v50 = vadd.f32 %v628_v48, %v627_v46 }
 0x12d   :  { %v594_v51 = vadd.f32 %v593_v49, %v592_v47  ;;  %v630_v52 = vrot.slane %v629_v50, 2 }
 0x12f   :  { %v595_v53 = vrot.slane %v594_v51, 1  ;;  %v631_v54 = vadd.f32 %v630_v52, %v629_v50 }
 0x131   :  { %v632_v55 = vrot.slane %v631_v54, 1  ;;  %v596_v56 = vadd.f32 %v595_v53, %v594_v51 }
 0x133   :  { %v633_v57 = vadd.f32 %v632_v55, %v631_v54 }
 0x135   :  { %v635_v58 = vsel %vm634_vm0, %v596_v56, %v633_v57 }
 0x136   :  { %v637_v59 = vsel %vm636_vm1, %v635_v58, 0.0 }
 0x137   :  { %638 = vst [vmem:[%s1081_s3] sm:$0xff] %v637_v59 }

// kernel: _lambda_.28
= control target key start
LH: loop header
LB: loop body
LE: loop exit
PB: predicated region body
PF: predicated region fallthrough
CT: control target
= control target key end

     0   :  { %s344_s0 = inlined_call_operand.vmem [shape: f32[128,128], index: 0, kind: input, shape index: {}]   ;;  %s345_s1 = inlined_call_operand.vmem [shape: f32[1,128], index: 1, kind: input, shape index: {}]   ;;  %s346_s2 = inlined_call_operand.vmem [shape: f32[1,128], index: 2, kind: input, shape index: {}]   ;;  %s347_s3 = inlined_call_operand.vmem [shape: f32[128,128], index: 3, kind: input, shape index: {}]   ;;  %s348_s4 = inlined_call_operand.vmem [shape: f32[128,128], index: 4, kind: output, shape index: {}]  }
   0x1   :  { %v17_v0 = vld [vmem:[%s344_s0] sm:$0xff]  ;;  %v18_v4 = vld [vmem:[%s344_s0 + $0x8] sm:$0xff]  ;;  %v19_v7 = vld [vmem:[%s344_s0 + $0x10] sm:$0xff] }
   0x2   :  { %v164_v1 = vld [vmem:[%s345_s1] ss:$0 sm:$0xff]  ;;  %v20_v8 = vld [vmem:[%s344_s0 + $0x18] sm:$0xff]  ;;  %v80_v10 = vld [vmem:[%s347_s3 + $0x8] sm:$0xff] }
   0x3   :  { %v169_v2 = vld [vmem:[%s346_s2] ss:$0 sm:$0xff]  ;;  %v40_v3 = vmul.f32 %v164_v1, %v17_v0  ;;  %v41_v6 = vmul.f32 %v164_v1, %v18_v4  ;;  %v42_v11 = vmul.f32 %v164_v1, %v19_v7  ;;  %v81_v12 = vld [vmem:[%s347_s3 + $0x10] sm:$0xff]  ;;  %v43_v13 = vmul.f32 %v164_v1, %v20_v8  ;;  %v82_v16 = vld [vmem:[%s347_s3 + $0x18] sm:$0xff] }
   0x4   :  { %v79_v5 = vld [vmem:[%s347_s3] sm:$0xff]  ;;  %v22_v18 = vld [vmem:[%s344_s0 + $0x28] sm:$0xff]  ;;  %v23_v19 = vld [vmem:[%s344_s0 + $0x30] sm:$0xff] }
   0x5   :  { %v63_v9 = vadd.f32 %v169_v2, %v40_v3  ;;  %v21_v14 = vld [vmem:[%s344_s0 + $0x20] sm:$0xff]  ;;  %v64_v15 = vadd.f32 %v169_v2, %v41_v6  ;;  %v65_v21 = vadd.f32 %v169_v2, %v42_v11  ;;  %v66_v22 = vadd.f32 %v169_v2, %v43_v13  ;;  %v24_v25 = vld [vmem:[%s344_s0 + $0x38] sm:$0xff]  ;;  %v84_v28 = vld [vmem:[%s347_s3 + $0x28] sm:$0xff] }
   0x6   :  { %v44_v17 = vmul.f32 %v164_v1, %v21_v14  ;;  %v83_v23 = vld [vmem:[%s347_s3 + $0x20] sm:$0xff]  ;;  %v45_v24 = vmul.f32 %v164_v1, %v22_v18  ;;  %v46_v29 = vmul.f32 %v164_v1, %v23_v19  ;;  %v47_v30 = vmul.f32 %v164_v1, %v24_v25  ;;  %v26_v32 = vld [vmem:[%s344_s0 + $0x48] sm:$0xff]  ;;  %v85_v36 = vld [vmem:[%s347_s3 + $0x30] sm:$0xff] }
   0x7   :  { %v95_v20 = vadd.f32 %v79_v5, %v63_v9  ;;  %v96_v26 = vadd.f32 %v80_v10, %v64_v15  ;;  %v25_v31 = vld [vmem:[%s344_s0 + $0x40] sm:$0xff]  ;;  %v97_v33 = vadd.f32 %v81_v12, %v65_v21  ;;  %v98_v34 = vadd.f32 %v82_v16, %v66_v22  ;;  %v86_v37 = vld [vmem:[%s347_s3 + $0x38] sm:$0xff]  ;;  %v27_v39 = vld [vmem:[%s344_s0 + $0x50] sm:$0xff] }
   0x8   :  { %v67_v27 = vadd.f32 %v169_v2, %v44_v17  ;;  %v68_v35 = vadd.f32 %v169_v2, %v45_v24  ;;  %v48_v38 = vmul.f32 %v164_v1, %v25_v31  ;;  %v69_v41 = vadd.f32 %v169_v2, %v46_v29  ;;  %v87_v43 = vld [vmem:[%s347_s3 + $0x40] sm:$0xff]  ;;  %v28_v45 = vld [vmem:[%s344_s0 + $0x58] sm:$0xff]  ;;  %v88_v49 = vld [vmem:[%s347_s3 + $0x48] sm:$0xff] }
   0x9   :  { %111 = vst [vmem:[%s348_s4] sm:$0xff] %v95_v20  ;;  %112 = vst [vmem:[%s348_s4 + $0x8] sm:$0xff] %v96_v26  ;;  %v70_v42 = vadd.f32 %v169_v2, %v47_v30  ;;  %v49_v44 = vmul.f32 %v164_v1, %v26_v32  ;;  %v29_v46 = vld [vmem:[%s344_s0 + $0x60] sm:$0xff]  ;;  %v50_v50 = vmul.f32 %v164_v1, %v27_v39  ;;  %v89_v51 = vld [vmem:[%s347_s3 + $0x50] sm:$0xff] }
   0xa   :  { %v99_v40 = vadd.f32 %v83_v23, %v67_v27  ;;  %113 = vst [vmem:[%s348_s4 + $0x10] sm:$0xff] %v97_v33  ;;  %114 = vst [vmem:[%s348_s4 + $0x18] sm:$0xff] %v98_v34  ;;  %v100_v47 = vadd.f32 %v84_v28, %v68_v35  ;;  %v71_v48 = vadd.f32 %v169_v2, %v48_v38  ;;  %v30_v53 = vld [vmem:[%s344_s0 + $0x68] sm:$0xff]  ;;  %v90_v57 = vld [vmem:[%s347_s3 + $0x58] sm:$0xff] }
   0xb   :  { %v51_v52 = vmul.f32 %v164_v1, %v28_v45  ;;  %v101_v54 = vadd.f32 %v85_v36, %v69_v41  ;;  %v102_v55 = vadd.f32 %v86_v37, %v70_v42  ;;  %v72_v56 = vadd.f32 %v169_v2, %v49_v44  ;;  %v31_v59 = vld [vmem:[%s344_s0 + $0x70] sm:$0xff]  ;;  %v32_v60 = vld [vmem:[%s344_s0 + $0x78] sm:$0xff]  ;;  %v91_v0 = vld [vmem:[%s347_s3 + $0x60] sm:$0xff] }
   0xc   :  { %115 = vst [vmem:[%s348_s4 + $0x20] sm:$0xff] %v99_v40  ;;  %v52_v58 = vmul.f32 %v164_v1, %v29_v46  ;;  %116 = vst [vmem:[%s348_s4 + $0x28] sm:$0xff] %v100_v47  ;;  %v103_v61 = vadd.f32 %v87_v43, %v71_v48  ;;  %v73_v62 = vadd.f32 %v169_v2, %v50_v50  ;;  %v92_v6 = vld [vmem:[%s347_s3 + $0x68] sm:$0xff]  ;;  %v93_v12 = vld [vmem:[%s347_s3 + $0x70] sm:$0xff] }
   0xd   :  { %v74_v63 = vadd.f32 %v169_v2, %v51_v52  ;;  %v53_v3 = vmul.f32 %v164_v1, %v30_v53  ;;  %117 = vst [vmem:[%s348_s4 + $0x30] sm:$0xff] %v101_v54  ;;  %118 = vst [vmem:[%s348_s4 + $0x38] sm:$0xff] %v102_v55  ;;  %v104_v4 = vadd.f32 %v88_v49, %v72_v56  ;;  %v94_v13 = vld [vmem:[%s347_s3 + $0x78] sm:$0xff] }
   0xe   :  { %v75_v5 = vadd.f32 %v169_v2, %v52_v58  ;;  %v54_v7 = vmul.f32 %v164_v1, %v31_v59  ;;  %v55_v8 = vmul.f32 %v164_v1, %v32_v60  ;;  %119 = vst [vmem:[%s348_s4 + $0x40] sm:$0xff] %v103_v61  ;;  %v105_v9 = vadd.f32 %v89_v51, %v73_v62 }
   0xf   :  { %v106_v10 = vadd.f32 %v90_v57, %v74_v63  ;;  %v76_v11 = vadd.f32 %v169_v2, %v53_v3  ;;  %120 = vst [vmem:[%s348_s4 + $0x48] sm:$0xff] %v104_v4 }
  0x10   :  { %v107_v1 = vadd.f32 %v91_v0, %v75_v5  ;;  %v77_v14 = vadd.f32 %v169_v2, %v54_v7  ;;  %v78_v15 = vadd.f32 %v169_v2, %v55_v8  ;;  %121 = vst [vmem:[%s348_s4 + $0x50] sm:$0xff] %v105_v9 }
  0x11   :  { %122 = vst [vmem:[%s348_s4 + $0x58] sm:$0xff] %v106_v10  ;;  %v108_v16 = vadd.f32 %v92_v6, %v76_v11 }
  0x12   :  { %123 = vst [vmem:[%s348_s4 + $0x60] sm:$0xff] %v107_v1  ;;  %v109_v17 = vadd.f32 %v93_v12, %v77_v14  ;;  %v110_v18 = vadd.f32 %v94_v13, %v78_v15 }
  0x13   :  { %124 = vst [vmem:[%s348_s4 + $0x68] sm:$0xff] %v108_v16 }
  0x14   :  { %125 = vst [vmem:[%s348_s4 + $0x70] sm:$0xff] %v109_v17  ;;  %126 = vst [vmem:[%s348_s4 + $0x78] sm:$0xff] %v110_v18 }

// kernel: _lambda_.25
= control target key start
LH: loop header
LB: loop body
LE: loop exit
PB: predicated region body
PF: predicated region fallthrough
CT: control target
= control target key end

     0   :  { %vm955_vm0 = vcmask 1040384   ;;  %vm957_vm1 = vcmask 1041408   ;;  %s1737_s1 = inlined_call_operand.vmem [shape: bf16[640,128], index: 1, kind: input, shape index: {}]   ;;  %s1738_s0 = inlined_call_operand.vmem [shape: bf16[128,640], index: 0, kind: input, shape index: {}]   ;;  %s1739_s2 = inlined_call_operand.vmem [shape: f32[128,128], index: 2, kind: output, shape index: {0}]   ;;  %s1740_s3 = inlined_call_operand.vmem [shape: f32[8,128], index: 3, kind: output, shape index: {1}]  }
   0x1   :  { %v1240_v0 = vld [vmem:[%s1737_s1 + $0x78] sm:$0xff]   ;;  %v1244_v4 = vld [vmem:[%s1737_s1 + $0x70] sm:$0xff]   ;;  %v1248_v8 = vld [vmem:[%s1737_s1 + $0x68] sm:$0xff]  }
   0x2   :  { %v1241_v1 = vld [vmem:[%s1737_s1 + $0xf8] sm:$0xff]   ;;  %1048 = vmatprep.subr.bf16.mxu0 %v1240_v0  ;;  %v1245_v5 = vld [vmem:[%s1737_s1 + $0xf0] sm:$0xff]   ;;  %v1249_v9 = vld [vmem:[%s1737_s1 + $0xe8] sm:$0xff]  }
   0x3   :  { %v1242_v2 = vld [vmem:[%s1737_s1 + $0x38] sm:$0xff]   ;;  %1112 = vmatprep.subr.bf16.mxu1 %v1241_v1  ;;  %v1246_v6 = vld [vmem:[%s1737_s1 + $0x30] sm:$0xff]   ;;  %v1250_v10 = vld [vmem:[%s1737_s1 + $0x28] sm:$0xff]  }
   0x4   :  { %v1243_v3 = vld [vmem:[%s1737_s1 + $0xb8] sm:$0xff]   ;;  %1049 = vmatpush3.bf16.msra.mxu0 %v1242_v2  ;;  %v1247_v7 = vld [vmem:[%s1737_s1 + $0xb0] sm:$0xff]   ;;  %v1251_v11 = vld [vmem:[%s1737_s1 + $0xa8] sm:$0xff]  }
   0x5   :  { %1113 = vmatpush3.bf16.msra.mxu1 %v1243_v3  ;;  %1050 = vmatprep.subr.bf16.mxu0 %v1244_v4  ;;  %v1252_v12 = vld [vmem:[%s1737_s1 + $0x60] sm:$0xff]   ;;  %v1256_v16 = vld [vmem:[%s1737_s1 + $0x58] sm:$0xff]   ;;  %v1260_v20 = vld [vmem:[%s1737_s1 + $0x50] sm:$0xff]  }
   0x6   :  { %1114 = vmatprep.subr.bf16.mxu1 %v1245_v5  ;;  %v1253_v13 = vld [vmem:[%s1737_s1 + $0xe0] sm:$0xff]   ;;  %v1257_v17 = vld [vmem:[%s1737_s1 + $0xd8] sm:$0xff]   ;;  %v1261_v21 = vld [vmem:[%s1737_s1 + $0xd0] sm:$0xff]  }
   0x7   :  { %v1254_v14 = vld [vmem:[%s1737_s1 + $0x20] sm:$0xff]   ;;  %v1258_v18 = vld [vmem:[%s1737_s1 + $0x18] sm:$0xff]   ;;  %v1262_v22 = vld [vmem:[%s1737_s1 + $0x10] sm:$0xff]  }
   0x8   :  { %1051 = vmatpush3.bf16.msra.mxu0 %v1246_v6  ;;  %v1255_v15 = vld [vmem:[%s1737_s1 + $0xa0] sm:$0xff]   ;;  %v1259_v19 = vld [vmem:[%s1737_s1 + $0x98] sm:$0xff]   ;;  %v1263_v23 = vld [vmem:[%s1737_s1 + $0x90] sm:$0xff]  }
   0x9   :  { %1115 = vmatpush3.bf16.msra.mxu1 %v1247_v7  ;;  %1052 = vmatprep.subr.bf16.mxu0 %v1248_v8  ;;  %v1264_v24 = vld [vmem:[%s1737_s1 + $0x48] sm:$0xff]   ;;  %v1268_v28 = vld [vmem:[%s1737_s1 + $0x40] sm:$0xff]   ;;  %v1278_v36 = vld [vmem:[%s1737_s1 + $0x138] sm:$0xff]  }
   0xa   :  { %1116 = vmatprep.subr.bf16.mxu1 %v1249_v9  ;;  %v1265_v25 = vld [vmem:[%s1737_s1 + $0xc8] sm:$0xff]   ;;  %v1269_v29 = vld [vmem:[%s1737_s1 + $0xc0] sm:$0xff]   ;;  %v1285_v39 = vld [vmem:[%s1737_s1 + $0x130] sm:$0xff]  }
   0xb   :  { %v1266_v26 = vld [vmem:[%s1737_s1 + $0x8] sm:$0xff]   ;;  %v1270_v30 = vld [vmem:[%s1737_s1] sm:$0xff]   ;;  %v1288_v43 = vld [vmem:[%s1738_s0 + $0x5c] ss:$20 sps:$4 sm:$0xff]  }
   0xc   :  { %1053 = vmatpush3.bf16.msra.mxu0 %v1250_v10  ;;  %v1267_v27 = vld [vmem:[%s1737_s1 + $0x88] sm:$0xff]   ;;  %v1271_v31 = vld [vmem:[%s1737_s1 + $0x80] sm:$0xff]   ;;  %v1293_v48 = vld [vmem:[%s1738_s0 + $0x7c] ss:$20 sps:$4 sm:$0xff]  }
   0xd   :  { %1117 = vmatpush3.bf16.msra.mxu1 %v1251_v11  ;;  %1054 = vmatprep.subr.bf16.mxu0 %v1252_v12  ;;  %v1272_v32 = vld [vmem:[%s1738_s0] ss:$20 sps:$4 sm:$0xff]   ;;  %v1274_v33 = vld [vmem:[%s1738_s0 + $0x4] ss:$20 sps:$4 sm:$0xff]   ;;  %v1275_v34 = vld [vmem:[%s1738_s0 + $0x8] ss:$20 sps:$4 sm:$0xff]  }
   0xe   :  { %1118 = vmatprep.subr.bf16.mxu1 %v1253_v13  ;;  %v1277_v35 = vld [vmem:[%s1738_s0 + $0xc] ss:$20 sps:$4 sm:$0xff]   ;;  %622 = vmatprep.mubr.bf16.mxu0 %v1274_v33  ;;  %v1281_v38 = vld [vmem:[%s1738_s0 + $0x34] ss:$20 sps:$4 sm:$0xff]   ;;  %v1284_v41 = vld [vmem:[%s1738_s0 + $0x30] ss:$20 sps:$4 sm:$0xff]  }
   0xf   :  { %719 = vmatprep.mubr.bf16.mxu1 %v1277_v35  ;;  %v1279_v37 = vld [vmem:[%s1738_s0 + $0x2c] ss:$20 sps:$4 sm:$0xff]   ;;  %v1283_v40 = vld [vmem:[%s1738_s0 + $0x28] ss:$20 sps:$4 sm:$0xff]   ;;  %v1290_v46 = vld [vmem:[%s1738_s0 + $0x50] ss:$20 sps:$4 sm:$0xff]  }
  0x10   :  { %1055 = vmatpush3.bf16.msra.mxu0 %v1254_v14  ;;  %v1286_v42 = vld [vmem:[%s1738_s0 + $0x54] ss:$20 sps:$4 sm:$0xff]   ;;  %v1299_v45 = vld [vmem:[%s1737_s1 + $0x120] sm:$0xff]   ;;  %v1291_v47 = vld [vmem:[%s1738_s0 + $0x58] ss:$20 sps:$4 sm:$0xff]  }
  0x11   :  { %1119 = vmatpush3.bf16.msra.mxu1 %v1255_v15  ;;  %1056 = vmatprep.subr.bf16.mxu0 %v1256_v16  ;;  %v1292_v44 = vld [vmem:[%s1737_s1 + $0x128] sm:$0xff]   ;;  %v1295_v49 = vld [vmem:[%s1738_s0 + $0x84] ss:$20 sps:$4 sm:$0xff]   ;;  %v1313_v51 = vld [vmem:[%s1737_s1 + $0x110] sm:$0xff]  }
  0x12   :  { %1120 = vmatprep.subr.bf16.mxu1 %v1257_v17  ;;  %v1306_v50 = vld [vmem:[%s1737_s1 + $0x118] sm:$0xff]   ;;  %v1298_v53 = vld [vmem:[%s1738_s0 + $0x80] ss:$20 sps:$4 sm:$0xff]   ;;  %v1320_v55 = vld [vmem:[%s1737_s1 + $0x108] sm:$0xff]  }
  0x13   :  { %v1297_v52 = vld [vmem:[%s1738_s0 + $0x78] ss:$20 sps:$4 sm:$0xff]   ;;  %v1327_v57 = vld [vmem:[%s1737_s1 + $0x100] sm:$0xff]   ;;  %v1305_v59 = vld [vmem:[%s1738_s0 + $0xa8] ss:$20 sps:$4 sm:$0xff]  }
  0x14   :  { %1057 = vmatpush3.bf16.msra.mxu0 %v1258_v18  ;;  %v1300_v54 = vld [vmem:[%s1738_s0 + $0xa4] ss:$20 sps:$4 sm:$0xff]   ;;  %v1302_v56 = vld [vmem:[%s1738_s0 + $0xac] ss:$20 sps:$4 sm:$0xff]   ;;  %v1309_v61 = vld [vmem:[%s1738_s0 + $0xd4] ss:$20 sps:$4 sm:$0xff]  }
  0x15   :  { %1121 = vmatpush3.bf16.msra.mxu1 %v1259_v19  ;;  %1058 = vmatprep.subr.bf16.mxu0 %v1260_v20  ;;  %v1304_v58 = vld [vmem:[%s1738_s0 + $0xa0] ss:$20 sps:$4 sm:$0xff]   ;;  %v1311_v62 = vld [vmem:[%s1738_s0 + $0xc8] ss:$20 sps:$4 sm:$0xff]   ;;  %v1312_v63 = vld [vmem:[%s1738_s0 + $0xd0] ss:$20 sps:$4 sm:$0xff]  }
  0x16   :  { %1122 = vmatprep.subr.bf16.mxu1 %v1261_v21  ;;  %v1307_v60 = vld [vmem:[%s1738_s0 + $0xcc] ss:$20 sps:$4 sm:$0xff]   ;;  %v1314_v0 = vld [vmem:[%s1738_s0 + $0xf4] ss:$20 sps:$4 sm:$0xff]   ;;  %v1316_v1 = vld [vmem:[%s1738_s0 + $0xfc] ss:$20 sps:$4 sm:$0xff]  }
  0x17   :  { %v1318_v2 = vld [vmem:[%s1738_s0 + $0xf0] ss:$20 sps:$4 sm:$0xff]   ;;  %v1319_v3 = vld [vmem:[%s1738_s0 + $0xf8] ss:$20 sps:$4 sm:$0xff]   ;;  %v1326_v7 = vld [vmem:[%s1738_s0 + $0x120] ss:$20 sps:$4 sm:$0xff]  }
  0x18   :  { %1059 = vmatpush3.bf16.msra.mxu0 %v1262_v22  ;;  %v1321_v4 = vld [vmem:[%s1738_s0 + $0x11c] ss:$20 sps:$4 sm:$0xff]   ;;  %v1323_v5 = vld [vmem:[%s1738_s0 + $0x124] ss:$20 sps:$4 sm:$0xff]   ;;  %v1332_v12 = vld [vmem:[%s1738_s0 + $0x60] ss:$20 sps:$4 sm:$0xff]  }
  0x19   :  { %1123 = vmatpush3.bf16.msra.mxu1 %v1263_v23  ;;  %1060 = vmatprep.subr.bf16.mxu0 %v1264_v24  ;;  %v1325_v6 = vld [vmem:[%s1738_s0 + $0x118] ss:$20 sps:$4 sm:$0xff]   ;;  %v1328_v8 = vld [vmem:[%s1738_s0 + $0x10] ss:$20 sps:$4 sm:$0xff]   ;;  %v1333_v13 = vld [vmem:[%s1738_s0 + $0x100] ss:$20 sps:$4 sm:$0xff]  }
  0x1a   :  { %1124 = vmatprep.subr.bf16.mxu1 %v1265_v25  ;;  %v1329_v9 = vld [vmem:[%s1738_s0 + $0xb0] ss:$20 sps:$4 sm:$0xff]   ;;  %v1330_v10 = vld [vmem:[%s1738_s0 + $0x38] ss:$20 sps:$4 sm:$0xff]   ;;  %v1334_v14 = vld [vmem:[%s1738_s0 + $0x88] ss:$20 sps:$4 sm:$0xff]  }
  0x1b   :  { %v1331_v11 = vld [vmem:[%s1738_s0 + $0xd8] ss:$20 sps:$4 sm:$0xff]   ;;  %v1335_v15 = vld [vmem:[%s1738_s0 + $0x128] ss:$20 sps:$4 sm:$0xff]  }
  0x1c   :  { %1061 = vmatpush3.bf16.msra.mxu0 %v1266_v26 }
  0x1d   :  { %1125 = vmatpush3.bf16.msra.mxu1 %v1267_v27  ;;  %1062 = vmatprep.subr.bf16.mxu0 %v1268_v28 }
  0x1e   :  { %1126 = vmatprep.subr.bf16.mxu1 %v1269_v29 }
  0x20   :  { %1063 = vmatpush3.bf16.msra.mxu0 %v1270_v30 }
  0x21   :  { %1127 = vmatpush3.bf16.msra.mxu1 %v1271_v31  ;;  %1192 = vmatprep.subr.bf16.mxu0 %v1278_v36 }
  0x22   :  { %1224 = vmatprep.subr.bf16.mxu1 %v1278_v36 }
  0x23   :  { %623 = vmatmul.mubr.bf16.vlgmr.msra.gmra.mxu0 %v1272_v32 }
  0x24   :  { %720 = vmatmul.mubr.bf16.vlgmr.msra.gmra.mxu1 %v1275_v34  ;;  %1193 = vmatpush3.bf16.msra.mxu0 %v1278_v36 }
  0x25   :  { %630 = vmatprep.mubr.bf16.mxu0 %v1279_v37  ;;  %727 = vmatprep.mubr.bf16.mxu1 %v1281_v38 }
  0x26   :  { %1232 = vmatpush3.bf16.msra.mxu1 %v1278_v36  ;;  %1194 = vmatprep.subr.bf16.mxu0 %v1285_v39 }
  0x27   :  { %1225 = vmatprep.subr.bf16.mxu1 %v1285_v39 }
  0x28   :  { %1195 = vmatpush3.bf16.msra.mxu0 %v1285_v39 }
  0x29   :  { %1196 = vmatprep.subr.bf16.mxu0 %v1292_v44 }
  0x2a   :  { %1233 = vmatpush3.bf16.msra.mxu1 %v1285_v39 }
  0x2b   :  { %631 = vmatmul.mubr.bf16.gmra.mxu0 %v1283_v40  ;;  %1226 = vmatprep.subr.bf16.mxu1 %v1292_v44 }
  0x2c   :  { %728 = vmatmul.mubr.bf16.gmra.mxu1 %v1284_v41  ;;  %638 = vmatprep.mubr.bf16.mxu0 %v1286_v42 }
  0x2d   :  { %735 = vmatprep.mubr.bf16.mxu1 %v1288_v43  ;;  %1197 = vmatpush3.bf16.msra.mxu0 %v1292_v44 }
  0x2e   :  { %1198 = vmatprep.subr.bf16.mxu0 %v1299_v45  ;;  %1234 = vmatpush3.bf16.msra.mxu1 %v1292_v44 }
  0x2f   :  { %1227 = vmatprep.subr.bf16.mxu1 %v1299_v45 }
  0x31   :  { %1199 = vmatpush3.bf16.msra.mxu0 %v1299_v45 }
  0x32   :  { %1200 = vmatprep.subr.bf16.mxu0 %v1306_v50  ;;  %1235 = vmatpush3.bf16.msra.mxu1 %v1299_v45 }
  0x33   :  { %639 = vmatmul.mubr.bf16.gmra.mxu0 %v1290_v46  ;;  %1228 = vmatprep.subr.bf16.mxu1 %v1306_v50 }
  0x34   :  { %736 = vmatmul.mubr.bf16.gmra.mxu1 %v1291_v47  ;;  %646 = vmatprep.mubr.bf16.mxu0 %v1293_v48 }
  0x35   :  { %743 = vmatprep.mubr.bf16.mxu1 %v1295_v49  ;;  %1201 = vmatpush3.bf16.msra.mxu0 %v1306_v50 }
  0x36   :  { %1202 = vmatprep.subr.bf16.mxu0 %v1313_v51  ;;  %1236 = vmatpush3.bf16.msra.mxu1 %v1306_v50 }
  0x37   :  { %1229 = vmatprep.subr.bf16.mxu1 %v1313_v51 }
  0x39   :  { %1203 = vmatpush3.bf16.msra.mxu0 %v1313_v51 }
  0x3a   :  { %1204 = vmatprep.subr.bf16.mxu0 %v1320_v55  ;;  %1237 = vmatpush3.bf16.msra.mxu1 %v1313_v51 }
  0x3b   :  { %647 = vmatmul.mubr.bf16.gmra.mxu0 %v1297_v52  ;;  %1230 = vmatprep.subr.bf16.mxu1 %v1320_v55 }
  0x3c   :  { %744 = vmatmul.mubr.bf16.gmra.mxu1 %v1298_v53  ;;  %654 = vmatprep.mubr.bf16.mxu0 %v1300_v54 }
  0x3d   :  { %751 = vmatprep.mubr.bf16.mxu1 %v1302_v56  ;;  %1205 = vmatpush3.bf16.msra.mxu0 %v1320_v55 }
  0x3e   :  { %1206 = vmatprep.subr.bf16.mxu0 %v1327_v57  ;;  %1238 = vmatpush3.bf16.msra.mxu1 %v1320_v55 }
  0x3f   :  { %1231 = vmatprep.subr.bf16.mxu1 %v1327_v57 }
  0x41   :  { %1207 = vmatpush3.bf16.msra.mxu0 %v1327_v57 }
  0x42   :  { %1239 = vmatpush3.bf16.msra.mxu1 %v1327_v57 }
  0x43   :  { %655 = vmatmul.mubr.bf16.gmra.mxu0 %v1304_v58 }
  0x44   :  { %752 = vmatmul.mubr.bf16.gmra.mxu1 %v1305_v59  ;;  %662 = vmatprep.mubr.bf16.mxu0 %v1307_v60 }
  0x45   :  { %759 = vmatprep.mubr.bf16.mxu1 %v1309_v61 }
  0x4b   :  { %663 = vmatmul.mubr.bf16.gmra.mxu0 %v1311_v62 }
  0x4c   :  { %760 = vmatmul.mubr.bf16.gmra.mxu1 %v1312_v63  ;;  %670 = vmatprep.mubr.bf16.mxu0 %v1314_v0 }
  0x4d   :  { %767 = vmatprep.mubr.bf16.mxu1 %v1316_v1 }
  0x53   :  { %671 = vmatmul.mubr.bf16.gmra.mxu0 %v1318_v2 }
  0x54   :  { %768 = vmatmul.mubr.bf16.gmra.mxu1 %v1319_v3  ;;  %678 = vmatprep.mubr.bf16.mxu0 %v1321_v4 }
  0x55   :  { %775 = vmatprep.mubr.bf16.mxu1 %v1323_v5 }
  0x5b   :  { %679 = vmatmul.mubr.bf16.gmra.mxu0 %v1325_v6 }
  0x5c   :  { %776 = vmatmul.mubr.bf16.gmra.mxu1 %v1326_v7  ;;  %1208 = vmatprep.mubr.bf16.mxu0 %v1328_v8 }
  0x5d   :  { %1216 = vmatprep.mubr.bf16.mxu1 %v1329_v9 }
  0x63   :  { %1209 = vmatmul.mubr.bf16.vlgmr.msra.gmra.mxu0 %v1330_v10 }
  0x64   :  { %1217 = vmatmul.mubr.bf16.vlgmr.msra.gmra.mxu1 %v1331_v11  ;;  %1212 = vmatprep.mubr.bf16.mxu0 %v1332_v12 }
  0x65   :  { %1220 = vmatprep.mubr.bf16.mxu1 %v1333_v13 }
  0x6b   :  { %1213 = vmatmul.mubr.bf16.gmra.mxu0 %v1334_v14 }
  0x6c   :  { %1221 = vmatmul.mubr.bf16.gmra.mxu1 %v1335_v15 }
  0xe3   :  { %v1064_v16 = vpop.f32.mrf.mxu0 }
  0xe4   :  { %v1128_v17 = vpop.f32.mrf.mxu1 }
  0xe5   :  { %v1065_v18 = vpop.f32.mrf.mxu0 }
  0xe6   :  { %v1129_v19 = vpop.f32.mrf.mxu1  ;;  %v1066_v11 = vadd.f32 %v1065_v18, %v1064_v16 }
  0xe7   :  { %v1596_v20 = vpop.f32.mrf.mxu0  ;;  %v1130_v12 = vadd.f32 %v1129_v19, %v1128_v17 }
  0xe8   :  { %v1598_v21 = vpop.f32.mrf.mxu1 }
  0xe9   :  { %v1600_v22 = vpop.f32.mrf.mxu0  ;;  %v722_v18 = vadd.f32 %v1130_v12, %v1066_v11 }
  0xea   :  { %v1602_v23 = vpop.f32.mrf.mxu1 }
  0xeb   :  { %v1070_v24 = vpop.f32.mrf.mxu0 }
  0xec   :  { %v1134_v25 = vpop.f32.mrf.mxu1 }
  0xed   :  { %v1071_v26 = vpop.f32.mrf.mxu0 }
  0xee   :  { %v1135_v27 = vpop.f32.mrf.mxu1  ;;  %v1072_v13 = vadd.f32 %v1071_v26, %v1070_v24 }
  0xef   :  { %v1073_v28 = vpop.f32.mrf.mxu0  ;;  %v1136_v14 = vadd.f32 %v1135_v27, %v1134_v25 }
  0xf0   :  { %v1137_v29 = vpop.f32.mrf.mxu1 }
  0xf1   :  { %v1074_v30 = vpop.f32.mrf.mxu0  ;;  %v730_v17 = vadd.f32 %v1136_v14, %v1072_v13 }
  0xf2   :  { %v1138_v31 = vpop.f32.mrf.mxu1 }
  0xf3   :  { %v1604_v32 = vpop.f32.mrf.mxu0 }
  0xf4   :  { %v1606_v33 = vpop.f32.mrf.mxu1 }
  0xf5   :  { %v1608_v34 = vpop.f32.mrf.mxu0 }
  0xf6   :  { %v1610_v35 = vpop.f32.mrf.mxu1 }
  0xf7   :  { %v1612_v36 = vpop.f32.mrf.mxu0 }
  0xf8   :  { %1741 = vst [vmem:[#allocation2_spill] sm:$0xff] %v1612_v36  ;;  %v1614_v37 = vpop.f32.mrf.mxu1 }
  0xf9   :  { %1742 = vst [vmem:[#allocation3_spill] sm:$0xff] %v1614_v37  ;;  %v1616_v38 = vpop.f32.mrf.mxu0  ;;  %v1139_v37 = vadd.f32 %v1138_v31, %v1137_v29  ;;  %v1142_v29 = vadd.f32 %v1610_v35, %v1606_v33 }
  0xfa   :  { %1743 = vst [vmem:[#allocation4_spill] sm:$0xff] %v1616_v38  ;;  %v1618_v39 = vpop.f32.mrf.mxu1 }
  0xfb   :  { %1744 = vst [vmem:[#allocation5_spill] sm:$0xff] %v1618_v39  ;;  %v1082_v40 = vpop.f32.mrf.mxu0  ;;  %v1075_v39 = vadd.f32 %v1074_v30, %v1073_v28  ;;  %v1078_v28 = vadd.f32 %v1608_v34, %v1604_v32 }
  0xfc   :  { %v1620_v41 = vpop.f32.mrf.mxu1 }
  0xfd   :  { %v1083_v42 = vpop.f32.mrf.mxu0  ;;  %v733_v27 = vadd.f32 %v1139_v37, %v1075_v39 }
  0xfe   :  { %v1622_v43 = vpop.f32.mrf.mxu1  ;;  %v1084_v30 = vadd.f32 %v1083_v42, %v1082_v40 }
  0xff   :  { %v1624_v44 = vpop.f32.mrf.mxu0 }
 0x100   :  { %v1626_v45 = vpop.f32.mrf.mxu1 }
 0x101   :  { %v1628_v46 = vpop.f32.mrf.mxu0 }
 0x102   :  { %v1630_v47 = vpop.f32.mrf.mxu1  ;;  %v1087_v37 = vadd.f32 %v1628_v46, %v1624_v44  ;;  %v1754_v44 = vld [vmem:[#allocation4_spill] sm:$0xff] }
 0x103   :  { %1745 = vst [vmem:[#allocation6_spill] sm:$0xff] %v1630_v47  ;;  %v1088_v48 = vpop.f32.mrf.mxu0 }
 0x104   :  { %v1152_v49 = vpop.f32.mrf.mxu1 }
 0x105   :  { %v1089_v50 = vpop.f32.mrf.mxu0 }
 0x106   :  { %v1153_v51 = vpop.f32.mrf.mxu1  ;;  %v1090_v36 = vadd.f32 %v1089_v50, %v1088_v48  ;;  %v1148_v50 = vadd.f32 %v1622_v43, %v1620_v41  ;;  %v1753_v43 = vld [vmem:[#allocation2_spill] sm:$0xff] }
 0x107   :  { %v1091_v52 = vpop.f32.mrf.mxu0 }
 0x108   :  { %v1155_v53 = vpop.f32.mrf.mxu1 }
 0x109   :  { %v1092_v54 = vpop.f32.mrf.mxu0 }
 0x10a   :  { %v1156_v55 = vpop.f32.mrf.mxu1  ;;  %v1752_v32 = vld [vmem:[#allocation6_spill] sm:$0xff] }
 0x10b   :  { %v1094_v56 = vpop.f32.mrf.mxu0  ;;  %v1157_v48 = vadd.f32 %v1156_v55, %v1155_v53  ;;  %v1151_v34 = vadd.f32 %v1752_v32, %v1626_v45  ;;  %v1081_v45 = vadd.f32 %v1754_v44, %v1753_v43  ;;  %v738_v53 = vadd.f32 %v1142_v29, %v1078_v28 }
 0x10c   :  { %v1158_v57 = vpop.f32.mrf.mxu1 }
 0x10d   :  { %v1095_v58 = vpop.f32.mrf.mxu0 }
 0x10e   :  { %v1159_v59 = vpop.f32.mrf.mxu1 }
 0x10f   :  { %v1097_v60 = vpop.f32.mrf.mxu0 }
 0x110   :  { %v1161_v61 = vpop.f32.mrf.mxu1 }
 0x111   :  { %v1098_v62 = vpop.f32.mrf.mxu0 }
 0x112   :  { %v1162_v63 = vpop.f32.mrf.mxu1  ;;  %v1099_v19 = vadd.f32 %v1098_v62, %v1097_v60  ;;  %v1758_v62 = vld [vmem:[#allocation5_spill] sm:$0xff] }
 0x113   :  { %v1632_v0 = vpop.f32.mrf.mxu0  ;;  %v1163_v24 = vadd.f32 %v1162_v63, %v1161_v61  ;;  %v1757_v61 = vld [vmem:[#allocation3_spill] sm:$0xff] }
 0x114   :  { %1746 = vst [vmem:[#allocation7_spill] sm:$0xff] %v1632_v0  ;;  %v1634_v1 = vpop.f32.mrf.mxu1  ;;  %v1160_v0 = vadd.f32 %v1159_v59, %v1158_v57  ;;  %v1145_v63 = vadd.f32 %v1758_v62, %v1757_v61 }
 0x115   :  { %1747 = vst [vmem:[#allocation8_spill] sm:$0xff] %v1634_v1  ;;  %v1101_v2 = vpop.f32.mrf.mxu0  ;;  %v1096_v1 = vadd.f32 %v1095_v58, %v1094_v56  ;;  %v765_v42 = vadd.f32 %v1163_v24, %v1099_v19 }
 0x116   :  { %v1165_v3 = vpop.f32.mrf.mxu1 }
 0x117   :  { %v1636_v4 = vpop.f32.mrf.mxu0  ;;  %v762_v26 = vadd.f32 %v1160_v0, %v1096_v1 }
 0x118   :  { %1748 = vst [vmem:[#allocation9_spill] sm:$0xff] %v1636_v4  ;;  %v1638_v5 = vpop.f32.mrf.mxu1 }
 0x119   :  { %1749 = vst [vmem:[#allocation10_spill] sm:$0xff] %v1638_v5  ;;  %v1640_v6 = vpop.f32.mrf.mxu0  ;;  %v1154_v5 = vadd.f32 %v1153_v51, %v1152_v49 }
 0x11a   :  { %1750 = vst [vmem:[#allocation11_spill] sm:$0xff] %v1640_v6  ;;  %v1642_v7 = vpop.f32.mrf.mxu1  ;;  %v1133_v6 = vadd.f32 %v1602_v23, %v1598_v21 }
 0x11b   :  { %1751 = vst [vmem:[#allocation12_spill] sm:$0xff] %v1642_v7  ;;  %v1106_v8 = vpop.f32.mrf.mxu0  ;;  %v1069_v7 = vadd.f32 %v1600_v22, %v1596_v20  ;;  %v1093_v22 = vadd.f32 %v1092_v54, %v1091_v52  ;;  %v754_v49 = vadd.f32 %v1154_v5, %v1090_v36  ;;  %v1755_v54 = vld [vmem:[#allocation7_spill] sm:$0xff] }
 0x11c   :  { %v1170_v9 = vpop.f32.mrf.mxu1  ;;  %v1102_v55 = vadd.f32 %v1101_v2, %v1755_v54  ;;  %v1756_v56 = vld [vmem:[#allocation8_spill] sm:$0xff]  ;;  %v746_v2 = vadd.f32 %v1148_v50, %v1084_v30 }
 0x11d   :  { %v1107_v10 = vpop.f32.mrf.mxu0  ;;  %v725_v52 = vadd.f32 %v1133_v6, %v1069_v7  ;;  %v1166_v57 = vadd.f32 %v1165_v3, %v1756_v56  ;;  %v757_v60 = vadd.f32 %v1157_v48, %v1093_v22  ;;  %v749_v3 = vadd.f32 %v1151_v34, %v1087_v37 }
 0x11e   :  { %v1171_v15 = vpop.f32.mrf.mxu1  ;;  %v1108_v39 = vadd.f32 %v1107_v10, %v1106_v8  ;;  %v741_v48 = vadd.f32 %v1145_v63, %v1081_v45 }
 0x11f   :  { %v1109_v38 = vpop.f32.mrf.mxu0  ;;  %v1172_v40 = vadd.f32 %v1171_v15, %v1170_v9  ;;  %v1759_v15 = vld [vmem:[#allocation9_spill] sm:$0xff]  ;;  %v770_v24 = vadd.f32 %v1166_v57, %v1102_v55 }
 0x120   :  { %v1173_v4 = vpop.f32.mrf.mxu1 }
 0x121   :  { %v1110_v47 = vpop.f32.mrf.mxu0  ;;  %v778_v9 = vadd.f32 %v1172_v40, %v1108_v39 }
 0x122   :  { %v1174_v16 = vpop.f32.mrf.mxu1  ;;  %v1111_v5 = vadd.f32 %v1110_v47, %v1109_v38  ;;  %v1760_v38 = vld [vmem:[#allocation11_spill] sm:$0xff] }
 0x123   :  { %v1210_v25 = vpop.f32.mrf.mxu0  ;;  %v1175_v6 = vadd.f32 %v1174_v16, %v1173_v4  ;;  %v1105_v47 = vadd.f32 %v1760_v38, %v1759_v15  ;;  %v1761_v4 = vld [vmem:[#allocation10_spill] sm:$0xff]  ;;  %v1762_v16 = vld [vmem:[#allocation12_spill] sm:$0xff] }
 0x124   :  { %v827_v31 = vadd.f32 %v1210_v25, %v730_v17  ;;  %v1218_v20 = vpop.f32.mrf.mxu1  ;;  %v1169_v17 = vadd.f32 %v1762_v16, %v1761_v4 }
 0x125   :  { %v1652_v21 = vadd.f32 %v1218_v20, %v762_v26  ;;  %v818_v23 = vpop.f32.mrf.mxu0  ;;  %v781_v22 = vadd.f32 %v1175_v6, %v1111_v5 }
 0x126   :  { %883 = vst [vmem:[%s1739_s2 + $0x10] sm:$0xff] %v827_v31  ;;  %v819_v33 = vadd.f32 %v818_v23, %v722_v18  ;;  %v850_v35 = vpop.f32.mrf.mxu1  ;;  %v920_v25 = vmul.f32 %v827_v31, %v827_v31 }
 0x127   :  { %891 = vst [vmem:[%s1739_s2 + $0x50] sm:$0xff] %v1652_v21  ;;  %v1667_v36 = vadd.f32 %v850_v35, %v754_v49  ;;  %v1211_v41 = vpop.f32.mrf.mxu0 }
 0x128   :  { %881 = vst [vmem:[%s1739_s2] sm:$0xff] %v819_v33  ;;  %v830_v46 = vadd.f32 %v1211_v41, %v733_v27  ;;  %v1219_v51 = vpop.f32.mrf.mxu1  ;;  %v918_v10 = vmul.f32 %v819_v33, %v819_v33 }
 0x129   :  { %889 = vst [vmem:[%s1739_s2 + $0x40] sm:$0xff] %v1667_v36  ;;  %v1680_v58 = vadd.f32 %v1219_v51, %v765_v42  ;;  %v821_v59 = vpop.f32.mrf.mxu0  ;;  %v926_v57 = vmul.f32 %v1667_v36, %v1667_v36 }
 0x12a   :  { %884 = vst [vmem:[%s1739_s2 + $0x18] sm:$0xff] %v830_v46  ;;  %v822_v0 = vadd.f32 %v821_v59, %v725_v52  ;;  %v853_v1 = vpop.f32.mrf.mxu1  ;;  %v921_v23 = vmul.f32 %v830_v46, %v830_v46 }
 0x12b   :  { %892 = vst [vmem:[%s1739_s2 + $0x58] sm:$0xff] %v1680_v58  ;;  %v854_v7 = vadd.f32 %v853_v1, %v757_v60  ;;  %v1214_v8 = vpop.f32.mrf.mxu0 }
 0x12c   :  { %882 = vst [vmem:[%s1739_s2 + $0x8] sm:$0xff] %v822_v0  ;;  %v897_v11 = vadd.f32 %v822_v0, %v819_v33  ;;  %v919_v12 = vmul.f32 %v822_v0, %v822_v0  ;;  %v843_v13 = vadd.f32 %v1214_v8, %v746_v2  ;;  %v1222_v14 = vpop.f32.mrf.mxu1  ;;  %v773_v33 = vadd.f32 %v1169_v17, %v1105_v47 }
 0x12d   :  { %890 = vst [vmem:[%s1739_s2 + $0x48] sm:$0xff] %v854_v7  ;;  %v875_v18 = vadd.f32 %v1222_v14, %v778_v9  ;;  %v834_v19 = vpop.f32.mrf.mxu0  ;;  %v927_v61 = vmul.f32 %v854_v7, %v854_v7  ;;  %v928_v0 = vmul.f32 %v1652_v21, %v1652_v21 }
 0x12e   :  { %v898_v26 = vadd.f32 %v897_v11, %v827_v31  ;;  %v934_v27 = vadd.f32 %v919_v12, %v918_v10  ;;  %887 = vst [vmem:[%s1739_s2 + $0x30] sm:$0xff] %v843_v13  ;;  %v835_v28 = vadd.f32 %v834_v19, %v738_v53  ;;  %v866_v29 = vpop.f32.mrf.mxu1  ;;  %v924_v51 = vmul.f32 %v843_v13, %v843_v13 }
 0x12f   :  { %895 = vst [vmem:[%s1739_s2 + $0x70] sm:$0xff] %v875_v18  ;;  %v867_v30 = vadd.f32 %v866_v29, %v770_v24  ;;  %v1215_v20 = vpop.f32.mrf.mxu0 }
 0x130   :  { %v935_v49 = vadd.f32 %v934_v27, %v920_v25  ;;  %885 = vst [vmem:[%s1739_s2 + $0x20] sm:$0xff] %v835_v28  ;;  %v899_v31 = vadd.f32 %v898_v26, %v830_v46  ;;  %v846_v50 = vadd.f32 %v1215_v20, %v749_v3  ;;  %v1223_v37 = vpop.f32.mrf.mxu1  ;;  %v922_v39 = vmul.f32 %v835_v28, %v835_v28 }
 0x131   :  { %893 = vst [vmem:[%s1739_s2 + $0x60] sm:$0xff] %v867_v30  ;;  %v878_v32 = vadd.f32 %v1223_v37, %v781_v22  ;;  %v837_v34 = vpop.f32.mrf.mxu0  ;;  %v929_v3 = vmul.f32 %v1680_v58, %v1680_v58  ;;  %v930_v8 = vmul.f32 %v867_v30, %v867_v30 }
 0x132   :  { %v900_v35 = vadd.f32 %v899_v31, %v835_v28  ;;  %v936_v40 = vadd.f32 %v935_v49, %v921_v23  ;;  %888 = vst [vmem:[%s1739_s2 + $0x38] sm:$0xff] %v846_v50  ;;  %v838_v41 = vadd.f32 %v837_v34, %v741_v48  ;;  %v869_v42 = vpop.f32.mrf.mxu1  ;;  %v925_v54 = vmul.f32 %v846_v50, %v846_v50 }
 0x133   :  { %896 = vst [vmem:[%s1739_s2 + $0x78] sm:$0xff] %v878_v32  ;;  %v870_v43 = vadd.f32 %v869_v42, %v773_v33  ;;  %v933_v15 = vmul.f32 %v878_v32, %v878_v32 }
 0x134   :  { %v937_v44 = vadd.f32 %v936_v40, %v922_v39  ;;  %886 = vst [vmem:[%s1739_s2 + $0x28] sm:$0xff] %v838_v41  ;;  %v901_v45 = vadd.f32 %v900_v35, %v838_v41  ;;  %v923_v46 = vmul.f32 %v838_v41, %v838_v41 }
 0x135   :  { %894 = vst [vmem:[%s1739_s2 + $0x68] sm:$0xff] %v870_v43  ;;  %v931_v11 = vmul.f32 %v870_v43, %v870_v43 }
 0x136   :  { %v902_v52 = vadd.f32 %v901_v45, %v843_v13  ;;  %v938_v53 = vadd.f32 %v937_v44, %v923_v46  ;;  %v932_v13 = vmul.f32 %v875_v18, %v875_v18 }
 0x138   :  { %v903_v55 = vadd.f32 %v902_v52, %v846_v50  ;;  %v939_v56 = vadd.f32 %v938_v53, %v924_v51 }
 0x13a   :  { %v904_v59 = vadd.f32 %v903_v55, %v1667_v36  ;;  %v940_v60 = vadd.f32 %v939_v56, %v925_v54 }
 0x13c   :  { %v941_v62 = vadd.f32 %v940_v60, %v926_v57  ;;  %v905_v63 = vadd.f32 %v904_v59, %v854_v7 }
 0x13e   :  { %v906_v1 = vadd.f32 %v905_v63, %v1652_v21  ;;  %v942_v2 = vadd.f32 %v941_v62, %v927_v61 }
 0x140   :  { %v907_v5 = vadd.f32 %v906_v1, %v1680_v58  ;;  %v943_v6 = vadd.f32 %v942_v2, %v928_v0 }
 0x142   :  { %v908_v9 = vadd.f32 %v907_v5, %v867_v30  ;;  %v944_v10 = vadd.f32 %v943_v6, %v929_v3 }
 0x144   :  { %v909_v36 = vadd.f32 %v908_v9, %v870_v43  ;;  %v945_v12 = vadd.f32 %v944_v10, %v930_v8 }
 0x146   :  { %v910_v7 = vadd.f32 %v909_v36, %v875_v18  ;;  %v946_v14 = vadd.f32 %v945_v12, %v931_v11 }
 0x148   :  { %v911_v38 = vadd.f32 %v910_v7, %v878_v32  ;;  %v947_v47 = vadd.f32 %v946_v14, %v932_v13 }
 0x14a   :  { %v912_v21 = vrot.slane %v911_v38, 4  ;;  %v948_v4 = vadd.f32 %v947_v47, %v933_v15 }
 0x14c   :  { %v913_v16 = vadd.f32 %v912_v21, %v911_v38  ;;  %v949_v17 = vrot.slane %v948_v4, 4 }
 0x14e   :  { %v914_v19 = vrot.slane %v913_v16, 2  ;;  %v950_v24 = vadd.f32 %v949_v17, %v948_v4 }
 0x150   :  { %v915_v58 = vadd.f32 %v914_v19, %v913_v16  ;;  %v951_v25 = vrot.slane %v950_v24, 2 }
 0x152   :  { %v916_v26 = vrot.slane %v915_v58, 1  ;;  %v952_v27 = vadd.f32 %v951_v25, %v950_v24 }
 0x154   :  { %v953_v28 = vrot.slane %v952_v27, 1  ;;  %v917_v29 = vadd.f32 %v916_v26, %v915_v58 }
 0x156   :  { %v954_v30 = vadd.f32 %v953_v28, %v952_v27 }
 0x158   :  { %v956_v18 = vsel %vm955_vm0, %v917_v29, %v954_v30 }
 0x159   :  { %v958_v20 = vsel %vm957_vm1, %v956_v18, 0.0 }
 0x15a   :  { %959 = vst [vmem:[%s1740_s3] sm:$0xff] %v958_v20 }

// kernel: _lambda_.33
= control target key start
LH: loop header
LB: loop body
LE: loop exit
PB: predicated region body
PF: predicated region fallthrough
CT: control target
= control target key end

     0   :  { %v3121_v0 = vmov 0   ;;  %vm2491_vm0 = vcmask 1040384   ;;  %vm2493_vm1 = vcmask 1041408   ;;  %s4345_s1 = inlined_call_operand.vmem [shape: bf16[640,128], index: 1, kind: input, shape index: {}]   ;;  %s4346_s0 = inlined_call_operand.vmem [shape: bf16[512,640], index: 0, kind: input, shape index: {}]   ;;  %s4347_s2 = inlined_call_operand.vmem [shape: f32[512,128], index: 2, kind: output, shape index: {0}]   ;;  %s4348_s3 = inlined_call_operand.vmem [shape: f32[8,128], index: 3, kind: output, shape index: {1}]  }
   0x1   :  { %1358 = vmatprep.subr.bf16.mxu0 %v3121_v0  ;;  %2824 = vmatprep.subr.bf16.mxu1 %v3121_v0  ;;  %v2857_v1 = vld [vmem:[%s4345_s1 + $0x38] sm:$0xff]   ;;  %v2858_v2 = vld [vmem:[%s4345_s1 + $0x30] sm:$0xff]   ;;  %v2859_v3 = vld [vmem:[%s4345_s1 + $0x28] sm:$0xff]  }
   0x2   :  { %1359 = vmatpush1.bf16.msra.mxu0 %v2857_v1  ;;  %2840 = vmatpush1.bf16.msra.mxu1 %v2857_v1  ;;  %v2860_v4 = vld [vmem:[%s4345_s1 + $0x20] sm:$0xff]   ;;  %v2861_v5 = vld [vmem:[%s4345_s1 + $0x18] sm:$0xff]   ;;  %v2862_v7 = vld [vmem:[%s4345_s1 + $0x10] sm:$0xff]  }
   0x3   :  { %1360 = vmatprep.subr.bf16.mxu0 %v3121_v0  ;;  %2825 = vmatprep.subr.bf16.mxu1 %v3121_v0  ;;  %v2875_v6 = vld [vmem:[%s4346_s0 + $0x4] ss:$20 sps:$4 sm:$0xff]   ;;  %v2863_v9 = vld [vmem:[%s4345_s1 + $0x8] sm:$0xff]   ;;  %v2866_v12 = vld [vmem:[%s4345_s1 + $0x70] sm:$0xff]  }
   0x4   :  { %v2878_v8 = vld [vmem:[%s4346_s0 + $0x3c4] ss:$20 sps:$4 sm:$0xff]   ;;  %1390 = vmatprep.mubr.bf16.mxu0 %v2875_v6  ;;  %v2867_v13 = vld [vmem:[%s4345_s1 + $0x68] sm:$0xff]   ;;  %v2870_v16 = vld [vmem:[%s4345_s1 + $0x50] sm:$0xff]  }
   0x5   :  { %1582 = vmatprep.mubr.bf16.mxu1 %v2878_v8  ;;  %v2864_v10 = vld [vmem:[%s4345_s1] sm:$0xff]   ;;  %v2865_v11 = vld [vmem:[%s4345_s1 + $0x78] sm:$0xff]   ;;  %v2871_v17 = vld [vmem:[%s4345_s1 + $0x48] sm:$0xff]  }
   0x6   :  { %1361 = vmatpush1.bf16.msra.mxu0 %v2858_v2  ;;  %2841 = vmatpush1.bf16.msra.mxu1 %v2858_v2  ;;  %v2868_v14 = vld [vmem:[%s4345_s1 + $0x60] sm:$0xff]   ;;  %v2869_v15 = vld [vmem:[%s4345_s1 + $0x58] sm:$0xff]   ;;  %v2904_v25 = vld [vmem:[%s4345_s1 + $0x130] sm:$0xff]  }
   0x7   :  { %1362 = vmatprep.subr.bf16.mxu0 %v3121_v0  ;;  %2826 = vmatprep.subr.bf16.mxu1 %v3121_v0  ;;  %v2872_v18 = vld [vmem:[%s4345_s1 + $0x40] sm:$0xff]   ;;  %v2879_v19 = vld [vmem:[%s4345_s1 + $0x138] sm:$0xff]   ;;  %v2881_v26 = vld [vmem:[%s4345_s1 + $0xb0] sm:$0xff]  }
   0x8   :  { %v2873_v20 = vld [vmem:[%s4346_s0] ss:$20 sps:$4 sm:$0xff]   ;;  %v2880_v22 = vld [vmem:[%s4345_s1 + $0xb8] sm:$0xff]   ;;  %v2929_v27 = vld [vmem:[%s4345_s1 + $0x128] sm:$0xff]  }
   0x9   :  { %v2876_v21 = vld [vmem:[%s4346_s0 + $0x3c0] ss:$20 sps:$4 sm:$0xff]   ;;  %v2886_v28 = vld [vmem:[%s4346_s0 + $0x28] ss:$20 sps:$4 sm:$0xff]   ;;  %v2894_v35 = vld [vmem:[%s4346_s0 + $0x50] ss:$20 sps:$4 sm:$0xff]  }
   0xa   :  { %1363 = vmatpush1.bf16.msra.mxu0 %v2859_v3  ;;  %2842 = vmatpush1.bf16.msra.mxu1 %v2859_v3  ;;  %v2882_v23 = vld [vmem:[%s4346_s0 + $0x2c] ss:$20 sps:$4 sm:$0xff]   ;;  %v2887_v29 = vld [vmem:[%s4346_s0 + $0x3e8] ss:$20 sps:$4 sm:$0xff]   ;;  %v2895_v36 = vld [vmem:[%s4346_s0 + $0x410] ss:$20 sps:$4 sm:$0xff]  }
   0xb   :  { %1364 = vmatprep.subr.bf16.mxu0 %v3121_v0  ;;  %2827 = vmatprep.subr.bf16.mxu1 %v3121_v0  ;;  %v2884_v24 = vld [vmem:[%s4346_s0 + $0x3ec] ss:$20 sps:$4 sm:$0xff]   ;;  %v2890_v31 = vld [vmem:[%s4346_s0 + $0x54] ss:$20 sps:$4 sm:$0xff]   ;;  %v2896_v37 = vld [vmem:[%s4345_s1 + $0x98] sm:$0xff]  }
   0xc   :  { %v2888_v30 = vld [vmem:[%s4345_s1 + $0xa8] sm:$0xff]   ;;  %v2952_v33 = vld [vmem:[%s4345_s1 + $0x120] sm:$0xff]   ;;  %v2898_v38 = vld [vmem:[%s4346_s0 + $0x7c] ss:$20 sps:$4 sm:$0xff]  }
   0xd   :  { %v2892_v32 = vld [vmem:[%s4346_s0 + $0x414] ss:$20 sps:$4 sm:$0xff]   ;;  %v2889_v34 = vld [vmem:[%s4345_s1 + $0xa0] sm:$0xff]   ;;  %v2900_v39 = vld [vmem:[%s4346_s0 + $0x43c] ss:$20 sps:$4 sm:$0xff]  }
   0xe   :  { %1365 = vmatpush1.bf16.msra.mxu0 %v2860_v4  ;;  %2843 = vmatpush1.bf16.msra.mxu1 %v2860_v4  ;;  %v2971_v40 = vld [vmem:[%s4345_s1 + $0x118] sm:$0xff]   ;;  %v2897_v41 = vld [vmem:[%s4345_s1 + $0x90] sm:$0xff]   ;;  %v2905_v45 = vld [vmem:[%s4345_s1 + $0x88] sm:$0xff]  }
   0xf   :  { %1366 = vmatprep.subr.bf16.mxu0 %v3121_v0  ;;  %2828 = vmatprep.subr.bf16.mxu1 %v3121_v0  ;;  %v2990_v42 = vld [vmem:[%s4345_s1 + $0x110] sm:$0xff]   ;;  %v2902_v43 = vld [vmem:[%s4346_s0 + $0x78] ss:$20 sps:$4 sm:$0xff]   ;;  %v2906_v49 = vld [vmem:[%s4345_s1 + $0x80] sm:$0xff]  }
  0x10   :  { %v2903_v44 = vld [vmem:[%s4346_s0 + $0x438] ss:$20 sps:$4 sm:$0xff]   ;;  %v2911_v50 = vld [vmem:[%s4346_s0 + $0xa0] ss:$20 sps:$4 sm:$0xff]   ;;  %v2919_v56 = vld [vmem:[%s4346_s0 + $0xc8] ss:$20 sps:$4 sm:$0xff]  }
  0x11   :  { %v2907_v46 = vld [vmem:[%s4346_s0 + $0xa4] ss:$20 sps:$4 sm:$0xff]   ;;  %v3009_v48 = vld [vmem:[%s4345_s1 + $0x108] sm:$0xff]   ;;  %v2912_v51 = vld [vmem:[%s4346_s0 + $0x460] ss:$20 sps:$4 sm:$0xff]  }
  0x12   :  { %1367 = vmatpush1.bf16.msra.mxu0 %v2861_v5  ;;  %2844 = vmatpush1.bf16.msra.mxu1 %v2861_v5  ;;  %v2909_v47 = vld [vmem:[%s4346_s0 + $0x464] ss:$20 sps:$4 sm:$0xff]   ;;  %v2915_v53 = vld [vmem:[%s4346_s0 + $0xcc] ss:$20 sps:$4 sm:$0xff]   ;;  %v2914_v55 = vld [vmem:[%s4345_s1 + $0xf0] sm:$0xff]  }
  0x13   :  { %1368 = vmatprep.subr.bf16.mxu0 %v3121_v0  ;;  %2829 = vmatprep.subr.bf16.mxu1 %v3121_v0  ;;  %v2913_v52 = vld [vmem:[%s4345_s1 + $0xf8] sm:$0xff]   ;;  %v2917_v54 = vld [vmem:[%s4346_s0 + $0x48c] ss:$20 sps:$4 sm:$0xff]   ;;  %v2923_v59 = vld [vmem:[%s4346_s0 + $0xf4] ss:$20 sps:$4 sm:$0xff]  }
  0x14   :  { %v2920_v57 = vld [vmem:[%s4346_s0 + $0x488] ss:$20 sps:$4 sm:$0xff]   ;;  %v3028_v61 = vld [vmem:[%s4345_s1 + $0x100] sm:$0xff]   ;;  %v2931_v5 = vld [vmem:[%s4345_s1 + $0xd0] sm:$0xff]  }
  0x15   :  { %v2921_v58 = vld [vmem:[%s4345_s1 + $0xe8] sm:$0xff]   ;;  %v2922_v62 = vld [vmem:[%s4345_s1 + $0xe0] sm:$0xff]   ;;  %v2930_v2 = vld [vmem:[%s4345_s1 + $0xd8] sm:$0xff]  }
  0x16   :  { %1369 = vmatpush1.bf16.msra.mxu0 %v2862_v7  ;;  %2845 = vmatpush1.bf16.msra.mxu1 %v2862_v7  ;;  %v2925_v60 = vld [vmem:[%s4346_s0 + $0x4b4] ss:$20 sps:$4 sm:$0xff]   ;;  %v2927_v63 = vld [vmem:[%s4346_s0 + $0xf0] ss:$20 sps:$4 sm:$0xff]   ;;  %v2936_v6 = vld [vmem:[%s4346_s0 + $0x118] ss:$20 sps:$4 sm:$0xff]  }
  0x17   :  { %1370 = vmatprep.subr.bf16.mxu0 %v3121_v0  ;;  %2830 = vmatprep.subr.bf16.mxu1 %v3121_v0  ;;  %v2928_v1 = vld [vmem:[%s4346_s0 + $0x4b0] ss:$20 sps:$4 sm:$0xff]   ;;  %v2937_v7 = vld [vmem:[%s4346_s0 + $0x4d8] ss:$20 sps:$4 sm:$0xff]  }
  0x18   :  { %v2932_v3 = vld [vmem:[%s4346_s0 + $0x11c] ss:$20 sps:$4 sm:$0xff]   ;;  %v2938_v8 = vld [vmem:[%s4345_s1 + $0xc8] sm:$0xff]  }
  0x19   :  { %v2934_v4 = vld [vmem:[%s4346_s0 + $0x4dc] ss:$20 sps:$4 sm:$0xff]  }
  0x1a   :  { %1371 = vmatpush1.bf16.msra.mxu0 %v2863_v9  ;;  %2846 = vmatpush1.bf16.msra.mxu1 %v2863_v9  ;;  %v2940_v9 = vld [vmem:[%s4346_s0 + $0x144] ss:$20 sps:$4 sm:$0xff]  }
  0x1b   :  { %1372 = vmatprep.subr.bf16.mxu0 %v3121_v0  ;;  %2831 = vmatprep.subr.bf16.mxu1 %v3121_v0 }
  0x1e   :  { %1373 = vmatpush1.bf16.msra.mxu0 %v2864_v10  ;;  %2847 = vmatpush1.bf16.msra.mxu1 %v2864_v10  ;;  %v2944_v10 = vld [vmem:[%s4346_s0 + $0xc] ss:$20 sps:$4 sm:$0xff]  }
  0x1f   :  { %1374 = vmatprep.subr.bf16.mxu0 %v3121_v0  ;;  %2832 = vmatprep.subr.bf16.mxu1 %v3121_v0 }
  0x22   :  { %1375 = vmatpush2.bf16.msra.mxu0 %v2865_v11  ;;  %2848 = vmatpush2.bf16.msra.mxu1 %v2865_v11  ;;  %v2939_v11 = vld [vmem:[%s4345_s1 + $0xc0] sm:$0xff]  }
  0x23   :  { %1376 = vmatprep.subr.bf16.mxu0 %v3121_v0  ;;  %2833 = vmatprep.subr.bf16.mxu1 %v3121_v0 }
  0x26   :  { %1377 = vmatpush2.bf16.msra.mxu0 %v2866_v12  ;;  %2849 = vmatpush2.bf16.msra.mxu1 %v2866_v12  ;;  %v2942_v12 = vld [vmem:[%s4346_s0 + $0x8] ss:$20 sps:$4 sm:$0xff]  }
  0x27   :  { %1378 = vmatprep.subr.bf16.mxu0 %v3121_v0  ;;  %2834 = vmatprep.subr.bf16.mxu1 %v3121_v0 }
  0x2a   :  { %1379 = vmatpush2.bf16.msra.mxu0 %v2867_v13  ;;  %2850 = vmatpush2.bf16.msra.mxu1 %v2867_v13  ;;  %v2945_v13 = vld [vmem:[%s4346_s0 + $0x140] ss:$20 sps:$4 sm:$0xff]  }
  0x2b   :  { %1380 = vmatprep.subr.bf16.mxu0 %v3121_v0  ;;  %2835 = vmatprep.subr.bf16.mxu1 %v3121_v0 }
  0x2e   :  { %1381 = vmatpush2.bf16.msra.mxu0 %v2868_v14  ;;  %2851 = vmatpush2.bf16.msra.mxu1 %v2868_v14  ;;  %v2946_v14 = vld [vmem:[%s4346_s0 + $0x16c] ss:$20 sps:$4 sm:$0xff]  }
  0x2f   :  { %1382 = vmatprep.subr.bf16.mxu0 %v3121_v0  ;;  %2836 = vmatprep.subr.bf16.mxu1 %v3121_v0 }
  0x32   :  { %1383 = vmatpush2.bf16.msra.mxu0 %v2869_v15  ;;  %2852 = vmatpush2.bf16.msra.mxu1 %v2869_v15  ;;  %v2948_v15 = vld [vmem:[%s4346_s0 + $0x34] ss:$20 sps:$4 sm:$0xff]  }
  0x33   :  { %1384 = vmatprep.subr.bf16.mxu0 %v3121_v0  ;;  %2837 = vmatprep.subr.bf16.mxu1 %v3121_v0 }
  0x36   :  { %1385 = vmatpush2.bf16.msra.mxu0 %v2870_v16  ;;  %2853 = vmatpush2.bf16.msra.mxu1 %v2870_v16  ;;  %v2951_v16 = vld [vmem:[%s4346_s0 + $0x30] ss:$20 sps:$4 sm:$0xff]  }
  0x37   :  { %1386 = vmatprep.subr.bf16.mxu0 %v3121_v0  ;;  %2838 = vmatprep.subr.bf16.mxu1 %v3121_v0 }
  0x3a   :  { %1387 = vmatpush2.bf16.msra.mxu0 %v2871_v17  ;;  %2854 = vmatpush2.bf16.msra.mxu1 %v2871_v17  ;;  %v2953_v17 = vld [vmem:[%s4346_s0 + $0x194] ss:$20 sps:$4 sm:$0xff]  }
  0x3b   :  { %1388 = vmatprep.subr.bf16.mxu0 %v3121_v0  ;;  %2839 = vmatprep.subr.bf16.mxu1 %v3121_v0 }
  0x3e   :  { %1389 = vmatpush2.bf16.msra.mxu0 %v2872_v18  ;;  %2855 = vmatpush2.bf16.msra.mxu1 %v2872_v18  ;;  %v2955_v18 = vld [vmem:[%s4346_s0 + $0x5c] ss:$20 sps:$4 sm:$0xff]  }
  0x3f   :  { %1647 = vmatprep.subr.bf16.mxu1 %v3121_v0  ;;  %2744 = vmatprep.subr.bf16.mxu0 %v2879_v19 }
  0x41   :  { %1391 = vmatmul.mubr.bf16.vlgmr.msra.gmra.mxu0 %v2873_v20  ;;  %1583 = vmatmul.mubr.bf16.vlgmr.msra.gmra.mxu1 %v2876_v21  ;;  %v2958_v20 = vld [vmem:[%s4346_s0 + $0x58] ss:$20 sps:$4 sm:$0xff]   ;;  %v2959_v21 = vld [vmem:[%s4346_s0 + $0x1bc] ss:$20 sps:$4 sm:$0xff]  }
  0x42   :  { %1648 = vmatpush1.bf16.msra.mxu1 %v2880_v22  ;;  %2745 = vmatpush3.bf16.msra.mxu0 %v2879_v19  ;;  %v2957_v19 = vld [vmem:[%s4346_s0 + $0x190] ss:$20 sps:$4 sm:$0xff]  }
  0x43   :  { %1649 = vmatprep.subr.bf16.mxu1 %v3121_v0  ;;  %1398 = vmatprep.mubr.bf16.mxu0 %v2882_v23  ;;  %v2961_v22 = vld [vmem:[%s4346_s0 + $0x84] ss:$20 sps:$4 sm:$0xff]  }
  0x44   :  { %1590 = vmatprep.mubr.bf16.mxu1 %v2884_v24  ;;  %2746 = vmatprep.subr.bf16.mxu0 %v2904_v25  ;;  %v2963_v23 = vld [vmem:[%s4346_s0 + $0x1b8] ss:$20 sps:$4 sm:$0xff]   ;;  %v2964_v24 = vld [vmem:[%s4346_s0 + $0x80] ss:$20 sps:$4 sm:$0xff]  }
  0x46   :  { %1650 = vmatpush1.bf16.msra.mxu1 %v2881_v26  ;;  %2747 = vmatpush3.bf16.msra.mxu0 %v2904_v25  ;;  %v2965_v25 = vld [vmem:[%s4346_s0 + $0x1e4] ss:$20 sps:$4 sm:$0xff]   ;;  %v2967_v26 = vld [vmem:[%s4346_s0 + $0xac] ss:$20 sps:$4 sm:$0xff]  }
  0x47   :  { %1651 = vmatprep.subr.bf16.mxu1 %v3121_v0  ;;  %2748 = vmatprep.subr.bf16.mxu0 %v2929_v27 }
  0x49   :  { %1399 = vmatmul.mubr.bf16.gmra.mxu0 %v2886_v28  ;;  %1591 = vmatmul.mubr.bf16.gmra.mxu1 %v2887_v29  ;;  %v2970_v28 = vld [vmem:[%s4346_s0 + $0xa8] ss:$20 sps:$4 sm:$0xff]   ;;  %v2972_v29 = vld [vmem:[%s4346_s0 + $0x20c] ss:$20 sps:$4 sm:$0xff]  }
  0x4a   :  { %1652 = vmatpush1.bf16.msra.mxu1 %v2888_v30  ;;  %1406 = vmatprep.mubr.bf16.mxu0 %v2890_v31  ;;  %v2974_v30 = vld [vmem:[%s4346_s0 + $0xd4] ss:$20 sps:$4 sm:$0xff]  }
  0x4b   :  { %1653 = vmatprep.subr.bf16.mxu1 %v3121_v0  ;;  %1598 = vmatprep.mubr.bf16.mxu1 %v2892_v32  ;;  %v2976_v31 = vld [vmem:[%s4346_s0 + $0x208] ss:$20 sps:$4 sm:$0xff]   ;;  %v2977_v32 = vld [vmem:[%s4346_s0 + $0xd0] ss:$20 sps:$4 sm:$0xff]  }
  0x4c   :  { %2749 = vmatpush3.bf16.msra.mxu0 %v2929_v27  ;;  %v2969_v27 = vld [vmem:[%s4346_s0 + $0x1e0] ss:$20 sps:$4 sm:$0xff]  }
  0x4d   :  { %2750 = vmatprep.subr.bf16.mxu0 %v2952_v33 }
  0x4e   :  { %1654 = vmatpush1.bf16.msra.mxu1 %v2889_v34  ;;  %v2980_v34 = vld [vmem:[%s4346_s0 + $0xfc] ss:$20 sps:$4 sm:$0xff]  }
  0x4f   :  { %1655 = vmatprep.subr.bf16.mxu1 %v3121_v0 }
  0x50   :  { %2751 = vmatpush3.bf16.msra.mxu0 %v2952_v33  ;;  %v2978_v33 = vld [vmem:[%s4346_s0 + $0x234] ss:$20 sps:$4 sm:$0xff]  }
  0x51   :  { %1407 = vmatmul.mubr.bf16.gmra.mxu0 %v2894_v35  ;;  %1599 = vmatmul.mubr.bf16.gmra.mxu1 %v2895_v36  ;;  %v2982_v35 = vld [vmem:[%s4346_s0 + $0x230] ss:$20 sps:$4 sm:$0xff]   ;;  %v2983_v36 = vld [vmem:[%s4346_s0 + $0xf8] ss:$20 sps:$4 sm:$0xff]  }
  0x52   :  { %1656 = vmatpush1.bf16.msra.mxu1 %v2896_v37  ;;  %1414 = vmatprep.mubr.bf16.mxu0 %v2898_v38  ;;  %v2984_v37 = vld [vmem:[%s4346_s0 + $0x25c] ss:$20 sps:$4 sm:$0xff]   ;;  %v2986_v38 = vld [vmem:[%s4346_s0 + $0x124] ss:$20 sps:$4 sm:$0xff]  }
  0x53   :  { %1657 = vmatprep.subr.bf16.mxu1 %v3121_v0  ;;  %1606 = vmatprep.mubr.bf16.mxu1 %v2900_v39  ;;  %v2988_v39 = vld [vmem:[%s4346_s0 + $0x258] ss:$20 sps:$4 sm:$0xff]  }
  0x54   :  { %2752 = vmatprep.subr.bf16.mxu0 %v2971_v40 }
  0x55   :  { %2753 = vmatpush3.bf16.msra.mxu0 %v2971_v40  ;;  %v2989_v40 = vld [vmem:[%s4346_s0 + $0x120] ss:$20 sps:$4 sm:$0xff]  }
  0x56   :  { %1658 = vmatpush1.bf16.msra.mxu1 %v2897_v41  ;;  %2754 = vmatprep.subr.bf16.mxu0 %v2990_v42  ;;  %v2991_v41 = vld [vmem:[%s4346_s0 + $0x284] ss:$20 sps:$4 sm:$0xff]  }
  0x57   :  { %1659 = vmatprep.subr.bf16.mxu1 %v3121_v0 }
  0x59   :  { %1415 = vmatmul.mubr.bf16.gmra.mxu0 %v2902_v43  ;;  %1607 = vmatmul.mubr.bf16.gmra.mxu1 %v2903_v44  ;;  %v2995_v43 = vld [vmem:[%s4346_s0 + $0x280] ss:$20 sps:$4 sm:$0xff]   ;;  %v2996_v44 = vld [vmem:[%s4346_s0 + $0x148] ss:$20 sps:$4 sm:$0xff]  }
  0x5a   :  { %1660 = vmatpush1.bf16.msra.mxu1 %v2905_v45  ;;  %1422 = vmatprep.mubr.bf16.mxu0 %v2907_v46  ;;  %v2997_v45 = vld [vmem:[%s4346_s0 + $0x2ac] ss:$20 sps:$4 sm:$0xff]   ;;  %v2999_v46 = vld [vmem:[%s4346_s0 + $0x174] ss:$20 sps:$4 sm:$0xff]  }
  0x5b   :  { %1661 = vmatprep.subr.bf16.mxu1 %v3121_v0  ;;  %1614 = vmatprep.mubr.bf16.mxu1 %v2909_v47  ;;  %v3001_v47 = vld [vmem:[%s4346_s0 + $0x2a8] ss:$20 sps:$4 sm:$0xff]  }
  0x5c   :  { %2755 = vmatpush3.bf16.msra.mxu0 %v2990_v42  ;;  %v2993_v42 = vld [vmem:[%s4346_s0 + $0x14c] ss:$20 sps:$4 sm:$0xff]  }
  0x5d   :  { %2756 = vmatprep.subr.bf16.mxu0 %v3009_v48 }
  0x5e   :  { %1662 = vmatpush1.bf16.msra.mxu1 %v2906_v49  ;;  %v3003_v49 = vld [vmem:[%s4346_s0 + $0x2d4] ss:$20 sps:$4 sm:$0xff]  }
  0x5f   :  { %1663 = vmatprep.subr.bf16.mxu1 %v3121_v0 }
  0x60   :  { %2757 = vmatpush3.bf16.msra.mxu0 %v3009_v48  ;;  %v3002_v48 = vld [vmem:[%s4346_s0 + $0x170] ss:$20 sps:$4 sm:$0xff]  }
  0x61   :  { %1423 = vmatmul.mubr.bf16.gmra.mxu0 %v2911_v50  ;;  %1615 = vmatmul.mubr.bf16.gmra.mxu1 %v2912_v51  ;;  %v3005_v50 = vld [vmem:[%s4346_s0 + $0x19c] ss:$20 sps:$4 sm:$0xff]  }
  0x62   :  { %1664 = vmatpush2.bf16.msra.mxu1 %v2913_v52  ;;  %1430 = vmatprep.mubr.bf16.mxu0 %v2915_v53  ;;  %v3007_v51 = vld [vmem:[%s4346_s0 + $0x2d0] ss:$20 sps:$4 sm:$0xff]   ;;  %v3008_v52 = vld [vmem:[%s4346_s0 + $0x198] ss:$20 sps:$4 sm:$0xff]  }
  0x63   :  { %1665 = vmatprep.subr.bf16.mxu1 %v3121_v0  ;;  %1622 = vmatprep.mubr.bf16.mxu1 %v2917_v54  ;;  %v3010_v53 = vld [vmem:[%s4346_s0 + $0x2fc] ss:$20 sps:$4 sm:$0xff]   ;;  %v3012_v54 = vld [vmem:[%s4346_s0 + $0x1c4] ss:$20 sps:$4 sm:$0xff]  }
  0x64   :  { %2758 = vmatprep.subr.bf16.mxu0 %v3028_v61 }
  0x65   :  { %2759 = vmatpush3.bf16.msra.mxu0 %v3028_v61  ;;  %v3022_v61 = vld [vmem:[%s4346_s0 + $0x34c] ss:$20 sps:$4 sm:$0xff]  }
  0x66   :  { %1666 = vmatpush2.bf16.msra.mxu1 %v2914_v55  ;;  %v3014_v55 = vld [vmem:[%s4346_s0 + $0x2f8] ss:$20 sps:$4 sm:$0xff]  }
  0x67   :  { %1667 = vmatprep.subr.bf16.mxu1 %v3121_v0 }
  0x69   :  { %1431 = vmatmul.mubr.bf16.gmra.mxu0 %v2919_v56  ;;  %1623 = vmatmul.mubr.bf16.gmra.mxu1 %v2920_v57  ;;  %v3015_v56 = vld [vmem:[%s4346_s0 + $0x1c0] ss:$20 sps:$4 sm:$0xff]   ;;  %v3016_v57 = vld [vmem:[%s4346_s0 + $0x324] ss:$20 sps:$4 sm:$0xff]  }
  0x6a   :  { %1668 = vmatpush2.bf16.msra.mxu1 %v2921_v58  ;;  %1438 = vmatprep.mubr.bf16.mxu0 %v2923_v59  ;;  %v3018_v58 = vld [vmem:[%s4346_s0 + $0x1ec] ss:$20 sps:$4 sm:$0xff]  }
  0x6b   :  { %1669 = vmatprep.subr.bf16.mxu1 %v3121_v0  ;;  %1630 = vmatprep.mubr.bf16.mxu1 %v2925_v60  ;;  %v3020_v59 = vld [vmem:[%s4346_s0 + $0x320] ss:$20 sps:$4 sm:$0xff]   ;;  %v3021_v60 = vld [vmem:[%s4346_s0 + $0x1e8] ss:$20 sps:$4 sm:$0xff]  }
  0x6e   :  { %1670 = vmatpush2.bf16.msra.mxu1 %v2922_v62  ;;  %v3024_v62 = vld [vmem:[%s4346_s0 + $0x214] ss:$20 sps:$4 sm:$0xff]  }
  0x6f   :  { %1671 = vmatprep.subr.bf16.mxu1 %v3121_v0 }
  0x71   :  { %1439 = vmatmul.mubr.bf16.gmra.mxu0 %v2927_v63  ;;  %1631 = vmatmul.mubr.bf16.gmra.mxu1 %v2928_v1  ;;  %v3026_v63 = vld [vmem:[%s4346_s0 + $0x348] ss:$20 sps:$4 sm:$0xff]   ;;  %v3027_v1 = vld [vmem:[%s4346_s0 + $0x210] ss:$20 sps:$4 sm:$0xff]  }
  0x72   :  { %1672 = vmatpush2.bf16.msra.mxu1 %v2930_v2  ;;  %1446 = vmatprep.mubr.bf16.mxu0 %v2932_v3  ;;  %v3029_v2 = vld [vmem:[%s4346_s0 + $0x374] ss:$20 sps:$4 sm:$0xff]   ;;  %v3031_v3 = vld [vmem:[%s4346_s0 + $0x23c] ss:$20 sps:$4 sm:$0xff]  }
  0x73   :  { %1673 = vmatprep.subr.bf16.mxu1 %v3121_v0  ;;  %1638 = vmatprep.mubr.bf16.mxu1 %v2934_v4  ;;  %v3033_v4 = vld [vmem:[%s4346_s0 + $0x370] ss:$20 sps:$4 sm:$0xff]  }
  0x76   :  { %1674 = vmatpush2.bf16.msra.mxu1 %v2931_v5  ;;  %v3034_v5 = vld [vmem:[%s4346_s0 + $0x238] ss:$20 sps:$4 sm:$0xff]  }
  0x77   :  { %1675 = vmatprep.subr.bf16.mxu1 %v3121_v0 }
  0x79   :  { %1447 = vmatmul.mubr.bf16.gmra.mxu0 %v2936_v6  ;;  %1639 = vmatmul.mubr.bf16.gmra.mxu1 %v2937_v7  ;;  %v3035_v6 = vld [vmem:[%s4346_s0 + $0x39c] ss:$20 sps:$4 sm:$0xff]   ;;  %v3037_v7 = vld [vmem:[%s4346_s0 + $0x264] ss:$20 sps:$4 sm:$0xff]  }
  0x7a   :  { %1676 = vmatpush2.bf16.msra.mxu1 %v2938_v8  ;;  %1454 = vmatprep.mubr.bf16.mxu0 %v2940_v9  ;;  %v3039_v8 = vld [vmem:[%s4346_s0 + $0x398] ss:$20 sps:$4 sm:$0xff]   ;;  %v3040_v9 = vld [vmem:[%s4346_s0 + $0x260] ss:$20 sps:$4 sm:$0xff]  }
  0x7b   :  { %1677 = vmatprep.subr.bf16.mxu1 %v3121_v0  ;;  %1679 = vmatprep.mubr.bf16.mxu1 %v2944_v10  ;;  %v2950_v0 = vld [vmem:[%s4346_s0 + $0x168] ss:$20 sps:$4 sm:$0xff]   ;;  %v3041_v10 = vld [vmem:[%s4346_s0 + $0x28c] ss:$20 sps:$4 sm:$0xff]  }
  0x7e   :  { %1678 = vmatpush2.bf16.msra.mxu1 %v2939_v11  ;;  %v3043_v11 = vld [vmem:[%s4346_s0 + $0x10] ss:$20 sps:$4 sm:$0xff]  }
  0x81   :  { %1455 = vmatmul.mubr.bf16.gmra.mxu0 %v2945_v13  ;;  %1680 = vmatmul.mubr.bf16.vlgmr.msra.gmra.mxu1 %v2942_v12  ;;  %v3044_v12 = vld [vmem:[%s4346_s0 + $0x288] ss:$20 sps:$4 sm:$0xff]   ;;  %v3045_v13 = vld [vmem:[%s4346_s0 + $0x38] ss:$20 sps:$4 sm:$0xff]  }
  0x82   :  { %1462 = vmatprep.mubr.bf16.mxu0 %v2946_v14  ;;  %1687 = vmatprep.mubr.bf16.mxu1 %v2948_v15  ;;  %v3046_v14 = vld [vmem:[%s4346_s0 + $0x2b4] ss:$20 sps:$4 sm:$0xff]  }
  0x83   :  { %v3048_v15 = vld [vmem:[%s4346_s0 + $0x60] ss:$20 sps:$4 sm:$0xff]  }
  0x89   :  { %1463 = vmatmul.mubr.bf16.gmra.mxu0 %v2950_v0  ;;  %1688 = vmatmul.mubr.bf16.gmra.mxu1 %v2951_v16 }
  0x8a   :  { %1470 = vmatprep.mubr.bf16.mxu0 %v2953_v17  ;;  %1695 = vmatprep.mubr.bf16.mxu1 %v2955_v18 }
  0x91   :  { %1471 = vmatmul.mubr.bf16.gmra.mxu0 %v2957_v19  ;;  %1696 = vmatmul.mubr.bf16.gmra.mxu1 %v2958_v20 }
  0x92   :  { %1478 = vmatprep.mubr.bf16.mxu0 %v2959_v21  ;;  %1703 = vmatprep.mubr.bf16.mxu1 %v2961_v22  ;;  %v3049_v21 = vld [vmem:[%s4346_s0 + $0x2b0] ss:$20 sps:$4 sm:$0xff]   ;;  %v3050_v22 = vld [vmem:[%s4346_s0 + $0x88] ss:$20 sps:$4 sm:$0xff]  }
  0x99   :  { %1479 = vmatmul.mubr.bf16.gmra.mxu0 %v2963_v23  ;;  %1704 = vmatmul.mubr.bf16.gmra.mxu1 %v2964_v24  ;;  %v3051_v23 = vld [vmem:[%s4346_s0 + $0x2dc] ss:$20 sps:$4 sm:$0xff]  }
  0x9a   :  { %1486 = vmatprep.mubr.bf16.mxu0 %v2965_v25  ;;  %1711 = vmatprep.mubr.bf16.mxu1 %v2967_v26  ;;  %v3053_v24 = vld [vmem:[%s4346_s0 + $0xb0] ss:$20 sps:$4 sm:$0xff]  }
  0xa1   :  { %1487 = vmatmul.mubr.bf16.gmra.mxu0 %v2969_v27  ;;  %1712 = vmatmul.mubr.bf16.gmra.mxu1 %v2970_v28 }
  0xa2   :  { %1494 = vmatprep.mubr.bf16.mxu0 %v2972_v29  ;;  %1719 = vmatprep.mubr.bf16.mxu1 %v2974_v30 }
  0xa9   :  { %1495 = vmatmul.mubr.bf16.gmra.mxu0 %v2976_v31  ;;  %1720 = vmatmul.mubr.bf16.gmra.mxu1 %v2977_v32 }
  0xaa   :  { %1502 = vmatprep.mubr.bf16.mxu0 %v2978_v33  ;;  %1727 = vmatprep.mubr.bf16.mxu1 %v2980_v34  ;;  %v3054_v33 = vld [vmem:[%s4346_s0 + $0x2d8] ss:$20 sps:$4 sm:$0xff]  }
  0xab   :  { %v3055_v34 = vld [vmem:[%s4346_s0 + $0xd8] ss:$20 sps:$4 sm:$0xff]  }
  0xb1   :  { %1503 = vmatmul.mubr.bf16.gmra.mxu0 %v2982_v35  ;;  %1728 = vmatmul.mubr.bf16.gmra.mxu1 %v2983_v36  ;;  %v3056_v35 = vld [vmem:[%s4346_s0 + $0x304] ss:$20 sps:$4 sm:$0xff]   ;;  %v3058_v36 = vld [vmem:[%s4346_s0 + $0x100] ss:$20 sps:$4 sm:$0xff]  }
  0xb2   :  { %1510 = vmatprep.mubr.bf16.mxu0 %v2984_v37  ;;  %1735 = vmatprep.mubr.bf16.mxu1 %v2986_v38 }
  0xb9   :  { %1511 = vmatmul.mubr.bf16.gmra.mxu0 %v2988_v39  ;;  %1736 = vmatmul.mubr.bf16.gmra.mxu1 %v2989_v40 }
  0xba   :  { %1518 = vmatprep.mubr.bf16.mxu0 %v2991_v41  ;;  %1743 = vmatprep.mubr.bf16.mxu1 %v2993_v42 }
  0xc1   :  { %1519 = vmatmul.mubr.bf16.gmra.mxu0 %v2995_v43  ;;  %1744 = vmatmul.mubr.bf16.gmra.mxu1 %v2996_v44 }
  0xc2   :  { %1526 = vmatprep.mubr.bf16.mxu0 %v2997_v45  ;;  %1751 = vmatprep.mubr.bf16.mxu1 %v2999_v46  ;;  %v3059_v45 = vld [vmem:[%s4346_s0 + $0x300] ss:$20 sps:$4 sm:$0xff]   ;;  %v3060_v46 = vld [vmem:[%s4346_s0 + $0x128] ss:$20 sps:$4 sm:$0xff]  }
  0xc9   :  { %1527 = vmatmul.mubr.bf16.gmra.mxu0 %v3001_v47  ;;  %1752 = vmatmul.mubr.bf16.gmra.mxu1 %v3002_v48  ;;  %v3063_v47 = vld [vmem:[%s4346_s0 + $0x32c] ss:$20 sps:$4 sm:$0xff]   ;;  %v3064_v48 = vld [vmem:[%s4346_s0 + $0x150] ss:$20 sps:$4 sm:$0xff]  }
  0xca   :  { %1534 = vmatprep.mubr.bf16.mxu0 %v3003_v49  ;;  %1759 = vmatprep.mubr.bf16.mxu1 %v3005_v50 }
  0xd1   :  { %1535 = vmatmul.mubr.bf16.gmra.mxu0 %v3007_v51  ;;  %1760 = vmatmul.mubr.bf16.gmra.mxu1 %v3008_v52 }
  0xd2   :  { %1542 = vmatprep.mubr.bf16.mxu0 %v3010_v53  ;;  %1767 = vmatprep.mubr.bf16.mxu1 %v3012_v54 }
  0xd9   :  { %1543 = vmatmul.mubr.bf16.gmra.mxu0 %v3014_v55  ;;  %1768 = vmatmul.mubr.bf16.gmra.mxu1 %v3015_v56 }
  0xda   :  { %1550 = vmatprep.mubr.bf16.mxu0 %v3016_v57  ;;  %1775 = vmatprep.mubr.bf16.mxu1 %v3018_v58  ;;  %v3061_v57 = vld [vmem:[%s4346_s0 + $0x328] ss:$20 sps:$4 sm:$0xff]   ;;  %v3065_v58 = vld [vmem:[%s4346_s0 + $0x178] ss:$20 sps:$4 sm:$0xff]  }
  0xe1   :  { %1551 = vmatmul.mubr.bf16.gmra.mxu0 %v3020_v59  ;;  %1776 = vmatmul.mubr.bf16.gmra.mxu1 %v3021_v60  ;;  %v3068_v59 = vld [vmem:[%s4346_s0 + $0x354] ss:$20 sps:$4 sm:$0xff]  }
  0xe2   :  { %1558 = vmatprep.mubr.bf16.mxu0 %v3022_v61  ;;  %1783 = vmatprep.mubr.bf16.mxu1 %v3024_v62  ;;  %v3069_v60 = vld [vmem:[%s4346_s0 + $0x1a0] ss:$20 sps:$4 sm:$0xff]  }
  0xe9   :  { %1559 = vmatmul.mubr.bf16.gmra.mxu0 %v3026_v63  ;;  %1784 = vmatmul.mubr.bf16.gmra.mxu1 %v3027_v1 }
  0xea   :  { %1566 = vmatprep.mubr.bf16.mxu0 %v3029_v2  ;;  %1791 = vmatprep.mubr.bf16.mxu1 %v3031_v3 }
  0xf1   :  { %1567 = vmatmul.mubr.bf16.gmra.mxu0 %v3033_v4  ;;  %1792 = vmatmul.mubr.bf16.gmra.mxu1 %v3034_v5 }
  0xf2   :  { %1574 = vmatprep.mubr.bf16.mxu0 %v3035_v6  ;;  %1799 = vmatprep.mubr.bf16.mxu1 %v3037_v7  ;;  %v3066_v6 = vld [vmem:[%s4346_s0 + $0x350] ss:$20 sps:$4 sm:$0xff]   ;;  %v3070_v7 = vld [vmem:[%s4346_s0 + $0x1c8] ss:$20 sps:$4 sm:$0xff]  }
  0xf9   :  { %1575 = vmatmul.mubr.bf16.gmra.mxu0 %v3039_v8  ;;  %1800 = vmatmul.mubr.bf16.gmra.mxu1 %v3040_v9  ;;  %v3073_v8 = vld [vmem:[%s4346_s0 + $0x37c] ss:$20 sps:$4 sm:$0xff]  }
  0xfa   :  { %1807 = vmatprep.mubr.bf16.mxu1 %v3041_v10  ;;  %2760 = vmatprep.mubr.bf16.mxu0 %v3043_v11  ;;  %v3074_v9 = vld [vmem:[%s4346_s0 + $0x1f0] ss:$20 sps:$4 sm:$0xff]  }
 0x101   :  { %v3616_v0 = vpop.f32.mrf.mxu0  ;;  %v3618_v16 = vpop.f32.mrf.mxu1  ;;  %1808 = vmatmul.mubr.bf16.gmra.mxu1 %v3044_v12  ;;  %2761 = vmatmul.mubr.bf16.vlgmr.msra.gmra.mxu0 %v3045_v13 }
 0x102   :  { %4349 = vst [vmem:[#allocation2_spill] sm:$0xff] %v3618_v16  ;;  %1815 = vmatprep.mubr.bf16.mxu1 %v3046_v14  ;;  %2764 = vmatprep.mubr.bf16.mxu0 %v3048_v15 }
 0x103   :  { %v1394_v17 = vpop.f32.mrf.mxu0  ;;  %v1586_v18 = vpop.f32.mrf.mxu1 }
 0x105   :  { %v3620_v19 = vpop.f32.mrf.mxu0  ;;  %v3622_v20 = vpop.f32.mrf.mxu1 }
 0x106   :  { %4350 = vst [vmem:[#allocation3_spill] sm:$0xff] %v3622_v20 }
 0x107   :  { %v1397_v25 = vpop.f32.mrf.mxu0  ;;  %v1589_v26 = vpop.f32.mrf.mxu1 }
 0x109   :  { %v3636_v27 = vpop.f32.mrf.mxu0  ;;  %v3638_v28 = vpop.f32.mrf.mxu1  ;;  %1816 = vmatmul.mubr.bf16.gmra.mxu1 %v3049_v21  ;;  %2765 = vmatmul.mubr.bf16.gmra.mxu0 %v3050_v22  ;;  %v3071_v21 = vld [vmem:[%s4346_s0 + $0x378] ss:$20 sps:$4 sm:$0xff]  }
 0x10a   :  { %4351 = vst [vmem:[#allocation4_spill] sm:$0xff] %v3638_v28  ;;  %1823 = vmatprep.mubr.bf16.mxu1 %v3051_v23  ;;  %2768 = vmatprep.mubr.bf16.mxu0 %v3053_v24  ;;  %v3075_v22 = vld [vmem:[%s4346_s0 + $0x218] ss:$20 sps:$4 sm:$0xff]   ;;  %v3079_v24 = vld [vmem:[%s4346_s0 + $0x240] ss:$20 sps:$4 sm:$0xff]  }
 0x10b   :  { %v1402_v29 = vpop.f32.mrf.mxu0  ;;  %v1594_v30 = vpop.f32.mrf.mxu1  ;;  %v3078_v23 = vld [vmem:[%s4346_s0 + $0x3a4] ss:$20 sps:$4 sm:$0xff]  }
 0x10d   :  { %v3640_v31 = vpop.f32.mrf.mxu0  ;;  %v3642_v32 = vpop.f32.mrf.mxu1 }
 0x10e   :  { %4352 = vst [vmem:[#allocation5_spill] sm:$0xff] %v3642_v32 }
 0x10f   :  { %v1405_v37 = vpop.f32.mrf.mxu0  ;;  %v1597_v38 = vpop.f32.mrf.mxu1 }
 0x110   :  { %v3076_v37 = vld [vmem:[%s4346_s0 + $0x3a0] ss:$20 sps:$4 sm:$0xff]   ;;  %v3080_v38 = vld [vmem:[%s4346_s0 + $0x268] ss:$20 sps:$4 sm:$0xff]  }
 0x111   :  { %v3656_v39 = vpop.f32.mrf.mxu0  ;;  %v3658_v40 = vpop.f32.mrf.mxu1  ;;  %1824 = vmatmul.mubr.bf16.gmra.mxu1 %v3054_v33  ;;  %2769 = vmatmul.mubr.bf16.gmra.mxu0 %v3055_v34 }
 0x112   :  { %4353 = vst [vmem:[#allocation6_spill] sm:$0xff] %v3658_v40  ;;  %1831 = vmatprep.mubr.bf16.mxu1 %v3056_v35  ;;  %2772 = vmatprep.mubr.bf16.mxu0 %v3058_v36 }
 0x113   :  { %v1410_v41 = vpop.f32.mrf.mxu0  ;;  %v1602_v42 = vpop.f32.mrf.mxu1 }
 0x114   :  { %v3083_v41 = vld [vmem:[%s4346_s0 + $0x3cc] ss:$20 sps:$4 sm:$0xff]   ;;  %v3084_v42 = vld [vmem:[%s4346_s0 + $0x290] ss:$20 sps:$4 sm:$0xff]  }
 0x115   :  { %v3660_v43 = vpop.f32.mrf.mxu0  ;;  %v3662_v44 = vpop.f32.mrf.mxu1 }
 0x116   :  { %4354 = vst [vmem:[#allocation7_spill] sm:$0xff] %v3662_v44 }
 0x117   :  { %v1413_v49 = vpop.f32.mrf.mxu0  ;;  %v1605_v50 = vpop.f32.mrf.mxu1 }
 0x119   :  { %v3676_v51 = vpop.f32.mrf.mxu0  ;;  %v3678_v52 = vpop.f32.mrf.mxu1  ;;  %1832 = vmatmul.mubr.bf16.gmra.mxu1 %v3059_v45  ;;  %2773 = vmatmul.mubr.bf16.gmra.mxu0 %v3060_v46 }
 0x11a   :  { %4355 = vst [vmem:[#allocation8_spill] sm:$0xff] %v3678_v52  ;;  %1839 = vmatprep.mubr.bf16.mxu1 %v3063_v47  ;;  %2776 = vmatprep.mubr.bf16.mxu0 %v3064_v48 }
 0x11b   :  { %v1418_v53 = vpop.f32.mrf.mxu0  ;;  %v1610_v54 = vpop.f32.mrf.mxu1 }
 0x11d   :  { %v3680_v55 = vpop.f32.mrf.mxu0  ;;  %v3682_v56 = vpop.f32.mrf.mxu1 }
 0x11e   :  { %4356 = vst [vmem:[#allocation9_spill] sm:$0xff] %v3682_v56 }
 0x11f   :  { %v1421_v61 = vpop.f32.mrf.mxu0  ;;  %v1613_v62 = vpop.f32.mrf.mxu1 }
 0x121   :  { %v3696_v63 = vpop.f32.mrf.mxu0  ;;  %v3698_v1 = vpop.f32.mrf.mxu1  ;;  %1840 = vmatmul.mubr.bf16.gmra.mxu1 %v3061_v57  ;;  %2777 = vmatmul.mubr.bf16.gmra.mxu0 %v3065_v58  ;;  %v3081_v57 = vld [vmem:[%s4346_s0 + $0x3c8] ss:$20 sps:$4 sm:$0xff]   ;;  %v3085_v58 = vld [vmem:[%s4346_s0 + $0x2b8] ss:$20 sps:$4 sm:$0xff]  }
 0x122   :  { %4357 = vst [vmem:[#allocation10_spill] sm:$0xff] %v3698_v1  ;;  %1847 = vmatprep.mubr.bf16.mxu1 %v3068_v59  ;;  %2780 = vmatprep.mubr.bf16.mxu0 %v3069_v60  ;;  %v3088_v59 = vld [vmem:[%s4346_s0 + $0x3f4] ss:$20 sps:$4 sm:$0xff]  }
 0x123   :  { %v1426_v2 = vpop.f32.mrf.mxu0  ;;  %v1618_v3 = vpop.f32.mrf.mxu1  ;;  %v3089_v60 = vld [vmem:[%s4346_s0 + $0x2e0] ss:$20 sps:$4 sm:$0xff]  }
 0x125   :  { %v3700_v4 = vpop.f32.mrf.mxu0  ;;  %v3702_v5 = vpop.f32.mrf.mxu1 }
 0x126   :  { %4358 = vst [vmem:[#allocation11_spill] sm:$0xff] %v3702_v5 }
 0x127   :  { %v1429_v10 = vpop.f32.mrf.mxu0  ;;  %v1621_v11 = vpop.f32.mrf.mxu1 }
 0x128   :  { %v3086_v11 = vld [vmem:[%s4346_s0 + $0x3f0] ss:$20 sps:$4 sm:$0xff]  }
 0x129   :  { %v3716_v12 = vpop.f32.mrf.mxu0  ;;  %v3718_v13 = vpop.f32.mrf.mxu1  ;;  %1848 = vmatmul.mubr.bf16.gmra.mxu1 %v3066_v6  ;;  %2781 = vmatmul.mubr.bf16.gmra.mxu0 %v3070_v7 }
 0x12a   :  { %4359 = vst [vmem:[#allocation12_spill] sm:$0xff] %v3718_v13  ;;  %1855 = vmatprep.mubr.bf16.mxu1 %v3073_v8  ;;  %2784 = vmatprep.mubr.bf16.mxu0 %v3074_v9 }
 0x12b   :  { %v1434_v14 = vpop.f32.mrf.mxu0  ;;  %v1626_v15 = vpop.f32.mrf.mxu1 }
 0x12c   :  { %v3090_v14 = vld [vmem:[%s4346_s0 + $0x308] ss:$20 sps:$4 sm:$0xff]  }
 0x12d   :  { %v3720_v17 = vpop.f32.mrf.mxu0  ;;  %v3722_v18 = vpop.f32.mrf.mxu1 }
 0x12e   :  { %4360 = vst [vmem:[#allocation13_spill] sm:$0xff] %v3722_v18 }
 0x12f   :  { %v1437_v25 = vpop.f32.mrf.mxu0  ;;  %v1629_v26 = vpop.f32.mrf.mxu1 }
 0x131   :  { %v3736_v29 = vpop.f32.mrf.mxu0  ;;  %v3738_v30 = vpop.f32.mrf.mxu1  ;;  %1856 = vmatmul.mubr.bf16.gmra.mxu1 %v3071_v21  ;;  %2785 = vmatmul.mubr.bf16.gmra.mxu0 %v3075_v22  ;;  %v3094_v21 = vld [vmem:[%s4346_s0 + $0x330] ss:$20 sps:$4 sm:$0xff]  }
 0x132   :  { %4361 = vst [vmem:[#allocation14_spill] sm:$0xff] %v3738_v30  ;;  %1863 = vmatprep.mubr.bf16.mxu1 %v3078_v23  ;;  %2788 = vmatprep.mubr.bf16.mxu0 %v3079_v24 }
 0x133   :  { %v1442_v33 = vpop.f32.mrf.mxu0  ;;  %v1634_v34 = vpop.f32.mrf.mxu1 }
 0x135   :  { %v3740_v35 = vpop.f32.mrf.mxu0  ;;  %v3742_v36 = vpop.f32.mrf.mxu1 }
 0x136   :  { %4362 = vst [vmem:[#allocation15_spill] sm:$0xff] %v3742_v36 }
 0x137   :  { %v1445_v45 = vpop.f32.mrf.mxu0  ;;  %v1637_v46 = vpop.f32.mrf.mxu1 }
 0x138   :  { %v3099_v45 = vld [vmem:[%s4346_s0 + $0x380] ss:$20 sps:$4 sm:$0xff]  }
 0x139   :  { %v3756_v47 = vpop.f32.mrf.mxu0  ;;  %v3758_v48 = vpop.f32.mrf.mxu1  ;;  %1864 = vmatmul.mubr.bf16.gmra.mxu1 %v3076_v37  ;;  %2789 = vmatmul.mubr.bf16.gmra.mxu0 %v3080_v38  ;;  %v3091_v38 = vld [vmem:[%s4346_s0 + $0x418] ss:$20 sps:$4 sm:$0xff]  }
 0x13a   :  { %4363 = vst [vmem:[#allocation16_spill] sm:$0xff] %v3758_v48  ;;  %1871 = vmatprep.mubr.bf16.mxu1 %v3083_v41  ;;  %2792 = vmatprep.mubr.bf16.mxu0 %v3084_v42  ;;  %v3095_v41 = vld [vmem:[%s4346_s0 + $0x358] ss:$20 sps:$4 sm:$0xff]  }
 0x13b   :  { %v1450_v49 = vpop.f32.mrf.mxu0  ;;  %v1642_v50 = vpop.f32.mrf.mxu1 }
 0x13d   :  { %v3760_v53 = vpop.f32.mrf.mxu0  ;;  %v3762_v54 = vpop.f32.mrf.mxu1 }
 0x13e   :  { %4364 = vst [vmem:[#allocation17_spill] sm:$0xff] %v3762_v54 }
 0x13f   :  { %v1453_v61 = vpop.f32.mrf.mxu0  ;;  %v1645_v62 = vpop.f32.mrf.mxu1 }
 0x140   :  { %v3096_v62 = vld [vmem:[%s4346_s0 + $0x440] ss:$20 sps:$4 sm:$0xff]  }
 0x141   :  { %v3776_v2 = vpop.f32.mrf.mxu0  ;;  %v1681_v3 = vpop.f32.mrf.mxu1  ;;  %1872 = vmatmul.mubr.bf16.gmra.mxu1 %v3081_v57  ;;  %2793 = vmatmul.mubr.bf16.gmra.mxu0 %v3085_v58 }
 0x142   :  { %v3779_v6 = vadd.f32 %v1681_v3, %v3616_v0  ;;  %1879 = vmatprep.mubr.bf16.mxu1 %v3088_v59  ;;  %2796 = vmatprep.mubr.bf16.mxu0 %v3089_v60  ;;  %v3093_v0 = vld [vmem:[%s4346_s0 + $0x41c] ss:$20 sps:$4 sm:$0xff]  }
 0x143   :  { %v1458_v7 = vpop.f32.mrf.mxu0  ;;  %v1683_v8 = vpop.f32.mrf.mxu1  ;;  %v3100_v3 = vld [vmem:[%s4346_s0 + $0x3a8] ss:$20 sps:$4 sm:$0xff]  }
 0x144   :  { %v3104_v8 = vld [vmem:[%s4346_s0 + $0x3d0] ss:$20 sps:$4 sm:$0xff]  }
 0x145   :  { %v3781_v9 = vpop.f32.mrf.mxu0  ;;  %v1684_v10 = vpop.f32.mrf.mxu1 }
 0x146   :  { %v3790_v15 = vadd.f32 %v1684_v10, %v3620_v19 }
 0x147   :  { %v1461_v22 = vpop.f32.mrf.mxu0  ;;  %v1686_v23 = vpop.f32.mrf.mxu1 }
 0x149   :  { %v3798_v24 = vpop.f32.mrf.mxu0  ;;  %v1689_v25 = vpop.f32.mrf.mxu1  ;;  %1880 = vmatmul.mubr.bf16.gmra.mxu1 %v3086_v11  ;;  %2797 = vmatmul.mubr.bf16.gmra.mxu0 %v3090_v14 }
 0x14a   :  { %v3801_v26 = vadd.f32 %v1689_v25, %v3636_v27  ;;  %1887 = vmatprep.mubr.bf16.mxu1 %v3093_v0  ;;  %2800 = vmatprep.mubr.bf16.mxu0 %v3094_v21  ;;  %v3098_v27 = vld [vmem:[%s4346_s0 + $0x444] ss:$20 sps:$4 sm:$0xff]  }
 0x14b   :  { %v1466_v19 = vpop.f32.mrf.mxu0  ;;  %v1691_v33 = vpop.f32.mrf.mxu1 }
 0x14c   :  { %v3101_v19 = vld [vmem:[%s4346_s0 + $0x468] ss:$20 sps:$4 sm:$0xff]   ;;  %v3105_v33 = vld [vmem:[%s4346_s0 + $0x3f8] ss:$20 sps:$4 sm:$0xff]  }
 0x14d   :  { %v3803_v34 = vpop.f32.mrf.mxu0  ;;  %v1692_v37 = vpop.f32.mrf.mxu1 }
 0x14e   :  { %v3812_v42 = vadd.f32 %v1692_v37, %v3640_v31 }
 0x14f   :  { %v1469_v46 = vpop.f32.mrf.mxu0  ;;  %v1694_v49 = vpop.f32.mrf.mxu1 }
 0x151   :  { %v3820_v50 = vpop.f32.mrf.mxu0  ;;  %v1697_v57 = vpop.f32.mrf.mxu1  ;;  %1888 = vmatmul.mubr.bf16.gmra.mxu1 %v3091_v38  ;;  %2801 = vmatmul.mubr.bf16.gmra.mxu0 %v3095_v41  ;;  %v3109_v38 = vld [vmem:[%s4346_s0 + $0x420] ss:$20 sps:$4 sm:$0xff]  }
 0x152   :  { %v3823_v58 = vadd.f32 %v1697_v57, %v3656_v39  ;;  %1895 = vmatprep.mubr.bf16.mxu1 %v3098_v27  ;;  %2804 = vmatprep.mubr.bf16.mxu0 %v3099_v45  ;;  %v3103_v39 = vld [vmem:[%s4346_s0 + $0x46c] ss:$20 sps:$4 sm:$0xff]  }
 0x153   :  { %v1474_v31 = vpop.f32.mrf.mxu0  ;;  %v1699_v59 = vpop.f32.mrf.mxu1 }
 0x155   :  { %v3825_v60 = vpop.f32.mrf.mxu0  ;;  %v1700_v61 = vpop.f32.mrf.mxu1 }
 0x156   :  { %v3834_v7 = vadd.f32 %v1700_v61, %v3660_v43  ;;  %v3106_v61 = vld [vmem:[%s4346_s0 + $0x490] ss:$20 sps:$4 sm:$0xff]  }
 0x157   :  { %v1477_v10 = vpop.f32.mrf.mxu0  ;;  %v1702_v11 = vpop.f32.mrf.mxu1 }
 0x159   :  { %v3842_v14 = vpop.f32.mrf.mxu0  ;;  %v1705_v0 = vpop.f32.mrf.mxu1  ;;  %1896 = vmatmul.mubr.bf16.gmra.mxu1 %v3096_v62  ;;  %2805 = vmatmul.mubr.bf16.gmra.mxu0 %v3100_v3  ;;  %v3110_v62 = vld [vmem:[%s4346_s0 + $0x448] ss:$20 sps:$4 sm:$0xff]  }
 0x15a   :  { %v3845_v21 = vadd.f32 %v1705_v0, %v3676_v51  ;;  %1903 = vmatprep.mubr.bf16.mxu1 %v3103_v39  ;;  %2808 = vmatprep.mubr.bf16.mxu0 %v3104_v8  ;;  %v3108_v51 = vld [vmem:[%s4346_s0 + $0x494] ss:$20 sps:$4 sm:$0xff]   ;;  %v3114_v39 = vld [vmem:[%s4346_s0 + $0x470] ss:$20 sps:$4 sm:$0xff]  }
 0x15b   :  { %v1482_v43 = vpop.f32.mrf.mxu0  ;;  %v1707_v22 = vpop.f32.mrf.mxu1 }
 0x15d   :  { %v3847_v23 = vpop.f32.mrf.mxu0  ;;  %v1708_v25 = vpop.f32.mrf.mxu1 }
 0x15e   :  { %v3856_v37 = vadd.f32 %v1708_v25, %v3680_v55 }
 0x15f   :  { %v1485_v41 = vpop.f32.mrf.mxu0  ;;  %v1710_v27 = vpop.f32.mrf.mxu1 }
 0x160   :  { %v3119_v41 = vld [vmem:[%s4346_s0 + $0x4c0] ss:$20 sps:$4 sm:$0xff]  }
 0x161   :  { %v3864_v45 = vpop.f32.mrf.mxu0  ;;  %v1713_v46 = vpop.f32.mrf.mxu1  ;;  %1904 = vmatmul.mubr.bf16.gmra.mxu1 %v3101_v19  ;;  %2809 = vmatmul.mubr.bf16.gmra.mxu0 %v3105_v33  ;;  %v3111_v33 = vld [vmem:[%s4346_s0 + $0x4b8] ss:$20 sps:$4 sm:$0xff]  }
 0x162   :  { %v3867_v49 = vadd.f32 %v1713_v46, %v3696_v63  ;;  %1911 = vmatprep.mubr.bf16.mxu1 %v3108_v51  ;;  %2812 = vmatprep.mubr.bf16.mxu0 %v3109_v38  ;;  %v3113_v63 = vld [vmem:[%s4346_s0 + $0x4bc] ss:$20 sps:$4 sm:$0xff]   ;;  %v3115_v51 = vld [vmem:[%s4346_s0 + $0x498] ss:$20 sps:$4 sm:$0xff]  }
 0x163   :  { %v1490_v55 = vpop.f32.mrf.mxu0  ;;  %v1715_v57 = vpop.f32.mrf.mxu1 }
 0x165   :  { %v3869_v31 = vpop.f32.mrf.mxu0  ;;  %v1716_v59 = vpop.f32.mrf.mxu1 }
 0x166   :  { %v3878_v3 = vadd.f32 %v1716_v59, %v3700_v4 }
 0x167   :  { %v1493_v8 = vpop.f32.mrf.mxu0  ;;  %v1718_v10 = vpop.f32.mrf.mxu1 }
 0x168   :  { %v3120_v8 = vld [vmem:[%s4346_s0 + $0x4e8] ss:$20 sps:$4 sm:$0xff]  }
 0x169   :  { %v3886_v11 = vpop.f32.mrf.mxu0  ;;  %v1721_v0 = vpop.f32.mrf.mxu1  ;;  %1912 = vmatmul.mubr.bf16.gmra.mxu1 %v3106_v61  ;;  %2813 = vmatmul.mubr.bf16.gmra.mxu0 %v3110_v62 }
 0x16a   :  { %v3889_v43 = vadd.f32 %v1721_v0, %v3716_v12  ;;  %1919 = vmatprep.mubr.bf16.mxu1 %v3113_v63  ;;  %2816 = vmatprep.mubr.bf16.mxu0 %v3114_v39  ;;  %v3118_v12 = vld [vmem:[%s4346_s0 + $0x4e4] ss:$20 sps:$4 sm:$0xff]   ;;  %v3116_v39 = vld [vmem:[%s4346_s0 + $0x4e0] ss:$20 sps:$4 sm:$0xff]  }
 0x16b   :  { %v1498_v4 = vpop.f32.mrf.mxu0  ;;  %v1723_v22 = vpop.f32.mrf.mxu1 }
 0x16d   :  { %v3891_v25 = vpop.f32.mrf.mxu0  ;;  %v1724_v19 = vpop.f32.mrf.mxu1 }
 0x16e   :  { %v3900_v38 = vadd.f32 %v1724_v19, %v3720_v17 }
 0x16f   :  { %v1501_v27 = vpop.f32.mrf.mxu0  ;;  %v1726_v46 = vpop.f32.mrf.mxu1 }
 0x171   :  { %v3908_v55 = vpop.f32.mrf.mxu0  ;;  %v1729_v57 = vpop.f32.mrf.mxu1  ;;  %1920 = vmatmul.mubr.bf16.gmra.mxu1 %v3111_v33  ;;  %2817 = vmatmul.mubr.bf16.gmra.mxu0 %v3115_v51 }
 0x172   :  { %v3911_v59 = vadd.f32 %v1729_v57, %v3736_v29  ;;  %1927 = vmatprep.mubr.bf16.mxu1 %v3118_v12  ;;  %2820 = vmatprep.mubr.bf16.mxu0 %v3119_v41 }
 0x173   :  { %v1506_v17 = vpop.f32.mrf.mxu0  ;;  %v1731_v61 = vpop.f32.mrf.mxu1 }
 0x175   :  { %v3913_v62 = vpop.f32.mrf.mxu0  ;;  %v1732_v63 = vpop.f32.mrf.mxu1 }
 0x176   :  { %v3922_v10 = vadd.f32 %v1732_v63, %v3740_v35 }
 0x177   :  { %v1509_v29 = vpop.f32.mrf.mxu0  ;;  %v1734_v0 = vpop.f32.mrf.mxu1 }
 0x179   :  { %v3924_v4 = vpop.f32.mrf.mxu0  ;;  %v1737_v22 = vpop.f32.mrf.mxu1  ;;  %1928 = vmatmul.mubr.bf16.gmra.mxu1 %v3116_v39  ;;  %2821 = vmatmul.mubr.bf16.gmra.mxu0 %v3120_v8 }
 0x17a   :  { %v3927_v19 = vadd.f32 %v1737_v22, %v3756_v47 }
 0x17b   :  { %v1514_v33 = vpop.f32.mrf.mxu0  ;;  %v1739_v51 = vpop.f32.mrf.mxu1 }
 0x17d   :  { %v3929_v12 = vpop.f32.mrf.mxu0  ;;  %v1740_v41 = vpop.f32.mrf.mxu1 }
 0x17e   :  { %v3932_v27 = vadd.f32 %v1740_v41, %v3760_v53 }
 0x17f   :  { %v1517_v35 = vpop.f32.mrf.mxu0  ;;  %v1742_v46 = vpop.f32.mrf.mxu1 }
 0x181   :  { %v3934_v57 = vpop.f32.mrf.mxu0  ;;  %v1745_v17 = vpop.f32.mrf.mxu1 }
 0x182   :  { %v3937_v61 = vadd.f32 %v1745_v17, %v3776_v2 }
 0x183   :  { %v1522_v63 = vpop.f32.mrf.mxu0  ;;  %v1747_v39 = vpop.f32.mrf.mxu1 }
 0x185   :  { %v3939_v47 = vpop.f32.mrf.mxu0  ;;  %v1748_v8 = vpop.f32.mrf.mxu1 }
 0x186   :  { %v3942_v29 = vadd.f32 %v1748_v8, %v3781_v9 }
 0x187   :  { %v1525_v0 = vpop.f32.mrf.mxu0  ;;  %v1750_v22 = vpop.f32.mrf.mxu1 }
 0x189   :  { %v3944_v53 = vpop.f32.mrf.mxu0  ;;  %v1753_v33 = vpop.f32.mrf.mxu1 }
 0x18a   :  { %v3947_v51 = vadd.f32 %v1753_v33, %v3798_v24 }
 0x18b   :  { %v1530_v41 = vpop.f32.mrf.mxu0  ;;  %v1755_v35 = vpop.f32.mrf.mxu1 }
 0x18d   :  { %v3949_v2 = vpop.f32.mrf.mxu0  ;;  %v1756_v46 = vpop.f32.mrf.mxu1 }
 0x18e   :  { %v3952_v17 = vadd.f32 %v1756_v46, %v3803_v34 }
 0x18f   :  { %v1533_v63 = vpop.f32.mrf.mxu0  ;;  %v1758_v39 = vpop.f32.mrf.mxu1 }
 0x191   :  { %v3954_v9 = vpop.f32.mrf.mxu0  ;;  %v1761_v8 = vpop.f32.mrf.mxu1 }
 0x192   :  { %v3957_v0 = vadd.f32 %v1761_v8, %v3820_v50 }
 0x193   :  { %v1538_v22 = vpop.f32.mrf.mxu0  ;;  %v1763_v54 = vpop.f32.mrf.mxu1 }
 0x195   :  { %v3959_v24 = vpop.f32.mrf.mxu0  ;;  %v1764_v33 = vpop.f32.mrf.mxu1 }
 0x196   :  { %v3962_v41 = vadd.f32 %v1764_v33, %v3825_v60 }
 0x197   :  { %v1541_v35 = vpop.f32.mrf.mxu0  ;;  %v1766_v36 = vpop.f32.mrf.mxu1 }
 0x199   :  { %v3964_v34 = vpop.f32.mrf.mxu0  ;;  %v1769_v46 = vpop.f32.mrf.mxu1 }
 0x19a   :  { %v3967_v63 = vadd.f32 %v1769_v46, %v3842_v14 }
 0x19b   :  { %v1546_v39 = vpop.f32.mrf.mxu0  ;;  %v1771_v48 = vpop.f32.mrf.mxu1 }
 0x19d   :  { %v3969_v50 = vpop.f32.mrf.mxu0  ;;  %v1772_v8 = vpop.f32.mrf.mxu1 }
 0x19e   :  { %v3972_v54 = vadd.f32 %v1772_v8, %v3847_v23 }
 0x19f   :  { %v1549_v22 = vpop.f32.mrf.mxu0  ;;  %v1774_v30 = vpop.f32.mrf.mxu1 }
 0x1a1   :  { %v3974_v60 = vpop.f32.mrf.mxu0  ;;  %v1777_v33 = vpop.f32.mrf.mxu1 }
 0x1a2   :  { %v3977_v36 = vadd.f32 %v1777_v33, %v3864_v45 }
 0x1a3   :  { %v1554_v35 = vpop.f32.mrf.mxu0  ;;  %v1779_v5 = vpop.f32.mrf.mxu1 }
 0x1a5   :  { %v3979_v14 = vpop.f32.mrf.mxu0  ;;  %v1780_v46 = vpop.f32.mrf.mxu1 }
 0x1a6   :  { %v3982_v48 = vadd.f32 %v1780_v46, %v3869_v31 }
 0x1a7   :  { %v1557_v39 = vpop.f32.mrf.mxu0  ;;  %v1782_v18 = vpop.f32.mrf.mxu1 }
 0x1a9   :  { %v3984_v23 = vpop.f32.mrf.mxu0  ;;  %v1785_v8 = vpop.f32.mrf.mxu1 }
 0x1aa   :  { %v3987_v30 = vadd.f32 %v1785_v8, %v3886_v11 }
 0x1ab   :  { %v1562_v22 = vpop.f32.mrf.mxu0  ;;  %v1787_v1 = vpop.f32.mrf.mxu1 }
 0x1ad   :  { %v3989_v45 = vpop.f32.mrf.mxu0  ;;  %v1788_v33 = vpop.f32.mrf.mxu1 }
 0x1ae   :  { %v3992_v5 = vadd.f32 %v1788_v33, %v3891_v25 }
 0x1af   :  { %v1565_v35 = vpop.f32.mrf.mxu0  ;;  %v1790_v13 = vpop.f32.mrf.mxu1 }
 0x1b1   :  { %v3994_v31 = vpop.f32.mrf.mxu0  ;;  %v1793_v46 = vpop.f32.mrf.mxu1 }
 0x1b2   :  { %v3997_v18 = vadd.f32 %v1793_v46, %v3908_v55 }
 0x1b3   :  { %v1570_v39 = vpop.f32.mrf.mxu0  ;;  %v1795_v44 = vpop.f32.mrf.mxu1 }
 0x1b5   :  { %v3999_v11 = vpop.f32.mrf.mxu0  ;;  %v1796_v8 = vpop.f32.mrf.mxu1 }
 0x1b6   :  { %4365 = vst [vmem:[#allocation18_spill] sm:$0xff] %v3999_v11  ;;  %v4002_v1 = vadd.f32 %v1796_v8, %v3913_v62 }
 0x1b7   :  { %v1573_v22 = vpop.f32.mrf.mxu0  ;;  %v1798_v56 = vpop.f32.mrf.mxu1 }
 0x1b9   :  { %v4004_v25 = vpop.f32.mrf.mxu0  ;;  %v4006_v33 = vpop.f32.mrf.mxu1 }
 0x1bb   :  { %v1578_v13 = vpop.f32.mrf.mxu0  ;;  %v1803_v35 = vpop.f32.mrf.mxu1 }
 0x1bd   :  { %v4008_v40 = vpop.f32.mrf.mxu0  ;;  %v4010_v55 = vpop.f32.mrf.mxu1 }
 0x1be   :  { %4366 = vst [vmem:[#allocation19_spill] sm:$0xff] %v4008_v40 }
 0x1bf   :  { %v1581_v46 = vpop.f32.mrf.mxu0  ;;  %v1806_v44 = vpop.f32.mrf.mxu1 }
 0x1c1   :  { %v1809_v39 = vpop.f32.mrf.mxu1  ;;  %v2762_v52 = vpop.f32.mrf.mxu0 }
 0x1c2   :  { %v4013_v20 = vadd.f32 %v1809_v39, %v3934_v57  ;;  %v1979_v62 = vadd.f32 %v2762_v52, %v3801_v26 }
 0x1c3   :  { %v1811_v56 = vpop.f32.mrf.mxu1  ;;  %v1970_v8 = vpop.f32.mrf.mxu0 }
 0x1c4   :  { %2227 = vst [vmem:[%s4347_s2 + $0x10] sm:$0xff] %v1979_v62  ;;  %v1971_v22 = vadd.f32 %v1970_v8, %v3779_v6 }
 0x1c5   :  { %v1812_v13 = vpop.f32.mrf.mxu1  ;;  %v2763_v35 = vpop.f32.mrf.mxu0 }
 0x1c6   :  { %2225 = vst [vmem:[%s4347_s2] sm:$0xff] %v1971_v22  ;;  %v4024_v46 = vadd.f32 %v1812_v13, %v3939_v47  ;;  %v1982_v57 = vadd.f32 %v2763_v35, %v3812_v42  ;;  %v2358_v56 = vmul.f32 %v1971_v22, %v1971_v22 }
 0x1c7   :  { %v1814_v52 = vpop.f32.mrf.mxu1  ;;  %v1973_v26 = vpop.f32.mrf.mxu0 }
 0x1c8   :  { %2228 = vst [vmem:[%s4347_s2 + $0x18] sm:$0xff] %v1982_v57  ;;  %v1974_v44 = vadd.f32 %v1973_v26, %v3790_v15  ;;  %v2360_v52 = vmul.f32 %v1979_v62, %v1979_v62  ;;  %v2361_v11 = vmul.f32 %v1982_v57, %v1982_v57 }
 0x1c9   :  { %v4031_v6 = vpop.f32.mrf.mxu1  ;;  %v2766_v39 = vpop.f32.mrf.mxu0 }
 0x1ca   :  { %2226 = vst [vmem:[%s4347_s2 + $0x8] sm:$0xff] %v1974_v44  ;;  %v2289_v47 = vadd.f32 %v1974_v44, %v1971_v22  ;;  %v2359_v8 = vmul.f32 %v1974_v44, %v1974_v44  ;;  %v1995_v42 = vadd.f32 %v2766_v39, %v3845_v21 }
 0x1cb   :  { %v1819_v13 = vpop.f32.mrf.mxu1  ;;  %v1986_v35 = vpop.f32.mrf.mxu0 }
 0x1cc   :  { %v2290_v32 = vadd.f32 %v2289_v47, %v1979_v62  ;;  %v2422_v16 = vadd.f32 %v2359_v8, %v2358_v56  ;;  %2231 = vst [vmem:[%s4347_s2 + $0x30] sm:$0xff] %v1995_v42  ;;  %v1987_v15 = vadd.f32 %v1986_v35, %v3823_v58 }
 0x1cd   :  { %v4041_v26 = vpop.f32.mrf.mxu1  ;;  %v2767_v28 = vpop.f32.mrf.mxu0 }
 0x1ce   :  { %v2423_v40 = vadd.f32 %v2422_v16, %v2360_v52  ;;  %2229 = vst [vmem:[%s4347_s2 + $0x20] sm:$0xff] %v1987_v15  ;;  %v2291_v21 = vadd.f32 %v2290_v32, %v1982_v57  ;;  %v1998_v22 = vadd.f32 %v2767_v28, %v3856_v37  ;;  %v2362_v56 = vmul.f32 %v1987_v15, %v1987_v15 }
 0x1cf   :  { %v1822_v62 = vpop.f32.mrf.mxu1  ;;  %v1989_v44 = vpop.f32.mrf.mxu0 }
 0x1d0   :  { %v2292_v39 = vadd.f32 %v2291_v21, %v1987_v15  ;;  %v2424_v47 = vadd.f32 %v2423_v40, %v2361_v11  ;;  %v1990_v8 = vadd.f32 %v1989_v44, %v3834_v7  ;;  %2232 = vst [vmem:[%s4347_s2 + $0x38] sm:$0xff] %v1998_v22  ;;  %v2364_v11 = vmul.f32 %v1995_v42, %v1995_v42 }
 0x1d1   :  { %v4051_v58 = vpop.f32.mrf.mxu1  ;;  %v2770_v16 = vpop.f32.mrf.mxu0  ;;  %v2365_v62 = vmul.f32 %v1998_v22, %v1998_v22 }
 0x1d2   :  { %v2425_v13 = vadd.f32 %v2424_v47, %v2362_v56  ;;  %2230 = vst [vmem:[%s4347_s2 + $0x28] sm:$0xff] %v1990_v8  ;;  %v2293_v28 = vadd.f32 %v2292_v39, %v1990_v8  ;;  %v2363_v32 = vmul.f32 %v1990_v8, %v1990_v8  ;;  %v2011_v37 = vadd.f32 %v2770_v16, %v3889_v43 }
 0x1d3   :  { %v1827_v57 = vpop.f32.mrf.mxu1  ;;  %v2002_v40 = vpop.f32.mrf.mxu0 }
 0x1d4   :  { %v2294_v7 = vadd.f32 %v2293_v28, %v1995_v42  ;;  %v2426_v35 = vadd.f32 %v2425_v13, %v2363_v32  ;;  %v2003_v52 = vadd.f32 %v2002_v40, %v3867_v49  ;;  %2235 = vst [vmem:[%s4347_s2 + $0x50] sm:$0xff] %v2011_v37 }
 0x1d5   :  { %v4061_v15 = vpop.f32.mrf.mxu1  ;;  %v2771_v21 = vpop.f32.mrf.mxu0 }
 0x1d6   :  { %v2427_v44 = vadd.f32 %v2426_v35, %v2364_v11  ;;  %2233 = vst [vmem:[%s4347_s2 + $0x40] sm:$0xff] %v2003_v52  ;;  %v2295_v43 = vadd.f32 %v2294_v7, %v1998_v22  ;;  %v2014_v39 = vadd.f32 %v2771_v21, %v3900_v38  ;;  %v2366_v49 = vmul.f32 %v2003_v52, %v2003_v52 }
 0x1d7   :  { %v1830_v42 = vpop.f32.mrf.mxu1  ;;  %v2005_v56 = vpop.f32.mrf.mxu0  ;;  %v2368_v7 = vmul.f32 %v2011_v37, %v2011_v37 }
 0x1d8   :  { %v2296_v47 = vadd.f32 %v2295_v43, %v2003_v52  ;;  %v2428_v8 = vadd.f32 %v2427_v44, %v2365_v62  ;;  %v2006_v16 = vadd.f32 %v2005_v56, %v3878_v3  ;;  %2236 = vst [vmem:[%s4347_s2 + $0x58] sm:$0xff] %v2014_v39  ;;  %v2369_v44 = vmul.f32 %v2014_v39, %v2014_v39 }
 0x1d9   :  { %v4071_v13 = vpop.f32.mrf.mxu1  ;;  %v2774_v28 = vpop.f32.mrf.mxu0 }
 0x1da   :  { %v2429_v32 = vadd.f32 %v2428_v8, %v2366_v49  ;;  %2234 = vst [vmem:[%s4347_s2 + $0x48] sm:$0xff] %v2006_v16  ;;  %v2297_v38 = vadd.f32 %v2296_v47, %v2006_v16  ;;  %v2367_v22 = vmul.f32 %v2006_v16, %v2006_v16  ;;  %v2027_v57 = vadd.f32 %v2774_v28, %v3927_v19 }
 0x1db   :  { %v1835_v40 = vpop.f32.mrf.mxu1  ;;  %v2018_v11 = vpop.f32.mrf.mxu0 }
 0x1dc   :  { %v2298_v3 = vadd.f32 %v2297_v38, %v2011_v37  ;;  %v2430_v35 = vadd.f32 %v2429_v32, %v2367_v22  ;;  %v2019_v52 = vadd.f32 %v2018_v11, %v3911_v59  ;;  %2239 = vst [vmem:[%s4347_s2 + $0x70] sm:$0xff] %v2027_v57  ;;  %v2372_v11 = vmul.f32 %v2027_v57, %v2027_v57 }
 0x1dd   :  { %v4081_v21 = vpop.f32.mrf.mxu1  ;;  %v2775_v62 = vpop.f32.mrf.mxu0 }
 0x1de   :  { %v2431_v43 = vadd.f32 %v2430_v35, %v2368_v7  ;;  %2237 = vst [vmem:[%s4347_s2 + $0x60] sm:$0xff] %v2019_v52  ;;  %v2299_v19 = vadd.f32 %v2298_v3, %v2014_v39  ;;  %v2030_v42 = vadd.f32 %v2775_v62, %v3932_v27  ;;  %v2370_v59 = vmul.f32 %v2019_v52, %v2019_v52 }
 0x1df   :  { %v1838_v37 = vpop.f32.mrf.mxu1  ;;  %v2021_v56 = vpop.f32.mrf.mxu0 }
 0x1e0   :  { %v2300_v47 = vadd.f32 %v2299_v19, %v2019_v52  ;;  %v2432_v49 = vadd.f32 %v2431_v43, %v2369_v44  ;;  %v2022_v8 = vadd.f32 %v2021_v56, %v3922_v10  ;;  %2240 = vst [vmem:[%s4347_s2 + $0x78] sm:$0xff] %v2030_v42  ;;  %v2373_v62 = vmul.f32 %v2030_v42, %v2030_v42 }
 0x1e1   :  { %v4091_v16 = vpop.f32.mrf.mxu1  ;;  %v2778_v28 = vpop.f32.mrf.mxu0 }
 0x1e2   :  { %v2433_v32 = vadd.f32 %v2432_v49, %v2370_v59  ;;  %2238 = vst [vmem:[%s4347_s2 + $0x68] sm:$0xff] %v2022_v8  ;;  %v2301_v27 = vadd.f32 %v2300_v47, %v2022_v8  ;;  %v2371_v39 = vmul.f32 %v2022_v8, %v2022_v8  ;;  %v2043_v38 = vadd.f32 %v2778_v28, %v3947_v51 }
 0x1e3   :  { %v1843_v22 = vpop.f32.mrf.mxu1  ;;  %v2034_v40 = vpop.f32.mrf.mxu0 }
 0x1e4   :  { %v2302_v10 = vadd.f32 %v2301_v27, %v2027_v57  ;;  %v2434_v7 = vadd.f32 %v2433_v32, %v2371_v39  ;;  %v2035_v3 = vadd.f32 %v2034_v40, %v3937_v61  ;;  %2243 = vst [vmem:[%s4347_s2 + $0x90] sm:$0xff] %v2043_v38  ;;  %v2376_v39 = vmul.f32 %v2043_v38, %v2043_v38 }
 0x1e5   :  { %v4101_v35 = vpop.f32.mrf.mxu1  ;;  %v2779_v52 = vpop.f32.mrf.mxu0 }
 0x1e6   :  { %v2435_v44 = vadd.f32 %v2434_v7, %v2372_v11  ;;  %2241 = vst [vmem:[%s4347_s2 + $0x80] sm:$0xff] %v2035_v3  ;;  %v2303_v51 = vadd.f32 %v2302_v10, %v2030_v42  ;;  %v2046_v43 = vadd.f32 %v2779_v52, %v3952_v17  ;;  %v2374_v61 = vmul.f32 %v2035_v3, %v2035_v3 }
 0x1e7   :  { %v1846_v57 = vpop.f32.mrf.mxu1  ;;  %v2037_v19 = vpop.f32.mrf.mxu0 }
 0x1e8   :  { %v2304_v37 = vadd.f32 %v2303_v51, %v2035_v3  ;;  %v2436_v56 = vadd.f32 %v2435_v44, %v2373_v62  ;;  %v2038_v47 = vadd.f32 %v2037_v19, %v3942_v29  ;;  %2244 = vst [vmem:[%s4347_s2 + $0x98] sm:$0xff] %v2046_v43  ;;  %v2377_v7 = vmul.f32 %v2046_v43, %v2046_v43 }
 0x1e9   :  { %v4111_v59 = vpop.f32.mrf.mxu1  ;;  %v2782_v49 = vpop.f32.mrf.mxu0 }
 0x1ea   :  { %v2437_v8 = vadd.f32 %v2436_v56, %v2374_v61  ;;  %2242 = vst [vmem:[%s4347_s2 + $0x88] sm:$0xff] %v2038_v47  ;;  %v2305_v17 = vadd.f32 %v2304_v37, %v2038_v47  ;;  %v2375_v42 = vmul.f32 %v2038_v47, %v2038_v47  ;;  %v2059_v28 = vadd.f32 %v2782_v49, %v3967_v63 }
 0x1eb   :  { %v1851_v32 = vpop.f32.mrf.mxu1  ;;  %v2050_v27 = vpop.f32.mrf.mxu0 }
 0x1ec   :  { %v2306_v29 = vadd.f32 %v2305_v17, %v2043_v38  ;;  %v2438_v22 = vadd.f32 %v2437_v8, %v2375_v42  ;;  %v2051_v40 = vadd.f32 %v2050_v27, %v3957_v0  ;;  %2247 = vst [vmem:[%s4347_s2 + $0xb0] sm:$0xff] %v2059_v28  ;;  %v2380_v8 = vmul.f32 %v2059_v28, %v2059_v28 }
 0x1ed   :  { %v4121_v11 = vpop.f32.mrf.mxu1  ;;  %v2783_v10 = vpop.f32.mrf.mxu0 }
 0x1ee   :  { %v2439_v3 = vadd.f32 %v2438_v22, %v2376_v39  ;;  %2245 = vst [vmem:[%s4347_s2 + $0xa0] sm:$0xff] %v2051_v40  ;;  %v2307_v63 = vadd.f32 %v2306_v29, %v2046_v43  ;;  %v2062_v52 = vadd.f32 %v2783_v10, %v3972_v54  ;;  %v2378_v0 = vmul.f32 %v2051_v40, %v2051_v40 }
 0x1ef   :  { %v1854_v38 = vpop.f32.mrf.mxu1  ;;  %v2053_v62 = vpop.f32.mrf.mxu0 }
 0x1f0   :  { %v2308_v44 = vadd.f32 %v2307_v63, %v2051_v40  ;;  %v2440_v51 = vadd.f32 %v2439_v3, %v2377_v7  ;;  %v2054_v57 = vadd.f32 %v2053_v62, %v3962_v41  ;;  %2248 = vst [vmem:[%s4347_s2 + $0xb8] sm:$0xff] %v2062_v52  ;;  %v2381_v39 = vmul.f32 %v2062_v52, %v2062_v52 }
 0x1f1   :  { %v4131_v19 = vpop.f32.mrf.mxu1  ;;  %v2786_v37 = vpop.f32.mrf.mxu0  ;;  %v1802_v63 = vadd.f32 %v4006_v33, %v3924_v4 }
 0x1f2   :  { %v2441_v61 = vadd.f32 %v2440_v51, %v2378_v0  ;;  %2246 = vst [vmem:[%s4347_s2 + $0xa8] sm:$0xff] %v2054_v57  ;;  %v2309_v54 = vadd.f32 %v2308_v44, %v2054_v57  ;;  %v2379_v43 = vmul.f32 %v2054_v57, %v2054_v57  ;;  %v2075_v56 = vadd.f32 %v2786_v37, %v3987_v30 }
 0x1f3   :  { %v1859_v47 = vpop.f32.mrf.mxu1  ;;  %v2066_v49 = vpop.f32.mrf.mxu0 }
 0x1f4   :  { %v2310_v41 = vadd.f32 %v2309_v54, %v2059_v28  ;;  %v2442_v17 = vadd.f32 %v2441_v61, %v2379_v43  ;;  %v2067_v42 = vadd.f32 %v2066_v49, %v3977_v36  ;;  %2251 = vst [vmem:[%s4347_s2 + $0xd0] sm:$0xff] %v2075_v56  ;;  %v2384_v57 = vmul.f32 %v2075_v56, %v2075_v56 }
 0x1f5   :  { %v4141_v32 = vpop.f32.mrf.mxu1  ;;  %v2787_v27 = vpop.f32.mrf.mxu0  ;;  %v1805_v61 = vadd.f32 %v4010_v55, %v3929_v12 }
 0x1f6   :  { %v2443_v29 = vadd.f32 %v2442_v17, %v2380_v8  ;;  %2249 = vst [vmem:[%s4347_s2 + $0xc0] sm:$0xff] %v2067_v42  ;;  %v2311_v30 = vadd.f32 %v2310_v41, %v2062_v52  ;;  %v2078_v22 = vadd.f32 %v2787_v27, %v3992_v5  ;;  %v2382_v36 = vmul.f32 %v2067_v42, %v2067_v42 }
 0x1f7   :  { %v1862_v28 = vpop.f32.mrf.mxu1  ;;  %v2069_v40 = vpop.f32.mrf.mxu0  ;;  %v1818_v27 = vadd.f32 %v4031_v6, %v3944_v53 }
 0x1f8   :  { %v2312_v10 = vadd.f32 %v2311_v30, %v2067_v42  ;;  %v2444_v7 = vadd.f32 %v2443_v29, %v2381_v39  ;;  %v2070_v3 = vadd.f32 %v2069_v40, %v3982_v48  ;;  %2252 = vst [vmem:[%s4347_s2 + $0xd8] sm:$0xff] %v2078_v22  ;;  %v2385_v47 = vmul.f32 %v2078_v22, %v2078_v22 }
 0x1f9   :  { %v4153_v38 = vpop.f32.mrf.mxu1  ;;  %v2790_v62 = vpop.f32.mrf.mxu0 }
 0x1fa   :  { %v2445_v52 = vadd.f32 %v2444_v7, %v2382_v36  ;;  %2250 = vst [vmem:[%s4347_s2 + $0xc8] sm:$0xff] %v2070_v3  ;;  %v2313_v5 = vadd.f32 %v2312_v10, %v2070_v3  ;;  %v2383_v44 = vmul.f32 %v2070_v3, %v2070_v3  ;;  %v2091_v0 = vadd.f32 %v2790_v62, %v1802_v63 }
 0x1fb   :  { %v1867_v51 = vpop.f32.mrf.mxu1  ;;  %v2082_v48 = vpop.f32.mrf.mxu0  ;;  %v1821_v3 = vadd.f32 %v4041_v26, %v3949_v2 }
 0x1fc   :  { %v2314_v37 = vadd.f32 %v2313_v5, %v2075_v56  ;;  %v2446_v4 = vadd.f32 %v2445_v52, %v2383_v44  ;;  %v2083_v33 = vadd.f32 %v2082_v48, %v3997_v18  ;;  %2255 = vst [vmem:[%s4347_s2 + $0xf0] sm:$0xff] %v2091_v0  ;;  %v2388_v36 = vmul.f32 %v2091_v0, %v2091_v0 }
 0x1fd   :  { %v4164_v54 = vpop.f32.mrf.mxu1  ;;  %v2791_v43 = vpop.f32.mrf.mxu0 }
 0x1fe   :  { %v2447_v49 = vadd.f32 %v2446_v4, %v2384_v57  ;;  %2253 = vst [vmem:[%s4347_s2 + $0xe0] sm:$0xff] %v2083_v33  ;;  %v2315_v56 = vadd.f32 %v2314_v37, %v2078_v22  ;;  %v2094_v8 = vadd.f32 %v2791_v43, %v1805_v61  ;;  %v2386_v42 = vmul.f32 %v2083_v33, %v2083_v33 }
 0x1ff   :  { %v1870_v41 = vpop.f32.mrf.mxu1  ;;  %v2085_v18 = vpop.f32.mrf.mxu0  ;;  %v1834_v37 = vadd.f32 %v4071_v13, %v3964_v34  ;;  %v1826_v61 = vadd.f32 %v4051_v58, %v3954_v9 }
 0x200   :  { %v2316_v17 = vadd.f32 %v2315_v56, %v2083_v33  ;;  %v2448_v12 = vadd.f32 %v2447_v49, %v2385_v47  ;;  %v2086_v55 = vadd.f32 %v2085_v18, %v4002_v1  ;;  %2256 = vst [vmem:[%s4347_s2 + $0xf8] sm:$0xff] %v2094_v8  ;;  %v2389_v52 = vmul.f32 %v2094_v8, %v2094_v8 }
 0x201   :  { %v4175_v39 = vpop.f32.mrf.mxu1  ;;  %v2794_v29 = vpop.f32.mrf.mxu0 }
 0x202   :  { %v2449_v30 = vadd.f32 %v2448_v12, %v2386_v42  ;;  %2254 = vst [vmem:[%s4347_s2 + $0xe8] sm:$0xff] %v2086_v55  ;;  %v2317_v22 = vadd.f32 %v2316_v17, %v2086_v55  ;;  %v2387_v28 = vmul.f32 %v2086_v55, %v2086_v55  ;;  %v2107_v40 = vadd.f32 %v2794_v29, %v1818_v27 }
 0x203   :  { %v1875_v10 = vpop.f32.mrf.mxu1  ;;  %v2098_v1 = vpop.f32.mrf.mxu0  ;;  %v1837_v17 = vadd.f32 %v4081_v21, %v3969_v50  ;;  %v1829_v42 = vadd.f32 %v4061_v15, %v3959_v24 }
 0x204   :  { %v2318_v7 = vadd.f32 %v2317_v22, %v2091_v0  ;;  %v2450_v53 = vadd.f32 %v2449_v30, %v2387_v28  ;;  %v2099_v6 = vadd.f32 %v2098_v1, %v4013_v20  ;;  %2259 = vst [vmem:[%s4347_s2 + $0x110] sm:$0xff] %v2107_v40  ;;  %v2392_v13 = vmul.f32 %v2107_v40, %v2107_v40 }
 0x205   :  { %v4186_v63 = vpop.f32.mrf.mxu1  ;;  %v2795_v62 = vpop.f32.mrf.mxu0  ;;  %v1850_v10 = vadd.f32 %v4111_v59, %v3984_v23  ;;  %v1842_v1 = vadd.f32 %v4091_v16, %v3974_v60 }
 0x206   :  { %v2451_v5 = vadd.f32 %v2450_v53, %v2388_v36  ;;  %2257 = vst [vmem:[%s4347_s2 + $0x100] sm:$0xff] %v2099_v6  ;;  %v2319_v44 = vadd.f32 %v2318_v7, %v2094_v8  ;;  %v2110_v0 = vadd.f32 %v2795_v62, %v1821_v3  ;;  %v2390_v57 = vmul.f32 %v2099_v6, %v2099_v6 }
 0x207   :  { %v1878_v51 = vpop.f32.mrf.mxu1  ;;  %v2101_v20 = vpop.f32.mrf.mxu0 }
 0x208   :  { %v2320_v48 = vadd.f32 %v2319_v44, %v2099_v6  ;;  %v2452_v2 = vadd.f32 %v2451_v5, %v2389_v52  ;;  %v2102_v26 = vadd.f32 %v2101_v20, %v4024_v46  ;;  %2260 = vst [vmem:[%s4347_s2 + $0x118] sm:$0xff] %v2110_v0  ;;  %v2393_v12 = vmul.f32 %v2110_v0, %v2110_v0 }
 0x209   :  { %v4197_v4 = vpop.f32.mrf.mxu1  ;;  %v2798_v33 = vpop.f32.mrf.mxu0  ;;  %v1853_v44 = vadd.f32 %v4121_v11, %v3989_v45 }
 0x20a   :  { %v2453_v43 = vadd.f32 %v2452_v2, %v2390_v57  ;;  %2258 = vst [vmem:[%s4347_s2 + $0x108] sm:$0xff] %v2102_v26  ;;  %v2321_v47 = vadd.f32 %v2320_v48, %v2102_v26  ;;  %v2391_v46 = vmul.f32 %v2102_v26, %v2102_v26  ;;  %v2123_v49 = vadd.f32 %v2798_v33, %v1834_v37 }
 0x20b   :  { %v1883_v56 = vpop.f32.mrf.mxu1  ;;  %v2114_v34 = vpop.f32.mrf.mxu0 }
 0x20c   :  { %v2322_v8 = vadd.f32 %v2321_v47, %v2107_v40  ;;  %v2454_v41 = vadd.f32 %v2453_v43, %v2391_v46  ;;  %v2115_v18 = vadd.f32 %v2114_v34, %v1826_v61  ;;  %2263 = vst [vmem:[%s4347_s2 + $0x130] sm:$0xff] %v2123_v49  ;;  %v2396_v59 = vmul.f32 %v2123_v49, %v2123_v49 }
 0x20d   :  { %v4209_v9 = vpop.f32.mrf.mxu1  ;;  %v2799_v58 = vpop.f32.mrf.mxu0  ;;  %v1866_v61 = vadd.f32 %v4153_v38, %v4004_v25  ;;  %v1858_v43 = vadd.f32 %v4131_v19, %v3994_v31 }
 0x20e   :  { %v2455_v55 = vadd.f32 %v2454_v41, %v2392_v13  ;;  %2261 = vst [vmem:[%s4347_s2 + $0x120] sm:$0xff] %v2115_v18  ;;  %v2323_v27 = vadd.f32 %v2322_v8, %v2110_v0  ;;  %v2126_v29 = vadd.f32 %v2799_v58, %v1837_v17  ;;  %v2394_v22 = vmul.f32 %v2115_v18, %v2115_v18  ;;  %v4368_v58 = vld [vmem:[#allocation18_spill] sm:$0xff] }
 0x20f   :  { %v1886_v30 = vpop.f32.mrf.mxu1  ;;  %v2117_v50 = vpop.f32.mrf.mxu0  ;;  %v1845_v0 = vadd.f32 %v4101_v35, %v3979_v14 }
 0x210   :  { %v2324_v21 = vadd.f32 %v2323_v27, %v2115_v18  ;;  %v2456_v28 = vadd.f32 %v2455_v55, %v2393_v12  ;;  %v2118_v40 = vadd.f32 %v2117_v50, %v1829_v42  ;;  %2264 = vst [vmem:[%s4347_s2 + $0x138] sm:$0xff] %v2126_v29  ;;  %v2397_v51 = vmul.f32 %v2126_v29, %v2126_v29  ;;  %v4367_v18 = vld [vmem:[#allocation19_spill] sm:$0xff] }
 0x211   :  { %v4221_v24 = vpop.f32.mrf.mxu1  ;;  %v2802_v15 = vpop.f32.mrf.mxu0  ;;  %v1869_v17 = vadd.f32 %v4164_v54, %v4367_v18  ;;  %v1861_v42 = vadd.f32 %v4141_v32, %v4368_v58 }
 0x212   :  { %v2457_v36 = vadd.f32 %v2456_v28, %v2394_v22  ;;  %2262 = vst [vmem:[%s4347_s2 + $0x128] sm:$0xff] %v2118_v40  ;;  %v2325_v7 = vadd.f32 %v2324_v21, %v2118_v40  ;;  %v2395_v53 = vmul.f32 %v2118_v40, %v2118_v40  ;;  %v2139_v6 = vadd.f32 %v2802_v15, %v1850_v10  ;;  %v4369_v40 = vld [vmem:[#allocation4_spill] sm:$0xff] }
 0x213   :  { %v1891_v3 = vpop.f32.mrf.mxu1  ;;  %v2130_v23 = vpop.f32.mrf.mxu0  ;;  %v1882_v10 = vadd.f32 %v4197_v4, %v4369_v40 }
 0x214   :  { %v2326_v62 = vadd.f32 %v2325_v7, %v2123_v49  ;;  %v2458_v52 = vadd.f32 %v2457_v36, %v2395_v53  ;;  %v2131_v5 = vadd.f32 %v2130_v23, %v1842_v1  ;;  %2267 = vst [vmem:[%s4347_s2 + $0x150] sm:$0xff] %v2139_v6  ;;  %v2400_v25 = vmul.f32 %v2139_v6, %v2139_v6  ;;  %v4370_v1 = vld [vmem:[#allocation2_spill] sm:$0xff] }
 0x215   :  { %v4233_v60 = vpop.f32.mrf.mxu1  ;;  %v2803_v16 = vpop.f32.mrf.mxu0  ;;  %v1874_v36 = vadd.f32 %v4175_v39, %v4370_v1 }
 0x216   :  { %v2459_v20 = vadd.f32 %v2458_v52, %v2396_v59  ;;  %2265 = vst [vmem:[%s4347_s2 + $0x140] sm:$0xff] %v2131_v5  ;;  %v2327_v48 = vadd.f32 %v2326_v62, %v2126_v29  ;;  %v2142_v57 = vadd.f32 %v2803_v16, %v1853_v44  ;;  %v2398_v26 = vmul.f32 %v2131_v5, %v2131_v5  ;;  %v4371_v44 = vld [vmem:[#allocation5_spill] sm:$0xff] }
 0x217   :  { %v1894_v2 = vpop.f32.mrf.mxu1  ;;  %v2133_v45 = vpop.f32.mrf.mxu0  ;;  %v1885_v16 = vadd.f32 %v4209_v9, %v4371_v44 }
 0x218   :  { %v2328_v11 = vadd.f32 %v2327_v48, %v2131_v5  ;;  %v2460_v37 = vadd.f32 %v2459_v20, %v2397_v51  ;;  %v2134_v33 = vadd.f32 %v2133_v45, %v1845_v0  ;;  %2268 = vst [vmem:[%s4347_s2 + $0x158] sm:$0xff] %v2142_v57  ;;  %v2401_v12 = vmul.f32 %v2142_v57, %v2142_v57  ;;  %v4372_v51 = vld [vmem:[#allocation3_spill] sm:$0xff] }
 0x219   :  { %v1897_v14 = vpop.f32.mrf.mxu1  ;;  %v2806_v35 = vpop.f32.mrf.mxu0  ;;  %v1877_v20 = vadd.f32 %v4186_v63, %v4372_v51 }
 0x21a   :  { %v2461_v47 = vadd.f32 %v2460_v37, %v2398_v26  ;;  %2266 = vst [vmem:[%s4347_s2 + $0x148] sm:$0xff] %v2134_v33  ;;  %v2329_v46 = vadd.f32 %v2328_v11, %v2134_v33  ;;  %v2399_v49 = vmul.f32 %v2134_v33, %v2134_v33  ;;  %v2155_v56 = vadd.f32 %v2806_v35, %v1866_v61  ;;  %v4373_v35 = vld [vmem:[#allocation8_spill] sm:$0xff] }
 0x21b   :  { %v1899_v34 = vpop.f32.mrf.mxu1  ;;  %v2146_v13 = vpop.f32.mrf.mxu0 }
 0x21c   :  { %v2330_v38 = vadd.f32 %v2329_v46, %v2139_v6  ;;  %v2462_v8 = vadd.f32 %v2461_v47, %v2399_v49  ;;  %v2147_v41 = vadd.f32 %v2146_v13, %v1858_v43  ;;  %2271 = vst [vmem:[%s4347_s2 + $0x170] sm:$0xff] %v2155_v56  ;;  %v2404_v59 = vmul.f32 %v2155_v56, %v2155_v56  ;;  %v4374_v46 = vld [vmem:[#allocation6_spill] sm:$0xff] }
 0x21d   :  { %v1900_v31 = vpop.f32.mrf.mxu1  ;;  %v2807_v19 = vpop.f32.mrf.mxu0  ;;  %v1898_v43 = vadd.f32 %v1897_v14, %v4373_v35  ;;  %v1890_v49 = vadd.f32 %v4221_v24, %v4374_v46 }
 0x21e   :  { %v2463_v55 = vadd.f32 %v2462_v8, %v2400_v25  ;;  %2269 = vst [vmem:[%s4347_s2 + $0x160] sm:$0xff] %v2147_v41  ;;  %v2331_v27 = vadd.f32 %v2330_v38, %v2142_v57  ;;  %v2158_v29 = vadd.f32 %v2807_v19, %v1869_v17  ;;  %v2402_v21 = vmul.f32 %v2147_v41, %v2147_v41  ;;  %v4375_v19 = vld [vmem:[#allocation9_spill] sm:$0xff] }
 0x21f   :  { %v1902_v30 = vpop.f32.mrf.mxu1  ;;  %v2149_v50 = vpop.f32.mrf.mxu0  ;;  %v1901_v58 = vadd.f32 %v1900_v31, %v4375_v19 }
 0x220   :  { %v2332_v54 = vadd.f32 %v2331_v27, %v2147_v41  ;;  %v2464_v22 = vadd.f32 %v2463_v55, %v2401_v12  ;;  %v2150_v28 = vadd.f32 %v2149_v50, %v1861_v42  ;;  %2272 = vst [vmem:[%s4347_s2 + $0x178] sm:$0xff] %v2158_v29  ;;  %v2405_v48 = vmul.f32 %v2158_v29, %v2158_v29  ;;  %v4376_v12 = vld [vmem:[#allocation7_spill] sm:$0xff] }
 0x221   :  { %v4265_v32 = vpop.f32.mrf.mxu1  ;;  %v2810_v15 = vpop.f32.mrf.mxu0  ;;  %v1893_v55 = vadd.f32 %v4233_v60, %v4376_v12 }
 0x222   :  { %v2465_v7 = vadd.f32 %v2464_v22, %v2402_v21  ;;  %2270 = vst [vmem:[%s4347_s2 + $0x168] sm:$0xff] %v2150_v28  ;;  %v2333_v53 = vadd.f32 %v2332_v54, %v2150_v28  ;;  %v2403_v6 = vmul.f32 %v2150_v28, %v2150_v28  ;;  %v2171_v3 = vadd.f32 %v2810_v15, %v1882_v10  ;;  %v4377_v10 = vld [vmem:[#allocation12_spill] sm:$0xff] }
 0x223   :  { %v1907_v23 = vpop.f32.mrf.mxu1  ;;  %v2162_v4 = vpop.f32.mrf.mxu0 }
 0x224   :  { %v2334_v62 = vadd.f32 %v2333_v53, %v2155_v56  ;;  %v2466_v52 = vadd.f32 %v2465_v7, %v2403_v6  ;;  %v2163_v5 = vadd.f32 %v2162_v4, %v1874_v36  ;;  %2275 = vst [vmem:[%s4347_s2 + $0x190] sm:$0xff] %v2171_v3  ;;  %v2408_v14 = vmul.f32 %v2171_v3, %v2171_v3  ;;  %v4378_v36 = vld [vmem:[#allocation10_spill] sm:$0xff] }
 0x225   :  { %v4277_v39 = vpop.f32.mrf.mxu1  ;;  %v2811_v0 = vpop.f32.mrf.mxu0  ;;  %v1906_v7 = vadd.f32 %v4265_v32, %v4378_v36 }
 0x226   :  { %v2467_v57 = vadd.f32 %v2466_v52, %v2404_v59  ;;  %2273 = vst [vmem:[%s4347_s2 + $0x180] sm:$0xff] %v2163_v5  ;;  %v2335_v2 = vadd.f32 %v2334_v62, %v2158_v29  ;;  %v2174_v45 = vadd.f32 %v2811_v0, %v1885_v16  ;;  %v2406_v37 = vmul.f32 %v2163_v5, %v2163_v5  ;;  %v4379_v16 = vld [vmem:[#allocation13_spill] sm:$0xff] }
 0x227   :  { %v1910_v11 = vpop.f32.mrf.mxu1  ;;  %v2165_v9 = vpop.f32.mrf.mxu0 }
 0x228   :  { %v2336_v26 = vadd.f32 %v2335_v2, %v2163_v5  ;;  %v2468_v33 = vadd.f32 %v2467_v57, %v2405_v48  ;;  %v2166_v61 = vadd.f32 %v2165_v9, %v1877_v20  ;;  %2276 = vst [vmem:[%s4347_s2 + $0x198] sm:$0xff] %v2174_v45  ;;  %v2409_v27 = vmul.f32 %v2174_v45, %v2174_v45  ;;  %v4380_v20 = vld [vmem:[#allocation11_spill] sm:$0xff] }
 0x229   :  { %v1913_v63 = vpop.f32.mrf.mxu1  ;;  %v2814_v47 = vpop.f32.mrf.mxu0  ;;  %v1909_v48 = vadd.f32 %v4277_v39, %v4380_v20 }
 0x22a   :  { %v2469_v56 = vadd.f32 %v2468_v33, %v2406_v37  ;;  %2274 = vst [vmem:[%s4347_s2 + $0x188] sm:$0xff] %v2166_v61  ;;  %v2337_v34 = vadd.f32 %v2336_v26, %v2166_v61  ;;  %v2407_v13 = vmul.f32 %v2166_v61, %v2166_v61  ;;  %v2187_v25 = vadd.f32 %v2814_v47, %v1898_v43  ;;  %v4381_v43 = vld [vmem:[#allocation14_spill] sm:$0xff] }
 0x22b   :  { %v1915_v38 = vpop.f32.mrf.mxu1  ;;  %v2178_v8 = vpop.f32.mrf.mxu0  ;;  %v1914_v15 = vadd.f32 %v1913_v63, %v4377_v10 }
 0x22c   :  { %v2338_v41 = vadd.f32 %v2337_v34, %v2171_v3  ;;  %v2470_v18 = vadd.f32 %v2469_v56, %v2407_v13  ;;  %v2179_v17 = vadd.f32 %v2178_v8, %v1890_v49  ;;  %2279 = vst [vmem:[%s4347_s2 + $0x1b0] sm:$0xff] %v2187_v25  ;;  %v2412_v62 = vmul.f32 %v2187_v25, %v2187_v25  ;;  %v4382_v34 = vld [vmem:[#allocation16_spill] sm:$0xff] }
 0x22d   :  { %v1916_v24 = vpop.f32.mrf.mxu1  ;;  %v2815_v42 = vpop.f32.mrf.mxu0 }
 0x22e   :  { %v2471_v29 = vadd.f32 %v2470_v18, %v2408_v14  ;;  %2277 = vst [vmem:[%s4347_s2 + $0x1a0] sm:$0xff] %v2179_v17  ;;  %v2339_v30 = vadd.f32 %v2338_v41, %v2174_v45  ;;  %v2190_v50 = vadd.f32 %v2815_v42, %v1901_v58  ;;  %v2410_v22 = vmul.f32 %v2179_v17, %v2179_v17 }
 0x22f   :  { %v1918_v54 = vpop.f32.mrf.mxu1  ;;  %v2181_v21 = vpop.f32.mrf.mxu0  ;;  %v1917_v0 = vadd.f32 %v1916_v24, %v4379_v16  ;;  %v4383_v24 = vld [vmem:[#allocation15_spill] sm:$0xff] }
 0x230   :  { %v2340_v31 = vadd.f32 %v2339_v30, %v2179_v17  ;;  %v2472_v28 = vadd.f32 %v2471_v29, %v2409_v27  ;;  %v2182_v40 = vadd.f32 %v2181_v21, %v1893_v55  ;;  %2280 = vst [vmem:[%s4347_s2 + $0x1b8] sm:$0xff] %v2190_v50  ;;  %v2413_v57 = vmul.f32 %v2190_v50, %v2190_v50  ;;  %v4384_v29 = vld [vmem:[#allocation17_spill] sm:$0xff] }
 0x231   :  { %v1921_v60 = vpop.f32.mrf.mxu1  ;;  %v2818_v1 = vpop.f32.mrf.mxu0 }
 0x232   :  { %v2473_v53 = vadd.f32 %v2472_v28, %v2410_v22  ;;  %2278 = vst [vmem:[%s4347_s2 + $0x1a8] sm:$0xff] %v2182_v40  ;;  %v2341_v6 = vadd.f32 %v2340_v31, %v2182_v40  ;;  %v2411_v3 = vmul.f32 %v2182_v40, %v2182_v40  ;;  %v2203_v23 = vadd.f32 %v2818_v1, %v1914_v15 }
 0x233   :  { %v1923_v4 = vpop.f32.mrf.mxu1  ;;  %v2194_v59 = vpop.f32.mrf.mxu0  ;;  %v1922_v63 = vadd.f32 %v1921_v60, %v4381_v43 }
 0x234   :  { %v2342_v52 = vadd.f32 %v2341_v6, %v2187_v25  ;;  %v2474_v5 = vadd.f32 %v2473_v53, %v2411_v3  ;;  %v2195_v44 = vadd.f32 %v2194_v59, %v1906_v7  ;;  %2283 = vst [vmem:[%s4347_s2 + $0x1d0] sm:$0xff] %v2203_v23  ;;  %v2416_v25 = vmul.f32 %v2203_v23, %v2203_v23 }
 0x235   :  { %v1924_v32 = vpop.f32.mrf.mxu1  ;;  %v2819_v51 = vpop.f32.mrf.mxu0 }
 0x236   :  { %v2475_v2 = vadd.f32 %v2474_v5, %v2412_v62  ;;  %2281 = vst [vmem:[%s4347_s2 + $0x1c0] sm:$0xff] %v2195_v44  ;;  %v2343_v45 = vadd.f32 %v2342_v52, %v2190_v50  ;;  %v2206_v11 = vadd.f32 %v2819_v51, %v1917_v0  ;;  %v2414_v33 = vmul.f32 %v2195_v44, %v2195_v44 }
 0x237   :  { %v1926_v9 = vpop.f32.mrf.mxu1  ;;  %v2197_v26 = vpop.f32.mrf.mxu0  ;;  %v1925_v42 = vadd.f32 %v1924_v32, %v4383_v24 }
 0x238   :  { %v2344_v37 = vadd.f32 %v2343_v45, %v2195_v44  ;;  %v2476_v61 = vadd.f32 %v2475_v2, %v2413_v57  ;;  %v2198_v35 = vadd.f32 %v2197_v26, %v1909_v48  ;;  %2284 = vst [vmem:[%s4347_s2 + $0x1d8] sm:$0xff] %v2206_v11  ;;  %v2417_v12 = vmul.f32 %v2206_v11, %v2206_v11 }
 0x239   :  { %v1929_v39 = vpop.f32.mrf.mxu1  ;;  %v2822_v47 = vpop.f32.mrf.mxu0 }
 0x23a   :  { %v2477_v46 = vadd.f32 %v2476_v61, %v2414_v33  ;;  %2282 = vst [vmem:[%s4347_s2 + $0x1c8] sm:$0xff] %v2198_v35  ;;  %v2345_v49 = vadd.f32 %v2344_v37, %v2198_v35  ;;  %v2415_v56 = vmul.f32 %v2198_v35, %v2198_v35  ;;  %v1930_v13 = vadd.f32 %v1929_v39, %v4382_v34 }
 0x23b   :  { %v1931_v38 = vpop.f32.mrf.mxu1  ;;  %v2210_v8 = vpop.f32.mrf.mxu0 }
 0x23c   :  { %v2346_v14 = vadd.f32 %v2345_v49, %v2203_v23  ;;  %v2478_v41 = vadd.f32 %v2477_v46, %v2415_v56  ;;  %v2219_v18 = vadd.f32 %v2822_v47, %v1930_v13  ;;  %v2211_v17 = vadd.f32 %v2210_v8, %v1922_v63 }
 0x23d   :  { %v1932_v19 = vpop.f32.mrf.mxu1  ;;  %v2823_v58 = vpop.f32.mrf.mxu0 }
 0x23e   :  { %v2479_v55 = vadd.f32 %v2478_v41, %v2416_v25  ;;  %2287 = vst [vmem:[%s4347_s2 + $0x1f0] sm:$0xff] %v2219_v18  ;;  %2285 = vst [vmem:[%s4347_s2 + $0x1e0] sm:$0xff] %v2211_v17  ;;  %v2347_v27 = vadd.f32 %v2346_v14, %v2206_v11  ;;  %v1933_v30 = vadd.f32 %v1932_v19, %v4384_v29 }
 0x23f   :  { %v1934_v50 = vpop.f32.mrf.mxu1  ;;  %v2213_v54 = vpop.f32.mrf.mxu0  ;;  %v2418_v31 = vmul.f32 %v2211_v17, %v2211_v17  ;;  %v2420_v1 = vmul.f32 %v2219_v18, %v2219_v18 }
 0x240   :  { %v2348_v21 = vadd.f32 %v2347_v27, %v2211_v17  ;;  %v2480_v22 = vadd.f32 %v2479_v55, %v2417_v12  ;;  %v2214_v28 = vadd.f32 %v2213_v54, %v1925_v42  ;;  %v2222_v40 = vadd.f32 %v2823_v58, %v1933_v30 }
 0x242   :  { %v2481_v10 = vadd.f32 %v2480_v22, %v2418_v31  ;;  %2286 = vst [vmem:[%s4347_s2 + $0x1e8] sm:$0xff] %v2214_v28  ;;  %v2349_v15 = vadd.f32 %v2348_v21, %v2214_v28  ;;  %v2419_v60 = vmul.f32 %v2214_v28, %v2214_v28  ;;  %2288 = vst [vmem:[%s4347_s2 + $0x1f8] sm:$0xff] %v2222_v40 }
 0x243   :  { %v2421_v53 = vmul.f32 %v2222_v40, %v2222_v40 }
 0x244   :  { %v2350_v36 = vadd.f32 %v2349_v15, %v2219_v18  ;;  %v2482_v7 = vadd.f32 %v2481_v10, %v2419_v60 }
 0x246   :  { %v2351_v6 = vadd.f32 %v2350_v36, %v2222_v40  ;;  %v2483_v3 = vadd.f32 %v2482_v7, %v2420_v1 }
 0x248   :  { %v2352_v23 = vrot.slane %v2351_v6, 4  ;;  %v2484_v4 = vadd.f32 %v2483_v3, %v2421_v53 }
 0x24a   :  { %v2353_v59 = vadd.f32 %v2352_v23, %v2351_v6  ;;  %v2485_v62 = vrot.slane %v2484_v4, 4 }
 0x24c   :  { %v2354_v52 = vrot.slane %v2353_v59, 2  ;;  %v2486_v5 = vadd.f32 %v2485_v62, %v2484_v4 }
 0x24e   :  { %v2355_v44 = vadd.f32 %v2354_v52, %v2353_v59  ;;  %v2487_v16 = vrot.slane %v2486_v5, 2 }
 0x250   :  { %v2356_v0 = vrot.slane %v2355_v44, 1  ;;  %v2488_v32 = vadd.f32 %v2487_v16, %v2486_v5 }
 0x252   :  { %v2489_v51 = vrot.slane %v2488_v32, 1  ;;  %v2357_v20 = vadd.f32 %v2356_v0, %v2355_v44 }
 0x254   :  { %v2490_v48 = vadd.f32 %v2489_v51, %v2488_v32 }
 0x256   :  { %v2492_v57 = vsel %vm2491_vm0, %v2357_v20, %v2490_v48 }
 0x257   :  { %v2494_v2 = vsel %vm2493_vm1, %v2492_v57, 0.0 }
 0x258   :  { %2495 = vst [vmem:[%s4348_s3] sm:$0xff] %v2494_v2 }

// kernel: _lambda_.35
= control target key start
LH: loop header
LB: loop body
LE: loop exit
PB: predicated region body
PF: predicated region fallthrough
CT: control target
= control target key end

     0   :  { %s2432_s12 = smov 0   ;;  %s2972_s0 = inlined_call_operand.vmem [shape: bf16[2048,384], index: 0, kind: input, shape index: {}]   ;;  %s2973_s1 = inlined_call_operand.vmem [shape: bf16[384,128], index: 1, kind: input, shape index: {}]   ;;  %s2974_s2 = inlined_call_operand.vmem [shape: f32[2048,128], index: 2, kind: output, shape index: {0}]   ;;  %s2975_s3 = inlined_call_operand.vmem [shape: f32[32,128], index: 3, kind: output, shape index: {1}]  }
   0x1 LB: > { %s2438_s13 = sadd.s32 4294967295, %s2409_s12   ;;  %p1961_p0 = scmp.ge.s32.totalorder %s2409_s12, 1  ;;  %s2409_s12 = sphi %s2432_s12, %s14_s12  }
   0x2   : > { %p142_p1 = scmp.lt.s32.totalorder %s2409_s12, 5 }
   0x4   : > { %p143_p2 = pnand %p1961_p0, %p142_p1 }
   0x5   : > { %s1962_s16 = sshll.u32 (!%p143_p2), %s2438_s13, 6  ;;  %p184_p4 = scmp.lt.s32.totalorder (!%p143_p2), %s2438_s13, 3 }
   0x6   : > { %146 = sbr.rel (%p143_p2) target bundleno = 510 (0x1fe), region = 28  ;;  %p172_p3 = scmp.lt.s32.totalorder (!%p143_p2), %s1962_s16, 255 }
   0xb   : > { %v2251_v0 = vld [vmem:[%s2973_s1 + $0x38] sm:$0xff]   ;;  %v2411_v1 = vmov 0   ;;  %v2252_v2 = vld [vmem:[%s2973_s1 + $0x30] sm:$0xff]   ;;  %v2253_v3 = vld [vmem:[%s2973_s1 + $0x28] sm:$0xff]   ;;  %s2977_s16 = smov (!%p172_p3, %s1962_s16), 255  ;;  %s2979_s13 = smov (!%p184_p4, %s2438_s13), 3 }
   0xc   : > { %1021 = vmatprep.subr.bf16.mxu0 %v2411_v1  ;;  %2209 = vmatprep.subr.bf16.mxu1 %v2411_v1  ;;  %v2254_v4 = vld [vmem:[%s2973_s1 + $0x20] sm:$0xff]   ;;  %s2241_s23 = smul.u32 12, %s2977_s16  ;;  %v2255_v5 = vld [vmem:[%s2973_s1 + $0x18] sm:$0xff]   ;;  %v2256_v7 = vld [vmem:[%s2973_s1 + $0x10] sm:$0xff]   ;;  %vm1865_vm0 = vcmask 1040384   ;;  %vm1867_vm1 = vcmask 1041408  }
   0xd   : > { %1022 = vmatpush1.bf16.msra.mxu0 %v2251_v0  ;;  %2225 = vmatpush1.bf16.msra.mxu1 %v2251_v0  ;;  %v2257_v9 = vld [vmem:[%s2973_s1 + $0x8] sm:$0xff]   ;;  %v2258_v10 = vld [vmem:[%s2973_s1] sm:$0xff]   ;;  %v2259_v11 = vld [vmem:[%s2973_s1 + $0x78] sm:$0xff]  }
   0xe   : > { %1023 = vmatprep.subr.bf16.mxu0 %v2411_v1  ;;  %2210 = vmatprep.subr.bf16.mxu1 %v2411_v1  ;;  %s2472_s28 = scalar_lea.vmem %s2972_s0, %s2241_s23  ;;  %v2260_v12 = vld [vmem:[%s2973_s1 + $0x70] sm:$0xff]   ;;  %v2261_v13 = vld [vmem:[%s2973_s1 + $0x68] sm:$0xff]   ;;  %v2262_v14 = vld [vmem:[%s2973_s1 + $0x60] sm:$0xff]  }
   0xf   : > { %v2269_v6 = vld [vmem:[%s2472_s28 + $0x4] ss:$12 sps:$4 sm:$0xff]   ;;  %v2263_v15 = vld [vmem:[%s2973_s1 + $0x58] sm:$0xff]   ;;  %v2265_v17 = vld [vmem:[%s2973_s1 + $0x48] sm:$0xff]  }
  0x10   : > { %v2272_v8 = vld [vmem:[%s2472_s28 + $0x244] ss:$12 sps:$4 sm:$0xff]   ;;  %1053 = vmatprep.mubr.bf16.mxu0 %v2269_v6  ;;  %v2291_v19 = vld [vmem:[%s2973_s1 + $0xb8] sm:$0xff]   ;;  %v2267_v20 = vld [vmem:[%s2472_s28] ss:$12 sps:$4 sm:$0xff]  }
  0x11   : > { %1024 = vmatpush1.bf16.msra.mxu0 %v2252_v2  ;;  %2226 = vmatpush1.bf16.msra.mxu1 %v2252_v2  ;;  %v2264_v16 = vld [vmem:[%s2973_s1 + $0x50] sm:$0xff]   ;;  %v2266_v18 = vld [vmem:[%s2973_s1 + $0x40] sm:$0xff]   ;;  %v2273_v22 = vld [vmem:[%s2472_s28 + $0x1c] ss:$12 sps:$4 sm:$0xff]  }
  0x12   : > { %1025 = vmatprep.subr.bf16.mxu0 %v2411_v1  ;;  %2211 = vmatprep.subr.bf16.mxu1 %v2411_v1  ;;  %v2270_v21 = vld [vmem:[%s2472_s28 + $0x240] ss:$12 sps:$4 sm:$0xff]   ;;  %v2275_v23 = vld [vmem:[%s2472_s28 + $0x25c] ss:$12 sps:$4 sm:$0xff]   ;;  %v2298_v24 = vld [vmem:[%s2973_s1 + $0xb0] sm:$0xff]  }
  0x13   : > { %1245 = vmatprep.mubr.bf16.mxu1 %v2272_v8  ;;  %v2277_v25 = vld [vmem:[%s2472_s28 + $0x18] ss:$12 sps:$4 sm:$0xff]   ;;  %v2305_v26 = vld [vmem:[%s2973_s1 + $0xa8] sm:$0xff]   ;;  %v2279_v28 = vld [vmem:[%s2472_s28 + $0x34] ss:$12 sps:$4 sm:$0xff]  }
  0x14   : > { %v2278_v27 = vld [vmem:[%s2472_s28 + $0x258] ss:$12 sps:$4 sm:$0xff]   ;;  %v2281_v29 = vld [vmem:[%s2472_s28 + $0x274] ss:$12 sps:$4 sm:$0xff]   ;;  %v2283_v31 = vld [vmem:[%s2472_s28 + $0x30] ss:$12 sps:$4 sm:$0xff]  }
  0x15   : > { %1026 = vmatpush1.bf16.msra.mxu0 %v2253_v3  ;;  %2227 = vmatpush1.bf16.msra.mxu1 %v2253_v3  ;;  %v2306_v30 = vld [vmem:[%s2973_s1 + $0xa0] sm:$0xff]   ;;  %v2313_v32 = vld [vmem:[%s2973_s1 + $0x98] sm:$0xff]   ;;  %v2314_v36 = vld [vmem:[%s2973_s1 + $0x90] sm:$0xff]  }
  0x16   : > { %1027 = vmatprep.subr.bf16.mxu0 %v2411_v1  ;;  %2212 = vmatprep.subr.bf16.mxu1 %v2411_v1  ;;  %v2284_v33 = vld [vmem:[%s2472_s28 + $0x270] ss:$12 sps:$4 sm:$0xff]   ;;  %v2285_v34 = vld [vmem:[%s2472_s28 + $0x4c] ss:$12 sps:$4 sm:$0xff]   ;;  %v2289_v37 = vld [vmem:[%s2472_s28 + $0x48] ss:$12 sps:$4 sm:$0xff]  }
  0x17   : > { %v2287_v35 = vld [vmem:[%s2472_s28 + $0x28c] ss:$12 sps:$4 sm:$0xff]   ;;  %v2290_v38 = vld [vmem:[%s2472_s28 + $0x288] ss:$12 sps:$4 sm:$0xff]   ;;  %v2292_v39 = vld [vmem:[%s2472_s28 + $0x64] ss:$12 sps:$4 sm:$0xff]  }
  0x18   : > { %v2294_v40 = vld [vmem:[%s2472_s28 + $0x2a4] ss:$12 sps:$4 sm:$0xff]   ;;  %v2321_v41 = vld [vmem:[%s2973_s1 + $0x88] sm:$0xff]   ;;  %v2307_v49 = vld [vmem:[%s2472_s28 + $0x94] ss:$12 sps:$4 sm:$0xff]  }
  0x19   : > { %1028 = vmatpush1.bf16.msra.mxu0 %v2254_v4  ;;  %2228 = vmatpush1.bf16.msra.mxu1 %v2254_v4  ;;  %v2322_v42 = vld [vmem:[%s2973_s1 + $0x80] sm:$0xff]   ;;  %v2299_v45 = vld [vmem:[%s2472_s28 + $0x7c] ss:$12 sps:$4 sm:$0xff]   ;;  %v2315_v53 = vld [vmem:[%s2472_s28 + $0xac] ss:$12 sps:$4 sm:$0xff]  }
  0x1a   : > { %1029 = vmatprep.subr.bf16.mxu0 %v2411_v1  ;;  %2213 = vmatprep.subr.bf16.mxu1 %v2411_v1  ;;  %v2296_v43 = vld [vmem:[%s2472_s28 + $0x60] ss:$12 sps:$4 sm:$0xff]   ;;  %v2301_v46 = vld [vmem:[%s2472_s28 + $0x2bc] ss:$12 sps:$4 sm:$0xff]   ;;  %v2303_v47 = vld [vmem:[%s2472_s28 + $0x78] ss:$12 sps:$4 sm:$0xff]  }
  0x1b   : > { %v2297_v44 = vld [vmem:[%s2472_s28 + $0x2a0] ss:$12 sps:$4 sm:$0xff]   ;;  %v2304_v48 = vld [vmem:[%s2472_s28 + $0x2b8] ss:$12 sps:$4 sm:$0xff]   ;;  %v2311_v51 = vld [vmem:[%s2472_s28 + $0x90] ss:$12 sps:$4 sm:$0xff]  }
  0x1c   : > { %v2309_v50 = vld [vmem:[%s2472_s28 + $0x2d4] ss:$12 sps:$4 sm:$0xff]   ;;  %v2312_v52 = vld [vmem:[%s2472_s28 + $0x2d0] ss:$12 sps:$4 sm:$0xff]   ;;  %v2317_v54 = vld [vmem:[%s2472_s28 + $0x2ec] ss:$12 sps:$4 sm:$0xff]  }
  0x1d   : > { %1030 = vmatpush1.bf16.msra.mxu0 %v2255_v5  ;;  %2229 = vmatpush1.bf16.msra.mxu1 %v2255_v5  ;;  %v2319_v55 = vld [vmem:[%s2472_s28 + $0xa8] ss:$12 sps:$4 sm:$0xff]   ;;  %v2323_v57 = vld [vmem:[%s2472_s28 + $0xc4] ss:$12 sps:$4 sm:$0xff]   ;;  %v2326_v59 = vld [vmem:[%s2472_s28 + $0xc0] ss:$12 sps:$4 sm:$0xff]  }
  0x1e   : > { %1031 = vmatprep.subr.bf16.mxu0 %v2411_v1  ;;  %2214 = vmatprep.subr.bf16.mxu1 %v2411_v1  ;;  %v2320_v56 = vld [vmem:[%s2472_s28 + $0x2e8] ss:$12 sps:$4 sm:$0xff]   ;;  %v2327_v60 = vld [vmem:[%s2472_s28 + $0x20] ss:$12 sps:$4 sm:$0xff]   ;;  %v2330_v62 = vld [vmem:[%s2472_s28 + $0x38] ss:$12 sps:$4 sm:$0xff]  }
  0x1f   : > { %v2325_v58 = vld [vmem:[%s2472_s28 + $0x8] ss:$12 sps:$4 sm:$0xff]   ;;  %v2331_v63 = vld [vmem:[%s2472_s28 + $0xd8] ss:$12 sps:$4 sm:$0xff]   ;;  %v2332_v0 = vld [vmem:[%s2472_s28 + $0x50] ss:$12 sps:$4 sm:$0xff]  }
  0x20   : > { %v2328_v61 = vld [vmem:[%s2472_s28 + $0xdc] ss:$12 sps:$4 sm:$0xff]   ;;  %v2337_v4 = vld [vmem:[%s2472_s28 + $0x80] ss:$12 sps:$4 sm:$0xff]   ;;  %v2340_v6 = vld [vmem:[%s2472_s28 + $0x98] ss:$12 sps:$4 sm:$0xff]  }
  0x21   : > { %1032 = vmatpush1.bf16.msra.mxu0 %v2256_v7  ;;  %2230 = vmatpush1.bf16.msra.mxu1 %v2256_v7  ;;  %v2335_v2 = vld [vmem:[%s2472_s28 + $0x68] ss:$12 sps:$4 sm:$0xff]   ;;  %v2336_v3 = vld [vmem:[%s2472_s28 + $0xf0] ss:$12 sps:$4 sm:$0xff]   ;;  %v2338_v5 = vld [vmem:[%s2472_s28 + $0x10c] ss:$12 sps:$4 sm:$0xff]  }
  0x22   : > { %1033 = vmatprep.subr.bf16.mxu0 %v2411_v1  ;;  %2215 = vmatprep.subr.bf16.mxu1 %v2411_v1  ;;  %v2341_v7 = vld [vmem:[%s2472_s28 + $0x108] ss:$12 sps:$4 sm:$0xff]   ;;  %v2342_v8 = vld [vmem:[%s2472_s28 + $0xb0] ss:$12 sps:$4 sm:$0xff]  }
  0x25   : > { %1034 = vmatpush1.bf16.msra.mxu0 %v2257_v9  ;;  %2231 = vmatpush1.bf16.msra.mxu1 %v2257_v9  ;;  %v2343_v9 = vld [vmem:[%s2472_s28 + $0x124] ss:$12 sps:$4 sm:$0xff]  }
  0x26   : > { %1035 = vmatprep.subr.bf16.mxu0 %v2411_v1  ;;  %2216 = vmatprep.subr.bf16.mxu1 %v2411_v1 }
  0x29   : > { %1036 = vmatpush1.bf16.msra.mxu0 %v2258_v10  ;;  %2232 = vmatpush1.bf16.msra.mxu1 %v2258_v10  ;;  %v2345_v10 = vld [vmem:[%s2472_s28 + $0xc8] ss:$12 sps:$4 sm:$0xff]  }
  0x2a   : > { %1037 = vmatprep.subr.bf16.mxu0 %v2411_v1  ;;  %2217 = vmatprep.subr.bf16.mxu1 %v2411_v1 }
  0x2d   : > { %1038 = vmatpush2.bf16.msra.mxu0 %v2259_v11  ;;  %2233 = vmatpush2.bf16.msra.mxu1 %v2259_v11  ;;  %v2346_v11 = vld [vmem:[%s2472_s28 + $0x120] ss:$12 sps:$4 sm:$0xff]  }
  0x2e   : > { %1039 = vmatprep.subr.bf16.mxu0 %v2411_v1  ;;  %2218 = vmatprep.subr.bf16.mxu1 %v2411_v1 }
  0x31   : > { %1040 = vmatpush2.bf16.msra.mxu0 %v2260_v12  ;;  %2234 = vmatpush2.bf16.msra.mxu1 %v2260_v12  ;;  %v2347_v12 = vld [vmem:[%s2472_s28 + $0xe0] ss:$12 sps:$4 sm:$0xff]  }
  0x32   : > { %1041 = vmatprep.subr.bf16.mxu0 %v2411_v1  ;;  %2219 = vmatprep.subr.bf16.mxu1 %v2411_v1 }
  0x35   : > { %1042 = vmatpush2.bf16.msra.mxu0 %v2261_v13  ;;  %2235 = vmatpush2.bf16.msra.mxu1 %v2261_v13  ;;  %v2348_v13 = vld [vmem:[%s2472_s28 + $0x13c] ss:$12 sps:$4 sm:$0xff]  }
  0x36   : > { %1043 = vmatprep.subr.bf16.mxu0 %v2411_v1  ;;  %2220 = vmatprep.subr.bf16.mxu1 %v2411_v1 }
  0x39   : > { %1044 = vmatpush2.bf16.msra.mxu0 %v2262_v14  ;;  %2236 = vmatpush2.bf16.msra.mxu1 %v2262_v14  ;;  %v2350_v14 = vld [vmem:[%s2472_s28 + $0xf8] ss:$12 sps:$4 sm:$0xff]  }
  0x3a   : > { %1045 = vmatprep.subr.bf16.mxu0 %v2411_v1  ;;  %2221 = vmatprep.subr.bf16.mxu1 %v2411_v1 }
  0x3d   : > { %1046 = vmatpush2.bf16.msra.mxu0 %v2263_v15  ;;  %2237 = vmatpush2.bf16.msra.mxu1 %v2263_v15  ;;  %v2351_v15 = vld [vmem:[%s2472_s28 + $0x138] ss:$12 sps:$4 sm:$0xff]  }
  0x3e   : > { %1047 = vmatprep.subr.bf16.mxu0 %v2411_v1  ;;  %2222 = vmatprep.subr.bf16.mxu1 %v2411_v1 }
  0x41   : > { %1048 = vmatpush2.bf16.msra.mxu0 %v2264_v16  ;;  %2238 = vmatpush2.bf16.msra.mxu1 %v2264_v16  ;;  %v2352_v16 = vld [vmem:[%s2472_s28 + $0x110] ss:$12 sps:$4 sm:$0xff]  }
  0x42   : > { %1049 = vmatprep.subr.bf16.mxu0 %v2411_v1  ;;  %2223 = vmatprep.subr.bf16.mxu1 %v2411_v1 }
  0x45   : > { %1050 = vmatpush2.bf16.msra.mxu0 %v2265_v17  ;;  %2239 = vmatpush2.bf16.msra.mxu1 %v2265_v17  ;;  %v2353_v17 = vld [vmem:[%s2472_s28 + $0x154] ss:$12 sps:$4 sm:$0xff]  }
  0x46   : > { %1051 = vmatprep.subr.bf16.mxu0 %v2411_v1  ;;  %2224 = vmatprep.subr.bf16.mxu1 %v2411_v1  ;;  %v2333_v1 = vld [vmem:[%s2472_s28 + $0xf4] ss:$12 sps:$4 sm:$0xff]  }
  0x49   : > { %1052 = vmatpush2.bf16.msra.mxu0 %v2266_v18  ;;  %2240 = vmatpush2.bf16.msra.mxu1 %v2266_v18  ;;  %v2355_v18 = vld [vmem:[%s2472_s28 + $0x128] ss:$12 sps:$4 sm:$0xff]  }
  0x4a   : > { %2129 = vmatprep.subr.bf16.mxu1 %v2291_v19 }
  0x4c   : > { %1054 = vmatmul.mubr.bf16.vlgmr.msra.gmra.mxu0 %v2267_v20  ;;  %1246 = vmatmul.mubr.bf16.vlgmr.msra.gmra.mxu1 %v2270_v21  ;;  %v2357_v20 = vld [vmem:[%s2472_s28 + $0x140] ss:$12 sps:$4 sm:$0xff]  }
  0x4d   : > { %1061 = vmatprep.mubr.bf16.mxu0 %v2273_v22  ;;  %1253 = vmatprep.mubr.bf16.mxu1 %v2275_v23  ;;  %v2358_v21 = vld [vmem:[%s2472_s28 + $0x16c] ss:$12 sps:$4 sm:$0xff]   ;;  %v2361_v23 = vld [vmem:[%s2472_s28 + $0x168] ss:$12 sps:$4 sm:$0xff]  }
  0x4e   : > { %2130 = vmatpush3.bf16.msra.mxu1 %v2291_v19  ;;  %v2356_v19 = vld [vmem:[%s2472_s28 + $0x150] ss:$12 sps:$4 sm:$0xff]   ;;  %v2360_v22 = vld [vmem:[%s2472_s28 + $0x158] ss:$12 sps:$4 sm:$0xff]  }
  0x4f   : > { %2131 = vmatprep.subr.bf16.mxu1 %v2298_v24 }
  0x52   : > { %2132 = vmatpush3.bf16.msra.mxu1 %v2298_v24  ;;  %v2362_v24 = vld [vmem:[%s2472_s28 + $0x170] ss:$12 sps:$4 sm:$0xff]  }
  0x53   : > { %2133 = vmatprep.subr.bf16.mxu1 %v2305_v26 }
  0x54   : > { %1062 = vmatmul.mubr.bf16.gmra.mxu0 %v2277_v25  ;;  %1254 = vmatmul.mubr.bf16.gmra.mxu1 %v2278_v27  ;;  %v2363_v25 = vld [vmem:[%s2472_s28 + $0x184] ss:$12 sps:$4 sm:$0xff]   ;;  %v2366_v27 = vld [vmem:[%s2472_s28 + $0x180] ss:$12 sps:$4 sm:$0xff]  }
  0x55   : > { %1069 = vmatprep.mubr.bf16.mxu0 %v2279_v28  ;;  %1261 = vmatprep.mubr.bf16.mxu1 %v2281_v29  ;;  %v2367_v28 = vld [vmem:[%s2472_s28 + $0x1a0] ss:$12 sps:$4 sm:$0xff]   ;;  %v2368_v29 = vld [vmem:[%s2472_s28 + $0x19c] ss:$12 sps:$4 sm:$0xff]  }
  0x56   : > { %2134 = vmatpush3.bf16.msra.mxu1 %v2305_v26  ;;  %v2365_v26 = vld [vmem:[%s2472_s28 + $0x188] ss:$12 sps:$4 sm:$0xff]  }
  0x57   : > { %2135 = vmatprep.subr.bf16.mxu1 %v2306_v30 }
  0x5a   : > { %2136 = vmatpush3.bf16.msra.mxu1 %v2306_v30  ;;  %v2370_v30 = vld [vmem:[%s2472_s28 + $0x1b8] ss:$12 sps:$4 sm:$0xff]  }
  0x5b   : > { %2137 = vmatprep.subr.bf16.mxu1 %v2313_v32 }
  0x5c   : > { %1070 = vmatmul.mubr.bf16.gmra.mxu0 %v2283_v31  ;;  %1262 = vmatmul.mubr.bf16.gmra.mxu1 %v2284_v33  ;;  %v2371_v31 = vld [vmem:[%s2472_s28 + $0x198] ss:$12 sps:$4 sm:$0xff]   ;;  %v2373_v33 = vld [vmem:[%s2472_s28 + $0x1b4] ss:$12 sps:$4 sm:$0xff]  }
  0x5d   : > { %1077 = vmatprep.mubr.bf16.mxu0 %v2285_v34  ;;  %1269 = vmatprep.mubr.bf16.mxu1 %v2287_v35  ;;  %v2375_v34 = vld [vmem:[%s2472_s28 + $0x1e8] ss:$12 sps:$4 sm:$0xff]   ;;  %v2376_v35 = vld [vmem:[%s2472_s28 + $0x1b0] ss:$12 sps:$4 sm:$0xff]  }
  0x5e   : > { %2138 = vmatpush3.bf16.msra.mxu1 %v2313_v32  ;;  %v2372_v32 = vld [vmem:[%s2472_s28 + $0x1d0] ss:$12 sps:$4 sm:$0xff]  }
  0x5f   : > { %2139 = vmatprep.subr.bf16.mxu1 %v2314_v36 }
  0x62   : > { %2140 = vmatpush3.bf16.msra.mxu1 %v2314_v36  ;;  %v2377_v36 = vld [vmem:[%s2472_s28 + $0x200] ss:$12 sps:$4 sm:$0xff]  }
  0x63   : > { %2141 = vmatprep.subr.bf16.mxu1 %v2321_v41 }
  0x64   : > { %1078 = vmatmul.mubr.bf16.gmra.mxu0 %v2289_v37  ;;  %1270 = vmatmul.mubr.bf16.gmra.mxu1 %v2290_v38  ;;  %v2378_v37 = vld [vmem:[%s2472_s28 + $0x1cc] ss:$12 sps:$4 sm:$0xff]  }
  0x65   : > { %1085 = vmatprep.mubr.bf16.mxu0 %v2292_v39  ;;  %1277 = vmatprep.mubr.bf16.mxu1 %v2294_v40  ;;  %v2380_v38 = vld [vmem:[%s2472_s28 + $0x218] ss:$12 sps:$4 sm:$0xff]   ;;  %v2381_v39 = vld [vmem:[%s2472_s28 + $0x1c8] ss:$12 sps:$4 sm:$0xff]   ;;  %v2382_v40 = vld [vmem:[%s2472_s28 + $0x230] ss:$12 sps:$4 sm:$0xff]  }
  0x66   : > { %2142 = vmatpush3.bf16.msra.mxu1 %v2321_v41  ;;  %v2383_v41 = vld [vmem:[%s2472_s28 + $0x1e4] ss:$12 sps:$4 sm:$0xff]  }
  0x67   : > { %2143 = vmatprep.subr.bf16.mxu1 %v2322_v42 }
  0x6a   : > { %2144 = vmatpush3.bf16.msra.mxu1 %v2322_v42  ;;  %v2385_v42 = vld [vmem:[%s2472_s28 + $0x248] ss:$12 sps:$4 sm:$0xff]  }
  0x6c   : > { %1086 = vmatmul.mubr.bf16.gmra.mxu0 %v2296_v43  ;;  %1278 = vmatmul.mubr.bf16.gmra.mxu1 %v2297_v44  ;;  %v2386_v43 = vld [vmem:[%s2472_s28 + $0x1e0] ss:$12 sps:$4 sm:$0xff]  }
  0x6d   : > { %1093 = vmatprep.mubr.bf16.mxu0 %v2299_v45  ;;  %1285 = vmatprep.mubr.bf16.mxu1 %v2301_v46  ;;  %v2387_v44 = vld [vmem:[%s2472_s28 + $0x260] ss:$12 sps:$4 sm:$0xff]   ;;  %v2388_v45 = vld [vmem:[%s2472_s28 + $0x1fc] ss:$12 sps:$4 sm:$0xff]   ;;  %v2390_v46 = vld [vmem:[%s2472_s28 + $0x278] ss:$12 sps:$4 sm:$0xff]  }
  0x74   : > { %1094 = vmatmul.mubr.bf16.gmra.mxu0 %v2303_v47  ;;  %1286 = vmatmul.mubr.bf16.gmra.mxu1 %v2304_v48  ;;  %v2391_v47 = vld [vmem:[%s2472_s28 + $0x1f8] ss:$12 sps:$4 sm:$0xff]   ;;  %v2392_v48 = vld [vmem:[%s2472_s28 + $0x290] ss:$12 sps:$4 sm:$0xff]  }
  0x75   : > { %1101 = vmatprep.mubr.bf16.mxu0 %v2307_v49  ;;  %1293 = vmatprep.mubr.bf16.mxu1 %v2309_v50  ;;  %v2393_v49 = vld [vmem:[%s2472_s28 + $0x214] ss:$12 sps:$4 sm:$0xff]  }
  0x76   : > { %v2395_v50 = vld [vmem:[%s2472_s28 + $0x2a8] ss:$12 sps:$4 sm:$0xff]  }
  0x7c   : > { %1102 = vmatmul.mubr.bf16.gmra.mxu0 %v2311_v51  ;;  %1294 = vmatmul.mubr.bf16.gmra.mxu1 %v2312_v52  ;;  %v2396_v51 = vld [vmem:[%s2472_s28 + $0x210] ss:$12 sps:$4 sm:$0xff]   ;;  %v2397_v52 = vld [vmem:[%s2472_s28 + $0x2c0] ss:$12 sps:$4 sm:$0xff]  }
  0x7d   : > { %1109 = vmatprep.mubr.bf16.mxu0 %v2315_v53  ;;  %1301 = vmatprep.mubr.bf16.mxu1 %v2317_v54  ;;  %v2398_v53 = vld [vmem:[%s2472_s28 + $0x22c] ss:$12 sps:$4 sm:$0xff]  }
  0x7e   : > { %v2400_v54 = vld [vmem:[%s2472_s28 + $0x2d8] ss:$12 sps:$4 sm:$0xff]  }
  0x84   : > { %1110 = vmatmul.mubr.bf16.gmra.mxu0 %v2319_v55  ;;  %1302 = vmatmul.mubr.bf16.gmra.mxu1 %v2320_v56  ;;  %v2401_v55 = vld [vmem:[%s2472_s28 + $0x228] ss:$12 sps:$4 sm:$0xff]   ;;  %v2402_v56 = vld [vmem:[%s2472_s28 + $0x2f0] ss:$12 sps:$4 sm:$0xff]   ;;  %s1965_s28 = sshll.u32 %s2977_s16, 3  ;;  %s1966_s16 = sshll.u32 %s2979_s13, 3 }
  0x85   : > { %1117 = vmatprep.mubr.bf16.mxu0 %v2323_v57  ;;  %2145 = vmatprep.mubr.bf16.mxu1 %v2325_v58  ;;  %s2719_s22 = scalar_lea.vmem %s2974_s2, %s1965_s28  ;;  %s187_s25 = scalar_lea.vmem %s2975_s3, %s1966_s16 }
  0x8c   : > { %1118 = vmatmul.mubr.bf16.gmra.mxu0 %v2326_v59  ;;  %2146 = vmatmul.mubr.bf16.vlgmr.msra.gmra.mxu1 %v2327_v60 }
  0x8d   : > { %1125 = vmatprep.mubr.bf16.mxu0 %v2328_v61  ;;  %2149 = vmatprep.mubr.bf16.mxu1 %v2330_v62 }
  0x94   : > { %1126 = vmatmul.mubr.bf16.gmra.mxu0 %v2331_v63  ;;  %2150 = vmatmul.mubr.bf16.gmra.mxu1 %v2332_v0 }
  0x95   : > { %1133 = vmatprep.mubr.bf16.mxu0 %v2333_v1  ;;  %2153 = vmatprep.mubr.bf16.mxu1 %v2335_v2 }
  0x9c   : > { %1134 = vmatmul.mubr.bf16.gmra.mxu0 %v2336_v3  ;;  %2154 = vmatmul.mubr.bf16.gmra.mxu1 %v2337_v4 }
  0x9d   : > { %1141 = vmatprep.mubr.bf16.mxu0 %v2338_v5  ;;  %2157 = vmatprep.mubr.bf16.mxu1 %v2340_v6 }
  0xa4   : > { %1142 = vmatmul.mubr.bf16.gmra.mxu0 %v2341_v7  ;;  %2158 = vmatmul.mubr.bf16.gmra.mxu1 %v2342_v8 }
  0xa5   : > { %1149 = vmatprep.mubr.bf16.mxu0 %v2343_v9  ;;  %2161 = vmatprep.mubr.bf16.mxu1 %v2345_v10 }
  0xac   : > { %1150 = vmatmul.mubr.bf16.gmra.mxu0 %v2346_v11  ;;  %2162 = vmatmul.mubr.bf16.gmra.mxu1 %v2347_v12 }
  0xad   : > { %1157 = vmatprep.mubr.bf16.mxu0 %v2348_v13  ;;  %2165 = vmatprep.mubr.bf16.mxu1 %v2350_v14 }
  0xb4   : > { %1158 = vmatmul.mubr.bf16.gmra.mxu0 %v2351_v15  ;;  %2166 = vmatmul.mubr.bf16.gmra.mxu1 %v2352_v16 }
  0xb5   : > { %1165 = vmatprep.mubr.bf16.mxu0 %v2353_v17  ;;  %2169 = vmatprep.mubr.bf16.mxu1 %v2355_v18 }
  0xbc   : > { %1166 = vmatmul.mubr.bf16.gmra.mxu0 %v2356_v19  ;;  %2170 = vmatmul.mubr.bf16.gmra.mxu1 %v2357_v20 }
  0xbd   : > { %1173 = vmatprep.mubr.bf16.mxu0 %v2358_v21  ;;  %2173 = vmatprep.mubr.bf16.mxu1 %v2360_v22 }
  0xc4   : > { %1174 = vmatmul.mubr.bf16.gmra.mxu0 %v2361_v23  ;;  %2174 = vmatmul.mubr.bf16.gmra.mxu1 %v2362_v24 }
  0xc5   : > { %1181 = vmatprep.mubr.bf16.mxu0 %v2363_v25  ;;  %2177 = vmatprep.mubr.bf16.mxu1 %v2365_v26 }
  0xcc   : > { %1182 = vmatmul.mubr.bf16.gmra.mxu0 %v2366_v27  ;;  %2178 = vmatmul.mubr.bf16.gmra.mxu1 %v2367_v28 }
  0xcd   : > { %1189 = vmatprep.mubr.bf16.mxu0 %v2368_v29  ;;  %2181 = vmatprep.mubr.bf16.mxu1 %v2370_v30 }
  0xd4   : > { %1190 = vmatmul.mubr.bf16.gmra.mxu0 %v2371_v31  ;;  %2182 = vmatmul.mubr.bf16.gmra.mxu1 %v2372_v32 }
  0xd5   : > { %1197 = vmatprep.mubr.bf16.mxu0 %v2373_v33  ;;  %2185 = vmatprep.mubr.bf16.mxu1 %v2375_v34 }
  0xdc   : > { %1198 = vmatmul.mubr.bf16.gmra.mxu0 %v2376_v35  ;;  %2186 = vmatmul.mubr.bf16.gmra.mxu1 %v2377_v36 }
  0xdd   : > { %1205 = vmatprep.mubr.bf16.mxu0 %v2378_v37  ;;  %2189 = vmatprep.mubr.bf16.mxu1 %v2380_v38 }
  0xe4   : > { %1206 = vmatmul.mubr.bf16.gmra.mxu0 %v2381_v39  ;;  %2190 = vmatmul.mubr.bf16.gmra.mxu1 %v2382_v40 }
  0xe5   : > { %1213 = vmatprep.mubr.bf16.mxu0 %v2383_v41  ;;  %2193 = vmatprep.mubr.bf16.mxu1 %v2385_v42 }
  0xec   : > { %1214 = vmatmul.mubr.bf16.gmra.mxu0 %v2386_v43  ;;  %2194 = vmatmul.mubr.bf16.gmra.mxu1 %v2387_v44 }
  0xed   : > { %1221 = vmatprep.mubr.bf16.mxu0 %v2388_v45  ;;  %2197 = vmatprep.mubr.bf16.mxu1 %v2390_v46 }
  0xf4   : > { %1222 = vmatmul.mubr.bf16.gmra.mxu0 %v2391_v47  ;;  %2198 = vmatmul.mubr.bf16.gmra.mxu1 %v2392_v48 }
  0xf5   : > { %1229 = vmatprep.mubr.bf16.mxu0 %v2393_v49  ;;  %2201 = vmatprep.mubr.bf16.mxu1 %v2395_v50 }
  0xfc   : > { %1230 = vmatmul.mubr.bf16.gmra.mxu0 %v2396_v51  ;;  %2202 = vmatmul.mubr.bf16.gmra.mxu1 %v2397_v52 }
  0xfd   : > { %1237 = vmatprep.mubr.bf16.mxu0 %v2398_v53  ;;  %2205 = vmatprep.mubr.bf16.mxu1 %v2400_v54 }
 0x104   : > { %1238 = vmatmul.mubr.bf16.gmra.mxu0 %v2401_v55  ;;  %2206 = vmatmul.mubr.bf16.gmra.mxu1 %v2402_v56 }
 0x10c   : > { %v2651_v57 = vpop.f32.mrf.mxu0  ;;  %v2653_v58 = vpop.f32.mrf.mxu1 }
 0x10e   : > { %v1057_v59 = vpop.f32.mrf.mxu0  ;;  %v1249_v60 = vpop.f32.mrf.mxu1 }
 0x110   : > { %v2655_v61 = vpop.f32.mrf.mxu0  ;;  %v2657_v62 = vpop.f32.mrf.mxu1 }
 0x112   : > { %v1060_v63 = vpop.f32.mrf.mxu0  ;;  %v1252_v0 = vpop.f32.mrf.mxu1 }
 0x114   : > { %v1063_v1 = vpop.f32.mrf.mxu0  ;;  %v2659_v2 = vpop.f32.mrf.mxu1 }
 0x116   : > { %v1065_v3 = vpop.f32.mrf.mxu0  ;;  %v1257_v4 = vpop.f32.mrf.mxu1 }
 0x118   : > { %v2661_v5 = vpop.f32.mrf.mxu0  ;;  %v2663_v6 = vpop.f32.mrf.mxu1 }
 0x11a   : > { %v1068_v7 = vpop.f32.mrf.mxu0  ;;  %v1260_v8 = vpop.f32.mrf.mxu1 }
 0x11c   : > { %v2665_v9 = vpop.f32.mrf.mxu0  ;;  %v2667_v10 = vpop.f32.mrf.mxu1 }
 0x11e   : > { %v1073_v11 = vpop.f32.mrf.mxu0  ;;  %v1265_v12 = vpop.f32.mrf.mxu1 }
 0x120   : > { %v2669_v13 = vpop.f32.mrf.mxu0  ;;  %v2671_v14 = vpop.f32.mrf.mxu1 }
 0x122   : > { %v1076_v15 = vpop.f32.mrf.mxu0  ;;  %v1268_v16 = vpop.f32.mrf.mxu1 }
 0x124   : > { %v2673_v17 = vpop.f32.mrf.mxu0  ;;  %v2675_v18 = vpop.f32.mrf.mxu1 }
 0x126   : > { %v1081_v19 = vpop.f32.mrf.mxu0  ;;  %v1273_v20 = vpop.f32.mrf.mxu1 }
 0x128   : > { %v2677_v21 = vpop.f32.mrf.mxu0  ;;  %v2679_v22 = vpop.f32.mrf.mxu1 }
 0x12a   : > { %v1084_v23 = vpop.f32.mrf.mxu0  ;;  %v1276_v24 = vpop.f32.mrf.mxu1 }
 0x12c   : > { %v2681_v25 = vpop.f32.mrf.mxu0  ;;  %v2683_v26 = vpop.f32.mrf.mxu1 }
 0x12e   : > { %v1089_v27 = vpop.f32.mrf.mxu0  ;;  %v1281_v28 = vpop.f32.mrf.mxu1 }
 0x130   : > { %v2685_v29 = vpop.f32.mrf.mxu0  ;;  %v2687_v30 = vpop.f32.mrf.mxu1 }
 0x132   : > { %v1092_v31 = vpop.f32.mrf.mxu0  ;;  %v1284_v32 = vpop.f32.mrf.mxu1 }
 0x134   : > { %v2689_v33 = vpop.f32.mrf.mxu0  ;;  %v2691_v34 = vpop.f32.mrf.mxu1 }
 0x136   : > { %v1097_v35 = vpop.f32.mrf.mxu0  ;;  %v1289_v36 = vpop.f32.mrf.mxu1 }
 0x138   : > { %v2693_v37 = vpop.f32.mrf.mxu0  ;;  %v2695_v38 = vpop.f32.mrf.mxu1 }
 0x13a   : > { %v1100_v39 = vpop.f32.mrf.mxu0  ;;  %v1292_v40 = vpop.f32.mrf.mxu1 }
 0x13c   : > { %v2697_v41 = vpop.f32.mrf.mxu0  ;;  %v2699_v42 = vpop.f32.mrf.mxu1 }
 0x13e   : > { %v1105_v43 = vpop.f32.mrf.mxu0  ;;  %v1297_v44 = vpop.f32.mrf.mxu1 }
 0x140   : > { %v2701_v45 = vpop.f32.mrf.mxu0  ;;  %v2703_v46 = vpop.f32.mrf.mxu1 }
 0x142   : > { %v1108_v47 = vpop.f32.mrf.mxu0  ;;  %v1300_v48 = vpop.f32.mrf.mxu1 }
 0x144   : > { %v2705_v49 = vpop.f32.mrf.mxu0  ;;  %v2707_v50 = vpop.f32.mrf.mxu1 }
 0x146   : > { %v1113_v51 = vpop.f32.mrf.mxu0  ;;  %v1305_v52 = vpop.f32.mrf.mxu1 }
 0x148   : > { %v2709_v53 = vpop.f32.mrf.mxu0  ;;  %v2711_v54 = vpop.f32.mrf.mxu1 }
 0x14a   : > { %v1116_v55 = vpop.f32.mrf.mxu0  ;;  %v1308_v56 = vpop.f32.mrf.mxu1 }
 0x14c   : > { %v2714_v59 = vpop.f32.mrf.mxu0  ;;  %v2147_v60 = vpop.f32.mrf.mxu1 }
 0x14d   : > { %v1353_v63 = vadd.f32 %v2147_v60, %v1063_v1 }
 0x14e   : > { %v1121_v0 = vpop.f32.mrf.mxu0  ;;  %v1344_v3 = vpop.f32.mrf.mxu1 }
 0x14f   : > { %1601 = vst [vmem:[%s2719_s22 + $0x10] sm:$0xff] %v1353_v63  ;;  %v1345_v4 = vadd.f32 %v1344_v3, %v2651_v57  ;;  %v1734_v31 = vmul.f32 %v1353_v63, %v1353_v63 }
 0x150   : > { %v2723_v7 = vpop.f32.mrf.mxu0  ;;  %v2148_v8 = vpop.f32.mrf.mxu1 }
 0x151   : > { %1599 = vst [vmem:[%s2719_s22] sm:$0xff] %v1345_v4  ;;  %v1356_v11 = vadd.f32 %v2148_v8, %v2661_v5  ;;  %v1732_v20 = vmul.f32 %v1345_v4, %v1345_v4 }
 0x152   : > { %v1124_v12 = vpop.f32.mrf.mxu0  ;;  %v1347_v15 = vpop.f32.mrf.mxu1 }
 0x153   : > { %1602 = vst [vmem:[%s2719_s22 + $0x18] sm:$0xff] %v1356_v11  ;;  %v1348_v16 = vadd.f32 %v1347_v15, %v2655_v61  ;;  %v1735_v39 = vmul.f32 %v1356_v11, %v1356_v11 }
 0x154   : > { %v2729_v19 = vpop.f32.mrf.mxu0  ;;  %v2151_v1 = vpop.f32.mrf.mxu1 }
 0x155   : > { %1600 = vst [vmem:[%s2719_s22 + $0x8] sm:$0xff] %v1348_v16  ;;  %v1663_v23 = vadd.f32 %v1348_v16, %v1345_v4  ;;  %v1733_v57 = vmul.f32 %v1348_v16, %v1348_v16  ;;  %v1369_v24 = vadd.f32 %v2151_v1, %v2673_v17 }
 0x156   : > { %v1129_v27 = vpop.f32.mrf.mxu0  ;;  %v1360_v28 = vpop.f32.mrf.mxu1 }
 0x157   : > { %v1664_v5 = vadd.f32 %v1663_v23, %v1353_v63  ;;  %v1796_v32 = vadd.f32 %v1733_v57, %v1732_v20  ;;  %1605 = vst [vmem:[%s2719_s22 + $0x30] sm:$0xff] %v1369_v24  ;;  %v1361_v35 = vadd.f32 %v1360_v28, %v2665_v9  ;;  %v1738_v8 = vmul.f32 %v1369_v24, %v1369_v24 }
 0x158   : > { %v2735_v61 = vpop.f32.mrf.mxu0  ;;  %v2152_v36 = vpop.f32.mrf.mxu1 }
 0x159   : > { %v1797_v40 = vadd.f32 %v1796_v32, %v1734_v31  ;;  %1603 = vst [vmem:[%s2719_s22 + $0x20] sm:$0xff] %v1361_v35  ;;  %v1665_v43 = vadd.f32 %v1664_v5, %v1356_v11  ;;  %v1372_v44 = vadd.f32 %v2152_v36, %v2677_v21  ;;  %v1736_v51 = vmul.f32 %v1361_v35, %v1361_v35 }
 0x15a   : > { %v1132_v17 = vpop.f32.mrf.mxu0  ;;  %v1363_v47 = vpop.f32.mrf.mxu1 }
 0x15b   : > { %v1666_v48 = vadd.f32 %v1665_v43, %v1361_v35  ;;  %v1798_v52 = vadd.f32 %v1797_v40, %v1735_v39  ;;  %1606 = vst [vmem:[%s2719_s22 + $0x38] sm:$0xff] %v1372_v44  ;;  %v1364_v55 = vadd.f32 %v1363_v47, %v2669_v13  ;;  %v1739_v1 = vmul.f32 %v1372_v44, %v1372_v44 }
 0x15c   : > { %v2741_v9 = vpop.f32.mrf.mxu0  ;;  %v2155_v56 = vpop.f32.mrf.mxu1 }
 0x15d   : > { %v1799_v60 = vadd.f32 %v1798_v52, %v1736_v51  ;;  %1604 = vst [vmem:[%s2719_s22 + $0x28] sm:$0xff] %v1364_v55  ;;  %v1667_v63 = vadd.f32 %v1666_v48, %v1364_v55  ;;  %v1737_v0 = vmul.f32 %v1364_v55, %v1364_v55  ;;  %v1385_v3 = vadd.f32 %v2155_v56, %v2689_v33 }
 0x15e   : > { %v1137_v21 = vpop.f32.mrf.mxu0  ;;  %v1376_v4 = vpop.f32.mrf.mxu1 }
 0x15f   : > { %v1668_v11 = vadd.f32 %v1667_v63, %v1369_v24  ;;  %v1800_v12 = vadd.f32 %v1799_v60, %v1737_v0  ;;  %1609 = vst [vmem:[%s2719_s22 + $0x50] sm:$0xff] %v1385_v3  ;;  %v1377_v15 = vadd.f32 %v1376_v4, %v2681_v25 }
 0x160   : > { %v2747_v13 = vpop.f32.mrf.mxu0  ;;  %v2156_v16 = vpop.f32.mrf.mxu1 }
 0x161   : > { %v1801_v20 = vadd.f32 %v1800_v12, %v1738_v8  ;;  %1607 = vst [vmem:[%s2719_s22 + $0x40] sm:$0xff] %v1377_v15  ;;  %v1669_v23 = vadd.f32 %v1668_v11, %v1372_v44  ;;  %v1388_v57 = vadd.f32 %v2156_v16, %v2693_v37  ;;  %v1740_v31 = vmul.f32 %v1377_v15, %v1377_v15 }
 0x162   : > { %v1140_v33 = vpop.f32.mrf.mxu0  ;;  %v1379_v27 = vpop.f32.mrf.mxu1  ;;  %v1742_v44 = vmul.f32 %v1385_v3, %v1385_v3 }
 0x163   : > { %v1670_v28 = vadd.f32 %v1669_v23, %v1377_v15  ;;  %v1802_v24 = vadd.f32 %v1801_v20, %v1739_v1  ;;  %1610 = vst [vmem:[%s2719_s22 + $0x58] sm:$0xff] %v1388_v57  ;;  %v1380_v5 = vadd.f32 %v1379_v27, %v2685_v29  ;;  %v1743_v52 = vmul.f32 %v1388_v57, %v1388_v57 }
 0x164   : > { %v1143_v25 = vpop.f32.mrf.mxu0  ;;  %v2159_v32 = vpop.f32.mrf.mxu1 }
 0x165   : > { %v1803_v35 = vadd.f32 %v1802_v24, %v1740_v31  ;;  %1608 = vst [vmem:[%s2719_s22 + $0x48] sm:$0xff] %v1380_v5  ;;  %v1671_v36 = vadd.f32 %v1670_v28, %v1380_v5  ;;  %v1741_v39 = vmul.f32 %v1380_v5, %v1380_v5  ;;  %v1401_v40 = vadd.f32 %v2159_v32, %v2705_v49 }
 0x166   : > { %v1145_v43 = vpop.f32.mrf.mxu0  ;;  %v1392_v37 = vpop.f32.mrf.mxu1 }
 0x167   : > { %v1672_v17 = vadd.f32 %v1671_v36, %v1385_v3  ;;  %v1804_v47 = vadd.f32 %v1803_v35, %v1741_v39  ;;  %1613 = vst [vmem:[%s2719_s22 + $0x70] sm:$0xff] %v1401_v40  ;;  %v1393_v48 = vadd.f32 %v1392_v37, %v2697_v41  ;;  %v1746_v20 = vmul.f32 %v1401_v40, %v1401_v40 }
 0x168   : > { %v1146_v51 = vpop.f32.mrf.mxu0  ;;  %v2160_v29 = vpop.f32.mrf.mxu1 }
 0x169   : > { %v1805_v55 = vadd.f32 %v1804_v47, %v1742_v44  ;;  %1611 = vst [vmem:[%s2719_s22 + $0x60] sm:$0xff] %v1393_v48  ;;  %v1673_v56 = vadd.f32 %v1672_v17, %v1388_v57  ;;  %v1404_v60 = vadd.f32 %v2160_v29, %v2709_v53  ;;  %v1744_v21 = vmul.f32 %v1393_v48, %v1393_v48 }
 0x16a   : > { %v1148_v63 = vpop.f32.mrf.mxu0  ;;  %v1395_v49 = vpop.f32.mrf.mxu1 }
 0x16b   : > { %v1674_v0 = vadd.f32 %v1673_v56, %v1393_v48  ;;  %v1806_v3 = vadd.f32 %v1805_v55, %v1743_v52  ;;  %1614 = vst [vmem:[%s2719_s22 + $0x78] sm:$0xff] %v1404_v60  ;;  %v1396_v4 = vadd.f32 %v1395_v49, %v2701_v45  ;;  %v1747_v28 = vmul.f32 %v1404_v60, %v1404_v60 }
 0x16c   : > { %v2761_v8 = vpop.f32.mrf.mxu0  ;;  %v2163_v41 = vpop.f32.mrf.mxu1 }
 0x16d   : > { %v1807_v11 = vadd.f32 %v1806_v3, %v1744_v21  ;;  %1612 = vst [vmem:[%s2719_s22 + $0x68] sm:$0xff] %v1396_v4  ;;  %v1675_v12 = vadd.f32 %v1674_v0, %v1396_v4  ;;  %v1745_v15 = vmul.f32 %v1396_v4, %v1396_v4  ;;  %v1417_v16 = vadd.f32 %v2163_v41, %v2729_v19 }
 0x16e   : > { %v1153_v53 = vpop.f32.mrf.mxu0  ;;  %v1408_v1 = vpop.f32.mrf.mxu1 }
 0x16f   : > { %v1676_v23 = vadd.f32 %v1675_v12, %v1401_v40  ;;  %v1808_v57 = vadd.f32 %v1807_v11, %v1745_v15  ;;  %1617 = vst [vmem:[%s2719_s22 + $0x90] sm:$0xff] %v1417_v16  ;;  %v1409_v33 = vadd.f32 %v1408_v1, %v2714_v59 }
 0x170   : > { %v2767_v45 = vpop.f32.mrf.mxu0  ;;  %v2164_v27 = vpop.f32.mrf.mxu1 }
 0x171   : > { %v1809_v31 = vadd.f32 %v1808_v57, %v1746_v20  ;;  %1615 = vst [vmem:[%s2719_s22 + $0x80] sm:$0xff] %v1409_v33  ;;  %v1677_v24 = vadd.f32 %v1676_v23, %v1404_v60  ;;  %v1420_v5 = vadd.f32 %v2164_v27, %v2735_v61  ;;  %v1748_v36 = vmul.f32 %v1409_v33, %v1409_v33 }
 0x172   : > { %v1156_v19 = vpop.f32.mrf.mxu0  ;;  %v1411_v32 = vpop.f32.mrf.mxu1  ;;  %v1750_v61 = vmul.f32 %v1417_v16, %v1417_v16 }
 0x173   : > { %v1678_v35 = vadd.f32 %v1677_v24, %v1409_v33  ;;  %v1810_v39 = vadd.f32 %v1809_v31, %v1747_v28  ;;  %1618 = vst [vmem:[%s2719_s22 + $0x98] sm:$0xff] %v1420_v5  ;;  %v1412_v40 = vadd.f32 %v1411_v32, %v2723_v7  ;;  %v1751_v7 = vmul.f32 %v1420_v5, %v1420_v5 }
 0x174   : > { %v1159_v59 = vpop.f32.mrf.mxu0  ;;  %v2167_v43 = vpop.f32.mrf.mxu1 }
 0x175   : > { %v1811_v37 = vadd.f32 %v1810_v39, %v1748_v36  ;;  %1616 = vst [vmem:[%s2719_s22 + $0x88] sm:$0xff] %v1412_v40  ;;  %v1679_v44 = vadd.f32 %v1678_v35, %v1412_v40  ;;  %v1749_v17 = vmul.f32 %v1412_v40, %v1412_v40  ;;  %v1433_v47 = vadd.f32 %v2167_v43, %v1143_v25 }
 0x176   : > { %v1161_v48 = vpop.f32.mrf.mxu0  ;;  %v1424_v29 = vpop.f32.mrf.mxu1 }
 0x177   : > { %v1680_v52 = vadd.f32 %v1679_v44, %v1417_v16  ;;  %v1812_v55 = vadd.f32 %v1811_v37, %v1749_v17  ;;  %1621 = vst [vmem:[%s2719_s22 + $0xb0] sm:$0xff] %v1433_v47  ;;  %v1425_v56 = vadd.f32 %v1424_v29, %v2741_v9  ;;  %v1754_v27 = vmul.f32 %v1433_v47, %v1433_v47 }
 0x178   : > { %v1162_v60 = vpop.f32.mrf.mxu0  ;;  %v2168_v63 = vpop.f32.mrf.mxu1 }
 0x179   : > { %v1813_v49 = vadd.f32 %v1812_v55, %v1750_v61  ;;  %1619 = vst [vmem:[%s2719_s22 + $0xa0] sm:$0xff] %v1425_v56  ;;  %v1681_v0 = vadd.f32 %v1680_v52, %v1420_v5  ;;  %v1436_v21 = vadd.f32 %v2168_v63, %v1146_v51  ;;  %v1752_v41 = vmul.f32 %v1425_v56, %v1425_v56 }
 0x17a   : > { %v1164_v3 = vpop.f32.mrf.mxu0  ;;  %v1427_v4 = vpop.f32.mrf.mxu1 }
 0x17b   : > { %v1682_v25 = vadd.f32 %v1681_v0, %v1425_v56  ;;  %v1814_v11 = vadd.f32 %v1813_v49, %v1751_v7  ;;  %1622 = vst [vmem:[%s2719_s22 + $0xb8] sm:$0xff] %v1436_v21  ;;  %v1428_v12 = vadd.f32 %v1427_v4, %v2747_v13  ;;  %v1755_v36 = vmul.f32 %v1436_v21, %v1436_v21 }
 0x17c   : > { %v1167_v15 = vpop.f32.mrf.mxu0  ;;  %v2171_v9 = vpop.f32.mrf.mxu1 }
 0x17d   : > { %v1815_v16 = vadd.f32 %v1814_v11, %v1752_v41  ;;  %1620 = vst [vmem:[%s2719_s22 + $0xa8] sm:$0xff] %v1428_v12  ;;  %v1683_v53 = vadd.f32 %v1682_v25, %v1428_v12  ;;  %v1753_v1 = vmul.f32 %v1428_v12, %v1428_v12  ;;  %v1449_v20 = vadd.f32 %v2171_v9, %v1159_v59 }
 0x17e   : > { %v1169_v23 = vpop.f32.mrf.mxu0  ;;  %v1440_v51 = vpop.f32.mrf.mxu1 }
 0x17f   : > { %v1816_v57 = vadd.f32 %v1815_v16, %v1753_v1  ;;  %1625 = vst [vmem:[%s2719_s22 + $0xd0] sm:$0xff] %v1449_v20  ;;  %v1441_v33 = vadd.f32 %v1440_v51, %v2761_v8  ;;  %v1684_v13 = vadd.f32 %v1683_v53, %v1433_v47  ;;  %v1758_v41 = vmul.f32 %v1449_v20, %v1449_v20 }
 0x180   : > { %v1170_v28 = vpop.f32.mrf.mxu0  ;;  %v2172_v31 = vpop.f32.mrf.mxu1 }
 0x181   : > { %1623 = vst [vmem:[%s2719_s22 + $0xc0] sm:$0xff] %v1441_v33  ;;  %v1452_v24 = vadd.f32 %v2172_v31, %v1162_v60  ;;  %v1817_v5 = vadd.f32 %v1816_v57, %v1754_v27  ;;  %v1685_v59 = vadd.f32 %v1684_v13, %v1436_v21  ;;  %v1756_v47 = vmul.f32 %v1441_v33, %v1441_v33 }
 0x182   : > { %v1172_v19 = vpop.f32.mrf.mxu0  ;;  %v1443_v32 = vpop.f32.mrf.mxu1 }
 0x183   : > { %1626 = vst [vmem:[%s2719_s22 + $0xd8] sm:$0xff] %v1452_v24  ;;  %v1444_v35 = vadd.f32 %v1443_v32, %v2767_v45  ;;  %v1818_v43 = vadd.f32 %v1817_v5, %v1755_v36  ;;  %v1686_v45 = vadd.f32 %v1685_v59, %v1441_v33  ;;  %v1759_v23 = vmul.f32 %v1452_v24, %v1452_v24 }
 0x184   : > { %v1175_v39 = vpop.f32.mrf.mxu0  ;;  %v2175_v40 = vpop.f32.mrf.mxu1 }
 0x185   : > { %1624 = vst [vmem:[%s2719_s22 + $0xc8] sm:$0xff] %v1444_v35  ;;  %v2786_v8 = vadd.f32 %v2175_v40, %v1175_v39  ;;  %v1819_v52 = vadd.f32 %v1818_v43, %v1756_v47  ;;  %v1757_v55 = vmul.f32 %v1444_v35, %v1444_v35  ;;  %v1687_v0 = vadd.f32 %v1686_v45, %v1444_v35 }
 0x186   : > { %v1177_v37 = vpop.f32.mrf.mxu0  ;;  %v1456_v44 = vpop.f32.mrf.mxu1 }
 0x187   : > { %1629 = vst [vmem:[%s2719_s22 + $0xf0] sm:$0xff] %v2786_v8  ;;  %v1457_v17 = vadd.f32 %v1456_v44, %v1167_v15  ;;  %v1820_v21 = vadd.f32 %v1819_v52, %v1757_v55  ;;  %v1688_v15 = vadd.f32 %v1687_v0, %v1449_v20 }
 0x188   : > { %v1178_v48 = vpop.f32.mrf.mxu0  ;;  %v2176_v29 = vpop.f32.mrf.mxu1 }
 0x189   : > { %1627 = vst [vmem:[%s2719_s22 + $0xe0] sm:$0xff] %v1457_v17  ;;  %v2791_v61 = vadd.f32 %v2176_v29, %v1178_v48  ;;  %v1821_v9 = vadd.f32 %v1820_v21, %v1758_v41  ;;  %v1689_v33 = vadd.f32 %v1688_v15, %v1452_v24  ;;  %v1760_v5 = vmul.f32 %v1457_v17, %v1457_v17 }
 0x18a   : > { %v1180_v56 = vpop.f32.mrf.mxu0  ;;  %v1459_v60 = vpop.f32.mrf.mxu1 }
 0x18b   : > { %1630 = vst [vmem:[%s2719_s22 + $0xf8] sm:$0xff] %v2791_v61  ;;  %v1460_v63 = vadd.f32 %v1459_v60, %v1170_v28  ;;  %v1822_v28 = vadd.f32 %v1821_v9, %v1759_v23  ;;  %v1690_v32 = vadd.f32 %v1689_v33, %v1457_v17  ;;  %v1762_v17 = vmul.f32 %v2786_v8, %v2786_v8 }
 0x18c   : > { %v1183_v7 = vpop.f32.mrf.mxu0  ;;  %v2179_v49 = vpop.f32.mrf.mxu1 }
 0x18d   : > { %1628 = vst [vmem:[%s2719_s22 + $0xe8] sm:$0xff] %v1460_v63  ;;  %v1823_v36 = vadd.f32 %v1822_v28, %v1760_v5  ;;  %v1761_v39 = vmul.f32 %v1460_v63, %v1460_v63  ;;  %v1691_v37 = vadd.f32 %v1690_v32, %v1460_v63 }
 0x18e   : > { %v1185_v3 = vpop.f32.mrf.mxu0  ;;  %v1472_v4 = vpop.f32.mrf.mxu1 }
 0x18f   : > { %v1473_v25 = vadd.f32 %v1472_v4, %v1183_v7  ;;  %v1824_v47 = vadd.f32 %v1823_v36, %v1761_v39  ;;  %v1692_v55 = vadd.f32 %v1691_v37, %v2786_v8 }
 0x190   : > { %v1186_v11 = vpop.f32.mrf.mxu0  ;;  %v2180_v12 = vpop.f32.mrf.mxu1 }
 0x191   : > { %1631 = vst [vmem:[%s2719_s22 + $0x100] sm:$0xff] %v1473_v25  ;;  %v1825_v60 = vadd.f32 %v1824_v47, %v1762_v17  ;;  %v1693_v3 = vadd.f32 %v1692_v55, %v2791_v61 }
 0x192   : > { %v1188_v16 = vpop.f32.mrf.mxu0  ;;  %v1475_v53 = vpop.f32.mrf.mxu1 }
 0x193   : > { %v1476_v1 = vadd.f32 %v1475_v53, %v1186_v11  ;;  %v1694_v16 = vadd.f32 %v1693_v3, %v1473_v25 }
 0x194   : > { %v1191_v51 = vpop.f32.mrf.mxu0  ;;  %v2183_v57 = vpop.f32.mrf.mxu1 }
 0x195   : > { %1632 = vst [vmem:[%s2719_s22 + $0x108] sm:$0xff] %v1476_v1  ;;  %v2798_v27 = vadd.f32 %v2179_v49, %v1191_v51  ;;  %v1763_v49 = vmul.f32 %v2791_v61, %v2791_v61  ;;  %v1765_v51 = vmul.f32 %v1476_v1, %v1476_v1 }
 0x196   : > { %v1193_v31 = vpop.f32.mrf.mxu0  ;;  %v1488_v13 = vpop.f32.mrf.mxu1 }
 0x197   : > { %1633 = vst [vmem:[%s2719_s22 + $0x110] sm:$0xff] %v2798_v27  ;;  %v1826_v41 = vadd.f32 %v1825_v60, %v1763_v49  ;;  %v1695_v31 = vadd.f32 %v1694_v16, %v1476_v1 }
 0x198   : > { %v1194_v20 = vpop.f32.mrf.mxu0  ;;  %v2184_v19 = vpop.f32.mrf.mxu1 }
 0x199   : > { %v2802_v35 = vadd.f32 %v2180_v12, %v1194_v20  ;;  %v1764_v12 = vmul.f32 %v1473_v25, %v1473_v25  ;;  %v1766_v25 = vmul.f32 %v2798_v27, %v2798_v27 }
 0x19a   : > { %v1196_v40 = vpop.f32.mrf.mxu0  ;;  %v1491_v24 = vpop.f32.mrf.mxu1 }
 0x19b   : > { %1634 = vst [vmem:[%s2719_s22 + $0x118] sm:$0xff] %v2802_v35  ;;  %v1827_v23 = vadd.f32 %v1826_v41, %v1764_v12  ;;  %v1767_v1 = vmul.f32 %v2802_v35, %v2802_v35  ;;  %v1696_v40 = vadd.f32 %v1695_v31, %v2798_v27 }
 0x19c   : > { %v1199_v59 = vpop.f32.mrf.mxu0  ;;  %v2806_v43 = vpop.f32.mrf.mxu1 }
 0x19d   : > { %v2808_v44 = vadd.f32 %v1488_v13, %v1199_v59  ;;  %v1828_v20 = vadd.f32 %v1827_v23, %v1765_v51 }
 0x19e   : > { %v1201_v48 = vpop.f32.mrf.mxu0  ;;  %v1504_v29 = vpop.f32.mrf.mxu1 }
 0x19f   : > { %1635 = vst [vmem:[%s2719_s22 + $0x120] sm:$0xff] %v2808_v44  ;;  %v1829_v37 = vadd.f32 %v1828_v20, %v1766_v25  ;;  %v1768_v47 = vmul.f32 %v2808_v44, %v2808_v44 }
 0x1a0   : > { %v1202_v45 = vpop.f32.mrf.mxu0  ;;  %v2814_v52 = vpop.f32.mrf.mxu1 }
 0x1a1   : > { %v2817_v56 = vadd.f32 %v1491_v24, %v1202_v45  ;;  %v1830_v17 = vadd.f32 %v1829_v37, %v1767_v1 }
 0x1a2   : > { %v1204_v63 = vpop.f32.mrf.mxu0  ;;  %v1507_v7 = vpop.f32.mrf.mxu1 }
 0x1a3   : > { %1636 = vst [vmem:[%s2719_s22 + $0x128] sm:$0xff] %v2817_v56 }
 0x1a4   : > { %v1207_v0 = vpop.f32.mrf.mxu0  ;;  %v2823_v21 = vpop.f32.mrf.mxu1 }
 0x1a5   : > { %v1497_v4 = vadd.f32 %v2183_v57, %v1207_v0 }
 0x1a6   : > { %v1209_v11 = vpop.f32.mrf.mxu0  ;;  %v2826_v8 = vpop.f32.mrf.mxu1 }
 0x1a7   : > { %1637 = vst [vmem:[%s2719_s22 + $0x130] sm:$0xff] %v1497_v4  ;;  %v1770_v49 = vmul.f32 %v1497_v4, %v1497_v4 }
 0x1a8   : > { %v1210_v15 = vpop.f32.mrf.mxu0  ;;  %v2829_v9 = vpop.f32.mrf.mxu1 }
 0x1a9   : > { %v1500_v53 = vadd.f32 %v2184_v19, %v1210_v15 }
 0x1aa   : > { %v1212_v33 = vpop.f32.mrf.mxu0  ;;  %v2831_v28 = vpop.f32.mrf.mxu1 }
 0x1ab   : > { %1638 = vst [vmem:[%s2719_s22 + $0x138] sm:$0xff] %v1500_v53  ;;  %v1771_v11 = vmul.f32 %v1500_v53, %v1500_v53 }
 0x1ac   : > { %v1215_v61 = vpop.f32.mrf.mxu0  ;;  %v2195_v57 = vpop.f32.mrf.mxu1 }
 0x1ad   : > { %v1505_v13 = vadd.f32 %v1504_v29, %v1215_v61  ;;  %v2835_v5 = vadd.f32 %v2195_v57, %v2659_v2  ;;  %v1697_v29 = vadd.f32 %v1696_v40, %v2802_v35 }
 0x1ae   : > { %v1217_v19 = vpop.f32.mrf.mxu0  ;;  %v1536_v32 = vpop.f32.mrf.mxu1 }
 0x1af   : > { %1639 = vst [vmem:[%s2719_s22 + $0x140] sm:$0xff] %v1505_v13  ;;  %1649 = vst [vmem:[%s2719_s22 + $0x190] sm:$0xff] %v2835_v5  ;;  %v2843_v36 = vadd.f32 %v1536_v32, %v2653_v58  ;;  %v1698_v60 = vadd.f32 %v1697_v29, %v2808_v44  ;;  %v1772_v23 = vmul.f32 %v1505_v13, %v1505_v13 }
 0x1b0   : > { %v1218_v39 = vpop.f32.mrf.mxu0  ;;  %v2196_v2 = vpop.f32.mrf.mxu1 }
 0x1b1   : > { %1647 = vst [vmem:[%s2719_s22 + $0x180] sm:$0xff] %v2843_v36  ;;  %v1508_v24 = vadd.f32 %v1507_v7, %v1218_v39  ;;  %v2851_v59 = vadd.f32 %v2196_v2, %v2663_v6  ;;  %v1769_v6 = vmul.f32 %v2817_v56, %v2817_v56  ;;  %v1831_v7 = vadd.f32 %v1830_v17, %v1768_v47 }
 0x1b2   : > { %v1220_v58 = vpop.f32.mrf.mxu0  ;;  %v1539_v48 = vpop.f32.mrf.mxu1  ;;  %v1699_v3 = vadd.f32 %v1698_v60, %v2817_v56 }
 0x1b3   : > { %1640 = vst [vmem:[%s2719_s22 + $0x148] sm:$0xff] %v1508_v24  ;;  %1650 = vst [vmem:[%s2719_s22 + $0x198] sm:$0xff] %v2851_v59  ;;  %v2860_v27 = vadd.f32 %v1539_v48, %v2657_v62  ;;  %v1832_v41 = vadd.f32 %v1831_v7, %v1769_v6  ;;  %v1773_v57 = vmul.f32 %v1508_v24, %v1508_v24 }
 0x1b4   : > { %v1223_v45 = vpop.f32.mrf.mxu0  ;;  %v2199_v55 = vpop.f32.mrf.mxu1 }
 0x1b5   : > { %1648 = vst [vmem:[%s2719_s22 + $0x188] sm:$0xff] %v2860_v27  ;;  %v1513_v35 = vadd.f32 %v2806_v43, %v1223_v45  ;;  %v2869_v63 = vadd.f32 %v2199_v55, %v2675_v18  ;;  %v1700_v18 = vadd.f32 %v1699_v3, %v1497_v4  ;;  %v1833_v16 = vadd.f32 %v1832_v41, %v1770_v49 }
 0x1b6   : > { %v1225_v62 = vpop.f32.mrf.mxu0  ;;  %v1552_v0 = vpop.f32.mrf.mxu1 }
 0x1b7   : > { %1641 = vst [vmem:[%s2719_s22 + $0x150] sm:$0xff] %v1513_v35  ;;  %1653 = vst [vmem:[%s2719_s22 + $0x1b0] sm:$0xff] %v2869_v63  ;;  %v2876_v44 = vadd.f32 %v1552_v0, %v2667_v10  ;;  %v1701_v61 = vadd.f32 %v1700_v18, %v1500_v53  ;;  %v1834_v4 = vadd.f32 %v1833_v16, %v1771_v11 }
 0x1b8   : > { %v1226_v43 = vpop.f32.mrf.mxu0  ;;  %v2200_v12 = vpop.f32.mrf.mxu1  ;;  %v1774_v19 = vmul.f32 %v1513_v35, %v1513_v35 }
 0x1b9   : > { %1651 = vst [vmem:[%s2719_s22 + $0x1a0] sm:$0xff] %v2876_v44  ;;  %v1516_v15 = vadd.f32 %v2814_v52, %v1226_v43  ;;  %v2882_v56 = vadd.f32 %v2200_v12, %v2679_v22  ;;  %v1702_v20 = vadd.f32 %v1701_v61, %v1505_v13  ;;  %v1835_v25 = vadd.f32 %v1834_v4, %v1772_v23 }
 0x1ba   : > { %v1228_v51 = vpop.f32.mrf.mxu0  ;;  %v1555_v33 = vpop.f32.mrf.mxu1 }
 0x1bb   : > { %1642 = vst [vmem:[%s2719_s22 + $0x158] sm:$0xff] %v1516_v15  ;;  %1654 = vst [vmem:[%s2719_s22 + $0x1b8] sm:$0xff] %v2882_v56  ;;  %v2888_v10 = vadd.f32 %v1555_v33, %v2671_v14  ;;  %v1703_v39 = vadd.f32 %v1702_v20, %v1508_v24  ;;  %v1836_v13 = vadd.f32 %v1835_v25, %v1773_v57 }
 0x1bc   : > { %v1231_v31 = vpop.f32.mrf.mxu0  ;;  %v2203_v52 = vpop.f32.mrf.mxu1  ;;  %v1775_v2 = vmul.f32 %v1516_v15, %v1516_v15  ;;  %v1784_v25 = vmul.f32 %v2876_v44, %v2876_v44 }
 0x1bd   : > { %1652 = vst [vmem:[%s2719_s22 + $0x1a8] sm:$0xff] %v2888_v10  ;;  %v1521_v22 = vadd.f32 %v2826_v8, %v1231_v31  ;;  %v2894_v53 = vadd.f32 %v2203_v52, %v2691_v34  ;;  %v1704_v37 = vadd.f32 %v1703_v39, %v1513_v35  ;;  %v1837_v47 = vadd.f32 %v1836_v13, %v1774_v19 }
 0x1be   : > { %v1233_v32 = vpop.f32.mrf.mxu0  ;;  %v1568_v1 = vpop.f32.mrf.mxu1  ;;  %v1782_v31 = vmul.f32 %v2835_v5, %v2835_v5 }
 0x1bf   : > { %1643 = vst [vmem:[%s2719_s22 + $0x160] sm:$0xff] %v1521_v22  ;;  %1657 = vst [vmem:[%s2719_s22 + $0x1d0] sm:$0xff] %v2894_v53  ;;  %v2900_v14 = vadd.f32 %v1568_v1, %v2683_v26  ;;  %v1705_v29 = vadd.f32 %v1704_v37, %v1516_v15  ;;  %v1776_v17 = vmul.f32 %v1521_v22, %v1521_v22 }
 0x1c0   : > { %v1234_v40 = vpop.f32.mrf.mxu0  ;;  %v2204_v8 = vpop.f32.mrf.mxu1  ;;  %v1838_v6 = vadd.f32 %v1837_v47, %v1775_v2 }
 0x1c1   : > { %1655 = vst [vmem:[%s2719_s22 + $0x1c0] sm:$0xff] %v2900_v14  ;;  %v1524_v34 = vadd.f32 %v2831_v28, %v1234_v40  ;;  %v2906_v24 = vadd.f32 %v2204_v8, %v2695_v38  ;;  %v1706_v60 = vadd.f32 %v1705_v29, %v1521_v22 }
 0x1c2   : > { %v1236_v58 = vpop.f32.mrf.mxu0  ;;  %v1571_v48 = vpop.f32.mrf.mxu1  ;;  %v1839_v62 = vadd.f32 %v1838_v6, %v1776_v17 }
 0x1c3   : > { %1644 = vst [vmem:[%s2719_s22 + $0x168] sm:$0xff] %v1524_v34  ;;  %1658 = vst [vmem:[%s2719_s22 + $0x1d8] sm:$0xff] %v2906_v24  ;;  %v1572_v26 = vadd.f32 %v1571_v48, %v2687_v30  ;;  %v1777_v28 = vmul.f32 %v1524_v34, %v1524_v34  ;;  %v1707_v0 = vadd.f32 %v1706_v60, %v1524_v34 }
 0x1c4   : > { %v1239_v45 = vpop.f32.mrf.mxu0  ;;  %v2207_v55 = vpop.f32.mrf.mxu1  ;;  %v1790_v48 = vmul.f32 %v2894_v53, %v2894_v53  ;;  %v1791_v17 = vmul.f32 %v2906_v24, %v2906_v24 }
 0x1c5   : > { %1656 = vst [vmem:[%s2719_s22 + $0x1c8] sm:$0xff] %v1572_v26  ;;  %v1529_v38 = vadd.f32 %v2823_v21, %v1239_v45  ;;  %v2915_v35 = vadd.f32 %v2207_v55, %v2707_v50  ;;  %v1840_v43 = vadd.f32 %v1839_v62, %v1777_v28 }
 0x1c6   : > { %v1241_v7 = vpop.f32.mrf.mxu0  ;;  %v1584_v49 = vpop.f32.mrf.mxu1 }
 0x1c7   : > { %1645 = vst [vmem:[%s2719_s22 + $0x170] sm:$0xff] %v1529_v38  ;;  %v1778_v3 = vmul.f32 %v1529_v38, %v1529_v38  ;;  %1661 = vst [vmem:[%s2719_s22 + $0x1f0] sm:$0xff] %v2915_v35  ;;  %v1585_v30 = vadd.f32 %v1584_v49, %v2699_v42  ;;  %v1708_v21 = vadd.f32 %v1707_v0, %v1529_v38 }
 0x1c8   : > { %v1242_v41 = vpop.f32.mrf.mxu0  ;;  %v2208_v11 = vpop.f32.mrf.mxu1  ;;  %v1780_v42 = vmul.f32 %v2843_v36, %v2843_v36  ;;  %v1794_v38 = vmul.f32 %v2915_v35, %v2915_v35 }
 0x1c9   : > { %1659 = vst [vmem:[%s2719_s22 + $0x1e0] sm:$0xff] %v1585_v30  ;;  %v1532_v50 = vadd.f32 %v2829_v9, %v1242_v41  ;;  %v1596_v12 = vadd.f32 %v2208_v11, %v2711_v54  ;;  %v1841_v16 = vadd.f32 %v1840_v43, %v1778_v3  ;;  %v1781_v9 = vmul.f32 %v2860_v27, %v2860_v27 }
 0x1ca   : > { %v1244_v18 = vpop.f32.mrf.mxu0  ;;  %v1587_v15 = vpop.f32.mrf.mxu1  ;;  %v1792_v45 = vmul.f32 %v1585_v30, %v1585_v30 }
 0x1cb   : > { %1646 = vst [vmem:[%s2719_s22 + $0x178] sm:$0xff] %v1532_v50  ;;  %v1709_v23 = vadd.f32 %v1708_v21, %v1532_v50  ;;  %v1779_v51 = vmul.f32 %v1532_v50, %v1532_v50  ;;  %1662 = vst [vmem:[%s2719_s22 + $0x1f8] sm:$0xff] %v1596_v12  ;;  %v1588_v33 = vadd.f32 %v1587_v15, %v2703_v46 }
 0x1cc   : > { %v1783_v46 = vmul.f32 %v2851_v59, %v2851_v59  ;;  %v1795_v49 = vmul.f32 %v1596_v12, %v1596_v12 }
 0x1cd   : > { %v1710_v61 = vadd.f32 %v1709_v23, %v2843_v36  ;;  %v1842_v4 = vadd.f32 %v1841_v16, %v1779_v51  ;;  %1660 = vst [vmem:[%s2719_s22 + $0x1e8] sm:$0xff] %v1588_v33 }
 0x1cf   : > { %v1711_v54 = vadd.f32 %v1710_v61, %v2860_v27  ;;  %v1843_v57 = vadd.f32 %v1842_v4, %v1780_v42  ;;  %v1785_v27 = vmul.f32 %v2888_v10, %v2888_v10 }
 0x1d1   : > { %v1712_v52 = vadd.f32 %v1711_v54, %v2835_v5  ;;  %v1844_v20 = vadd.f32 %v1843_v57, %v1781_v9  ;;  %v1786_v5 = vmul.f32 %v2869_v63, %v2869_v63 }
 0x1d3   : > { %v1713_v22 = vadd.f32 %v1712_v52, %v2851_v59  ;;  %v1845_v36 = vadd.f32 %v1844_v20, %v1782_v31  ;;  %v1787_v59 = vmul.f32 %v2882_v56, %v2882_v56 }
 0x1d5   : > { %v1714_v19 = vadd.f32 %v1713_v22, %v2876_v44  ;;  %v1846_v32 = vadd.f32 %v1845_v36, %v1783_v46  ;;  %v1788_v44 = vmul.f32 %v2900_v14, %v2900_v14 }
 0x1d7   : > { %v1715_v1 = vadd.f32 %v1714_v19, %v2888_v10  ;;  %v1847_v39 = vadd.f32 %v1846_v32, %v1784_v25  ;;  %v1789_v10 = vmul.f32 %v1572_v26, %v1572_v26 }
 0x1d9   : > { %v1848_v13 = vadd.f32 %v1847_v39, %v1785_v27  ;;  %v1716_v2 = vadd.f32 %v1715_v1, %v2869_v63 }
 0x1db   : > { %v1717_v40 = vadd.f32 %v1716_v2, %v2882_v56  ;;  %v1849_v8 = vadd.f32 %v1848_v13, %v1786_v5 }
 0x1dd   : > { %v1718_v37 = vadd.f32 %v1717_v40, %v2900_v14  ;;  %v1850_v34 = vadd.f32 %v1849_v8, %v1787_v59 }
 0x1df   : > { %v1719_v47 = vadd.f32 %v1718_v37, %v1572_v26  ;;  %v1851_v58 = vadd.f32 %v1850_v34, %v1788_v44  ;;  %v1793_v26 = vmul.f32 %v1588_v33, %v1588_v33 }
 0x1e1   : > { %v1720_v63 = vadd.f32 %v1719_v47, %v2894_v53  ;;  %v1852_v29 = vadd.f32 %v1851_v58, %v1789_v10 }
 0x1e3   : > { %v1721_v56 = vadd.f32 %v1720_v63, %v2906_v24  ;;  %v1853_v6 = vadd.f32 %v1852_v29, %v1790_v48 }
 0x1e5   : > { %v1722_v55 = vadd.f32 %v1721_v56, %v1585_v30  ;;  %v1854_v14 = vadd.f32 %v1853_v6, %v1791_v17 }
 0x1e7   : > { %v1723_v60 = vadd.f32 %v1722_v55, %v1588_v33  ;;  %v1855_v28 = vadd.f32 %v1854_v14, %v1792_v45 }
 0x1e9   : > { %v1724_v53 = vadd.f32 %v1723_v60, %v2915_v35  ;;  %v1856_v7 = vadd.f32 %v1855_v28, %v1793_v26 }
 0x1eb   : > { %v1725_v62 = vadd.f32 %v1724_v53, %v1596_v12  ;;  %v1857_v0 = vadd.f32 %v1856_v7, %v1794_v38 }
 0x1ed   : > { %v1726_v3 = vrot.slane %v1725_v62, 4  ;;  %v1858_v24 = vadd.f32 %v1857_v0, %v1795_v49 }
 0x1ef   : > { %v1727_v41 = vadd.f32 %v1726_v3, %v1725_v62  ;;  %v1859_v11 = vrot.slane %v1858_v24, 4 }
 0x1f1   : > { %v1728_v30 = vrot.slane %v1727_v41, 2  ;;  %v1860_v43 = vadd.f32 %v1859_v11, %v1858_v24 }
 0x1f3   : > { %v1729_v21 = vadd.f32 %v1728_v30, %v1727_v41  ;;  %v1861_v50 = vrot.slane %v1860_v43, 2 }
 0x1f5   : > { %v1730_v18 = vrot.slane %v1729_v21, 1  ;;  %v1862_v15 = vadd.f32 %v1861_v50, %v1860_v43 }
 0x1f7   : > { %v1863_v16 = vrot.slane %v1862_v15, 1  ;;  %v1731_v35 = vadd.f32 %v1730_v18, %v1729_v21 }
 0x1f9   : > { %v1864_v23 = vadd.f32 %v1863_v16, %v1862_v15 }
 0x1fb   : > { %v1866_v12 = vsel %vm1865_vm0, %v1731_v35, %v1864_v23 }
 0x1fc   : > { %v1868_v51 = vsel %vm1867_vm1, %v1866_v12, 0.0 }
 0x1fd   : > { %1869 = vst [vmem:[%s187_s25] sm:$0xff] %v1868_v51 }
 0x1fe PF: > { %s14_s12 = sadd.s32 1, %s2409_s12  }
 0x1ff   : > { %p11_p5 = scmp.ge.s32.totalorder %s14_s12, 6  }
 0x201   :  { %13 = sbr.rel (!%p11_p5) target bundleno = 1 (0x1), region = 70 }

// kernel: _lambda_.37
= control target key start
LH: loop header
LB: loop body
LE: loop exit
PB: predicated region body
PF: predicated region fallthrough
CT: control target
= control target key end

     0   :  { %s4369_s12 = smov 0   ;;  %s5534_s0 = inlined_call_operand.vmem [shape: bf16[2048,896], index: 0, kind: input, shape index: {}]   ;;  %s5535_s1 = inlined_call_operand.vmem [shape: bf16[896,128], index: 1, kind: input, shape index: {}]   ;;  %s5536_s2 = inlined_call_operand.vmem [shape: f32[1,128], index: 2, kind: input, shape index: {}]   ;;  %s5537_s3 = inlined_call_operand.vmem [shape: f32[2048,128], index: 3, kind: output, shape index: {}]  }
   0x1 LB: > { %s3381_s13 = sadd.s32 4294967295, %s4346_s12   ;;  %p3385_p0 = scmp.ge.s32.totalorder %s4346_s12, 1  ;;  %s4346_s12 = sphi %s4369_s12, %s13_s12  }
   0x2   : > { %p139_p1 = scmp.lt.s32.totalorder %s4346_s12, 5 }
   0x4   : > { %p140_p2 = pnand %p3385_p0, %p139_p1 }
   0x6   : > { %143 = sbr.rel (%p140_p2) target bundleno = 733 (0x2dd), region = 32 }
   0xb   : > { %v3835_v0 = vld [vmem:[%s5535_s1 + $0x38] sm:$0xff]   ;;  %v4348_v1 = vmov 0   ;;  %s3386_s16 = sshll.u32 %s3381_s13, 6  ;;  %v3836_v2 = vld [vmem:[%s5535_s1 + $0x30] sm:$0xff]   ;;  %v3837_v3 = vld [vmem:[%s5535_s1 + $0x28] sm:$0xff]  }
   0xc   : > { %2041 = vmatprep.subr.bf16.mxu0 %v4348_v1  ;;  %3793 = vmatprep.subr.bf16.mxu1 %v4348_v1  ;;  %p165_p3 = scmp.lt.s32.totalorder %s3386_s16, 255  ;;  %v3838_v4 = vld [vmem:[%s5535_s1 + $0x20] sm:$0xff]   ;;  %v3839_v5 = vld [vmem:[%s5535_s1 + $0x18] sm:$0xff]   ;;  %v3840_v7 = vld [vmem:[%s5535_s1 + $0x10] sm:$0xff]  }
   0xd   : > { %2042 = vmatpush1.bf16.msra.mxu0 %v3835_v0  ;;  %3809 = vmatpush1.bf16.msra.mxu1 %v3835_v0  ;;  %v3841_v9 = vld [vmem:[%s5535_s1 + $0x8] sm:$0xff]   ;;  %v3842_v10 = vld [vmem:[%s5535_s1] sm:$0xff]   ;;  %v3843_v11 = vld [vmem:[%s5535_s1 + $0x78] sm:$0xff]  }
   0xe   : > { %2043 = vmatprep.subr.bf16.mxu0 %v4348_v1  ;;  %3794 = vmatprep.subr.bf16.mxu1 %v4348_v1  ;;  %s5601_s16 = smov (!%p165_p3, %s3386_s16), 255  ;;  %v3844_v12 = vld [vmem:[%s5535_s1 + $0x70] sm:$0xff]   ;;  %v3845_v13 = vld [vmem:[%s5535_s1 + $0x68] sm:$0xff]   ;;  %v3846_v14 = vld [vmem:[%s5535_s1 + $0x60] sm:$0xff]  }
   0xf   : > { %s3825_s23 = smul.u32 28, %s5601_s16  ;;  %v3847_v15 = vld [vmem:[%s5535_s1 + $0x58] sm:$0xff]   ;;  %v3848_v16 = vld [vmem:[%s5535_s1 + $0x50] sm:$0xff]   ;;  %v3849_v17 = vld [vmem:[%s5535_s1 + $0x48] sm:$0xff]   ;;  %s3389_s11 = sshll.u32 %s5601_s16, 3 }
  0x10   : > { %v3850_v18 = vld [vmem:[%s5535_s1 + $0x40] sm:$0xff]   ;;  %v3857_v21 = vld [vmem:[%s5535_s1 + $0xb8] sm:$0xff]   ;;  %v3859_v25 = vld [vmem:[%s5535_s1 + $0xb0] sm:$0xff]   ;;  %s5350_s15 = scalar_lea.vmem %s5537_s3, %s3389_s11 }
  0x11   : > { %2044 = vmatpush1.bf16.msra.mxu0 %v3836_v2  ;;  %3810 = vmatpush1.bf16.msra.mxu1 %v3836_v2  ;;  %s4406_s28 = scalar_lea.vmem %s5534_s0, %s3825_s23  ;;  %v3858_v22 = vld [vmem:[%s5535_s1 + $0x138] sm:$0xff]   ;;  %v3868_v26 = vld [vmem:[%s5535_s1 + $0x130] sm:$0xff]   ;;  %v3866_v29 = vld [vmem:[%s5535_s1 + $0xa8] sm:$0xff]  }
  0x12   : > { %2045 = vmatprep.subr.bf16.mxu0 %v4348_v1  ;;  %3795 = vmatprep.subr.bf16.mxu1 %v4348_v1  ;;  %v3853_v6 = vld [vmem:[%s4406_s28 + $0x4] ss:$28 sps:$4 sm:$0xff]   ;;  %v3860_v23 = vld [vmem:[%s4406_s28 + $0x3c] ss:$28 sps:$4 sm:$0xff]   ;;  %v3869_v30 = vld [vmem:[%s4406_s28 + $0x74] ss:$28 sps:$4 sm:$0xff]  }
  0x13   : > { %v3856_v8 = vld [vmem:[%s4406_s28 + $0x544] ss:$28 sps:$4 sm:$0xff]   ;;  %2073 = vmatprep.mubr.bf16.mxu0 %v3853_v6  ;;  %v3862_v24 = vld [vmem:[%s4406_s28 + $0x57c] ss:$28 sps:$4 sm:$0xff]   ;;  %v3871_v31 = vld [vmem:[%s4406_s28 + $0x5b4] ss:$28 sps:$4 sm:$0xff]  }
  0x14   : > { %2265 = vmatprep.mubr.bf16.mxu1 %v3856_v8  ;;  %v3851_v19 = vld [vmem:[%s4406_s28] ss:$28 sps:$4 sm:$0xff]   ;;  %v3864_v27 = vld [vmem:[%s4406_s28 + $0x38] ss:$28 sps:$4 sm:$0xff]   ;;  %v3884_v32 = vld [vmem:[%s5535_s1 + $0x128] sm:$0xff]  }
  0x15   : > { %2046 = vmatpush1.bf16.msra.mxu0 %v3837_v3  ;;  %3811 = vmatpush1.bf16.msra.mxu1 %v3837_v3  ;;  %v3854_v20 = vld [vmem:[%s4406_s28 + $0x540] ss:$28 sps:$4 sm:$0xff]   ;;  %v3865_v28 = vld [vmem:[%s4406_s28 + $0x578] ss:$28 sps:$4 sm:$0xff]   ;;  %v3873_v34 = vld [vmem:[%s4406_s28 + $0x70] ss:$28 sps:$4 sm:$0xff]  }
  0x16   : > { %2047 = vmatprep.subr.bf16.mxu0 %v4348_v1  ;;  %3796 = vmatprep.subr.bf16.mxu1 %v4348_v1  ;;  %v3867_v33 = vld [vmem:[%s5535_s1 + $0xa0] sm:$0xff]   ;;  %v3874_v35 = vld [vmem:[%s4406_s28 + $0x5b0] ss:$28 sps:$4 sm:$0xff]   ;;  %v3875_v37 = vld [vmem:[%s5535_s1 + $0x98] sm:$0xff]  }
  0x17   : > { %v3894_v36 = vld [vmem:[%s5535_s1 + $0x120] sm:$0xff]   ;;  %v3877_v38 = vld [vmem:[%s4406_s28 + $0xac] ss:$28 sps:$4 sm:$0xff]   ;;  %v3910_v40 = vld [vmem:[%s5535_s1 + $0x118] sm:$0xff]  }
  0x18   : > { %v3879_v39 = vld [vmem:[%s4406_s28 + $0x5ec] ss:$28 sps:$4 sm:$0xff]   ;;  %v3876_v41 = vld [vmem:[%s5535_s1 + $0x90] sm:$0xff]   ;;  %v3886_v45 = vld [vmem:[%s4406_s28 + $0xe4] ss:$28 sps:$4 sm:$0xff]  }
  0x19   : > { %2048 = vmatpush1.bf16.msra.mxu0 %v3838_v4  ;;  %3812 = vmatpush1.bf16.msra.mxu1 %v3838_v4  ;;  %v3881_v42 = vld [vmem:[%s4406_s28 + $0xa8] ss:$28 sps:$4 sm:$0xff]   ;;  %v3920_v47 = vld [vmem:[%s5535_s1 + $0x110] sm:$0xff]   ;;  %v3890_v49 = vld [vmem:[%s4406_s28 + $0xe0] ss:$28 sps:$4 sm:$0xff]  }
  0x1a   : > { %2049 = vmatprep.subr.bf16.mxu0 %v4348_v1  ;;  %3797 = vmatprep.subr.bf16.mxu1 %v4348_v1  ;;  %v3882_v43 = vld [vmem:[%s4406_s28 + $0x5e8] ss:$28 sps:$4 sm:$0xff]   ;;  %v3891_v51 = vld [vmem:[%s4406_s28 + $0x620] ss:$28 sps:$4 sm:$0xff]   ;;  %v3893_v56 = vld [vmem:[%s5535_s1 + $0xf0] sm:$0xff]  }
  0x1b   : > { %v3883_v44 = vld [vmem:[%s5535_s1 + $0x88] sm:$0xff]   ;;  %v3888_v46 = vld [vmem:[%s4406_s28 + $0x624] ss:$28 sps:$4 sm:$0xff]   ;;  %v3892_v52 = vld [vmem:[%s5535_s1 + $0xf8] sm:$0xff]  }
  0x1c   : > { %v3885_v48 = vld [vmem:[%s5535_s1 + $0x80] sm:$0xff]   ;;  %v3934_v50 = vld [vmem:[%s5535_s1 + $0x108] sm:$0xff]   ;;  %v3895_v53 = vld [vmem:[%s4406_s28 + $0x11c] ss:$28 sps:$4 sm:$0xff]  }
  0x1d   : > { %2050 = vmatpush1.bf16.msra.mxu0 %v3839_v5  ;;  %3813 = vmatpush1.bf16.msra.mxu1 %v3839_v5  ;;  %v3897_v54 = vld [vmem:[%s4406_s28 + $0x65c] ss:$28 sps:$4 sm:$0xff]   ;;  %v3941_v55 = vld [vmem:[%s5535_s1 + $0x100] sm:$0xff]   ;;  %v3901_v59 = vld [vmem:[%s5535_s1 + $0xe8] sm:$0xff]  }
  0x1e   : > { %2051 = vmatprep.subr.bf16.mxu0 %v4348_v1  ;;  %3798 = vmatprep.subr.bf16.mxu1 %v4348_v1  ;;  %v3899_v57 = vld [vmem:[%s4406_s28 + $0x118] ss:$28 sps:$4 sm:$0xff]   ;;  %v3902_v63 = vld [vmem:[%s5535_s1 + $0xe0] sm:$0xff]   ;;  %v3907_v0 = vld [vmem:[%s4406_s28 + $0x150] ss:$28 sps:$4 sm:$0xff]  }
  0x1f   : > { %v3900_v58 = vld [vmem:[%s4406_s28 + $0x658] ss:$28 sps:$4 sm:$0xff]   ;;  %v3908_v2 = vld [vmem:[%s4406_s28 + $0x690] ss:$28 sps:$4 sm:$0xff]  }
  0x20   : > { %v3903_v60 = vld [vmem:[%s4406_s28 + $0x154] ss:$28 sps:$4 sm:$0xff]   ;;  %v3955_v62 = vld [vmem:[%s5535_s1 + $0x178] sm:$0xff]   ;;  %v3912_v5 = vld [vmem:[%s4406_s28 + $0x18c] ss:$28 sps:$4 sm:$0xff]  }
  0x21   : > { %2052 = vmatpush1.bf16.msra.mxu0 %v3840_v7  ;;  %3814 = vmatpush1.bf16.msra.mxu1 %v3840_v7  ;;  %v3905_v61 = vld [vmem:[%s4406_s28 + $0x694] ss:$28 sps:$4 sm:$0xff]   ;;  %v3909_v4 = vld [vmem:[%s5535_s1 + $0xd8] sm:$0xff]   ;;  %v3914_v6 = vld [vmem:[%s4406_s28 + $0x6cc] ss:$28 sps:$4 sm:$0xff]  }
  0x22   : > { %2053 = vmatprep.subr.bf16.mxu0 %v4348_v1  ;;  %3799 = vmatprep.subr.bf16.mxu1 %v4348_v1  ;;  %v3962_v3 = vld [vmem:[%s5535_s1 + $0x170] sm:$0xff]   ;;  %v3975_v7 = vld [vmem:[%s5535_s1 + $0x168] sm:$0xff]  }
  0x23   : > { %v3911_v8 = vld [vmem:[%s5535_s1 + $0xd0] sm:$0xff]  }
  0x25   : > { %2054 = vmatpush1.bf16.msra.mxu0 %v3841_v9  ;;  %3815 = vmatpush1.bf16.msra.mxu1 %v3841_v9  ;;  %v3916_v9 = vld [vmem:[%s4406_s28 + $0x188] ss:$28 sps:$4 sm:$0xff]  }
  0x26   : > { %2055 = vmatprep.subr.bf16.mxu0 %v4348_v1  ;;  %3800 = vmatprep.subr.bf16.mxu1 %v4348_v1 }
  0x29   : > { %2056 = vmatpush1.bf16.msra.mxu0 %v3842_v10  ;;  %3816 = vmatpush1.bf16.msra.mxu1 %v3842_v10  ;;  %v3917_v10 = vld [vmem:[%s4406_s28 + $0x6c8] ss:$28 sps:$4 sm:$0xff]  }
  0x2a   : > { %2057 = vmatprep.subr.bf16.mxu0 %v4348_v1  ;;  %3801 = vmatprep.subr.bf16.mxu1 %v4348_v1 }
  0x2d   : > { %2058 = vmatpush2.bf16.msra.mxu0 %v3843_v11  ;;  %3817 = vmatpush2.bf16.msra.mxu1 %v3843_v11  ;;  %v3918_v11 = vld [vmem:[%s5535_s1 + $0xc8] sm:$0xff]  }
  0x2e   : > { %2059 = vmatprep.subr.bf16.mxu0 %v4348_v1  ;;  %3802 = vmatprep.subr.bf16.mxu1 %v4348_v1 }
  0x31   : > { %2060 = vmatpush2.bf16.msra.mxu0 %v3844_v12  ;;  %3818 = vmatpush2.bf16.msra.mxu1 %v3844_v12  ;;  %v3921_v12 = vld [vmem:[%s4406_s28 + $0x1c4] ss:$28 sps:$4 sm:$0xff]  }
  0x32   : > { %2061 = vmatprep.subr.bf16.mxu0 %v4348_v1  ;;  %3803 = vmatprep.subr.bf16.mxu1 %v4348_v1 }
  0x35   : > { %2062 = vmatpush2.bf16.msra.mxu0 %v3845_v13  ;;  %3819 = vmatpush2.bf16.msra.mxu1 %v3845_v13  ;;  %v3925_v13 = vld [vmem:[%s4406_s28 + $0xc] ss:$28 sps:$4 sm:$0xff]  }
  0x36   : > { %2063 = vmatprep.subr.bf16.mxu0 %v4348_v1  ;;  %3804 = vmatprep.subr.bf16.mxu1 %v4348_v1 }
  0x39   : > { %2064 = vmatpush2.bf16.msra.mxu0 %v3846_v14  ;;  %3820 = vmatpush2.bf16.msra.mxu1 %v3846_v14  ;;  %v3983_v14 = vld [vmem:[%s5535_s1 + $0x160] sm:$0xff]  }
  0x3a   : > { %2065 = vmatprep.subr.bf16.mxu0 %v4348_v1  ;;  %3805 = vmatprep.subr.bf16.mxu1 %v4348_v1 }
  0x3d   : > { %2066 = vmatpush2.bf16.msra.mxu0 %v3847_v15  ;;  %3821 = vmatpush2.bf16.msra.mxu1 %v3847_v15  ;;  %v3919_v15 = vld [vmem:[%s5535_s1 + $0xc0] sm:$0xff]  }
  0x3e   : > { %2067 = vmatprep.subr.bf16.mxu0 %v4348_v1  ;;  %3806 = vmatprep.subr.bf16.mxu1 %v4348_v1 }
  0x41   : > { %2068 = vmatpush2.bf16.msra.mxu0 %v3848_v16  ;;  %3822 = vmatpush2.bf16.msra.mxu1 %v3848_v16  ;;  %v3927_v16 = vld [vmem:[%s5535_s1 + $0x1b8] sm:$0xff]  }
  0x42   : > { %2069 = vmatprep.subr.bf16.mxu0 %v4348_v1  ;;  %3807 = vmatprep.subr.bf16.mxu1 %v4348_v1 }
  0x45   : > { %2070 = vmatpush2.bf16.msra.mxu0 %v3849_v17  ;;  %3823 = vmatpush2.bf16.msra.mxu1 %v3849_v17  ;;  %v3996_v17 = vld [vmem:[%s5535_s1 + $0x158] sm:$0xff]  }
  0x46   : > { %2071 = vmatprep.subr.bf16.mxu0 %v4348_v1  ;;  %3808 = vmatprep.subr.bf16.mxu1 %v4348_v1 }
  0x49   : > { %2072 = vmatpush2.bf16.msra.mxu0 %v3850_v18  ;;  %3824 = vmatpush2.bf16.msra.mxu1 %v3850_v18  ;;  %v3923_v18 = vld [vmem:[%s4406_s28 + $0x8] ss:$28 sps:$4 sm:$0xff]  }
  0x4a   : > { %2330 = vmatprep.subr.bf16.mxu1 %v4348_v1  ;;  %2619 = vmatprep.subr.bf16.mxu0 %v4348_v1 }
  0x4c   : > { %2074 = vmatmul.mubr.bf16.vlgmr.msra.gmra.mxu0 %v3851_v19  ;;  %2266 = vmatmul.mubr.bf16.vlgmr.msra.gmra.mxu1 %v3854_v20  ;;  %v3926_v19 = vld [vmem:[%s4406_s28 + $0x1c0] ss:$28 sps:$4 sm:$0xff]  }
  0x4d   : > { %2331 = vmatpush1.bf16.msra.mxu1 %v3857_v21  ;;  %2620 = vmatpush1.bf16.msra.mxu0 %v3858_v22  ;;  %v3928_v20 = vld [vmem:[%s4406_s28 + $0x1fc] ss:$28 sps:$4 sm:$0xff]   ;;  %v3930_v21 = vld [vmem:[%s4406_s28 + $0x44] ss:$28 sps:$4 sm:$0xff]   ;;  %v3954_v22 = vld [vmem:[%s5535_s1 + $0x1b0] sm:$0xff]  }
  0x4e   : > { %2332 = vmatprep.subr.bf16.mxu1 %v4348_v1  ;;  %2081 = vmatprep.mubr.bf16.mxu0 %v3860_v23  ;;  %v4003_v23 = vld [vmem:[%s5535_s1 + $0x150] sm:$0xff]  }
  0x4f   : > { %2273 = vmatprep.mubr.bf16.mxu1 %v3862_v24  ;;  %2621 = vmatprep.subr.bf16.mxu0 %v4348_v1  ;;  %v3982_v24 = vld [vmem:[%s5535_s1 + $0x1a8] sm:$0xff]  }
  0x51   : > { %2333 = vmatpush1.bf16.msra.mxu1 %v3859_v25  ;;  %2622 = vmatpush1.bf16.msra.mxu0 %v3868_v26  ;;  %v3932_v25 = vld [vmem:[%s4406_s28 + $0x1f8] ss:$28 sps:$4 sm:$0xff]   ;;  %v3933_v26 = vld [vmem:[%s4406_s28 + $0x40] ss:$28 sps:$4 sm:$0xff]  }
  0x52   : > { %2334 = vmatprep.subr.bf16.mxu1 %v4348_v1  ;;  %2623 = vmatprep.subr.bf16.mxu0 %v4348_v1 }
  0x54   : > { %2082 = vmatmul.mubr.bf16.gmra.mxu0 %v3864_v27  ;;  %2274 = vmatmul.mubr.bf16.gmra.mxu1 %v3865_v28  ;;  %v3935_v27 = vld [vmem:[%s4406_s28 + $0x234] ss:$28 sps:$4 sm:$0xff]   ;;  %v3937_v28 = vld [vmem:[%s4406_s28 + $0x7c] ss:$28 sps:$4 sm:$0xff]  }
  0x55   : > { %2335 = vmatpush1.bf16.msra.mxu1 %v3866_v29  ;;  %2089 = vmatprep.mubr.bf16.mxu0 %v3869_v30  ;;  %v4010_v29 = vld [vmem:[%s5535_s1 + $0x1a0] sm:$0xff]   ;;  %v4017_v30 = vld [vmem:[%s5535_s1 + $0x148] sm:$0xff]  }
  0x56   : > { %2336 = vmatprep.subr.bf16.mxu1 %v4348_v1  ;;  %2281 = vmatprep.mubr.bf16.mxu1 %v3871_v31  ;;  %v4024_v31 = vld [vmem:[%s5535_s1 + $0x140] sm:$0xff]  }
  0x57   : > { %2624 = vmatpush1.bf16.msra.mxu0 %v3884_v32  ;;  %v4037_v32 = vld [vmem:[%s5535_s1 + $0x198] sm:$0xff]  }
  0x58   : > { %2625 = vmatprep.subr.bf16.mxu0 %v4348_v1 }
  0x59   : > { %2337 = vmatpush1.bf16.msra.mxu1 %v3867_v33  ;;  %v3939_v33 = vld [vmem:[%s4406_s28 + $0x230] ss:$28 sps:$4 sm:$0xff]  }
  0x5a   : > { %2338 = vmatprep.subr.bf16.mxu1 %v4348_v1 }
  0x5b   : > { %2626 = vmatpush1.bf16.msra.mxu0 %v3894_v36  ;;  %v3944_v36 = vld [vmem:[%s4406_s28 + $0xb4] ss:$28 sps:$4 sm:$0xff]  }
  0x5c   : > { %2090 = vmatmul.mubr.bf16.gmra.mxu0 %v3873_v34  ;;  %2282 = vmatmul.mubr.bf16.gmra.mxu1 %v3874_v35  ;;  %v3940_v34 = vld [vmem:[%s4406_s28 + $0x78] ss:$28 sps:$4 sm:$0xff]   ;;  %v3942_v35 = vld [vmem:[%s4406_s28 + $0x26c] ss:$28 sps:$4 sm:$0xff]  }
  0x5d   : > { %2339 = vmatpush1.bf16.msra.mxu1 %v3875_v37  ;;  %2097 = vmatprep.mubr.bf16.mxu0 %v3877_v38  ;;  %v3946_v37 = vld [vmem:[%s4406_s28 + $0x268] ss:$28 sps:$4 sm:$0xff]   ;;  %v3947_v38 = vld [vmem:[%s4406_s28 + $0xb0] ss:$28 sps:$4 sm:$0xff]  }
  0x5e   : > { %2340 = vmatprep.subr.bf16.mxu1 %v4348_v1  ;;  %2289 = vmatprep.mubr.bf16.mxu1 %v3879_v39  ;;  %v3948_v39 = vld [vmem:[%s4406_s28 + $0x2a4] ss:$28 sps:$4 sm:$0xff]  }
  0x5f   : > { %2627 = vmatprep.subr.bf16.mxu0 %v4348_v1 }
  0x60   : > { %2628 = vmatpush1.bf16.msra.mxu0 %v3910_v40  ;;  %v3952_v40 = vld [vmem:[%s4406_s28 + $0x2a0] ss:$28 sps:$4 sm:$0xff]  }
  0x61   : > { %2341 = vmatpush1.bf16.msra.mxu1 %v3876_v41  ;;  %2629 = vmatprep.subr.bf16.mxu0 %v4348_v1  ;;  %v3953_v41 = vld [vmem:[%s4406_s28 + $0xe8] ss:$28 sps:$4 sm:$0xff]  }
  0x62   : > { %2342 = vmatprep.subr.bf16.mxu1 %v4348_v1 }
  0x64   : > { %2098 = vmatmul.mubr.bf16.gmra.mxu0 %v3881_v42  ;;  %2290 = vmatmul.mubr.bf16.gmra.mxu1 %v3882_v43  ;;  %v3956_v42 = vld [vmem:[%s4406_s28 + $0x2dc] ss:$28 sps:$4 sm:$0xff]   ;;  %v3958_v43 = vld [vmem:[%s4406_s28 + $0x124] ss:$28 sps:$4 sm:$0xff]  }
  0x65   : > { %2343 = vmatpush1.bf16.msra.mxu1 %v3883_v44  ;;  %2105 = vmatprep.mubr.bf16.mxu0 %v3886_v45  ;;  %v4062_v44 = vld [vmem:[%s5535_s1 + $0x190] sm:$0xff]  }
  0x66   : > { %2344 = vmatprep.subr.bf16.mxu1 %v4348_v1  ;;  %2297 = vmatprep.mubr.bf16.mxu1 %v3888_v46  ;;  %v3960_v45 = vld [vmem:[%s4406_s28 + $0x2d8] ss:$28 sps:$4 sm:$0xff]   ;;  %v3961_v46 = vld [vmem:[%s4406_s28 + $0x120] ss:$28 sps:$4 sm:$0xff]  }
  0x67   : > { %2630 = vmatpush1.bf16.msra.mxu0 %v3920_v47  ;;  %v3963_v47 = vld [vmem:[%s4406_s28 + $0x314] ss:$28 sps:$4 sm:$0xff]  }
  0x68   : > { %2631 = vmatprep.subr.bf16.mxu0 %v4348_v1 }
  0x69   : > { %2345 = vmatpush1.bf16.msra.mxu1 %v3885_v48  ;;  %v3965_v48 = vld [vmem:[%s4406_s28 + $0x15c] ss:$28 sps:$4 sm:$0xff]  }
  0x6a   : > { %2346 = vmatprep.subr.bf16.mxu1 %v4348_v1 }
  0x6b   : > { %2632 = vmatpush1.bf16.msra.mxu0 %v3934_v50  ;;  %v3968_v50 = vld [vmem:[%s4406_s28 + $0x158] ss:$28 sps:$4 sm:$0xff]  }
  0x6c   : > { %2106 = vmatmul.mubr.bf16.gmra.mxu0 %v3890_v49  ;;  %2298 = vmatmul.mubr.bf16.gmra.mxu1 %v3891_v51  ;;  %v3967_v49 = vld [vmem:[%s4406_s28 + $0x310] ss:$28 sps:$4 sm:$0xff]  }
  0x6d   : > { %2347 = vmatpush2.bf16.msra.mxu1 %v3892_v52  ;;  %2113 = vmatprep.mubr.bf16.mxu0 %v3895_v53  ;;  %v3969_v51 = vld [vmem:[%s4406_s28 + $0x34c] ss:$28 sps:$4 sm:$0xff]   ;;  %v3971_v52 = vld [vmem:[%s4406_s28 + $0x194] ss:$28 sps:$4 sm:$0xff]  }
  0x6e   : > { %2348 = vmatprep.subr.bf16.mxu1 %v4348_v1  ;;  %2305 = vmatprep.mubr.bf16.mxu1 %v3897_v54  ;;  %v3973_v53 = vld [vmem:[%s4406_s28 + $0x348] ss:$28 sps:$4 sm:$0xff]   ;;  %v3974_v54 = vld [vmem:[%s4406_s28 + $0x190] ss:$28 sps:$4 sm:$0xff]  }
  0x6f   : > { %2633 = vmatprep.subr.bf16.mxu0 %v4348_v1 }
  0x70   : > { %2634 = vmatpush1.bf16.msra.mxu0 %v3941_v55  ;;  %v3976_v55 = vld [vmem:[%s4406_s28 + $0x384] ss:$28 sps:$4 sm:$0xff]  }
  0x71   : > { %2349 = vmatpush2.bf16.msra.mxu1 %v3893_v56  ;;  %2635 = vmatprep.subr.bf16.mxu0 %v4348_v1  ;;  %v3978_v56 = vld [vmem:[%s4406_s28 + $0x1cc] ss:$28 sps:$4 sm:$0xff]  }
  0x72   : > { %2350 = vmatprep.subr.bf16.mxu1 %v4348_v1 }
  0x74   : > { %2114 = vmatmul.mubr.bf16.gmra.mxu0 %v3899_v57  ;;  %2306 = vmatmul.mubr.bf16.gmra.mxu1 %v3900_v58  ;;  %v3980_v57 = vld [vmem:[%s4406_s28 + $0x380] ss:$28 sps:$4 sm:$0xff]   ;;  %v3981_v58 = vld [vmem:[%s4406_s28 + $0x1c8] ss:$28 sps:$4 sm:$0xff]  }
  0x75   : > { %2351 = vmatpush2.bf16.msra.mxu1 %v3901_v59  ;;  %2121 = vmatprep.mubr.bf16.mxu0 %v3903_v60  ;;  %v3984_v59 = vld [vmem:[%s4406_s28 + $0x3bc] ss:$28 sps:$4 sm:$0xff]   ;;  %v3986_v60 = vld [vmem:[%s4406_s28 + $0x204] ss:$28 sps:$4 sm:$0xff]  }
  0x76   : > { %2352 = vmatprep.subr.bf16.mxu1 %v4348_v1  ;;  %2313 = vmatprep.mubr.bf16.mxu1 %v3905_v61  ;;  %v4087_v61 = vld [vmem:[%s5535_s1 + $0x188] sm:$0xff]  }
  0x77   : > { %2636 = vmatpush2.bf16.msra.mxu0 %v3955_v62  ;;  %v3988_v62 = vld [vmem:[%s4406_s28 + $0x3b8] ss:$28 sps:$4 sm:$0xff]  }
  0x78   : > { %2637 = vmatprep.subr.bf16.mxu0 %v4348_v1 }
  0x79   : > { %2353 = vmatpush2.bf16.msra.mxu1 %v3902_v63  ;;  %v3989_v63 = vld [vmem:[%s4406_s28 + $0x200] ss:$28 sps:$4 sm:$0xff]  }
  0x7a   : > { %2354 = vmatprep.subr.bf16.mxu1 %v4348_v1 }
  0x7b   : > { %2638 = vmatpush2.bf16.msra.mxu0 %v3962_v3  ;;  %v3994_v3 = vld [vmem:[%s4406_s28 + $0x3f0] ss:$28 sps:$4 sm:$0xff]  }
  0x7c   : > { %2122 = vmatmul.mubr.bf16.gmra.mxu0 %v3907_v0  ;;  %2314 = vmatmul.mubr.bf16.gmra.mxu1 %v3908_v2  ;;  %v3990_v0 = vld [vmem:[%s4406_s28 + $0x3f4] ss:$28 sps:$4 sm:$0xff]   ;;  %v3992_v2 = vld [vmem:[%s4406_s28 + $0x23c] ss:$28 sps:$4 sm:$0xff]  }
  0x7d   : > { %2355 = vmatpush2.bf16.msra.mxu1 %v3909_v4  ;;  %2129 = vmatprep.mubr.bf16.mxu0 %v3912_v5  ;;  %v3995_v4 = vld [vmem:[%s4406_s28 + $0x238] ss:$28 sps:$4 sm:$0xff]   ;;  %v3997_v5 = vld [vmem:[%s4406_s28 + $0x42c] ss:$28 sps:$4 sm:$0xff]  }
  0x7e   : > { %2356 = vmatprep.subr.bf16.mxu1 %v4348_v1  ;;  %2321 = vmatprep.mubr.bf16.mxu1 %v3914_v6  ;;  %v3999_v6 = vld [vmem:[%s4406_s28 + $0x274] ss:$28 sps:$4 sm:$0xff]  }
  0x7f   : > { %2639 = vmatprep.subr.bf16.mxu0 %v4348_v1 }
  0x80   : > { %2640 = vmatpush2.bf16.msra.mxu0 %v3975_v7  ;;  %v4001_v7 = vld [vmem:[%s4406_s28 + $0x428] ss:$28 sps:$4 sm:$0xff]  }
  0x81   : > { %2357 = vmatpush2.bf16.msra.mxu1 %v3911_v8  ;;  %2641 = vmatprep.subr.bf16.mxu0 %v4348_v1  ;;  %v4002_v8 = vld [vmem:[%s4406_s28 + $0x270] ss:$28 sps:$4 sm:$0xff]  }
  0x82   : > { %2358 = vmatprep.subr.bf16.mxu1 %v4348_v1 }
  0x84   : > { %2130 = vmatmul.mubr.bf16.gmra.mxu0 %v3916_v9  ;;  %2322 = vmatmul.mubr.bf16.gmra.mxu1 %v3917_v10  ;;  %v4004_v9 = vld [vmem:[%s4406_s28 + $0x464] ss:$28 sps:$4 sm:$0xff]   ;;  %v4006_v10 = vld [vmem:[%s4406_s28 + $0x2ac] ss:$28 sps:$4 sm:$0xff]  }
  0x85   : > { %2359 = vmatpush2.bf16.msra.mxu1 %v3918_v11  ;;  %2137 = vmatprep.mubr.bf16.mxu0 %v3921_v12  ;;  %v4008_v11 = vld [vmem:[%s4406_s28 + $0x460] ss:$28 sps:$4 sm:$0xff]   ;;  %v4009_v12 = vld [vmem:[%s4406_s28 + $0x2a8] ss:$28 sps:$4 sm:$0xff]  }
  0x86   : > { %2360 = vmatprep.subr.bf16.mxu1 %v4348_v1  ;;  %2362 = vmatprep.mubr.bf16.mxu1 %v3925_v13  ;;  %v4011_v13 = vld [vmem:[%s4406_s28 + $0x49c] ss:$28 sps:$4 sm:$0xff]  }
  0x87   : > { %2642 = vmatpush2.bf16.msra.mxu0 %v3983_v14  ;;  %v4013_v14 = vld [vmem:[%s4406_s28 + $0x2e4] ss:$28 sps:$4 sm:$0xff]  }
  0x88   : > { %2643 = vmatprep.subr.bf16.mxu0 %v4348_v1 }
  0x89   : > { %2361 = vmatpush2.bf16.msra.mxu1 %v3919_v15  ;;  %v4112_v15 = vld [vmem:[%s5535_s1 + $0x180] sm:$0xff]  }
  0x8a   : > { %3713 = vmatprep.subr.bf16.mxu1 %v3927_v16 }
  0x8b   : > { %2644 = vmatpush2.bf16.msra.mxu0 %v3996_v17  ;;  %v4016_v17 = vld [vmem:[%s4406_s28 + $0x2e0] ss:$28 sps:$4 sm:$0xff]  }
  0x8c   : > { %2138 = vmatmul.mubr.bf16.gmra.mxu0 %v3926_v19  ;;  %2363 = vmatmul.mubr.bf16.vlgmr.msra.gmra.mxu1 %v3923_v18  ;;  %v4018_v18 = vld [vmem:[%s4406_s28 + $0x4d4] ss:$28 sps:$4 sm:$0xff]   ;;  %v4020_v19 = vld [vmem:[%s4406_s28 + $0x31c] ss:$28 sps:$4 sm:$0xff]  }
  0x8d   : > { %3714 = vmatpush3.bf16.msra.mxu1 %v3927_v16  ;;  %2145 = vmatprep.mubr.bf16.mxu0 %v3928_v20  ;;  %v4015_v16 = vld [vmem:[%s4406_s28 + $0x498] ss:$28 sps:$4 sm:$0xff]   ;;  %v4022_v20 = vld [vmem:[%s4406_s28 + $0x4d0] ss:$28 sps:$4 sm:$0xff]  }
  0x8e   : > { %2370 = vmatprep.mubr.bf16.mxu1 %v3930_v21  ;;  %3715 = vmatprep.subr.bf16.mxu1 %v3954_v22  ;;  %v4023_v21 = vld [vmem:[%s4406_s28 + $0x318] ss:$28 sps:$4 sm:$0xff]  }
  0x8f   : > { %2645 = vmatprep.subr.bf16.mxu0 %v4348_v1 }
  0x90   : > { %2646 = vmatpush2.bf16.msra.mxu0 %v4003_v23  ;;  %v4027_v23 = vld [vmem:[%s4406_s28 + $0x354] ss:$28 sps:$4 sm:$0xff]  }
  0x91   : > { %3716 = vmatpush3.bf16.msra.mxu1 %v3954_v22  ;;  %2647 = vmatprep.subr.bf16.mxu0 %v4348_v1  ;;  %v4025_v22 = vld [vmem:[%s4406_s28 + $0x50c] ss:$28 sps:$4 sm:$0xff]  }
  0x92   : > { %3717 = vmatprep.subr.bf16.mxu1 %v3982_v24 }
  0x94   : > { %2146 = vmatmul.mubr.bf16.gmra.mxu0 %v3932_v25  ;;  %2371 = vmatmul.mubr.bf16.gmra.mxu1 %v3933_v26  ;;  %v4030_v25 = vld [vmem:[%s4406_s28 + $0x350] ss:$28 sps:$4 sm:$0xff]  }
  0x95   : > { %2153 = vmatprep.mubr.bf16.mxu0 %v3935_v27  ;;  %2378 = vmatprep.mubr.bf16.mxu1 %v3937_v28  ;;  %v4031_v26 = vld [vmem:[%s4406_s28 + $0x38c] ss:$28 sps:$4 sm:$0xff]   ;;  %v4035_v27 = vld [vmem:[%s4406_s28 + $0x14] ss:$28 sps:$4 sm:$0xff]  }
  0x96   : > { %3718 = vmatpush3.bf16.msra.mxu1 %v3982_v24  ;;  %2648 = vmatpush2.bf16.msra.mxu0 %v4017_v30  ;;  %v4029_v24 = vld [vmem:[%s4406_s28 + $0x508] ss:$28 sps:$4 sm:$0xff]   ;;  %v4033_v28 = vld [vmem:[%s4406_s28 + $0x10] ss:$28 sps:$4 sm:$0xff]  }
  0x97   : > { %3719 = vmatprep.subr.bf16.mxu1 %v4010_v29  ;;  %2649 = vmatprep.subr.bf16.mxu0 %v4348_v1  ;;  %v3950_v1 = vld [vmem:[%s4406_s28 + $0xec] ss:$28 sps:$4 sm:$0xff]   ;;  %v4038_v30 = vld [vmem:[%s4406_s28 + $0x3c4] ss:$28 sps:$4 sm:$0xff]  }
  0x9a   : > { %3720 = vmatpush3.bf16.msra.mxu1 %v4010_v29  ;;  %2650 = vmatpush2.bf16.msra.mxu0 %v4024_v31  ;;  %v4036_v29 = vld [vmem:[%s4406_s28 + $0x388] ss:$28 sps:$4 sm:$0xff]  }
  0x9b   : > { %3721 = vmatprep.subr.bf16.mxu1 %v4037_v32  ;;  %v4040_v31 = vld [vmem:[%s4406_s28 + $0x4c] ss:$28 sps:$4 sm:$0xff]  }
  0x9c   : > { %2154 = vmatmul.mubr.bf16.gmra.mxu0 %v3939_v33  ;;  %2379 = vmatmul.mubr.bf16.gmra.mxu1 %v3940_v34 }
  0x9d   : > { %2161 = vmatprep.mubr.bf16.mxu0 %v3942_v35  ;;  %2386 = vmatprep.mubr.bf16.mxu1 %v3944_v36 }
  0x9e   : > { %3722 = vmatpush3.bf16.msra.mxu1 %v4037_v32 }
  0x9f   : > { %3723 = vmatprep.subr.bf16.mxu1 %v4062_v44 }
  0xa2   : > { %3724 = vmatpush3.bf16.msra.mxu1 %v4062_v44 }
  0xa3   : > { %3725 = vmatprep.subr.bf16.mxu1 %v4087_v61 }
  0xa4   : > { %2162 = vmatmul.mubr.bf16.gmra.mxu0 %v3946_v37  ;;  %2387 = vmatmul.mubr.bf16.gmra.mxu1 %v3947_v38  ;;  %v4042_v38 = vld [vmem:[%s4406_s28 + $0x3c0] ss:$28 sps:$4 sm:$0xff]  }
  0xa5   : > { %2169 = vmatprep.mubr.bf16.mxu0 %v3948_v39  ;;  %2394 = vmatprep.mubr.bf16.mxu1 %v3950_v1  ;;  %v4043_v39 = vld [vmem:[%s4406_s28 + $0x48] ss:$28 sps:$4 sm:$0xff]   ;;  %v4044_v1 = vld [vmem:[%s4406_s28 + $0x3fc] ss:$28 sps:$4 sm:$0xff]  }
  0xa6   : > { %3726 = vmatpush3.bf16.msra.mxu1 %v4087_v61  ;;  %v4054_v61 = vld [vmem:[%s4406_s28 + $0x430] ss:$28 sps:$4 sm:$0xff]  }
  0xa7   : > { %3727 = vmatprep.subr.bf16.mxu1 %v4112_v15 }
  0xaa   : > { %3728 = vmatpush3.bf16.msra.mxu1 %v4112_v15 }
  0xac   : > { %2170 = vmatmul.mubr.bf16.gmra.mxu0 %v3952_v40  ;;  %2395 = vmatmul.mubr.bf16.gmra.mxu1 %v3953_v41  ;;  %v4046_v40 = vld [vmem:[%s4406_s28 + $0x84] ss:$28 sps:$4 sm:$0xff]  }
  0xad   : > { %2177 = vmatprep.mubr.bf16.mxu0 %v3956_v42  ;;  %2402 = vmatprep.mubr.bf16.mxu1 %v3958_v43 }
  0xb4   : > { %2178 = vmatmul.mubr.bf16.gmra.mxu0 %v3960_v45  ;;  %2403 = vmatmul.mubr.bf16.gmra.mxu1 %v3961_v46 }
  0xb5   : > { %2185 = vmatprep.mubr.bf16.mxu0 %v3963_v47  ;;  %2410 = vmatprep.mubr.bf16.mxu1 %v3965_v48 }
  0xbc   : > { %2186 = vmatmul.mubr.bf16.gmra.mxu0 %v3967_v49  ;;  %2411 = vmatmul.mubr.bf16.gmra.mxu1 %v3968_v50  ;;  %v4048_v49 = vld [vmem:[%s4406_s28 + $0x3f8] ss:$28 sps:$4 sm:$0xff]   ;;  %v4049_v50 = vld [vmem:[%s4406_s28 + $0x80] ss:$28 sps:$4 sm:$0xff]  }
  0xbd   : > { %2193 = vmatprep.mubr.bf16.mxu0 %v3969_v51  ;;  %2418 = vmatprep.mubr.bf16.mxu1 %v3971_v52  ;;  %v4050_v51 = vld [vmem:[%s4406_s28 + $0x434] ss:$28 sps:$4 sm:$0xff]   ;;  %v4052_v52 = vld [vmem:[%s4406_s28 + $0xbc] ss:$28 sps:$4 sm:$0xff]  }
  0xc4   : > { %2194 = vmatmul.mubr.bf16.gmra.mxu0 %v3973_v53  ;;  %2419 = vmatmul.mubr.bf16.gmra.mxu1 %v3974_v54 }
  0xc5   : > { %2201 = vmatprep.mubr.bf16.mxu0 %v3976_v55  ;;  %2426 = vmatprep.mubr.bf16.mxu1 %v3978_v56 }
  0xcc   : > { %2202 = vmatmul.mubr.bf16.gmra.mxu0 %v3980_v57  ;;  %2427 = vmatmul.mubr.bf16.gmra.mxu1 %v3981_v58 }
  0xcd   : > { %2209 = vmatprep.mubr.bf16.mxu0 %v3984_v59  ;;  %2434 = vmatprep.mubr.bf16.mxu1 %v3986_v60 }
  0xd4   : > { %2210 = vmatmul.mubr.bf16.gmra.mxu0 %v3988_v62  ;;  %2435 = vmatmul.mubr.bf16.gmra.mxu1 %v3989_v63  ;;  %v4055_v62 = vld [vmem:[%s4406_s28 + $0xb8] ss:$28 sps:$4 sm:$0xff]   ;;  %v4058_v63 = vld [vmem:[%s4406_s28 + $0x46c] ss:$28 sps:$4 sm:$0xff]  }
  0xd5   : > { %2217 = vmatprep.mubr.bf16.mxu0 %v3990_v0  ;;  %2442 = vmatprep.mubr.bf16.mxu1 %v3992_v2  ;;  %v4061_v0 = vld [vmem:[%s4406_s28 + $0xf4] ss:$28 sps:$4 sm:$0xff]  }
  0xdc   : > { %2218 = vmatmul.mubr.bf16.gmra.mxu0 %v3994_v3  ;;  %2443 = vmatmul.mubr.bf16.gmra.mxu1 %v3995_v4 }
  0xdd   : > { %2225 = vmatprep.mubr.bf16.mxu0 %v3997_v5  ;;  %2450 = vmatprep.mubr.bf16.mxu1 %v3999_v6 }
  0xe4   : > { %2226 = vmatmul.mubr.bf16.gmra.mxu0 %v4001_v7  ;;  %2451 = vmatmul.mubr.bf16.gmra.mxu1 %v4002_v8 }
  0xe5   : > { %2233 = vmatprep.mubr.bf16.mxu0 %v4004_v9  ;;  %2458 = vmatprep.mubr.bf16.mxu1 %v4006_v10  ;;  %v4056_v10 = vld [vmem:[%s4406_s28 + $0x468] ss:$28 sps:$4 sm:$0xff]  }
  0xec   : > { %2234 = vmatmul.mubr.bf16.gmra.mxu0 %v4008_v11  ;;  %2459 = vmatmul.mubr.bf16.gmra.mxu1 %v4009_v12  ;;  %v4059_v11 = vld [vmem:[%s4406_s28 + $0xf0] ss:$28 sps:$4 sm:$0xff]   ;;  %v4065_v12 = vld [vmem:[%s4406_s28 + $0x4a4] ss:$28 sps:$4 sm:$0xff]  }
  0xed   : > { %2241 = vmatprep.mubr.bf16.mxu0 %v4011_v13  ;;  %2466 = vmatprep.mubr.bf16.mxu1 %v4013_v14  ;;  %v4068_v13 = vld [vmem:[%s4406_s28 + $0x12c] ss:$28 sps:$4 sm:$0xff]  }
  0xf4   : > { %2242 = vmatmul.mubr.bf16.gmra.mxu0 %v4015_v16  ;;  %2467 = vmatmul.mubr.bf16.gmra.mxu1 %v4016_v17 }
  0xf5   : > { %2249 = vmatprep.mubr.bf16.mxu0 %v4018_v18  ;;  %2474 = vmatprep.mubr.bf16.mxu1 %v4020_v19 }
  0xfc   : > { %2250 = vmatmul.mubr.bf16.gmra.mxu0 %v4022_v20  ;;  %2475 = vmatmul.mubr.bf16.gmra.mxu1 %v4023_v21 }
  0xfd   : > { %2257 = vmatprep.mubr.bf16.mxu0 %v4025_v22  ;;  %2482 = vmatprep.mubr.bf16.mxu1 %v4027_v23  ;;  %v4063_v22 = vld [vmem:[%s4406_s28 + $0x4a0] ss:$28 sps:$4 sm:$0xff]   ;;  %v4066_v23 = vld [vmem:[%s4406_s28 + $0x128] ss:$28 sps:$4 sm:$0xff]  }
 0x104   : > { %2258 = vmatmul.mubr.bf16.gmra.mxu0 %v4029_v24  ;;  %2483 = vmatmul.mubr.bf16.gmra.mxu1 %v4030_v25  ;;  %v4071_v24 = vld [vmem:[%s4406_s28 + $0x4dc] ss:$28 sps:$4 sm:$0xff]   ;;  %v4074_v25 = vld [vmem:[%s4406_s28 + $0x164] ss:$28 sps:$4 sm:$0xff]  }
 0x105   : > { %2490 = vmatprep.mubr.bf16.mxu1 %v4031_v26  ;;  %2651 = vmatprep.mubr.bf16.mxu0 %v4035_v27 }
 0x10c   : > { %v4719_v32 = vpop.f32.mrf.mxu0  ;;  %v4721_v33 = vpop.f32.mrf.mxu1  ;;  %2491 = vmatmul.mubr.bf16.gmra.mxu1 %v4036_v29  ;;  %2652 = vmatmul.mubr.bf16.vlgmr.msra.gmra.mxu0 %v4033_v28 }
 0x10d   : > { %2498 = vmatprep.mubr.bf16.mxu1 %v4038_v30  ;;  %2659 = vmatprep.mubr.bf16.mxu0 %v4040_v31 }
 0x10e   : > { %v2077_v34 = vpop.f32.mrf.mxu0  ;;  %v2269_v35 = vpop.f32.mrf.mxu1 }
 0x110   : > { %v4723_v36 = vpop.f32.mrf.mxu0  ;;  %v4725_v37 = vpop.f32.mrf.mxu1 }
 0x112   : > { %v2080_v41 = vpop.f32.mrf.mxu0  ;;  %v2272_v42 = vpop.f32.mrf.mxu1 }
 0x114   : > { %v4731_v43 = vpop.f32.mrf.mxu0  ;;  %v4733_v44 = vpop.f32.mrf.mxu1  ;;  %2499 = vmatmul.mubr.bf16.gmra.mxu1 %v4042_v38  ;;  %2660 = vmatmul.mubr.bf16.gmra.mxu0 %v4043_v39  ;;  %v4069_v38 = vld [vmem:[%s4406_s28 + $0x4d8] ss:$28 sps:$4 sm:$0xff]   ;;  %v4072_v39 = vld [vmem:[%s4406_s28 + $0x160] ss:$28 sps:$4 sm:$0xff]  }
 0x115   : > { %2506 = vmatprep.mubr.bf16.mxu1 %v4044_v1  ;;  %2667 = vmatprep.mubr.bf16.mxu0 %v4046_v40  ;;  %v4077_v1 = vld [vmem:[%s4406_s28 + $0x514] ss:$28 sps:$4 sm:$0xff]   ;;  %v4080_v40 = vld [vmem:[%s4406_s28 + $0x19c] ss:$28 sps:$4 sm:$0xff]  }
 0x116   : > { %v2085_v45 = vpop.f32.mrf.mxu0  ;;  %v2277_v46 = vpop.f32.mrf.mxu1 }
 0x118   : > { %v4735_v47 = vpop.f32.mrf.mxu0  ;;  %v4737_v48 = vpop.f32.mrf.mxu1 }
 0x11a   : > { %v2088_v53 = vpop.f32.mrf.mxu0  ;;  %v2280_v54 = vpop.f32.mrf.mxu1 }
 0x11b   : > { %v4075_v53 = vld [vmem:[%s4406_s28 + $0x510] ss:$28 sps:$4 sm:$0xff]   ;;  %v4078_v54 = vld [vmem:[%s4406_s28 + $0x198] ss:$28 sps:$4 sm:$0xff]  }
 0x11c   : > { %v4743_v55 = vpop.f32.mrf.mxu0  ;;  %v4745_v56 = vpop.f32.mrf.mxu1  ;;  %2507 = vmatmul.mubr.bf16.gmra.mxu1 %v4048_v49  ;;  %2668 = vmatmul.mubr.bf16.gmra.mxu0 %v4049_v50 }
 0x11d   : > { %2514 = vmatprep.mubr.bf16.mxu1 %v4050_v51  ;;  %2675 = vmatprep.mubr.bf16.mxu0 %v4052_v52 }
 0x11e   : > { %v2093_v57 = vpop.f32.mrf.mxu0  ;;  %v2285_v58 = vpop.f32.mrf.mxu1 }
 0x11f   : > { %v4083_v57 = vld [vmem:[%s4406_s28 + $0x54c] ss:$28 sps:$4 sm:$0xff]   ;;  %v4086_v58 = vld [vmem:[%s4406_s28 + $0x1d4] ss:$28 sps:$4 sm:$0xff]  }
 0x120   : > { %v4747_v59 = vpop.f32.mrf.mxu0  ;;  %v4749_v60 = vpop.f32.mrf.mxu1 }
 0x122   : > { %v2096_v2 = vpop.f32.mrf.mxu0  ;;  %v2288_v3 = vpop.f32.mrf.mxu1 }
 0x124   : > { %v4755_v4 = vpop.f32.mrf.mxu0  ;;  %v4757_v5 = vpop.f32.mrf.mxu1  ;;  %2515 = vmatmul.mubr.bf16.gmra.mxu1 %v4054_v61  ;;  %2676 = vmatmul.mubr.bf16.gmra.mxu0 %v4055_v62 }
 0x125   : > { %2522 = vmatprep.mubr.bf16.mxu1 %v4058_v63  ;;  %2683 = vmatprep.mubr.bf16.mxu0 %v4061_v0 }
 0x126   : > { %v2101_v6 = vpop.f32.mrf.mxu0  ;;  %v2293_v7 = vpop.f32.mrf.mxu1 }
 0x127   : > { %v4810_v6 = vld [vmem:[%s5536_s2] ss:$0 sm:$0xff] }
 0x128   : > { %v4759_v8 = vpop.f32.mrf.mxu0  ;;  %v4761_v9 = vpop.f32.mrf.mxu1 }
 0x129   : > { %5538 = vst [vmem:[#allocation2_spill] sm:$0xff] %v4761_v9  ;;  %v4164_v9 = vld [vmem:[%s4406_s28 + $0x2b8] ss:$28 sps:$4 sm:$0xff]  }
 0x12a   : > { %v2104_v14 = vpop.f32.mrf.mxu0  ;;  %v2296_v15 = vpop.f32.mrf.mxu1 }
 0x12b   : > { %v4093_v14 = vld [vmem:[%s4406_s28 + $0x20c] ss:$28 sps:$4 sm:$0xff]  }
 0x12c   : > { %v4767_v16 = vpop.f32.mrf.mxu0  ;;  %v4769_v17 = vpop.f32.mrf.mxu1  ;;  %2523 = vmatmul.mubr.bf16.gmra.mxu1 %v4056_v10  ;;  %2684 = vmatmul.mubr.bf16.gmra.mxu0 %v4059_v11  ;;  %v4081_v11 = vld [vmem:[%s4406_s28 + $0x548] ss:$28 sps:$4 sm:$0xff]  }
 0x12d   : > { %5539 = vst [vmem:[#allocation3_spill] sm:$0xff] %v4769_v17  ;;  %2530 = vmatprep.mubr.bf16.mxu1 %v4065_v12  ;;  %2691 = vmatprep.mubr.bf16.mxu0 %v4068_v13  ;;  %v4084_v12 = vld [vmem:[%s4406_s28 + $0x1d0] ss:$28 sps:$4 sm:$0xff]   ;;  %v4090_v13 = vld [vmem:[%s4406_s28 + $0x584] ss:$28 sps:$4 sm:$0xff]  }
 0x12e   : > { %v2109_v18 = vpop.f32.mrf.mxu0  ;;  %v2301_v19 = vpop.f32.mrf.mxu1  ;;  %v4159_v17 = vld [vmem:[%s4406_s28 + $0x248] ss:$28 sps:$4 sm:$0xff]  }
 0x12f   : > { %v2076_v19 = vadd.f32 %v4810_v6, %v4719_v32  ;;  %v4088_v32 = vld [vmem:[%s4406_s28 + $0x580] ss:$28 sps:$4 sm:$0xff]  }
 0x130   : > { %v4771_v20 = vpop.f32.mrf.mxu0  ;;  %v4773_v21 = vpop.f32.mrf.mxu1 }
 0x131   : > { %5540 = vst [vmem:[#allocation4_spill] sm:$0xff] %v4773_v21  ;;  %v4158_v21 = vld [vmem:[%s4406_s28 + $0x4ac] ss:$28 sps:$4 sm:$0xff]  }
 0x132   : > { %v2112_v26 = vpop.f32.mrf.mxu0  ;;  %v2304_v27 = vpop.f32.mrf.mxu1 }
 0x133   : > { %v2079_v27 = vadd.f32 %v4810_v6, %v4723_v36 }
 0x134   : > { %v4779_v28 = vpop.f32.mrf.mxu0  ;;  %v4781_v29 = vpop.f32.mrf.mxu1  ;;  %2531 = vmatmul.mubr.bf16.gmra.mxu1 %v4063_v22  ;;  %2692 = vmatmul.mubr.bf16.gmra.mxu0 %v4066_v23 }
 0x135   : > { %5541 = vst [vmem:[#allocation5_spill] sm:$0xff] %v4781_v29  ;;  %2538 = vmatprep.mubr.bf16.mxu1 %v4071_v24  ;;  %2699 = vmatprep.mubr.bf16.mxu0 %v4074_v25  ;;  %v4154_v29 = vld [vmem:[%s4406_s28 + $0x1d8] ss:$28 sps:$4 sm:$0xff]  }
 0x136   : > { %v2117_v30 = vpop.f32.mrf.mxu0  ;;  %v2309_v31 = vpop.f32.mrf.mxu1 }
 0x138   : > { %v4783_v34 = vpop.f32.mrf.mxu0  ;;  %v4785_v35 = vpop.f32.mrf.mxu1 }
 0x139   : > { %5542 = vst [vmem:[#allocation6_spill] sm:$0xff] %v4785_v35  ;;  %v4153_v35 = vld [vmem:[%s4406_s28 + $0x474] ss:$28 sps:$4 sm:$0xff]  }
 0x13a   : > { %v2120_v41 = vpop.f32.mrf.mxu0  ;;  %v2312_v42 = vpop.f32.mrf.mxu1 }
 0x13c   : > { %v4791_v45 = vpop.f32.mrf.mxu0  ;;  %v4793_v46 = vpop.f32.mrf.mxu1  ;;  %2539 = vmatmul.mubr.bf16.gmra.mxu1 %v4069_v38  ;;  %2700 = vmatmul.mubr.bf16.gmra.mxu0 %v4072_v39  ;;  %v4091_v38 = vld [vmem:[%s4406_s28 + $0x208] ss:$28 sps:$4 sm:$0xff]  }
 0x13d   : > { %5543 = vst [vmem:[#allocation7_spill] sm:$0xff] %v4793_v46  ;;  %2546 = vmatprep.mubr.bf16.mxu1 %v4077_v1  ;;  %2707 = vmatprep.mubr.bf16.mxu0 %v4080_v40  ;;  %v4096_v1 = vld [vmem:[%s4406_s28 + $0x5bc] ss:$28 sps:$4 sm:$0xff]   ;;  %v4099_v40 = vld [vmem:[%s4406_s28 + $0x244] ss:$28 sps:$4 sm:$0xff]  }
 0x13e   : > { %v2125_v49 = vpop.f32.mrf.mxu0  ;;  %v2317_v50 = vpop.f32.mrf.mxu1  ;;  %v4149_v46 = vld [vmem:[%s4406_s28 + $0x168] ss:$28 sps:$4 sm:$0xff]  }
 0x13f   : > { %v2084_v49 = vadd.f32 %v4810_v6, %v4731_v43  ;;  %v4094_v43 = vld [vmem:[%s4406_s28 + $0x5b8] ss:$28 sps:$4 sm:$0xff]  }
 0x140   : > { %v4795_v51 = vpop.f32.mrf.mxu0  ;;  %v4797_v52 = vpop.f32.mrf.mxu1 }
 0x141   : > { %5544 = vst [vmem:[#allocation8_spill] sm:$0xff] %v4797_v52  ;;  %v4148_v52 = vld [vmem:[%s4406_s28 + $0x43c] ss:$28 sps:$4 sm:$0xff]  }
 0x142   : > { %v2128_v61 = vpop.f32.mrf.mxu0  ;;  %v2320_v62 = vpop.f32.mrf.mxu1 }
 0x144   : > { %v4803_v63 = vpop.f32.mrf.mxu0  ;;  %v4805_v0 = vpop.f32.mrf.mxu1  ;;  %2547 = vmatmul.mubr.bf16.gmra.mxu1 %v4075_v53  ;;  %2708 = vmatmul.mubr.bf16.gmra.mxu0 %v4078_v54 }
 0x145   : > { %5545 = vst [vmem:[#allocation9_spill] sm:$0xff] %v4805_v0  ;;  %2554 = vmatprep.mubr.bf16.mxu1 %v4083_v57  ;;  %2715 = vmatprep.mubr.bf16.mxu0 %v4086_v58  ;;  %v2087_v58 = vadd.f32 %v4810_v6, %v4735_v47  ;;  %v4144_v0 = vld [vmem:[%s4406_s28 + $0xf8] ss:$28 sps:$4 sm:$0xff]  }
 0x146   : > { %v2133_v2 = vpop.f32.mrf.mxu0  ;;  %v2325_v3 = vpop.f32.mrf.mxu1 }
 0x147   : > { %v4097_v2 = vld [vmem:[%s4406_s28 + $0x240] ss:$28 sps:$4 sm:$0xff]  }
 0x148   : > { %v4812_v7 = vpop.f32.mrf.mxu0  ;;  %v4814_v10 = vpop.f32.mrf.mxu1 }
 0x149   : > { %5546 = vst [vmem:[#allocation10_spill] sm:$0xff] %v4814_v10  ;;  %v4143_v10 = vld [vmem:[%s4406_s28 + $0x404] ss:$28 sps:$4 sm:$0xff]  }
 0x14a   : > { %v2136_v15 = vpop.f32.mrf.mxu0  ;;  %v2328_v18 = vpop.f32.mrf.mxu1 }
 0x14b   : > { %v2092_v15 = vadd.f32 %v4810_v6, %v4743_v55  ;;  %v4100_v55 = vld [vmem:[%s4406_s28 + $0x5f0] ss:$28 sps:$4 sm:$0xff]  }
 0x14c   : > { %v4822_v22 = vpop.f32.mrf.mxu0  ;;  %v2364_v23 = vpop.f32.mrf.mxu1  ;;  %2555 = vmatmul.mubr.bf16.gmra.mxu1 %v4081_v11  ;;  %2716 = vmatmul.mubr.bf16.gmra.mxu0 %v4084_v12  ;;  %v4102_v11 = vld [vmem:[%s4406_s28 + $0x5f4] ss:$28 sps:$4 sm:$0xff]   ;;  %v4105_v12 = vld [vmem:[%s4406_s28 + $0x27c] ss:$28 sps:$4 sm:$0xff]  }
 0x14d   : > { %v4824_v24 = vadd.f32 %v2364_v23, %v2076_v19  ;;  %2562 = vmatprep.mubr.bf16.mxu1 %v4090_v13  ;;  %2723 = vmatprep.mubr.bf16.mxu0 %v4093_v14 }
 0x14e   : > { %v2141_v25 = vpop.f32.mrf.mxu0  ;;  %v2366_v26 = vpop.f32.mrf.mxu1 }
 0x14f   : > { %v2095_v26 = vadd.f32 %v4810_v6, %v4747_v59 }
 0x150   : > { %v4828_v30 = vpop.f32.mrf.mxu0  ;;  %v2367_v31 = vpop.f32.mrf.mxu1 }
 0x151   : > { %v4832_v39 = vadd.f32 %v2367_v31, %v2079_v27 }
 0x152   : > { %v2144_v41 = vpop.f32.mrf.mxu0  ;;  %v2369_v42 = vpop.f32.mrf.mxu1 }
 0x154   : > { %v4838_v50 = vpop.f32.mrf.mxu0  ;;  %v2372_v36 = vpop.f32.mrf.mxu1  ;;  %2563 = vmatmul.mubr.bf16.gmra.mxu1 %v4088_v32  ;;  %2724 = vmatmul.mubr.bf16.gmra.mxu0 %v4091_v38  ;;  %v4103_v32 = vld [vmem:[%s4406_s28 + $0x278] ss:$28 sps:$4 sm:$0xff]  }
 0x155   : > { %v4840_v53 = vadd.f32 %v2372_v36, %v2084_v49  ;;  %2570 = vmatprep.mubr.bf16.mxu1 %v4096_v1  ;;  %2731 = vmatprep.mubr.bf16.mxu0 %v4099_v40  ;;  %v4108_v1 = vld [vmem:[%s4406_s28 + $0x62c] ss:$28 sps:$4 sm:$0xff]   ;;  %v4111_v40 = vld [vmem:[%s4406_s28 + $0x2b4] ss:$28 sps:$4 sm:$0xff]   ;;  %v2100_v49 = vadd.f32 %v4810_v6, %v4755_v4 }
 0x156   : > { %v2149_v54 = vpop.f32.mrf.mxu0  ;;  %v2374_v57 = vpop.f32.mrf.mxu1  ;;  %v4106_v4 = vld [vmem:[%s4406_s28 + $0x628] ss:$28 sps:$4 sm:$0xff]  }
 0x158   : > { %v4844_v61 = vpop.f32.mrf.mxu0  ;;  %v2375_v62 = vpop.f32.mrf.mxu1 }
 0x159   : > { %v4848_v3 = vadd.f32 %v2375_v62, %v2087_v58  ;;  %v2103_v62 = vadd.f32 %v4810_v6, %v4759_v8 }
 0x15a   : > { %v2152_v13 = vpop.f32.mrf.mxu0  ;;  %v2377_v14 = vpop.f32.mrf.mxu1 }
 0x15b   : > { %v4115_v13 = vld [vmem:[%s4406_s28 + $0x664] ss:$28 sps:$4 sm:$0xff]   ;;  %v4118_v14 = vld [vmem:[%s4406_s28 + $0x2ec] ss:$28 sps:$4 sm:$0xff]  }
 0x15c   : > { %v4854_v18 = vpop.f32.mrf.mxu0  ;;  %v2380_v47 = vpop.f32.mrf.mxu1  ;;  %2571 = vmatmul.mubr.bf16.gmra.mxu1 %v4094_v43  ;;  %2732 = vmatmul.mubr.bf16.gmra.mxu0 %v4097_v2 }
 0x15d   : > { %v4856_v19 = vadd.f32 %v2380_v47, %v2092_v15  ;;  %2578 = vmatprep.mubr.bf16.mxu1 %v4102_v11  ;;  %2739 = vmatprep.mubr.bf16.mxu0 %v4105_v12  ;;  %v4109_v11 = vld [vmem:[%s4406_s28 + $0x2b0] ss:$28 sps:$4 sm:$0xff]  }
 0x15e   : > { %v2157_v23 = vpop.f32.mrf.mxu0  ;;  %v2382_v25 = vpop.f32.mrf.mxu1 }
 0x15f   : > { %v2108_v23 = vadd.f32 %v4810_v6, %v4767_v16  ;;  %v4113_v16 = vld [vmem:[%s4406_s28 + $0x660] ss:$28 sps:$4 sm:$0xff]  }
 0x160   : > { %v4860_v27 = vpop.f32.mrf.mxu0  ;;  %v2383_v31 = vpop.f32.mrf.mxu1 }
 0x161   : > { %v4864_v38 = vadd.f32 %v2383_v31, %v2095_v26 }
 0x162   : > { %v2160_v41 = vpop.f32.mrf.mxu0  ;;  %v2385_v42 = vpop.f32.mrf.mxu1 }
 0x163   : > { %v4116_v41 = vld [vmem:[%s4406_s28 + $0x2e8] ss:$28 sps:$4 sm:$0xff]  }
 0x164   : > { %v4870_v36 = vpop.f32.mrf.mxu0  ;;  %v2388_v59 = vpop.f32.mrf.mxu1  ;;  %2579 = vmatmul.mubr.bf16.gmra.mxu1 %v4100_v55  ;;  %2740 = vmatmul.mubr.bf16.gmra.mxu0 %v4103_v32  ;;  %v2111_v32 = vadd.f32 %v4810_v6, %v4771_v20 }
 0x165   : > { %v4872_v54 = vadd.f32 %v2388_v59, %v2100_v49  ;;  %2586 = vmatprep.mubr.bf16.mxu1 %v4108_v1  ;;  %2747 = vmatprep.mubr.bf16.mxu0 %v4111_v40  ;;  %v4121_v49 = vld [vmem:[%s4406_s28 + $0x69c] ss:$28 sps:$4 sm:$0xff]   ;;  %v4124_v59 = vld [vmem:[%s4406_s28 + $0x324] ss:$28 sps:$4 sm:$0xff]  }
 0x166   : > { %v2165_v57 = vpop.f32.mrf.mxu0  ;;  %v2390_v58 = vpop.f32.mrf.mxu1 }
 0x168   : > { %v4876_v43 = vpop.f32.mrf.mxu0  ;;  %v2391_v2 = vpop.f32.mrf.mxu1 }
 0x169   : > { %v4880_v12 = vadd.f32 %v2391_v2, %v2103_v62  ;;  %v2116_v62 = vadd.f32 %v4810_v6, %v4779_v28  ;;  %v4119_v28 = vld [vmem:[%s4406_s28 + $0x698] ss:$28 sps:$4 sm:$0xff]  }
 0x16a   : > { %v2168_v15 = vpop.f32.mrf.mxu0  ;;  %v2393_v47 = vpop.f32.mrf.mxu1 }
 0x16c   : > { %v4886_v25 = vpop.f32.mrf.mxu0  ;;  %v2396_v8 = vpop.f32.mrf.mxu1  ;;  %2587 = vmatmul.mubr.bf16.gmra.mxu1 %v4106_v4  ;;  %2748 = vmatmul.mubr.bf16.gmra.mxu0 %v4109_v11 }
 0x16d   : > { %v4888_v26 = vadd.f32 %v2396_v8, %v2108_v23  ;;  %2594 = vmatprep.mubr.bf16.mxu1 %v4115_v13  ;;  %2755 = vmatprep.mubr.bf16.mxu0 %v4118_v14  ;;  %v2119_v14 = vadd.f32 %v4810_v6, %v4783_v34  ;;  %v4122_v23 = vld [vmem:[%s4406_s28 + $0x320] ss:$28 sps:$4 sm:$0xff]  }
 0x16e   : > { %v2173_v31 = vpop.f32.mrf.mxu0  ;;  %v2398_v55 = vpop.f32.mrf.mxu1 }
 0x16f   : > { %v4127_v31 = vld [vmem:[%s4406_s28 + $0x6d4] ss:$28 sps:$4 sm:$0xff]   ;;  %v4130_v55 = vld [vmem:[%s4406_s28 + $0x35c] ss:$28 sps:$4 sm:$0xff]  }
 0x170   : > { %v4892_v1 = vpop.f32.mrf.mxu0  ;;  %v2399_v40 = vpop.f32.mrf.mxu1 }
 0x171   : > { %v4896_v42 = vadd.f32 %v2399_v40, %v2111_v32 }
 0x172   : > { %v2176_v57 = vpop.f32.mrf.mxu0  ;;  %v2401_v58 = vpop.f32.mrf.mxu1 }
 0x173   : > { %v2127_v58 = vadd.f32 %v4810_v6, %v4795_v51 }
 0x174   : > { %v4902_v2 = vpop.f32.mrf.mxu0  ;;  %v2404_v20 = vpop.f32.mrf.mxu1  ;;  %2595 = vmatmul.mubr.bf16.gmra.mxu1 %v4113_v16  ;;  %2756 = vmatmul.mubr.bf16.gmra.mxu0 %v4116_v41  ;;  %v2124_v16 = vadd.f32 %v4810_v6, %v4791_v45  ;;  %v4125_v45 = vld [vmem:[%s4406_s28 + $0x6d0] ss:$28 sps:$4 sm:$0xff]  }
 0x175   : > { %v4904_v4 = vadd.f32 %v2404_v20, %v2116_v62  ;;  %2602 = vmatprep.mubr.bf16.mxu1 %v4121_v49  ;;  %2763 = vmatprep.mubr.bf16.mxu0 %v4124_v59 }
 0x176   : > { %v2181_v11 = vpop.f32.mrf.mxu0  ;;  %v2406_v13 = vpop.f32.mrf.mxu1 }
 0x177   : > { %v4128_v11 = vld [vmem:[%s4406_s28 + $0x358] ss:$28 sps:$4 sm:$0xff]  }
 0x178   : > { %v4908_v15 = vpop.f32.mrf.mxu0  ;;  %v2407_v47 = vpop.f32.mrf.mxu1 }
 0x179   : > { %v4912_v8 = vadd.f32 %v2407_v47, %v2119_v14  ;;  %v4133_v14 = vld [vmem:[%s4406_s28 + $0x394] ss:$28 sps:$4 sm:$0xff]  }
 0x17a   : > { %v2184_v32 = vpop.f32.mrf.mxu0  ;;  %v2409_v40 = vpop.f32.mrf.mxu1  ;;  %v4134_v47 = vld [vmem:[%s4406_s28 + $0x18] ss:$28 sps:$4 sm:$0xff]  }
 0x17c   : > { %v4918_v41 = vpop.f32.mrf.mxu0  ;;  %v2412_v34 = vpop.f32.mrf.mxu1  ;;  %2603 = vmatmul.mubr.bf16.gmra.mxu1 %v4119_v28  ;;  %2764 = vmatmul.mubr.bf16.gmra.mxu0 %v4122_v23 }
 0x17d   : > { %v4920_v49 = vadd.f32 %v2412_v34, %v2124_v16  ;;  %2610 = vmatprep.mubr.bf16.mxu1 %v4127_v31  ;;  %2771 = vmatprep.mubr.bf16.mxu0 %v4130_v55  ;;  %v2132_v31 = vadd.f32 %v4810_v6, %v4803_v63  ;;  %v2135_v34 = vadd.f32 %v4810_v6, %v4812_v7  ;;  %v4131_v63 = vld [vmem:[%s4406_s28 + $0x390] ss:$28 sps:$4 sm:$0xff]  }
 0x17e   : > { %v2189_v59 = vpop.f32.mrf.mxu0  ;;  %v2414_v57 = vpop.f32.mrf.mxu1 }
 0x180   : > { %v4924_v62 = vpop.f32.mrf.mxu0  ;;  %v2415_v20 = vpop.f32.mrf.mxu1 }
 0x181   : > { %v4928_v13 = vadd.f32 %v2415_v20, %v2127_v58  ;;  %v4135_v58 = vld [vmem:[%s4406_s28 + $0x50] ss:$28 sps:$4 sm:$0xff]  }
 0x182   : > { %v2192_v28 = vpop.f32.mrf.mxu0  ;;  %v2417_v23 = vpop.f32.mrf.mxu1 }
 0x183   : > { %v4138_v28 = vld [vmem:[%s4406_s28 + $0x3cc] ss:$28 sps:$4 sm:$0xff]  }
 0x184   : > { %v4934_v55 = vpop.f32.mrf.mxu0  ;;  %v2420_v51 = vpop.f32.mrf.mxu1  ;;  %2611 = vmatmul.mubr.bf16.gmra.mxu1 %v4125_v45  ;;  %2772 = vmatmul.mubr.bf16.gmra.mxu0 %v4128_v11  ;;  %v4139_v23 = vld [vmem:[%s4406_s28 + $0x88] ss:$28 sps:$4 sm:$0xff]  }
 0x185   : > { %v4936_v32 = vadd.f32 %v2420_v51, %v2132_v31  ;;  %2779 = vmatprep.mubr.bf16.mxu0 %v4133_v14  ;;  %3729 = vmatprep.mubr.bf16.mxu1 %v4134_v47  ;;  %v2140_v14 = vadd.f32 %v4810_v6, %v4822_v22  ;;  %v4136_v22 = vld [vmem:[%s4406_s28 + $0x3c8] ss:$28 sps:$4 sm:$0xff]  }
 0x186   : > { %v2197_v40 = vpop.f32.mrf.mxu0  ;;  %v2422_v16 = vpop.f32.mrf.mxu1 }
 0x187   : > { %v2143_v16 = vadd.f32 %v4810_v6, %v4828_v30 }
 0x188   : > { %v4940_v59 = vpop.f32.mrf.mxu0  ;;  %v2423_v57 = vpop.f32.mrf.mxu1 }
 0x189   : > { %v4944_v20 = vadd.f32 %v2423_v57, %v2135_v34 }
 0x18a   : > { %v2200_v45 = vpop.f32.mrf.mxu0  ;;  %v2425_v11 = vpop.f32.mrf.mxu1 }
 0x18b   : > { %v4140_v45 = vld [vmem:[%s4406_s28 + $0xc0] ss:$28 sps:$4 sm:$0xff]  }
 0x18c   : > { %v4950_v47 = vpop.f32.mrf.mxu0  ;;  %v2428_v7 = vpop.f32.mrf.mxu1  ;;  %2780 = vmatmul.mubr.bf16.gmra.mxu0 %v4131_v63  ;;  %3730 = vmatmul.mubr.bf16.vlgmr.msra.gmra.mxu1 %v4135_v58 }
 0x18d   : > { %v4952_v31 = vadd.f32 %v2428_v7, %v2140_v14  ;;  %2787 = vmatprep.mubr.bf16.mxu0 %v4138_v28  ;;  %3733 = vmatprep.mubr.bf16.mxu1 %v4139_v23  ;;  %v2148_v28 = vadd.f32 %v4810_v6, %v4838_v50  ;;  %v4141_v50 = vld [vmem:[%s4406_s28 + $0x400] ss:$28 sps:$4 sm:$0xff]  }
 0x18e   : > { %v2205_v51 = vpop.f32.mrf.mxu0  ;;  %v2430_v40 = vpop.f32.mrf.mxu1 }
 0x18f   : > { %v2151_v40 = vadd.f32 %v4810_v6, %v4844_v61 }
 0x190   : > { %v4956_v34 = vpop.f32.mrf.mxu0  ;;  %v2431_v57 = vpop.f32.mrf.mxu1 }
 0x191   : > { %v4960_v11 = vadd.f32 %v2431_v57, %v2143_v16 }
 0x192   : > { %v2208_v63 = vpop.f32.mrf.mxu0  ;;  %v2433_v58 = vpop.f32.mrf.mxu1 }
 0x193   : > { %v4145_v63 = vld [vmem:[%s4406_s28 + $0x130] ss:$28 sps:$4 sm:$0xff]  }
 0x194   : > { %v4966_v23 = vpop.f32.mrf.mxu0  ;;  %v2436_v30 = vpop.f32.mrf.mxu1  ;;  %2788 = vmatmul.mubr.bf16.gmra.mxu0 %v4136_v22  ;;  %3734 = vmatmul.mubr.bf16.gmra.mxu1 %v4140_v45 }
 0x195   : > { %v4968_v14 = vadd.f32 %v2436_v30, %v2148_v28  ;;  %2795 = vmatprep.mubr.bf16.mxu0 %v4143_v10  ;;  %3737 = vmatprep.mubr.bf16.mxu1 %v4144_v0  ;;  %v2156_v0 = vadd.f32 %v4810_v6, %v4854_v18  ;;  %v4146_v18 = vld [vmem:[%s4406_s28 + $0x438] ss:$28 sps:$4 sm:$0xff]  }
 0x196   : > { %v2213_v7 = vpop.f32.mrf.mxu0  ;;  %v2438_v51 = vpop.f32.mrf.mxu1 }
 0x197   : > { %v2159_v51 = vadd.f32 %v4810_v6, %v4860_v27 }
 0x198   : > { %v4972_v16 = vpop.f32.mrf.mxu0  ;;  %v2439_v57 = vpop.f32.mrf.mxu1 }
 0x199   : > { %v4976_v58 = vadd.f32 %v2439_v57, %v2151_v40 }
 0x19a   : > { %v2216_v22 = vpop.f32.mrf.mxu0  ;;  %v2441_v45 = vpop.f32.mrf.mxu1 }
 0x19b   : > { %v4150_v22 = vld [vmem:[%s4406_s28 + $0x1a0] ss:$28 sps:$4 sm:$0xff]  }
 0x19c   : > { %v4982_v10 = vpop.f32.mrf.mxu0  ;;  %v2444_v61 = vpop.f32.mrf.mxu1  ;;  %2796 = vmatmul.mubr.bf16.gmra.mxu0 %v4141_v50  ;;  %3738 = vmatmul.mubr.bf16.gmra.mxu1 %v4145_v63 }
 0x19d   : > { %v4984_v28 = vadd.f32 %v2444_v61, %v2156_v0  ;;  %2803 = vmatprep.mubr.bf16.mxu0 %v4148_v52  ;;  %3741 = vmatprep.mubr.bf16.mxu1 %v4149_v46  ;;  %v2164_v46 = vadd.f32 %v4810_v6, %v4870_v36  ;;  %v4151_v36 = vld [vmem:[%s4406_s28 + $0x470] ss:$28 sps:$4 sm:$0xff]  }
 0x19e   : > { %v2221_v30 = vpop.f32.mrf.mxu0  ;;  %v2446_v7 = vpop.f32.mrf.mxu1 }
 0x19f   : > { %v2167_v7 = vadd.f32 %v4810_v6, %v4876_v43 }
 0x1a0   : > { %v4988_v40 = vpop.f32.mrf.mxu0  ;;  %v2447_v57 = vpop.f32.mrf.mxu1 }
 0x1a1   : > { %v4992_v45 = vadd.f32 %v2447_v57, %v2159_v51 }
 0x1a2   : > { %v2224_v50 = vpop.f32.mrf.mxu0  ;;  %v2449_v63 = vpop.f32.mrf.mxu1 }
 0x1a3   : > { %v4155_v50 = vld [vmem:[%s4406_s28 + $0x210] ss:$28 sps:$4 sm:$0xff]  }
 0x1a4   : > { %v4998_v52 = vpop.f32.mrf.mxu0  ;;  %v2452_v27 = vpop.f32.mrf.mxu1  ;;  %2804 = vmatmul.mubr.bf16.gmra.mxu0 %v4146_v18  ;;  %3742 = vmatmul.mubr.bf16.gmra.mxu1 %v4150_v22 }
 0x1a5   : > { %v5000_v0 = vadd.f32 %v2452_v27, %v2164_v46  ;;  %2811 = vmatprep.mubr.bf16.mxu0 %v4153_v35  ;;  %3745 = vmatprep.mubr.bf16.mxu1 %v4154_v29  ;;  %v2172_v29 = vadd.f32 %v4810_v6, %v4886_v25  ;;  %v4156_v25 = vld [vmem:[%s4406_s28 + $0x4a8] ss:$28 sps:$4 sm:$0xff]  }
 0x1a6   : > { %v2229_v61 = vpop.f32.mrf.mxu0  ;;  %v2454_v30 = vpop.f32.mrf.mxu1 }
 0x1a7   : > { %v2175_v30 = vadd.f32 %v4810_v6, %v4892_v1 }
 0x1a8   : > { %v5004_v51 = vpop.f32.mrf.mxu0  ;;  %v2455_v57 = vpop.f32.mrf.mxu1 }
 0x1a9   : > { %v5008_v63 = vadd.f32 %v2455_v57, %v2167_v7 }
 0x1aa   : > { %v2232_v18 = vpop.f32.mrf.mxu0  ;;  %v2457_v22 = vpop.f32.mrf.mxu1 }
 0x1ab   : > { %5547 = vst [vmem:[#allocation11_spill] sm:$0xff] %v5008_v63  ;;  %v4160_v18 = vld [vmem:[%s4406_s28 + $0x280] ss:$28 sps:$4 sm:$0xff]  }
 0x1ac   : > { %v5014_v35 = vpop.f32.mrf.mxu0  ;;  %v2460_v43 = vpop.f32.mrf.mxu1  ;;  %2812 = vmatmul.mubr.bf16.gmra.mxu0 %v4151_v36  ;;  %3746 = vmatmul.mubr.bf16.gmra.mxu1 %v4155_v50  ;;  %v4163_v63 = vld [vmem:[%s4406_s28 + $0x4e4] ss:$28 sps:$4 sm:$0xff]  }
 0x1ad   : > { %v5016_v46 = vadd.f32 %v2460_v43, %v2172_v29  ;;  %2819 = vmatprep.mubr.bf16.mxu0 %v4158_v21  ;;  %3749 = vmatprep.mubr.bf16.mxu1 %v4159_v17  ;;  %v2180_v17 = vadd.f32 %v4810_v6, %v4902_v2  ;;  %v4161_v2 = vld [vmem:[%s4406_s28 + $0x4e0] ss:$28 sps:$4 sm:$0xff]  }
 0x1ae   : > { %v2237_v27 = vpop.f32.mrf.mxu0  ;;  %v2462_v61 = vpop.f32.mrf.mxu1 }
 0x1af   : > { %5548 = vst [vmem:[#allocation12_spill] sm:$0xff] %v5016_v46  ;;  %v2183_v61 = vadd.f32 %v4810_v6, %v4908_v15  ;;  %v4169_v46 = vld [vmem:[%s4406_s28 + $0x328] ss:$28 sps:$4 sm:$0xff]  }
 0x1b0   : > { %v5020_v7 = vpop.f32.mrf.mxu0  ;;  %v2463_v57 = vpop.f32.mrf.mxu1 }
 0x1b1   : > { %v5024_v22 = vadd.f32 %v2463_v57, %v2175_v30 }
 0x1b2   : > { %v2240_v36 = vpop.f32.mrf.mxu0  ;;  %v2465_v50 = vpop.f32.mrf.mxu1 }
 0x1b3   : > { %5549 = vst [vmem:[#allocation13_spill] sm:$0xff] %v5024_v22  ;;  %v4165_v36 = vld [vmem:[%s4406_s28 + $0x2f0] ss:$28 sps:$4 sm:$0xff]   ;;  %v4168_v22 = vld [vmem:[%s4406_s28 + $0x51c] ss:$28 sps:$4 sm:$0xff]  }
 0x1b4   : > { %v5030_v21 = vpop.f32.mrf.mxu0  ;;  %v2468_v1 = vpop.f32.mrf.mxu1  ;;  %2820 = vmatmul.mubr.bf16.gmra.mxu0 %v4156_v25  ;;  %3750 = vmatmul.mubr.bf16.gmra.mxu1 %v4160_v18 }
 0x1b5   : > { %v5032_v29 = vadd.f32 %v2468_v1, %v2180_v17  ;;  %2827 = vmatprep.mubr.bf16.mxu0 %v4163_v63  ;;  %3753 = vmatprep.mubr.bf16.mxu1 %v4164_v9  ;;  %v2188_v9 = vadd.f32 %v4810_v6, %v4918_v41  ;;  %v4166_v41 = vld [vmem:[%s4406_s28 + $0x518] ss:$28 sps:$4 sm:$0xff]  }
 0x1b6   : > { %v2245_v43 = vpop.f32.mrf.mxu0  ;;  %v2470_v27 = vpop.f32.mrf.mxu1 }
 0x1b7   : > { %5550 = vst [vmem:[#allocation14_spill] sm:$0xff] %v5032_v29  ;;  %v2191_v27 = vadd.f32 %v4810_v6, %v4924_v62  ;;  %v4174_v29 = vld [vmem:[%s4406_s28 + $0x398] ss:$28 sps:$4 sm:$0xff]  }
 0x1b8   : > { %v5036_v30 = vpop.f32.mrf.mxu0  ;;  %v2471_v57 = vpop.f32.mrf.mxu1 }
 0x1b9   : > { %v5040_v50 = vadd.f32 %v2471_v57, %v2183_v61 }
 0x1ba   : > { %v2248_v25 = vpop.f32.mrf.mxu0  ;;  %v2473_v18 = vpop.f32.mrf.mxu1 }
 0x1bb   : > { %5551 = vst [vmem:[#allocation15_spill] sm:$0xff] %v5040_v50  ;;  %v4170_v25 = vld [vmem:[%s4406_s28 + $0x360] ss:$28 sps:$4 sm:$0xff]   ;;  %v4173_v50 = vld [vmem:[%s4406_s28 + $0x554] ss:$28 sps:$4 sm:$0xff]  }
 0x1bc   : > { %v5046_v63 = vpop.f32.mrf.mxu0  ;;  %v2476_v15 = vpop.f32.mrf.mxu1  ;;  %2828 = vmatmul.mubr.bf16.gmra.mxu0 %v4161_v2  ;;  %3754 = vmatmul.mubr.bf16.gmra.mxu1 %v4165_v36 }
 0x1bd   : > { %v5048_v17 = vadd.f32 %v2476_v15, %v2188_v9  ;;  %2835 = vmatprep.mubr.bf16.mxu0 %v4168_v22  ;;  %3757 = vmatprep.mubr.bf16.mxu1 %v4169_v46  ;;  %v2196_v46 = vadd.f32 %v4810_v6, %v4934_v55  ;;  %v4171_v55 = vld [vmem:[%s4406_s28 + $0x550] ss:$28 sps:$4 sm:$0xff]  }
 0x1be   : > { %v2253_v1 = vpop.f32.mrf.mxu0  ;;  %v2478_v43 = vpop.f32.mrf.mxu1 }
 0x1bf   : > { %5552 = vst [vmem:[#allocation16_spill] sm:$0xff] %v5048_v17  ;;  %v2199_v43 = vadd.f32 %v4810_v6, %v4940_v59  ;;  %v4179_v17 = vld [vmem:[%s4406_s28 + $0x408] ss:$28 sps:$4 sm:$0xff]  }
 0x1c0   : > { %v5052_v61 = vpop.f32.mrf.mxu0  ;;  %v2479_v57 = vpop.f32.mrf.mxu1 }
 0x1c1   : > { %v5056_v18 = vadd.f32 %v2479_v57, %v2191_v27 }
 0x1c2   : > { %v2256_v2 = vpop.f32.mrf.mxu0  ;;  %v2481_v36 = vpop.f32.mrf.mxu1 }
 0x1c3   : > { %5553 = vst [vmem:[#allocation17_spill] sm:$0xff] %v5056_v18  ;;  %v4175_v2 = vld [vmem:[%s4406_s28 + $0x3d0] ss:$28 sps:$4 sm:$0xff]  }
 0x1c4   : > { %v5062_v22 = vpop.f32.mrf.mxu0  ;;  %v2484_v62 = vpop.f32.mrf.mxu1  ;;  %2836 = vmatmul.mubr.bf16.gmra.mxu0 %v4166_v41  ;;  %3758 = vmatmul.mubr.bf16.gmra.mxu1 %v4170_v25  ;;  %v4178_v18 = vld [vmem:[%s4406_s28 + $0x58c] ss:$28 sps:$4 sm:$0xff]  }
 0x1c5   : > { %v5064_v9 = vadd.f32 %v2484_v62, %v2196_v46  ;;  %2843 = vmatprep.mubr.bf16.mxu0 %v4173_v50  ;;  %3761 = vmatprep.mubr.bf16.mxu1 %v4174_v29  ;;  %v2204_v29 = vadd.f32 %v4810_v6, %v4950_v47 }
 0x1c6   : > { %v2261_v15 = vpop.f32.mrf.mxu0  ;;  %v2486_v1 = vpop.f32.mrf.mxu1 }
 0x1c8   : > { %v5068_v27 = vpop.f32.mrf.mxu0  ;;  %v2487_v57 = vpop.f32.mrf.mxu1 }
 0x1c9   : > { %v5072_v36 = vadd.f32 %v2487_v57, %v2199_v43  ;;  %v2207_v43 = vadd.f32 %v4810_v6, %v4956_v34 }
 0x1ca   : > { %v2264_v41 = vpop.f32.mrf.mxu0  ;;  %v2489_v25 = vpop.f32.mrf.mxu1 }
 0x1cb   : > { %5554 = vst [vmem:[#allocation18_spill] sm:$0xff] %v5072_v36  ;;  %v4176_v41 = vld [vmem:[%s4406_s28 + $0x588] ss:$28 sps:$4 sm:$0xff]   ;;  %v4180_v25 = vld [vmem:[%s4406_s28 + $0x440] ss:$28 sps:$4 sm:$0xff]  }
 0x1cc   : > { %v2492_v50 = vpop.f32.mrf.mxu1  ;;  %v2653_v46 = vpop.f32.mrf.mxu0  ;;  %2844 = vmatmul.mubr.bf16.gmra.mxu0 %v4171_v55  ;;  %3762 = vmatmul.mubr.bf16.gmra.mxu1 %v4175_v2  ;;  %v4183_v2 = vld [vmem:[%s4406_s28 + $0x5c4] ss:$28 sps:$4 sm:$0xff]  }
 0x1cd   : > { %v5078_v59 = vadd.f32 %v2492_v50, %v2204_v29  ;;  %v5081_v62 = vadd.f32 %v2653_v46, %v4824_v24  ;;  %2851 = vmatprep.mubr.bf16.mxu0 %v4178_v18  ;;  %3765 = vmatprep.mubr.bf16.mxu1 %v4179_v17  ;;  %v4184_v29 = vld [vmem:[%s4406_s28 + $0x478] ss:$28 sps:$4 sm:$0xff]   ;;  %v2212_v17 = vadd.f32 %v4810_v6, %v4966_v23 }
 0x1ce   : > { %v2494_v15 = vpop.f32.mrf.mxu1  ;;  %v2655_v1 = vpop.f32.mrf.mxu0 }
 0x1d0   : > { %v2495_v57 = vpop.f32.mrf.mxu1  ;;  %v2656_v47 = vpop.f32.mrf.mxu0 }
 0x1d1   : > { %v5087_v36 = vadd.f32 %v2495_v57, %v2207_v43  ;;  %v5090_v55 = vadd.f32 %v2656_v47, %v4832_v39  ;;  %v2215_v43 = vadd.f32 %v4810_v6, %v4972_v16  ;;  %v4181_v47 = vld [vmem:[%s4406_s28 + $0x5c0] ss:$28 sps:$4 sm:$0xff]  }
 0x1d2   : > { %v2497_v24 = vpop.f32.mrf.mxu1  ;;  %v2658_v18 = vpop.f32.mrf.mxu0 }
 0x1d3   : > { %v4185_v24 = vld [vmem:[%s4406_s28 + $0x4b0] ss:$28 sps:$4 sm:$0xff]  }
 0x1d4   : > { %v2500_v50 = vpop.f32.mrf.mxu1  ;;  %v2661_v34 = vpop.f32.mrf.mxu0  ;;  %2852 = vmatmul.mubr.bf16.gmra.mxu0 %v4176_v41  ;;  %3766 = vmatmul.mubr.bf16.gmra.mxu1 %v4180_v25  ;;  %v4188_v25 = vld [vmem:[%s4406_s28 + $0x5fc] ss:$28 sps:$4 sm:$0xff]  }
 0x1d5   : > { %v5096_v46 = vadd.f32 %v2500_v50, %v2212_v17  ;;  %v5099_v39 = vadd.f32 %v2661_v34, %v4840_v53  ;;  %2859 = vmatprep.mubr.bf16.mxu0 %v4183_v2  ;;  %3769 = vmatprep.mubr.bf16.mxu1 %v4184_v29  ;;  %v4189_v17 = vld [vmem:[%s4406_s28 + $0x4e8] ss:$28 sps:$4 sm:$0xff]   ;;  %v2220_v29 = vadd.f32 %v4810_v6, %v4982_v10 }
 0x1d6   : > { %v2502_v15 = vpop.f32.mrf.mxu1  ;;  %v2663_v1 = vpop.f32.mrf.mxu0 }
 0x1d8   : > { %v2503_v57 = vpop.f32.mrf.mxu1  ;;  %v2664_v23 = vpop.f32.mrf.mxu0 }
 0x1d9   : > { %v5105_v18 = vadd.f32 %v2503_v57, %v2215_v43  ;;  %v5108_v41 = vadd.f32 %v2664_v23, %v4848_v3  ;;  %v2223_v43 = vadd.f32 %v4810_v6, %v4988_v40  ;;  %v4186_v23 = vld [vmem:[%s4406_s28 + $0x5f8] ss:$28 sps:$4 sm:$0xff]  }
 0x1da   : > { %v2505_v53 = vpop.f32.mrf.mxu1  ;;  %v2666_v2 = vpop.f32.mrf.mxu0 }
 0x1db   : > { %v4190_v53 = vld [vmem:[%s4406_s28 + $0x520] ss:$28 sps:$4 sm:$0xff]  }
 0x1dc   : > { %v2508_v50 = vpop.f32.mrf.mxu1  ;;  %v2669_v16 = vpop.f32.mrf.mxu0  ;;  %2860 = vmatmul.mubr.bf16.gmra.mxu0 %v4181_v47  ;;  %3770 = vmatmul.mubr.bf16.gmra.mxu1 %v4185_v24  ;;  %v4193_v24 = vld [vmem:[%s4406_s28 + $0x634] ss:$28 sps:$4 sm:$0xff]  }
 0x1dd   : > { %v5114_v34 = vadd.f32 %v2508_v50, %v2220_v29  ;;  %v5117_v3 = vadd.f32 %v2669_v16, %v4856_v19  ;;  %2867 = vmatprep.mubr.bf16.mxu0 %v4188_v25  ;;  %3773 = vmatprep.mubr.bf16.mxu1 %v4189_v17  ;;  %v4194_v29 = vld [vmem:[%s4406_s28 + $0x558] ss:$28 sps:$4 sm:$0xff]   ;;  %v2228_v17 = vadd.f32 %v4810_v6, %v4998_v52 }
 0x1de   : > { %v2510_v15 = vpop.f32.mrf.mxu1  ;;  %v2671_v1 = vpop.f32.mrf.mxu0 }
 0x1e0   : > { %v2511_v57 = vpop.f32.mrf.mxu1  ;;  %v2672_v10 = vpop.f32.mrf.mxu0 }
 0x1e1   : > { %v5123_v2 = vadd.f32 %v2511_v57, %v2223_v43  ;;  %v5126_v47 = vadd.f32 %v2672_v10, %v4864_v38  ;;  %v2231_v43 = vadd.f32 %v4810_v6, %v5004_v51  ;;  %v4191_v10 = vld [vmem:[%s4406_s28 + $0x630] ss:$28 sps:$4 sm:$0xff]  }
 0x1e2   : > { %v2513_v19 = vpop.f32.mrf.mxu1  ;;  %v2674_v25 = vpop.f32.mrf.mxu0 }
 0x1e3   : > { %v4195_v19 = vld [vmem:[%s4406_s28 + $0x590] ss:$28 sps:$4 sm:$0xff]  }
 0x1e4   : > { %v2516_v50 = vpop.f32.mrf.mxu1  ;;  %v2677_v40 = vpop.f32.mrf.mxu0  ;;  %2868 = vmatmul.mubr.bf16.gmra.mxu0 %v4186_v23  ;;  %3774 = vmatmul.mubr.bf16.gmra.mxu1 %v4190_v53  ;;  %v4198_v53 = vld [vmem:[%s4406_s28 + $0x66c] ss:$28 sps:$4 sm:$0xff]  }
 0x1e5   : > { %v5132_v16 = vadd.f32 %v2516_v50, %v2228_v17  ;;  %v5135_v38 = vadd.f32 %v2677_v40, %v4872_v54  ;;  %2875 = vmatprep.mubr.bf16.mxu0 %v4193_v24  ;;  %3777 = vmatprep.mubr.bf16.mxu1 %v4194_v29  ;;  %v4199_v17 = vld [vmem:[%s4406_s28 + $0x5c8] ss:$28 sps:$4 sm:$0xff]   ;;  %v2236_v29 = vadd.f32 %v4810_v6, %v5014_v35 }
 0x1e6   : > { %v2518_v15 = vpop.f32.mrf.mxu1  ;;  %v2679_v1 = vpop.f32.mrf.mxu0 }
 0x1e8   : > { %v2519_v57 = vpop.f32.mrf.mxu1  ;;  %v2680_v52 = vpop.f32.mrf.mxu0 }
 0x1e9   : > { %v5141_v25 = vadd.f32 %v2519_v57, %v2231_v43  ;;  %v5144_v23 = vadd.f32 %v2680_v52, %v4880_v12  ;;  %v2239_v43 = vadd.f32 %v4810_v6, %v5020_v7  ;;  %v4196_v52 = vld [vmem:[%s4406_s28 + $0x668] ss:$28 sps:$4 sm:$0xff]  }
 0x1ea   : > { %v2521_v54 = vpop.f32.mrf.mxu1  ;;  %v2682_v24 = vpop.f32.mrf.mxu0 }
 0x1eb   : > { %v4200_v54 = vld [vmem:[%s4406_s28 + $0x600] ss:$28 sps:$4 sm:$0xff]  }
 0x1ec   : > { %v2524_v50 = vpop.f32.mrf.mxu1  ;;  %v2685_v51 = vpop.f32.mrf.mxu0  ;;  %2876 = vmatmul.mubr.bf16.gmra.mxu0 %v4191_v10  ;;  %3778 = vmatmul.mubr.bf16.gmra.mxu1 %v4195_v19  ;;  %v4203_v19 = vld [vmem:[%s4406_s28 + $0x6a4] ss:$28 sps:$4 sm:$0xff]  }
 0x1ed   : > { %v5150_v40 = vadd.f32 %v2524_v50, %v2236_v29  ;;  %v5153_v12 = vadd.f32 %v2685_v51, %v4888_v26  ;;  %2883 = vmatprep.mubr.bf16.mxu0 %v4198_v53  ;;  %3781 = vmatprep.mubr.bf16.mxu1 %v4199_v17  ;;  %v4204_v29 = vld [vmem:[%s4406_s28 + $0x638] ss:$28 sps:$4 sm:$0xff]   ;;  %v2244_v17 = vadd.f32 %v4810_v6, %v5030_v21 }
 0x1ee   : > { %v2526_v15 = vpop.f32.mrf.mxu1  ;;  %v2687_v1 = vpop.f32.mrf.mxu0 }
 0x1f0   : > { %v2527_v57 = vpop.f32.mrf.mxu1  ;;  %v2688_v35 = vpop.f32.mrf.mxu0 }
 0x1f1   : > { %v5159_v24 = vadd.f32 %v2527_v57, %v2239_v43  ;;  %v5162_v10 = vadd.f32 %v2688_v35, %v4896_v42  ;;  %v2247_v43 = vadd.f32 %v4810_v6, %v5036_v30  ;;  %v4201_v35 = vld [vmem:[%s4406_s28 + $0x6a0] ss:$28 sps:$4 sm:$0xff]  }
 0x1f2   : > { %v2529_v26 = vpop.f32.mrf.mxu1  ;;  %v2690_v53 = vpop.f32.mrf.mxu0 }
 0x1f3   : > { %v4205_v26 = vld [vmem:[%s4406_s28 + $0x670] ss:$28 sps:$4 sm:$0xff]  }
 0x1f4   : > { %v2532_v50 = vpop.f32.mrf.mxu1  ;;  %v2693_v7 = vpop.f32.mrf.mxu0  ;;  %2884 = vmatmul.mubr.bf16.gmra.mxu0 %v4196_v52  ;;  %3782 = vmatmul.mubr.bf16.gmra.mxu1 %v4200_v54  ;;  %v4208_v54 = vld [vmem:[%s4406_s28 + $0x6dc] ss:$28 sps:$4 sm:$0xff]  }
 0x1f5   : > { %v5168_v51 = vadd.f32 %v2532_v50, %v2244_v17  ;;  %v5171_v42 = vadd.f32 %v2693_v7, %v4904_v4  ;;  %2891 = vmatprep.mubr.bf16.mxu0 %v4203_v19  ;;  %3785 = vmatprep.mubr.bf16.mxu1 %v4204_v29  ;;  %v4209_v17 = vld [vmem:[%s4406_s28 + $0x6a8] ss:$28 sps:$4 sm:$0xff]   ;;  %v2252_v29 = vadd.f32 %v4810_v6, %v5046_v63  ;;  %v4210_v63 = vld [vmem:[%s4406_s28 + $0x6e0] ss:$28 sps:$4 sm:$0xff]  }
 0x1f6   : > { %v2534_v15 = vpop.f32.mrf.mxu1  ;;  %v2695_v1 = vpop.f32.mrf.mxu0 }
 0x1f8   : > { %v2535_v57 = vpop.f32.mrf.mxu1  ;;  %v2696_v21 = vpop.f32.mrf.mxu0 }
 0x1f9   : > { %v5177_v53 = vadd.f32 %v2535_v57, %v2247_v43  ;;  %v5180_v52 = vadd.f32 %v2696_v21, %v4912_v8  ;;  %v2255_v43 = vadd.f32 %v4810_v6, %v5052_v61 }
 0x1fa   : > { %v2537_v4 = vpop.f32.mrf.mxu1  ;;  %v2698_v19 = vpop.f32.mrf.mxu0 }
 0x1fb   : > { %v4206_v4 = vld [vmem:[%s4406_s28 + $0x6d8] ss:$28 sps:$4 sm:$0xff]  }
 0x1fc   : > { %v2540_v50 = vpop.f32.mrf.mxu1  ;;  %v2701_v30 = vpop.f32.mrf.mxu0  ;;  %2892 = vmatmul.mubr.bf16.gmra.mxu0 %v4201_v35  ;;  %3786 = vmatmul.mubr.bf16.gmra.mxu1 %v4205_v26 }
 0x1fd   : > { %v5186_v7 = vadd.f32 %v2540_v50, %v2252_v29  ;;  %v5189_v15 = vadd.f32 %v2701_v30, %v4920_v49  ;;  %2899 = vmatprep.mubr.bf16.mxu0 %v4208_v54  ;;  %3789 = vmatprep.mubr.bf16.mxu1 %v4209_v17  ;;  %v2260_v49 = vadd.f32 %v4810_v6, %v5062_v22 }
 0x1fe   : > { %v2542_v8 = vpop.f32.mrf.mxu1  ;;  %v2703_v1 = vpop.f32.mrf.mxu0 }
 0x200   : > { %v2543_v57 = vpop.f32.mrf.mxu1  ;;  %v2704_v21 = vpop.f32.mrf.mxu0 }
 0x201   : > { %v5195_v19 = vadd.f32 %v2543_v57, %v2255_v43  ;;  %v5198_v35 = vadd.f32 %v2704_v21, %v4928_v13  ;;  %v2263_v13 = vadd.f32 %v4810_v6, %v5068_v27 }
 0x202   : > { %v2545_v26 = vpop.f32.mrf.mxu1  ;;  %v2706_v29 = vpop.f32.mrf.mxu0 }
 0x204   : > { %v2548_v54 = vpop.f32.mrf.mxu1  ;;  %v2709_v17 = vpop.f32.mrf.mxu0  ;;  %2900 = vmatmul.mubr.bf16.gmra.mxu0 %v4206_v4  ;;  %3790 = vmatmul.mubr.bf16.gmra.mxu1 %v4210_v63  ;;  %v2268_v63 = vadd.f32 %v4810_v6, %v4721_v33 }
 0x205   : > { %v5202_v50 = vadd.f32 %v2548_v54, %v2260_v49  ;;  %v5205_v61 = vadd.f32 %v2709_v17, %v4936_v32  ;;  %v2271_v17 = vadd.f32 %v4810_v6, %v4725_v37 }
 0x206   : > { %v2550_v30 = vpop.f32.mrf.mxu1  ;;  %v2711_v8 = vpop.f32.mrf.mxu0 }
 0x208   : > { %v2551_v1 = vpop.f32.mrf.mxu1  ;;  %v2712_v43 = vpop.f32.mrf.mxu0 }
 0x209   : > { %v5209_v57 = vadd.f32 %v2551_v1, %v2263_v13  ;;  %v5212_v22 = vadd.f32 %v2712_v43, %v4944_v20  ;;  %v2276_v43 = vadd.f32 %v4810_v6, %v4733_v44 }
 0x20a   : > { %v2553_v21 = vpop.f32.mrf.mxu1  ;;  %v2714_v4 = vpop.f32.mrf.mxu0 }
 0x20c   : > { %v2556_v26 = vpop.f32.mrf.mxu1  ;;  %v2717_v32 = vpop.f32.mrf.mxu0 }
 0x20d   : > { %v5216_v29 = vadd.f32 %v2556_v26, %v2268_v63  ;;  %v5219_v49 = vadd.f32 %v2717_v32, %v4952_v31  ;;  %v5238_v32 = vld [vmem:[%s5536_s2] ss:$0 sm:$0xff] }
 0x20e   : > { %v2558_v27 = vpop.f32.mrf.mxu1  ;;  %v2719_v54 = vpop.f32.mrf.mxu0 }
 0x20f   : > { %5555 = vst [vmem:[#allocation19_spill] sm:$0xff] %v5216_v29  ;;  %v5580_v29 = vld [vmem:[#allocation8_spill] sm:$0xff] }
 0x210   : > { %v2559_v30 = vpop.f32.mrf.mxu1  ;;  %v2720_v20 = vpop.f32.mrf.mxu0 }
 0x211   : > { %v5223_v8 = vadd.f32 %v2559_v30, %v2271_v17  ;;  %v5226_v13 = vadd.f32 %v2720_v20, %v4960_v11  ;;  %v2279_v11 = vadd.f32 %v5238_v32, %v4737_v48  ;;  %v2284_v30 = vadd.f32 %v5238_v32, %v4745_v56 }
 0x212   : > { %v2561_v33 = vpop.f32.mrf.mxu1  ;;  %v2722_v1 = vpop.f32.mrf.mxu0 }
 0x213   : > { %5556 = vst [vmem:[#allocation20_spill] sm:$0xff] %v5223_v8  ;;  %v5574_v8 = vld [vmem:[#allocation6_spill] sm:$0xff] }
 0x214   : > { %v2564_v21 = vpop.f32.mrf.mxu1  ;;  %v2725_v31 = vpop.f32.mrf.mxu0 }
 0x215   : > { %v5230_v4 = vadd.f32 %v2564_v21, %v2276_v43  ;;  %v5233_v63 = vadd.f32 %v2725_v31, %v4968_v14  ;;  %v2287_v31 = vadd.f32 %v5238_v32, %v4749_v60 }
 0x216   : > { %v2566_v37 = vpop.f32.mrf.mxu1  ;;  %v2727_v26 = vpop.f32.mrf.mxu0 }
 0x217   : > { %5557 = vst [vmem:[#allocation21_spill] sm:$0xff] %v5230_v4  ;;  %v5583_v4 = vld [vmem:[#allocation9_spill] sm:$0xff] }
 0x218   : > { %v2567_v27 = vpop.f32.mrf.mxu1  ;;  %v2728_v54 = vpop.f32.mrf.mxu0 }
 0x219   : > { %v5242_v44 = vadd.f32 %v2567_v27, %v2279_v11  ;;  %v5245_v6 = vadd.f32 %v2728_v54, %v4976_v58  ;;  %v2292_v54 = vadd.f32 %v5238_v32, %v4757_v5 }
 0x21a   : > { %v2569_v17 = vpop.f32.mrf.mxu1  ;;  %v2730_v14 = vpop.f32.mrf.mxu0 }
 0x21b   : > { %5558 = vst [vmem:[#allocation22_spill] sm:$0xff] %v5242_v44  ;;  %v5577_v44 = vld [vmem:[#allocation7_spill] sm:$0xff] }
 0x21c   : > { %v2572_v20 = vpop.f32.mrf.mxu1  ;;  %v2733_v33 = vpop.f32.mrf.mxu0 }
 0x21d   : > { %v5249_v1 = vadd.f32 %v2572_v20, %v2284_v30  ;;  %v5252_v43 = vadd.f32 %v2733_v33, %v4984_v28  ;;  %v5562_v33 = vld [vmem:[#allocation2_spill] sm:$0xff] }
 0x21e   : > { %v2574_v48 = vpop.f32.mrf.mxu1  ;;  %v2735_v21 = vpop.f32.mrf.mxu0 }
 0x21f   : > { %5559 = vst [vmem:[#allocation23_spill] sm:$0xff] %v5249_v1  ;;  %v2295_v48 = vadd.f32 %v5238_v32, %v5562_v33  ;;  %v5568_v1 = vld [vmem:[#allocation4_spill] sm:$0xff] }
 0x220   : > { %v2575_v37 = vpop.f32.mrf.mxu1  ;;  %v2736_v58 = vpop.f32.mrf.mxu0 }
 0x221   : > { %v5256_v26 = vadd.f32 %v2575_v37, %v2287_v31  ;;  %v5259_v11 = vadd.f32 %v2736_v58, %v4992_v45  ;;  %v5564_v37 = vld [vmem:[#allocation11_spill] sm:$0xff] }
 0x222   : > { %v2577_v56 = vpop.f32.mrf.mxu1  ;;  %v2738_v27 = vpop.f32.mrf.mxu0 }
 0x223   : > { %5560 = vst [vmem:[#allocation24_spill] sm:$0xff] %v5256_v26  ;;  %v5565_v27 = vld [vmem:[#allocation3_spill] sm:$0xff] }
 0x224   : > { %v2580_v17 = vpop.f32.mrf.mxu1  ;;  %v2741_v28 = vpop.f32.mrf.mxu0 }
 0x225   : > { %v5263_v14 = vadd.f32 %v2580_v17, %v2292_v54  ;;  %v5266_v30 = vadd.f32 %v2741_v28, %v5000_v0  ;;  %v2300_v54 = vadd.f32 %v5238_v32, %v5565_v27 }
 0x226   : > { %v2582_v60 = vpop.f32.mrf.mxu1  ;;  %v2743_v20 = vpop.f32.mrf.mxu0 }
 0x227   : > { %5561 = vst [vmem:[#allocation25_spill] sm:$0xff] %v5263_v14  ;;  %v5567_v60 = vld [vmem:[#allocation12_spill] sm:$0xff]  ;;  %v5571_v14 = vld [vmem:[#allocation5_spill] sm:$0xff] }
 0x228   : > { %v2583_v21 = vpop.f32.mrf.mxu1  ;;  %v2744_v45 = vpop.f32.mrf.mxu0 }
 0x229   : > { %v5270_v31 = vadd.f32 %v2583_v21, %v2295_v48  ;;  %v5273_v58 = vadd.f32 %v2744_v45, %v5564_v37  ;;  %v2303_v48 = vadd.f32 %v5238_v32, %v5568_v1 }
 0x22a   : > { %v2585_v5 = vpop.f32.mrf.mxu1  ;;  %v2746_v56 = vpop.f32.mrf.mxu0 }
 0x22b   : > { %5563 = vst [vmem:[#allocation2_spill] sm:$0xff] %v5270_v31  ;;  %v5570_v5 = vld [vmem:[#allocation13_spill] sm:$0xff] }
 0x22c   : > { %v2588_v17 = vpop.f32.mrf.mxu1  ;;  %v2749_v0 = vpop.f32.mrf.mxu0 }
 0x22d   : > { %v5277_v28 = vadd.f32 %v2588_v17, %v2300_v54  ;;  %v5280_v20 = vadd.f32 %v2749_v0, %v5567_v60  ;;  %v2308_v54 = vadd.f32 %v5238_v32, %v5571_v14 }
 0x22e   : > { %v2590_v33 = vpop.f32.mrf.mxu1  ;;  %v2751_v26 = vpop.f32.mrf.mxu0 }
 0x22f   : > { %5566 = vst [vmem:[#allocation11_spill] sm:$0xff] %v5277_v28  ;;  %v5573_v26 = vld [vmem:[#allocation14_spill] sm:$0xff] }
 0x230   : > { %v2591_v21 = vpop.f32.mrf.mxu1  ;;  %v2752_v45 = vpop.f32.mrf.mxu0 }
 0x231   : > { %v5284_v37 = vadd.f32 %v2591_v21, %v2303_v48  ;;  %v5287_v56 = vadd.f32 %v2752_v45, %v5570_v5  ;;  %v2311_v48 = vadd.f32 %v5238_v32, %v5574_v8 }
 0x232   : > { %v2593_v27 = vpop.f32.mrf.mxu1  ;;  %v2754_v31 = vpop.f32.mrf.mxu0 }
 0x233   : > { %5569 = vst [vmem:[#allocation3_spill] sm:$0xff] %v5284_v37  ;;  %v5576_v31 = vld [vmem:[#allocation15_spill] sm:$0xff] }
 0x234   : > { %v2596_v17 = vpop.f32.mrf.mxu1  ;;  %v2757_v0 = vpop.f32.mrf.mxu0 }
 0x235   : > { %v5291_v60 = vadd.f32 %v2596_v17, %v2308_v54  ;;  %v5294_v33 = vadd.f32 %v2757_v0, %v5573_v26  ;;  %v2316_v54 = vadd.f32 %v5238_v32, %v5577_v44 }
 0x236   : > { %v2598_v1 = vpop.f32.mrf.mxu1  ;;  %v2759_v28 = vpop.f32.mrf.mxu0 }
 0x237   : > { %5572 = vst [vmem:[#allocation12_spill] sm:$0xff] %v5291_v60  ;;  %v5579_v28 = vld [vmem:[#allocation16_spill] sm:$0xff] }
 0x238   : > { %v2599_v21 = vpop.f32.mrf.mxu1  ;;  %v2760_v45 = vpop.f32.mrf.mxu0 }
 0x239   : > { %v5298_v5 = vadd.f32 %v2599_v21, %v2311_v48  ;;  %v5301_v27 = vadd.f32 %v2760_v45, %v5576_v31  ;;  %v2319_v48 = vadd.f32 %v5238_v32, %v5580_v29  ;;  %v5584_v29 = vld [vmem:[#allocation10_spill] sm:$0xff] }
 0x23a   : > { %v2601_v14 = vpop.f32.mrf.mxu1  ;;  %v2762_v37 = vpop.f32.mrf.mxu0 }
 0x23b   : > { %5575 = vst [vmem:[#allocation4_spill] sm:$0xff] %v5298_v5  ;;  %v5582_v37 = vld [vmem:[#allocation17_spill] sm:$0xff] }
 0x23c   : > { %v2604_v17 = vpop.f32.mrf.mxu1  ;;  %v2765_v0 = vpop.f32.mrf.mxu0 }
 0x23d   : > { %v5305_v26 = vadd.f32 %v2604_v17, %v2316_v54  ;;  %v5308_v1 = vadd.f32 %v2765_v0, %v5579_v28  ;;  %v2324_v54 = vadd.f32 %v5238_v32, %v5583_v4 }
 0x23e   : > { %v2606_v8 = vpop.f32.mrf.mxu1  ;;  %v2767_v60 = vpop.f32.mrf.mxu0 }
 0x23f   : > { %5578 = vst [vmem:[#allocation13_spill] sm:$0xff] %v5305_v26  ;;  %v2327_v26 = vadd.f32 %v5238_v32, %v5584_v29 }
 0x240   : > { %v2607_v21 = vpop.f32.mrf.mxu1  ;;  %v2768_v45 = vpop.f32.mrf.mxu0 }
 0x241   : > { %v5312_v31 = vadd.f32 %v2607_v21, %v2319_v48  ;;  %v5315_v14 = vadd.f32 %v2768_v45, %v5582_v37 }
 0x242   : > { %v2609_v44 = vpop.f32.mrf.mxu1  ;;  %v2770_v5 = vpop.f32.mrf.mxu0 }
 0x243   : > { %5581 = vst [vmem:[#allocation5_spill] sm:$0xff] %v5312_v31 }
 0x244   : > { %v2612_v17 = vpop.f32.mrf.mxu1  ;;  %v5319_v0 = vpop.f32.mrf.mxu0 }
 0x245   : > { %v5321_v28 = vadd.f32 %v2612_v17, %v2324_v54 }
 0x246   : > { %v2614_v60 = vpop.f32.mrf.mxu1  ;;  %v2775_v8 = vpop.f32.mrf.mxu0 }
 0x248   : > { %v2615_v48 = vpop.f32.mrf.mxu1  ;;  %v5325_v21 = vpop.f32.mrf.mxu0 }
 0x249   : > { %v5327_v45 = vadd.f32 %v2615_v48, %v2327_v26 }
 0x24a   : > { %v2617_v37 = vpop.f32.mrf.mxu1  ;;  %v2778_v5 = vpop.f32.mrf.mxu0 }
 0x24c   : > { %v2781_v44 = vpop.f32.mrf.mxu0  ;;  %v3731_v31 = vpop.f32.mrf.mxu1 }
 0x24d   : > { %v5330_v4 = vadd.f32 %v2781_v44, %v5078_v59  ;;  %v2951_v54 = vadd.f32 %v3731_v31, %v5099_v39 }
 0x24e   : > { %v2783_v17 = vpop.f32.mrf.mxu0  ;;  %v2942_v60 = vpop.f32.mrf.mxu1 }
 0x24f   : > { %4211 = vtanh.f32 %v2951_v54  ;;  %v2943_v8 = vadd.f32 %v2942_v60, %v5081_v62 }
 0x250   : > { %v2784_v32 = vpop.f32.mrf.mxu0  ;;  %v3732_v29 = vpop.f32.mrf.mxu1 }
 0x251   : > { %4213 = vtanh.f32 %v2943_v8  ;;  %v5335_v26 = vadd.f32 %v2784_v32, %v5087_v36  ;;  %v2954_v48 = vadd.f32 %v3732_v29, %v5108_v41 }
 0x252   : > { %v2786_v37 = vpop.f32.mrf.mxu0  ;;  %v2945_v5 = vpop.f32.mrf.mxu1 }
 0x253   : > { %4215 = vtanh.f32 %v2954_v48  ;;  %v2946_v59 = vadd.f32 %v2945_v5, %v5090_v55 }
 0x254   : > { %v5339_v39 = vpop.f32.mrf.mxu0  ;;  %v3735_v31 = vpop.f32.mrf.mxu1 }
 0x255   : > { %4217 = vtanh.f32 %v2946_v59  ;;  %v2967_v62 = vadd.f32 %v3735_v31, %v5135_v38 }
 0x256   : > { %v2791_v44 = vpop.f32.mrf.mxu0  ;;  %v2958_v54 = vpop.f32.mrf.mxu1 }
 0x257   : > { %4219 = vtanh.f32 %v2967_v62  ;;  %v2959_v36 = vadd.f32 %v2958_v54, %v5117_v3 }
 0x258   : > { %v5344_v17 = vpop.f32.mrf.mxu0  ;;  %v3736_v41 = vpop.f32.mrf.mxu1 }
 0x259   : > { %4221 = vtanh.f32 %v2959_v36  ;;  %v2970_v60 = vadd.f32 %v3736_v41, %v5144_v23 }
 0x25a   : > { %v2794_v55 = vpop.f32.mrf.mxu0  ;;  %v2961_v38 = vpop.f32.mrf.mxu1 }
 0x25b   : > { %4223 = vtanh.f32 %v2970_v60  ;;  %v2962_v8 = vadd.f32 %v2961_v38, %v5126_v47 }
 0x25c   : > { %v4212_v3 = vpop.eup %4211  ;;  %v5353_v32 = vpop.f32.mrf.mxu0 }
 0x25d   : > { %v3739_v29 = vpop.f32.mrf.mxu1  ;;  %3263 = vst [vmem:[%s5350_s15 + $0x10] sm:$0xff] %v4212_v3  ;;  %4225 = vtanh.f32 %v2962_v8 }
 0x25e   : > { %v2983_v23 = vadd.f32 %v3739_v29, %v5171_v42  ;;  %v4214_v48 = vpop.eup %4213  ;;  %v2799_v37 = vpop.f32.mrf.mxu0 }
 0x25f   : > { %v2974_v5 = vpop.f32.mrf.mxu1  ;;  %3261 = vst [vmem:[%s5350_s15] sm:$0xff] %v4214_v48 }
 0x260   : > { %4227 = vtanh.f32 %v2983_v23  ;;  %v2975_v59 = vadd.f32 %v2974_v5, %v5153_v12  ;;  %v4216_v31 = vpop.eup %4215  ;;  %v5359_v47 = vpop.f32.mrf.mxu0 }
 0x261   : > { %v3740_v62 = vpop.f32.mrf.mxu1  ;;  %3264 = vst [vmem:[%s5350_s15 + $0x18] sm:$0xff] %v4216_v31 }
 0x262   : > { %4229 = vtanh.f32 %v2975_v59  ;;  %v2986_v44 = vadd.f32 %v3740_v62, %v5180_v52  ;;  %v4218_v54 = vpop.eup %4217  ;;  %v2802_v42 = vpop.f32.mrf.mxu0 }
 0x263   : > { %v2977_v36 = vpop.f32.mrf.mxu1  ;;  %3262 = vst [vmem:[%s5350_s15 + $0x8] sm:$0xff] %v4218_v54 }
 0x264   : > { %4231 = vtanh.f32 %v2986_v44  ;;  %v2978_v41 = vadd.f32 %v2977_v36, %v5162_v10  ;;  %v4220_v60 = vpop.eup %4219  ;;  %v5365_v12 = vpop.f32.mrf.mxu0 }
 0x265   : > { %v3743_v55 = vpop.f32.mrf.mxu1  ;;  %3267 = vst [vmem:[%s5350_s15 + $0x30] sm:$0xff] %v4220_v60 }
 0x266   : > { %4233 = vtanh.f32 %v2978_v41  ;;  %v2999_v38 = vadd.f32 %v3743_v55, %v5205_v61  ;;  %v4222_v8 = vpop.eup %4221  ;;  %v2807_v52 = vpop.f32.mrf.mxu0 }
 0x267   : > { %v2990_v3 = vpop.f32.mrf.mxu1  ;;  %3265 = vst [vmem:[%s5350_s15 + $0x20] sm:$0xff] %v4222_v8 }
 0x268   : > { %4235 = vtanh.f32 %v2999_v38  ;;  %v2991_v29 = vadd.f32 %v2990_v3, %v5189_v15  ;;  %v4224_v23 = vpop.eup %4223  ;;  %v5371_v10 = vpop.f32.mrf.mxu0 }
 0x269   : > { %v3744_v48 = vpop.f32.mrf.mxu1  ;;  %3268 = vst [vmem:[%s5350_s15 + $0x38] sm:$0xff] %v4224_v23 }
 0x26a   : > { %4237 = vtanh.f32 %v2991_v29  ;;  %v3002_v37 = vadd.f32 %v3744_v48, %v5212_v22  ;;  %v4226_v5 = vpop.eup %4225  ;;  %v2810_v61 = vpop.f32.mrf.mxu0 }
 0x26b   : > { %v2993_v59 = vpop.f32.mrf.mxu1  ;;  %3266 = vst [vmem:[%s5350_s15 + $0x28] sm:$0xff] %v4226_v5 }
 0x26c   : > { %4239 = vtanh.f32 %v3002_v37  ;;  %v2994_v31 = vadd.f32 %v2993_v59, %v5198_v35  ;;  %v5377_v15 = vpop.f32.mrf.mxu0 }
 0x26d   : > { %v4228_v62 = vpop.eup %4227  ;;  %v3747_v44 = vpop.f32.mrf.mxu1 }
 0x26e   : > { %3271 = vst [vmem:[%s5350_s15 + $0x50] sm:$0xff] %v4228_v62  ;;  %4241 = vtanh.f32 %v2994_v31  ;;  %v3015_v54 = vadd.f32 %v3747_v44, %v5233_v63  ;;  %v2815_v22 = vpop.f32.mrf.mxu0 }
 0x26f   : > { %v4230_v42 = vpop.eup %4229  ;;  %v3006_v36 = vpop.f32.mrf.mxu1 }
 0x270   : > { %3269 = vst [vmem:[%s5350_s15 + $0x40] sm:$0xff] %v4230_v42  ;;  %4243 = vtanh.f32 %v3015_v54  ;;  %v3007_v41 = vadd.f32 %v3006_v36, %v5219_v49  ;;  %v5383_v35 = vpop.f32.mrf.mxu0 }
 0x271   : > { %v4232_v60 = vpop.eup %4231  ;;  %v3748_v55 = vpop.f32.mrf.mxu1 }
 0x272   : > { %3272 = vst [vmem:[%s5350_s15 + $0x58] sm:$0xff] %v4232_v60  ;;  %4245 = vtanh.f32 %v3007_v41  ;;  %v3018_v38 = vadd.f32 %v3748_v55, %v5245_v6  ;;  %v2818_v63 = vpop.f32.mrf.mxu0 }
 0x273   : > { %v4234_v8 = vpop.eup %4233  ;;  %v3009_v52 = vpop.f32.mrf.mxu1 }
 0x274   : > { %3270 = vst [vmem:[%s5350_s15 + $0x48] sm:$0xff] %v4234_v8  ;;  %4247 = vtanh.f32 %v3018_v38  ;;  %v3010_v3 = vadd.f32 %v3009_v52, %v5226_v13  ;;  %v5389_v49 = vpop.f32.mrf.mxu0 }
 0x275   : > { %v4236_v29 = vpop.eup %4235  ;;  %v3751_v23 = vpop.f32.mrf.mxu1 }
 0x276   : > { %3275 = vst [vmem:[%s5350_s15 + $0x70] sm:$0xff] %v4236_v29  ;;  %4249 = vtanh.f32 %v3010_v3  ;;  %v3031_v48 = vadd.f32 %v3751_v23, %v5266_v30  ;;  %v2823_v6 = vpop.f32.mrf.mxu0  ;;  %v2774_v23 = vadd.f32 %v5319_v0, %v5064_v9 }
 0x277   : > { %v4238_v37 = vpop.eup %4237  ;;  %v3022_v5 = vpop.f32.mrf.mxu1 }
 0x278   : > { %3273 = vst [vmem:[%s5350_s15 + $0x60] sm:$0xff] %v4238_v37  ;;  %4251 = vtanh.f32 %v3031_v48  ;;  %v3023_v61 = vadd.f32 %v3022_v5, %v5252_v43  ;;  %v5395_v13 = vpop.f32.mrf.mxu0 }
 0x279   : > { %v4240_v59 = vpop.eup %4239  ;;  %v3752_v31 = vpop.f32.mrf.mxu1 }
 0x27a   : > { %3276 = vst [vmem:[%s5350_s15 + $0x78] sm:$0xff] %v4240_v59  ;;  %4253 = vtanh.f32 %v3023_v61  ;;  %v3034_v62 = vadd.f32 %v3752_v31, %v5273_v58  ;;  %v2826_v30 = vpop.f32.mrf.mxu0  ;;  %v5585_v31 = vld [vmem:[#allocation18_spill] sm:$0xff] }
 0x27b   : > { %v4242_v44 = vpop.eup %4241  ;;  %v3025_v54 = vpop.f32.mrf.mxu1 }
 0x27c   : > { %3274 = vst [vmem:[%s5350_s15 + $0x68] sm:$0xff] %v4242_v44  ;;  %4255 = vtanh.f32 %v3034_v62  ;;  %v3026_v42 = vadd.f32 %v3025_v54, %v5259_v11  ;;  %v5401_v43 = vpop.f32.mrf.mxu0  ;;  %v2777_v62 = vadd.f32 %v5325_v21, %v5585_v31 }
 0x27d   : > { %v4244_v22 = vpop.eup %4243  ;;  %v3755_v36 = vpop.f32.mrf.mxu1 }
 0x27e   : > { %3279 = vst [vmem:[%s5350_s15 + $0x90] sm:$0xff] %v4244_v22  ;;  %4257 = vtanh.f32 %v3026_v42  ;;  %v3047_v41 = vadd.f32 %v3755_v36, %v5294_v33  ;;  %v2831_v58 = vpop.f32.mrf.mxu0  ;;  %v2790_v36 = vadd.f32 %v5339_v39, %v5096_v46 }
 0x27f   : > { %v4246_v60 = vpop.eup %4245  ;;  %v3038_v55 = vpop.f32.mrf.mxu1 }
 0x280   : > { %3277 = vst [vmem:[%s5350_s15 + $0x80] sm:$0xff] %v4246_v60  ;;  %4259 = vtanh.f32 %v3047_v41  ;;  %v3039_v38 = vadd.f32 %v3038_v55, %v5280_v20  ;;  %v5407_v11 = vpop.f32.mrf.mxu0 }
 0x281   : > { %v4248_v8 = vpop.eup %4247  ;;  %v3756_v63 = vpop.f32.mrf.mxu1 }
 0x282   : > { %3280 = vst [vmem:[%s5350_s15 + $0x98] sm:$0xff] %v4248_v8  ;;  %4261 = vtanh.f32 %v3039_v38  ;;  %v3050_v52 = vadd.f32 %v3756_v63, %v5301_v27  ;;  %v2834_v29 = vpop.f32.mrf.mxu0  ;;  %v2793_v63 = vadd.f32 %v5344_v17, %v5105_v18 }
 0x283   : > { %v4250_v3 = vpop.eup %4249  ;;  %v3041_v33 = vpop.f32.mrf.mxu1 }
 0x284   : > { %3278 = vst [vmem:[%s5350_s15 + $0x88] sm:$0xff] %v4250_v3  ;;  %4263 = vtanh.f32 %v3050_v52  ;;  %v3042_v20 = vadd.f32 %v3041_v33, %v5287_v56  ;;  %v5415_v37 = vpop.f32.mrf.mxu0 }
 0x285   : > { %v4252_v48 = vpop.eup %4251  ;;  %v3759_v6 = vpop.f32.mrf.mxu1 }
 0x286   : > { %3283 = vst [vmem:[%s5350_s15 + $0xb0] sm:$0xff] %v4252_v48  ;;  %4265 = vtanh.f32 %v3042_v20  ;;  %v3063_v5 = vadd.f32 %v3759_v6, %v2774_v23  ;;  %v2839_v61 = vpop.f32.mrf.mxu0  ;;  %v2806_v20 = vadd.f32 %v5365_v12, %v5132_v16  ;;  %v2798_v6 = vadd.f32 %v5353_v32, %v5114_v34 }
 0x287   : > { %v4254_v27 = vpop.eup %4253  ;;  %v3054_v59 = vpop.f32.mrf.mxu1  ;;  %v2809_v16 = vadd.f32 %v5371_v10, %v5141_v25  ;;  %v2801_v34 = vadd.f32 %v5359_v47, %v5123_v2  ;;  %v2822_v25 = vadd.f32 %v5389_v49, %v5168_v51  ;;  %v2814_v2 = vadd.f32 %v5377_v15, %v5150_v40 }
 0x288   : > { %3281 = vst [vmem:[%s5350_s15 + $0xa0] sm:$0xff] %v4254_v27  ;;  %4267 = vtanh.f32 %v3063_v5  ;;  %v3055_v9 = vadd.f32 %v3054_v59, %v5308_v1  ;;  %v5422_v0 = vpop.f32.mrf.mxu0  ;;  %v2825_v51 = vadd.f32 %v5395_v13, %v5177_v53  ;;  %v2817_v40 = vadd.f32 %v5383_v35, %v5159_v24 }
 0x289   : > { %v4256_v56 = vpop.eup %4255  ;;  %v3760_v44 = vpop.f32.mrf.mxu1  ;;  %v2838_v53 = vadd.f32 %v5415_v37, %v5202_v50  ;;  %v2830_v24 = vadd.f32 %v5401_v43, %v5186_v7  ;;  %v2841_v50 = vadd.f32 %v5422_v0, %v5209_v57  ;;  %v2833_v7 = vadd.f32 %v5407_v11, %v5195_v19 }
 0x28a   : > { %3284 = vst [vmem:[%s5350_s15 + $0xb8] sm:$0xff] %v4256_v56  ;;  %4269 = vtanh.f32 %v3055_v9  ;;  %v3066_v30 = vadd.f32 %v3760_v44, %v2777_v62  ;;  %v2842_v42 = vpop.f32.mrf.mxu0 }
 0x28b   : > { %v4258_v54 = vpop.eup %4257  ;;  %v3057_v22 = vpop.f32.mrf.mxu1 }
 0x28c   : > { %3282 = vst [vmem:[%s5350_s15 + $0xa8] sm:$0xff] %v4258_v54  ;;  %4271 = vtanh.f32 %v3066_v30  ;;  %v3058_v21 = vadd.f32 %v3057_v22, %v5315_v14  ;;  %v5429_v41 = vpop.f32.mrf.mxu0 }
 0x28d   : > { %v4260_v1 = vpop.eup %4259  ;;  %v3763_v60 = vpop.f32.mrf.mxu1 }
 0x28e   : > { %3287 = vst [vmem:[%s5350_s15 + $0xd0] sm:$0xff] %v4260_v1  ;;  %4273 = vtanh.f32 %v3058_v21  ;;  %v3079_v58 = vadd.f32 %v3763_v60, %v2790_v36  ;;  %v2847_v38 = vpop.f32.mrf.mxu0 }
 0x28f   : > { %v4262_v55 = vpop.eup %4261  ;;  %v3070_v8 = vpop.f32.mrf.mxu1 }
 0x290   : > { %3285 = vst [vmem:[%s5350_s15 + $0xc0] sm:$0xff] %v4262_v55  ;;  %4275 = vtanh.f32 %v3079_v58  ;;  %v3071_v46 = vadd.f32 %v3070_v8, %v5330_v4  ;;  %v5436_v39 = vpop.f32.mrf.mxu0 }
 0x291   : > { %v4264_v14 = vpop.eup %4263  ;;  %v3764_v52 = vpop.f32.mrf.mxu1 }
 0x292   : > { %3288 = vst [vmem:[%s5350_s15 + $0xd8] sm:$0xff] %v4264_v14  ;;  %4277 = vtanh.f32 %v3071_v46  ;;  %v3082_v3 = vadd.f32 %v3764_v52, %v2793_v63  ;;  %v2850_v33 = vpop.f32.mrf.mxu0 }
 0x293   : > { %v4266_v29 = vpop.eup %4265  ;;  %v3073_v23 = vpop.f32.mrf.mxu1 }
 0x294   : > { %3286 = vst [vmem:[%s5350_s15 + $0xc8] sm:$0xff] %v4266_v29  ;;  %4279 = vtanh.f32 %v3082_v3  ;;  %v3074_v18 = vadd.f32 %v3073_v23, %v5335_v26  ;;  %v5443_v17 = vpop.f32.mrf.mxu0 }
 0x295   : > { %v4268_v4 = vpop.eup %4267  ;;  %v3767_v48 = vpop.f32.mrf.mxu1 }
 0x296   : > { %3291 = vst [vmem:[%s5350_s15 + $0xf0] sm:$0xff] %v4268_v4  ;;  %4281 = vtanh.f32 %v3074_v18  ;;  %v3095_v5 = vadd.f32 %v3767_v48, %v2806_v20  ;;  %v2855_v61 = vpop.f32.mrf.mxu0 }
 0x297   : > { %v4270_v27 = vpop.eup %4269  ;;  %v3086_v59 = vpop.f32.mrf.mxu1 }
 0x298   : > { %3289 = vst [vmem:[%s5350_s15 + $0xe0] sm:$0xff] %v4270_v27  ;;  %4283 = vtanh.f32 %v3095_v5  ;;  %v3087_v26 = vadd.f32 %v3086_v59, %v2798_v6  ;;  %v5451_v31 = vpop.f32.mrf.mxu0  ;;  %v5586_v6 = vld [vmem:[#allocation21_spill] sm:$0xff]  ;;  %v5587_v59 = vld [vmem:[#allocation19_spill] sm:$0xff] }
 0x299   : > { %v4272_v12 = vpop.eup %4271  ;;  %v3768_v62 = vpop.f32.mrf.mxu1  ;;  %v2854_v57 = vadd.f32 %v5443_v17, %v5586_v6  ;;  %v2846_v19 = vadd.f32 %v5429_v41, %v5587_v59 }
 0x29a   : > { %3292 = vst [vmem:[%s5350_s15 + $0xf8] sm:$0xff] %v4272_v12  ;;  %4285 = vtanh.f32 %v3087_v26  ;;  %v3098_v32 = vadd.f32 %v3768_v62, %v2809_v16  ;;  %v2858_v56 = vpop.f32.mrf.mxu0  ;;  %v5588_v62 = vld [vmem:[#allocation22_spill] sm:$0xff] }
 0x29b   : > { %v4274_v9 = vpop.eup %4273  ;;  %v3089_v44 = vpop.f32.mrf.mxu1  ;;  %v2857_v17 = vadd.f32 %v5451_v31, %v5588_v62 }
 0x29c   : > { %3290 = vst [vmem:[%s5350_s15 + $0xe8] sm:$0xff] %v4274_v9  ;;  %4287 = vtanh.f32 %v3098_v32  ;;  %v3090_v10 = vadd.f32 %v3089_v44, %v2801_v34  ;;  %v5459_v54 = vpop.f32.mrf.mxu0  ;;  %v5589_v44 = vld [vmem:[#allocation20_spill] sm:$0xff] }
 0x29d   : > { %v4276_v30 = vpop.eup %4275  ;;  %v3771_v42 = vpop.f32.mrf.mxu1  ;;  %v2849_v41 = vadd.f32 %v5436_v39, %v5589_v44 }
 0x29e   : > { %3295 = vst [vmem:[%s5350_s15 + $0x110] sm:$0xff] %v4276_v30  ;;  %4289 = vtanh.f32 %v3090_v10  ;;  %v3111_v47 = vadd.f32 %v3771_v42, %v2822_v25  ;;  %v2863_v36 = vpop.f32.mrf.mxu0 }
 0x29f   : > { %v4278_v22 = vpop.eup %4277  ;;  %v3102_v21 = vpop.f32.mrf.mxu1 }
 0x2a0   : > { %3293 = vst [vmem:[%s5350_s15 + $0x100] sm:$0xff] %v4278_v22  ;;  %4291 = vtanh.f32 %v3111_v47  ;;  %v3103_v49 = vadd.f32 %v3102_v21, %v2814_v2  ;;  %v5467_v60 = vpop.f32.mrf.mxu0  ;;  %v5590_v2 = vld [vmem:[#allocation25_spill] sm:$0xff] }
 0x2a1   : > { %v4280_v1 = vpop.eup %4279  ;;  %v3772_v58 = vpop.f32.mrf.mxu1 }
 0x2a2   : > { %3296 = vst [vmem:[%s5350_s15 + $0x118] sm:$0xff] %v4280_v1  ;;  %4293 = vtanh.f32 %v3103_v49  ;;  %v3114_v15 = vadd.f32 %v3772_v58, %v2825_v51  ;;  %v2866_v38 = vpop.f32.mrf.mxu0  ;;  %v5591_v51 = vld [vmem:[#allocation23_spill] sm:$0xff] }
 0x2a3   : > { %v4282_v55 = vpop.eup %4281  ;;  %v3105_v8 = vpop.f32.mrf.mxu1  ;;  %v2862_v49 = vadd.f32 %v5459_v54, %v5591_v51 }
 0x2a4   : > { %3294 = vst [vmem:[%s5350_s15 + $0x108] sm:$0xff] %v4282_v55  ;;  %4295 = vtanh.f32 %v3114_v15  ;;  %v3106_v13 = vadd.f32 %v3105_v8, %v2817_v40  ;;  %v2869_v46 = vpop.f32.mrf.mxu0  ;;  %v5592_v15 = vld [vmem:[#allocation2_spill] sm:$0xff] }
 0x2a5   : > { %v4284_v63 = vpop.eup %4283  ;;  %v3775_v14 = vpop.f32.mrf.mxu1  ;;  %v2870_v31 = vadd.f32 %v2869_v46, %v5590_v2 }
 0x2a6   : > { %3299 = vst [vmem:[%s5350_s15 + $0x130] sm:$0xff] %v4284_v63  ;;  %4297 = vtanh.f32 %v3106_v13  ;;  %v3127_v35 = vadd.f32 %v3775_v14, %v2838_v53  ;;  %v2871_v3 = vpop.f32.mrf.mxu0  ;;  %v5593_v63 = vld [vmem:[#allocation24_spill] sm:$0xff] }
 0x2a7   : > { %v4286_v52 = vpop.eup %4285  ;;  %v3118_v29 = vpop.f32.mrf.mxu1  ;;  %v2865_v46 = vadd.f32 %v5467_v60, %v5593_v63 }
 0x2a8   : > { %3297 = vst [vmem:[%s5350_s15 + $0x120] sm:$0xff] %v4286_v52  ;;  %4299 = vtanh.f32 %v3127_v35  ;;  %v3119_v37 = vadd.f32 %v3118_v29, %v2830_v24  ;;  %v2872_v23 = vpop.f32.mrf.mxu0  ;;  %v5594_v52 = vld [vmem:[#allocation12_spill] sm:$0xff] }
 0x2a9   : > { %v4288_v33 = vpop.eup %4287  ;;  %v3776_v20 = vpop.f32.mrf.mxu1  ;;  %v2873_v55 = vadd.f32 %v2872_v23, %v5592_v15  ;;  %v5595_v23 = vld [vmem:[#allocation11_spill] sm:$0xff] }
 0x2aa   : > { %3300 = vst [vmem:[%s5350_s15 + $0x138] sm:$0xff] %v4288_v33  ;;  %4301 = vtanh.f32 %v3119_v37  ;;  %v3130_v43 = vadd.f32 %v3776_v20, %v2841_v50  ;;  %v2874_v4 = vpop.f32.mrf.mxu0 }
 0x2ab   : > { %v4290_v18 = vpop.eup %4289  ;;  %v3121_v48 = vpop.f32.mrf.mxu1  ;;  %v5596_v4 = vld [vmem:[#allocation4_spill] sm:$0xff] }
 0x2ac   : > { %3298 = vst [vmem:[%s5350_s15 + $0x128] sm:$0xff] %v4290_v18  ;;  %4303 = vtanh.f32 %v3130_v43  ;;  %v3122_v0 = vadd.f32 %v3121_v48, %v2833_v7  ;;  %v2877_v27 = vpop.f32.mrf.mxu0 }
 0x2ad   : > { %v4292_v5 = vpop.eup %4291  ;;  %v3779_v61 = vpop.f32.mrf.mxu1  ;;  %v2878_v20 = vadd.f32 %v2877_v27, %v5595_v23 }
 0x2ae   : > { %3303 = vst [vmem:[%s5350_s15 + $0x150] sm:$0xff] %v4292_v5  ;;  %4305 = vtanh.f32 %v3122_v0  ;;  %v3143_v11 = vadd.f32 %v3779_v61, %v2854_v57  ;;  %v2879_v26 = vpop.f32.mrf.mxu0  ;;  %v5597_v61 = vld [vmem:[#allocation3_spill] sm:$0xff] }
 0x2af   : > { %v4294_v16 = vpop.eup %4293  ;;  %v3134_v12 = vpop.f32.mrf.mxu1 }
 0x2b0   : > { %3301 = vst [vmem:[%s5350_s15 + $0x140] sm:$0xff] %v4294_v16  ;;  %4307 = vtanh.f32 %v3143_v11  ;;  %v3135_v34 = vadd.f32 %v3134_v12, %v2846_v19  ;;  %v2880_v9 = vpop.f32.mrf.mxu0 }
 0x2b1   : > { %v4296_v32 = vpop.eup %4295  ;;  %v3780_v56 = vpop.f32.mrf.mxu1  ;;  %v2881_v59 = vadd.f32 %v2880_v9, %v5597_v61 }
 0x2b2   : > { %3304 = vst [vmem:[%s5350_s15 + $0x158] sm:$0xff] %v4296_v32  ;;  %4309 = vtanh.f32 %v3135_v34  ;;  %v3146_v25 = vadd.f32 %v3780_v56, %v2857_v17  ;;  %v2882_v30 = vpop.f32.mrf.mxu0  ;;  %v5598_v34 = vld [vmem:[#allocation13_spill] sm:$0xff] }
 0x2b3   : > { %v4298_v10 = vpop.eup %4297  ;;  %v3137_v42 = vpop.f32.mrf.mxu1 }
 0x2b4   : > { %3302 = vst [vmem:[%s5350_s15 + $0x148] sm:$0xff] %v4298_v10  ;;  %4311 = vtanh.f32 %v3146_v25  ;;  %v3138_v47 = vadd.f32 %v3137_v42, %v2849_v41  ;;  %v2885_v36 = vpop.f32.mrf.mxu0 }
 0x2b5   : > { %v4300_v22 = vpop.eup %4299  ;;  %v3783_v21 = vpop.f32.mrf.mxu1  ;;  %v2886_v3 = vadd.f32 %v2885_v36, %v5594_v52 }
 0x2b6   : > { %3307 = vst [vmem:[%s5350_s15 + $0x170] sm:$0xff] %v4300_v22  ;;  %4313 = vtanh.f32 %v3138_v47  ;;  %v3159_v39 = vadd.f32 %v3783_v21, %v2870_v31  ;;  %v2887_v58 = vpop.f32.mrf.mxu0  ;;  %v5599_v31 = vld [vmem:[#allocation5_spill] sm:$0xff] }
 0x2b7   : > { %v4302_v1 = vpop.eup %4301  ;;  %v3150_v40 = vpop.f32.mrf.mxu1 }
 0x2b8   : > { %3305 = vst [vmem:[%s5350_s15 + $0x160] sm:$0xff] %v4302_v1  ;;  %4315 = vtanh.f32 %v3159_v39  ;;  %v3151_v38 = vadd.f32 %v3150_v40, %v2862_v49  ;;  %v2888_v53 = vpop.f32.mrf.mxu0 }
 0x2b9   : > { %v4304_v8 = vpop.eup %4303  ;;  %v3784_v13 = vpop.f32.mrf.mxu1  ;;  %v2889_v48 = vadd.f32 %v2888_v53, %v5596_v4 }
 0x2ba   : > { %3308 = vst [vmem:[%s5350_s15 + $0x178] sm:$0xff] %v4304_v8  ;;  %4317 = vtanh.f32 %v3151_v38  ;;  %v3162_v54 = vadd.f32 %v3784_v13, %v2873_v55  ;;  %v2890_v24 = vpop.f32.mrf.mxu0 }
 0x2bb   : > { %v4306_v14 = vpop.eup %4305  ;;  %v3153_v35 = vpop.f32.mrf.mxu1 }
 0x2bc   : > { %3306 = vst [vmem:[%s5350_s15 + $0x168] sm:$0xff] %v4306_v14  ;;  %4319 = vtanh.f32 %v3162_v54  ;;  %v3154_v29 = vadd.f32 %v3153_v35, %v2865_v46  ;;  %v2893_v37 = vpop.f32.mrf.mxu0 }
 0x2bd   : > { %v4308_v50 = vpop.eup %4307  ;;  %v3787_v33 = vpop.f32.mrf.mxu1  ;;  %v2894_v32 = vadd.f32 %v2893_v37, %v5598_v34 }
 0x2be   : > { %3311 = vst [vmem:[%s5350_s15 + $0x190] sm:$0xff] %v4308_v50  ;;  %4321 = vtanh.f32 %v3154_v29  ;;  %v3175_v60 = vadd.f32 %v3787_v33, %v2886_v3  ;;  %v2895_v43 = vpop.f32.mrf.mxu0 }
 0x2bf   : > { %v4310_v7 = vpop.eup %4309  ;;  %v3166_v18 = vpop.f32.mrf.mxu1 }
 0x2c0   : > { %3309 = vst [vmem:[%s5350_s15 + $0x180] sm:$0xff] %v4310_v7  ;;  %4323 = vtanh.f32 %v3175_v60  ;;  %v3167_v6 = vadd.f32 %v3166_v18, %v2878_v20  ;;  %v2896_v0 = vpop.f32.mrf.mxu0 }
 0x2c1   : > { %v4312_v57 = vpop.eup %4311  ;;  %v3788_v5 = vpop.f32.mrf.mxu1  ;;  %v2897_v47 = vadd.f32 %v2896_v0, %v5599_v31 }
 0x2c2   : > { %3312 = vst [vmem:[%s5350_s15 + $0x198] sm:$0xff] %v4312_v57  ;;  %4325 = vtanh.f32 %v3167_v6  ;;  %v3178_v27 = vadd.f32 %v3788_v5, %v2889_v48  ;;  %v2898_v11 = vpop.f32.mrf.mxu0 }
 0x2c3   : > { %v4314_v19 = vpop.eup %4313  ;;  %v3169_v16 = vpop.f32.mrf.mxu1 }
 0x2c4   : > { %3310 = vst [vmem:[%s5350_s15 + $0x188] sm:$0xff] %v4314_v19  ;;  %4327 = vtanh.f32 %v3178_v27  ;;  %v3170_v26 = vadd.f32 %v3169_v16, %v2881_v59  ;;  %v2901_v62 = vpop.f32.mrf.mxu0 }
 0x2c5   : > { %v4316_v12 = vpop.eup %4315  ;;  %v3791_v17 = vpop.f32.mrf.mxu1  ;;  %v2902_v9 = vadd.f32 %v2901_v62, %v5321_v28 }
 0x2c6   : > { %3315 = vst [vmem:[%s5350_s15 + $0x1b0] sm:$0xff] %v4316_v12  ;;  %4329 = vtanh.f32 %v3170_v26  ;;  %v2903_v44 = vpop.f32.mrf.mxu0 }
 0x2c7   : > { %v4318_v56 = vpop.eup %4317  ;;  %v3182_v41 = vpop.f32.mrf.mxu1  ;;  %v3191_v25 = vadd.f32 %v3791_v17, %v2902_v9 }
 0x2c8   : > { %3313 = vst [vmem:[%s5350_s15 + $0x1a0] sm:$0xff] %v4318_v56  ;;  %v3183_v10 = vadd.f32 %v3182_v41, %v2894_v32  ;;  %v2904_v42 = vpop.f32.mrf.mxu0 }
 0x2c9   : > { %v4320_v30 = vpop.eup %4319  ;;  %v3792_v2 = vpop.f32.mrf.mxu1  ;;  %4331 = vtanh.f32 %v3191_v25  ;;  %v2905_v22 = vadd.f32 %v2904_v42, %v5327_v45 }
 0x2ca   : > { %3316 = vst [vmem:[%s5350_s15 + $0x1b8] sm:$0xff] %v4320_v30  ;;  %4333 = vtanh.f32 %v3183_v10  ;;  %v2906_v36 = vpop.f32.mrf.mxu0 }
 0x2cb   : > { %v4322_v28 = vpop.eup %4321  ;;  %v3185_v21 = vpop.f32.mrf.mxu1  ;;  %v3194_v51 = vadd.f32 %v3792_v2, %v2905_v22 }
 0x2cc   : > { %3314 = vst [vmem:[%s5350_s15 + $0x1a8] sm:$0xff] %v4322_v28  ;;  %v3186_v49 = vadd.f32 %v3185_v21, %v2897_v47 }
 0x2cd   : > { %v4324_v39 = vpop.eup %4323  ;;  %4335 = vtanh.f32 %v3194_v51 }
 0x2ce   : > { %3319 = vst [vmem:[%s5350_s15 + $0x1d0] sm:$0xff] %v4324_v39  ;;  %4337 = vtanh.f32 %v3186_v49 }
 0x2cf   : > { %v4326_v1 = vpop.eup %4325 }
 0x2d0   : > { %3317 = vst [vmem:[%s5350_s15 + $0x1c0] sm:$0xff] %v4326_v1 }
 0x2d1   : > { %v4328_v58 = vpop.eup %4327 }
 0x2d2   : > { %3320 = vst [vmem:[%s5350_s15 + $0x1d8] sm:$0xff] %v4328_v58 }
 0x2d3   : > { %v4330_v45 = vpop.eup %4329 }
 0x2d4   : > { %3318 = vst [vmem:[%s5350_s15 + $0x1c8] sm:$0xff] %v4330_v45 }
 0x2d6   : > { %v4332_v40 = vpop.eup %4331 }
 0x2d7   : > { %v4334_v15 = vpop.eup %4333  ;;  %3323 = vst [vmem:[%s5350_s15 + $0x1f0] sm:$0xff] %v4332_v40 }
 0x2d8   : > { %3321 = vst [vmem:[%s5350_s15 + $0x1e0] sm:$0xff] %v4334_v15 }
 0x2da   : > { %v4336_v55 = vpop.eup %4335 }
 0x2db   : > { %v4338_v38 = vpop.eup %4337  ;;  %3324 = vst [vmem:[%s5350_s15 + $0x1f8] sm:$0xff] %v4336_v55 }
 0x2dc   : > { %3322 = vst [vmem:[%s5350_s15 + $0x1e8] sm:$0xff] %v4338_v38 }
 0x2dd PF: > { %s13_s12 = sadd.s32 1, %s4346_s12  }
 0x2de   : > { %p10_p4 = scmp.ge.s32.totalorder %s13_s12, 6  }
 0x2e0   :  { %12 = sbr.rel (!%p10_p4) target bundleno = 1 (0x1), region = 62 }

</bundles_post_ra>
